<compile_context>
chip_gen: v6e
topology: v6e:2x2x1
jax: 0.10.0
libtpu: 0.0.40
codegen_flags: <defaults>
</compile_context>

<pallas_src>
import math

import jax
import jax.numpy as jnp
from jax.experimental import pallas as pl
from jax.experimental.pallas import tpu as pltpu

P_MAX = 18          # largest halo needed (dilations 6, 12, 18)
LP = 32             # aligned left/top pad of the VMEM slab (multiple of 8/16, >= P_MAX)
DILATIONS = (6, 12, 18)


def aspp_kernel(x_ref, w1_ref, wdil_ref, wpool_ref, wcomb_ref, bias_ref,
                out_ref, xpad_ref, acc_ref):
    # x_ref:    (1, H, W, Cin)        bf16  unpadded input tile (one batch element)
    # w1_ref:   (Cin, Cout)           bf16  1x1 conv weight (BN scale folded in)
    # wdil_ref: (3, 9*Cin, Cout)      bf16  dilated 3x3 weights, taps stacked on K
    # wpool_ref:(Cin, Cout)           bf16  pool-branch 1x1 conv weight
    # wcomb_ref:(5, Cout, Cout)       bf16  combine 1x1 conv weight, per-branch slices
    # bias_ref: (6, Cout)             f32   folded BN biases (5 branches + combine)
    # out_ref:  (1, H, W, Cout)       f32
    # xpad_ref: (LP+H+P, LP+W+P, Cin) f32   VMEM zero-padded slab (in-kernel halo)
    # acc_ref:  (H*W, Cout)           f32   VMEM accumulator for the combine output
    _, H, W, Cin = x_ref.shape
    Cout = out_ref.shape[3]
    HW = H * W

    # ---- in-kernel zero padding: only the unpadded tile ever crosses HBM ----
    # (full re-zero each grid step keeps the kernel correct under "parallel" sharding)
    xpad_ref[...] = jnp.zeros_like(xpad_ref)
    x0_f32 = x_ref[0].astype(jnp.float32)                    # (H, W, Cin)
    xpad_ref[LP:LP + H, LP:LP + W, :] = x0_f32               # aligned center store

    xc_f32 = x0_f32.reshape(HW, Cin)
    xc = xc_f32.astype(jnp.bfloat16)

    def branch(y_f32, idx):
        # BN scale already folded into the weights; only bias + ReLU remain here.
        return jnp.maximum(y_f32 + bias_ref[idx], 0.0).astype(jnp.bfloat16)

    # ---- branch 0: 1x1 conv, accumulate straight into the combine output ----
    b0 = branch(jnp.dot(xc, w1_ref[...], preferred_element_type=jnp.float32), 0)
    acc_ref[...] = jnp.dot(b0, wcomb_ref[0], preferred_element_type=jnp.float32)

    # ---- branches 1..3: dilated 3x3 convs (dilation == padding == 6/12/18) ----
    for br, d in enumerate(DILATIONS):
        if Cin < 128:
            # Small Cin: stack the 9 shifted taps along K -> one K=9*Cin MXU matmul
            # instead of 9 tiny-K pushes.
            taps = [xpad_ref[LP + (ky - 1) * d:LP + (ky - 1) * d + H,
                             LP + (kx - 1) * d:LP + (kx - 1) * d + W, :].reshape(HW, Cin)
                    for ky in range(3) for kx in range(3)]
            win = jnp.concatenate(taps, axis=1).astype(jnp.bfloat16)    # (HW, 9*Cin)
            y = jnp.dot(win, wdil_ref[br], preferred_element_type=jnp.float32)
        else:
            # Large Cin: each lane-dense tap already fills the MXU; accumulate 9 taps.
            y = jnp.zeros((HW, Cout), jnp.float32)
            for ky in range(3):
                for kx in range(3):
                    t = ky * 3 + kx
                    win = xpad_ref[LP + (ky - 1) * d:LP + (ky - 1) * d + H,
                                   LP + (kx - 1) * d:LP + (kx - 1) * d + W, :]
                    y = y + jnp.dot(win.reshape(HW, Cin).astype(jnp.bfloat16),
                                    wdil_ref[br, t * Cin:(t + 1) * Cin, :],
                                    preferred_element_type=jnp.float32)
        bi = branch(y, 1 + br)
        acc_ref[...] += jnp.dot(bi, wcomb_ref[1 + br],
                                preferred_element_type=jnp.float32)

    # ---- branch 4: global avg pool -> 1x1 conv -> rank-1 combine contribution ----
    # (bilinear upsample of a 1x1 map with align_corners=True == constant broadcast)
    xmean = jnp.mean(xc_f32, axis=0, keepdims=True)                       # (1, Cin)
    bp = branch(jnp.dot(xmean, wpool_ref[...].astype(jnp.float32),
                        preferred_element_type=jnp.float32), 4)           # (1, Cout)
    bp_comb = jnp.dot(bp.astype(jnp.float32), wcomb_ref[4].astype(jnp.float32),
                      preferred_element_type=jnp.float32)                 # (1, Cout)

    # ---- combine bias + ReLU, write output ----
    out = jnp.maximum(acc_ref[...] + bp_comb + bias_ref[5], 0.0)
    out_ref[...] = out.reshape(1, H, W, Cout).astype(out_ref.dtype)


def aspp_pallas(x_nchw, p):
    B, Cin, H, W = x_nchw.shape
    Cout = p["w1_s"].shape[1]
    HW = H * W
    slab_h = LP + H + P_MAX
    slab_w = LP + W + P_MAX

    x_nhwc = jnp.transpose(x_nchw, (0, 2, 3, 1)).astype(jnp.bfloat16)

    out_nhwc = pl.pallas_call(
        aspp_kernel,
        out_shape=jax.ShapeDtypeStruct((B, H, W, Cout), jnp.float32),
        grid_spec=pltpu.PrefetchScalarGridSpec(
            num_scalar_prefetch=0,
            grid=(B,),
            in_specs=[
                pl.BlockSpec((1, H, W, Cin), lambda b: (b, 0, 0, 0)),
                pl.BlockSpec((Cin, Cout), lambda b: (0, 0)),
                pl.BlockSpec((3, 9 * Cin, Cout), lambda b: (0, 0, 0)),
                pl.BlockSpec((Cin, Cout), lambda b: (0, 0)),
                pl.BlockSpec((5, Cout, Cout), lambda b: (0, 0, 0)),
                pl.BlockSpec((6, Cout), lambda b: (0, 0)),
            ],
            out_specs=pl.BlockSpec((1, H, W, Cout), lambda b: (b, 0, 0, 0)),
            scratch_shapes=[
                pltpu.VMEM((slab_h, slab_w, Cin), jnp.float32),   # padded slab
                pltpu.VMEM((HW, Cout), jnp.float32),              # combine accumulator
            ],
        ),
        compiler_params=pltpu.CompilerParams(
            dimension_semantics=("parallel",),        # v7x: shard batch over 2 TCs
            vmem_limit_bytes=48 * 1024 * 1024,        # headroom under v7x's 64 MiB
        ),
    )(x_nhwc, p["w1_s"], p["w_dil_s"], p["w_pool_s"], p["w_comb_s"], p["bias"])

    return jnp.transpose(out_nhwc, (0, 3, 1, 2))      # back to NCHW


def init_params(key, cin, cout):
    """Deterministic synthetic parameters (PyTorch-style fan-in uniform convs; BN in
    inference mode folded into the weights (scale) and a per-channel bias)."""
    ks = jax.random.split(key, 8)
    eps = 1e-5

    def conv_w(k, shape, fan_in):
        bound = 1.0 / math.sqrt(fan_in)
        return jax.random.uniform(k, shape, jnp.float32, -bound, bound)

    w1 = conv_w(ks[0], (cin, cout), cin)                       # 1x1
    w_dil = conv_w(ks[1], (3, 3, 3, cin, cout), 9 * cin)       # [branch, ky, kx, Cin, Cout]
    w_pool = conv_w(ks[2], (cin, cout), cin)                   # 1x1 (pool branch)
    w_comb = conv_w(ks[3], (5 * cout, cout), 5 * cout)         # combine 1x1

    gamma = jax.random.uniform(ks[4], (6, cout), jnp.float32, 0.5, 1.5)
    beta = jax.random.uniform(ks[5], (6, cout), jnp.float32, -0.1, 0.1)
    rmean = jax.random.uniform(ks[6], (6, cout), jnp.float32, -0.2, 0.2)
    rvar = jax.random.uniform(ks[7], (6, cout), jnp.float32, 0.5, 1.5)

    bn_scale = gamma / jnp.sqrt(rvar + eps)
    bn_bias = beta - rmean * bn_scale

    # One-time host-side fold of the BN scale into the conv weights; bf16 for the MXU.
    w1_s = (w1 * bn_scale[0]).astype(jnp.bfloat16)
    w_dil_s = (w_dil * bn_scale[1:4][:, None, None, None, :]) \
        .reshape(3, 9 * cin, cout).astype(jnp.bfloat16)            # taps stacked on K
    w_pool_s = (w_pool * bn_scale[4]).astype(jnp.bfloat16)
    w_comb_s = (w_comb * bn_scale[5]).reshape(5, cout, cout).astype(jnp.bfloat16)

    return dict(w1_s=w1_s, w_dil_s=w_dil_s, w_pool_s=w_pool_s, w_comb_s=w_comb_s,
                bias=bn_bias)


def aspp_reference(x_nchw, p):
    """Pure-JAX reference (lax conv) mirroring the kernel's bf16 rounding points."""
    x = jnp.transpose(x_nchw, (0, 2, 3, 1)).astype(jnp.bfloat16).astype(jnp.float32)
    Cin = x.shape[-1]
    w1 = p["w1_s"].astype(jnp.float32)
    wdil = p["w_dil_s"].astype(jnp.float32)
    wpool = p["w_pool_s"].astype(jnp.float32)
    wcomb = p["w_comb_s"].astype(jnp.float32)          # (5, Cout, Cout)
    bias = p["bias"]
    Cout = w1.shape[1]
    dn = ("NHWC", "HWIO", "NHWC")

    def rnd(y):  # branch outputs are bf16-rounded before the combine matmul
        return y.astype(jnp.bfloat16).astype(jnp.float32)

    outs = [rnd(jnp.maximum(jnp.einsum("bhwc,co->bhwo", x, w1) + bias[0], 0.0))]
    for i, d in enumerate(DILATIONS):
        w = wdil[i].reshape(3, 3, Cin, Cout)            # HWIO
        y = jax.lax.conv_general_dilated(x, w, (1, 1), [(d, d), (d, d)],
                                         rhs_dilation=(d, d), dimension_numbers=dn)
        outs.append(rnd(jnp.maximum(y + bias[1 + i], 0.0)))
    xm = jnp.mean(x, axis=(1, 2), keepdims=True)        # (B,1,1,Cin)
    bp = rnd(jnp.maximum(jnp.einsum("bijc,co->bijo", xm, wpool) + bias[4], 0.0))
    outs.append(jnp.broadcast_to(bp, outs[0].shape))
    cat = jnp.concatenate(outs, axis=-1)
    out = jnp.maximum(jnp.einsum("bhwc,co->bhwo", cat, wcomb.reshape(5 * Cout, Cout))
                      + bias[5], 0.0)
    return jnp.transpose(out, (0, 3, 1, 2))


if __name__ == "__main__":
    B, Cin, Cout, H, W = 2, 4, 8, 16, 16

    key = jax.random.PRNGKey(0)
    kx_, kp = jax.random.split(key)
    x = jax.random.normal(kx_, (B, Cin, H, W), jnp.float32)     # NCHW, like PyTorch
    params = init_params(kp, Cin, Cout)

    out = jax.block_until_ready(aspp_pallas(x, params))
    assert out.shape == (B, Cout, H, W)

    ref = jax.block_until_ready(aspp_reference(x, params))
    err = float(jnp.max(jnp.abs(out - ref)))
    assert jnp.allclose(out, ref, atol=2e-2, rtol=2e-2), err

    print("KERNEL_OK")
</pallas_src>

<mosaic_0001>
module attributes {stable_mosaic.version = 11 : i64} {
  func.func @aspp_kernel(%arg0: i32, %arg1: memref<1x16x16x4xbf16, #tpu.memory_space<vmem>>, %arg2: memref<4x8xbf16, #tpu.memory_space<vmem>>, %arg3: memref<3x36x8xbf16, #tpu.memory_space<vmem>>, %arg4: memref<4x8xbf16, #tpu.memory_space<vmem>>, %arg5: memref<5x8x8xbf16, #tpu.memory_space<vmem>>, %arg6: memref<6x8xf32, #tpu.memory_space<vmem>>, %arg7: memref<1x16x16x8xf32, #tpu.memory_space<vmem>>, %arg8: memref<66x66x4xf32, #tpu.memory_space<vmem>>, %arg9: memref<256x8xf32, #tpu.memory_space<vmem>>) attributes {dimension_semantics = [#tpu.dimension_semantics<parallel>], iteration_bounds = array<i64: 2>, scalar_prefetch = 0 : i64, scratch_operands = 2 : i64, tpu.core_type = #tpu.core_type<tc>, window_params = [{transform_indices = @transform_0, window_bounds = array<i64: 1, 16, 16, 4>}, {pipeline_mode = #tpu.pipeline_mode<synchronous>, transform_indices = @transform_1, window_bounds = array<i64: 4, 8>}, {pipeline_mode = #tpu.pipeline_mode<synchronous>, transform_indices = @transform_2, window_bounds = array<i64: 3, 36, 8>}, {pipeline_mode = #tpu.pipeline_mode<synchronous>, transform_indices = @transform_3, window_bounds = array<i64: 4, 8>}, {pipeline_mode = #tpu.pipeline_mode<synchronous>, transform_indices = @transform_4, window_bounds = array<i64: 5, 8, 8>}, {pipeline_mode = #tpu.pipeline_mode<synchronous>, transform_indices = @transform_5, window_bounds = array<i64: 6, 8>}, {transform_indices = @transform_6, window_bounds = array<i64: 1, 16, 16, 8>}]} {
    %cst = arith.constant 0.000000e+00 : f32
    %0 = vector.broadcast %cst : f32 to vector<66x66x4xf32>
    %c0 = arith.constant 0 : index
    %c0_0 = arith.constant 0 : index
    %c0_1 = arith.constant 0 : index
    %1 = vector.load %arg8[%c0, %c0_0, %c0_1] : memref<66x66x4xf32, #tpu.memory_space<vmem>>, vector<66x66x4xf32>
    tpu.vector_store %arg8[%c0, %c0_0, %c0_1], %0 {strides = array<i32>} : memref<66x66x4xf32, #tpu.memory_space<vmem>>, vector<66x66x4xf32>,
    %c0_2 = arith.constant 0 : index
    %c0_3 = arith.constant 0 : index
    %c0_4 = arith.constant 0 : index
    %c0_5 = arith.constant 0 : index
    %2 = vector.load %arg1[%c0_2, %c0_3, %c0_4, %c0_5] : memref<1x16x16x4xbf16, #tpu.memory_space<vmem>>, vector<1x16x16x4xbf16>
    %3 = vector.shape_cast %2 : vector<1x16x16x4xbf16> to vector<16x16x4xbf16>
    %4 = arith.extf %3 : vector<16x16x4xbf16> to vector<16x16x4xf32>
    %c32 = arith.constant 32 : index
    %c32_6 = arith.constant 32 : index
    %c0_7 = arith.constant 0 : index
    %5 = vector.load %arg8[%c32, %c32_6, %c0_7] : memref<66x66x4xf32, #tpu.memory_space<vmem>>, vector<16x16x4xf32>
    tpu.vector_store %arg8[%c32, %c32_6, %c0_7], %4 {strides = array<i32>} : memref<66x66x4xf32, #tpu.memory_space<vmem>>, vector<16x16x4xf32>,
    %6 = vector.shape_cast %4 : vector<16x16x4xf32> to vector<256x4xf32>
    %7 = arith.truncf %6 : vector<256x4xf32> to vector<256x4xbf16>
    %c0_8 = arith.constant 0 : index
    %c0_9 = arith.constant 0 : index
    %8 = vector.load %arg2[%c0_8, %c0_9] : memref<4x8xbf16, #tpu.memory_space<vmem>>, vector<4x8xbf16>
    %cst_10 = arith.constant dense<0.000000e+00> : vector<256x8xf32>
    %9 = tpu.matmul %7, %8, %cst_10 {dimension_numbers = #tpu.dot_dimension_numbers<[1], [0], [0], [1], [0, 0, 1, 1], [], []>} : vector<256x4xbf16>, vector<4x8xbf16>, vector<256x8xf32> -> vector<256x8xf32>
    %c0_11 = arith.constant 0 : index
    %c0_12 = arith.constant 0 : index
    %10 = vector.load %arg6[%c0_11, %c0_12] : memref<6x8xf32, #tpu.memory_space<vmem>>, vector<1x8xf32>
    %11 = vector.shape_cast %10 : vector<1x8xf32> to vector<8xf32>
    %12 = vector.shape_cast %11 : vector<8xf32> to vector<1x8xf32>
    %13 = vector.broadcast %12 : vector<1x8xf32> to vector<256x8xf32>
    %14 = arith.addf %9, %13 : vector<256x8xf32>
    %cst_13 = arith.constant 0.000000e+00 : f32
    %15 = vector.broadcast %cst_13 : f32 to vector<256x8xf32>
    %16 = arith.maximumf %14, %15 : vector<256x8xf32>
    %17 = arith.truncf %16 : vector<256x8xf32> to vector<256x8xbf16>
    %c0_14 = arith.constant 0 : index
    %c0_15 = arith.constant 0 : index
    %c0_16 = arith.constant 0 : index
    %18 = vector.load %arg5[%c0_14, %c0_15, %c0_16] : memref<5x8x8xbf16, #tpu.memory_space<vmem>>, vector<1x8x8xbf16>
    %19 = vector.shape_cast %18 : vector<1x8x8xbf16> to vector<8x8xbf16>
    %cst_17 = arith.constant dense<0.000000e+00> : vector<256x8xf32>
    %20 = tpu.matmul %17, %19, %cst_17 {dimension_numbers = #tpu.dot_dimension_numbers<[1], [0], [0], [1], [0, 0, 1, 1], [], []>} : vector<256x8xbf16>, vector<8x8xbf16>, vector<256x8xf32> -> vector<256x8xf32>
    %c0_18 = arith.constant 0 : index
    %c0_19 = arith.constant 0 : index
    %21 = vector.load %arg9[%c0_18, %c0_19] : memref<256x8xf32, #tpu.memory_space<vmem>>, vector<256x8xf32>
    tpu.vector_store %arg9[%c0_18, %c0_19], %20 {strides = array<i32>} : memref<256x8xf32, #tpu.memory_space<vmem>>, vector<256x8xf32>,
    %c26 = arith.constant 26 : index
    %c26_20 = arith.constant 26 : index
    %c0_21 = arith.constant 0 : index
    %22 = vector.load %arg8[%c26, %c26_20, %c0_21] : memref<66x66x4xf32, #tpu.memory_space<vmem>>, vector<16x16x4xf32>
    %23 = vector.shape_cast %22 : vector<16x16x4xf32> to vector<256x4xf32>
    %c26_22 = arith.constant 26 : index
    %c32_23 = arith.constant 32 : index
    %c0_24 = arith.constant 0 : index
    %24 = vector.load %arg8[%c26_22, %c32_23, %c0_24] : memref<66x66x4xf32, #tpu.memory_space<vmem>>, vector<16x16x4xf32>
    %25 = vector.shape_cast %24 : vector<16x16x4xf32> to vector<256x4xf32>
    %c26_25 = arith.constant 26 : index
    %c38 = arith.constant 38 : index
    %c0_26 = arith.constant 0 : index
    %26 = vector.load %arg8[%c26_25, %c38, %c0_26] : memref<66x66x4xf32, #tpu.memory_space<vmem>>, vector<16x16x4xf32>
    %27 = vector.shape_cast %26 : vector<16x16x4xf32> to vector<256x4xf32>
    %c32_27 = arith.constant 32 : index
    %c26_28 = arith.constant 26 : index
    %c0_29 = arith.constant 0 : index
    %28 = vector.load %arg8[%c32_27, %c26_28, %c0_29] : memref<66x66x4xf32, #tpu.memory_space<vmem>>, vector<16x16x4xf32>
    %29 = vector.shape_cast %28 : vector<16x16x4xf32> to vector<256x4xf32>
    %c32_30 = arith.constant 32 : index
    %c32_31 = arith.constant 32 : index
    %c0_32 = arith.constant 0 : index
    %30 = vector.load %arg8[%c32_30, %c32_31, %c0_32] : memref<66x66x4xf32, #tpu.memory_space<vmem>>, vector<16x16x4xf32>
    %31 = vector.shape_cast %30 : vector<16x16x4xf32> to vector<256x4xf32>
    %c32_33 = arith.constant 32 : index
    %c38_34 = arith.constant 38 : index
    %c0_35 = arith.constant 0 : index
    %32 = vector.load %arg8[%c32_33, %c38_34, %c0_35] : memref<66x66x4xf32, #tpu.memory_space<vmem>>, vector<16x16x4xf32>
    %33 = vector.shape_cast %32 : vector<16x16x4xf32> to vector<256x4xf32>
    %c38_36 = arith.constant 38 : index
    %c26_37 = arith.constant 26 : index
    %c0_38 = arith.constant 0 : index
    %34 = vector.load %arg8[%c38_36, %c26_37, %c0_38] : memref<66x66x4xf32, #tpu.memory_space<vmem>>, vector<16x16x4xf32>
    %35 = vector.shape_cast %34 : vector<16x16x4xf32> to vector<256x4xf32>
    %c38_39 = arith.constant 38 : index
    %c32_40 = arith.constant 32 : index
    %c0_41 = arith.constant 0 : index
    %36 = vector.load %arg8[%c38_39, %c32_40, %c0_41] : memref<66x66x4xf32, #tpu.memory_space<vmem>>, vector<16x16x4xf32>
    %37 = vector.shape_cast %36 : vector<16x16x4xf32> to vector<256x4xf32>
    %c38_42 = arith.constant 38 : index
    %c38_43 = arith.constant 38 : index
    %c0_44 = arith.constant 0 : index
    %38 = vector.load %arg8[%c38_42, %c38_43, %c0_44] : memref<66x66x4xf32, #tpu.memory_space<vmem>>, vector<16x16x4xf32>
    %39 = vector.shape_cast %38 : vector<16x16x4xf32> to vector<256x4xf32>
    %40 = tpu.concatenate %23, %25, %27, %29, %31, %33, %35, %37, %39 in 1 : vector<256x4xf32>, vector<256x4xf32>, vector<256x4xf32>, vector<256x4xf32>, vector<256x4xf32>, vector<256x4xf32>, vector<256x4xf32>, vector<256x4xf32>, vector<256x4xf32> -> vector<256x36xf32>
    %41 = arith.truncf %40 : vector<256x36xf32> to vector<256x36xbf16>
    %c0_45 = arith.constant 0 : index
    %c0_46 = arith.constant 0 : index
    %c0_47 = arith.constant 0 : index
    %42 = vector.load %arg3[%c0_45, %c0_46, %c0_47] : memref<3x36x8xbf16, #tpu.memory_space<vmem>>, vector<1x36x8xbf16>
    %43 = vector.shape_cast %42 : vector<1x36x8xbf16> to vector<36x8xbf16>
    %cst_48 = arith.constant dense<0.000000e+00> : vector<256x8xf32>
    %44 = tpu.matmul %41, %43, %cst_48 {dimension_numbers = #tpu.dot_dimension_numbers<[1], [0], [0], [1], [0, 0, 1, 1], [], []>} : vector<256x36xbf16>, vector<36x8xbf16>, vector<256x8xf32> -> vector<256x8xf32>
    %c1 = arith.constant 1 : index
    %c0_49 = arith.constant 0 : index
    %45 = vector.load %arg6[%c1, %c0_49] : memref<6x8xf32, #tpu.memory_space<vmem>>, vector<1x8xf32>
    %46 = vector.shape_cast %45 : vector<1x8xf32> to vector<8xf32>
    %47 = vector.shape_cast %46 : vector<8xf32> to vector<1x8xf32>
    %48 = vector.broadcast %47 : vector<1x8xf32> to vector<256x8xf32>
    %49 = arith.addf %44, %48 : vector<256x8xf32>
    %cst_50 = arith.constant 0.000000e+00 : f32
    %50 = vector.broadcast %cst_50 : f32 to vector<256x8xf32>
    %51 = arith.maximumf %49, %50 : vector<256x8xf32>
    %52 = arith.truncf %51 : vector<256x8xf32> to vector<256x8xbf16>
    %c0_51 = arith.constant 0 : index
    %c0_52 = arith.constant 0 : index
    %53 = vector.load %arg9[%c0_51, %c0_52] : memref<256x8xf32, #tpu.memory_space<vmem>>, vector<256x8xf32>
    %c1_53 = arith.constant 1 : index
    %c0_54 = arith.constant 0 : index
    %c0_55 = arith.constant 0 : index
    %54 = vector.load %arg5[%c1_53, %c0_54, %c0_55] : memref<5x8x8xbf16, #tpu.memory_space<vmem>>, vector<1x8x8xbf16>
    %55 = vector.shape_cast %54 : vector<1x8x8xbf16> to vector<8x8xbf16>
    %cst_56 = arith.constant dense<0.000000e+00> : vector<256x8xf32>
    %56 = tpu.matmul %52, %55, %cst_56 {dimension_numbers = #tpu.dot_dimension_numbers<[1], [0], [0], [1], [0, 0, 1, 1], [], []>} : vector<256x8xbf16>, vector<8x8xbf16>, vector<256x8xf32> -> vector<256x8xf32>
    %57 = arith.addf %53, %56 : vector<256x8xf32>
    %c0_57 = arith.constant 0 : index
    %c0_58 = arith.constant 0 : index
    %58 = vector.load %arg9[%c0_57, %c0_58] : memref<256x8xf32, #tpu.memory_space<vmem>>, vector<256x8xf32>
    tpu.vector_store %arg9[%c0_57, %c0_58], %57 {strides = array<i32>} : memref<256x8xf32, #tpu.memory_space<vmem>>, vector<256x8xf32>,
    %c20 = arith.constant 20 : index
    %c20_59 = arith.constant 20 : index
    %c0_60 = arith.constant 0 : index
    %59 = vector.load %arg8[%c20, %c20_59, %c0_60] : memref<66x66x4xf32, #tpu.memory_space<vmem>>, vector<16x16x4xf32>
    %60 = vector.shape_cast %59 : vector<16x16x4xf32> to vector<256x4xf32>
    %c20_61 = arith.constant 20 : index
    %c32_62 = arith.constant 32 : index
    %c0_63 = arith.constant 0 : index
    %61 = vector.load %arg8[%c20_61, %c32_62, %c0_63] : memref<66x66x4xf32, #tpu.memory_space<vmem>>, vector<16x16x4xf32>
    %62 = vector.shape_cast %61 : vector<16x16x4xf32> to vector<256x4xf32>
    %c20_64 = arith.constant 20 : index
    %c44 = arith.constant 44 : index
    %c0_65 = arith.constant 0 : index
    %63 = vector.load %arg8[%c20_64, %c44, %c0_65] : memref<66x66x4xf32, #tpu.memory_space<vmem>>, vector<16x16x4xf32>
    %64 = vector.shape_cast %63 : vector<16x16x4xf32> to vector<256x4xf32>
    %c32_66 = arith.constant 32 : index
    %c20_67 = arith.constant 20 : index
    %c0_68 = arith.constant 0 : index
    %65 = vector.load %arg8[%c32_66, %c20_67, %c0_68] : memref<66x66x4xf32, #tpu.memory_space<vmem>>, vector<16x16x4xf32>
    %66 = vector.shape_cast %65 : vector<16x16x4xf32> to vector<256x4xf32>
    %c32_69 = arith.constant 32 : index
    %c32_70 = arith.constant 32 : index
    %c0_71 = arith.constant 0 : index
    %67 = vector.load %arg8[%c32_69, %c32_70, %c0_71] : memref<66x66x4xf32, #tpu.memory_space<vmem>>, vector<16x16x4xf32>
    %68 = vector.shape_cast %67 : vector<16x16x4xf32> to vector<256x4xf32>
    %c32_72 = arith.constant 32 : index
    %c44_73 = arith.constant 44 : index
    %c0_74 = arith.constant 0 : index
    %69 = vector.load %arg8[%c32_72, %c44_73, %c0_74] : memref<66x66x4xf32, #tpu.memory_space<vmem>>, vector<16x16x4xf32>
    %70 = vector.shape_cast %69 : vector<16x16x4xf32> to vector<256x4xf32>
    %c44_75 = arith.constant 44 : index
    %c20_76 = arith.constant 20 : index
    %c0_77 = arith.constant 0 : index
    %71 = vector.load %arg8[%c44_75, %c20_76, %c0_77] : memref<66x66x4xf32, #tpu.memory_space<vmem>>, vector<16x16x4xf32>
    %72 = vector.shape_cast %71 : vector<16x16x4xf32> to vector<256x4xf32>
    %c44_78 = arith.constant 44 : index
    %c32_79 = arith.constant 32 : index
    %c0_80 = arith.constant 0 : index
    %73 = vector.load %arg8[%c44_78, %c32_79, %c0_80] : memref<66x66x4xf32, #tpu.memory_space<vmem>>, vector<16x16x4xf32>
    %74 = vector.shape_cast %73 : vector<16x16x4xf32> to vector<256x4xf32>
    %c44_81 = arith.constant 44 : index
    %c44_82 = arith.constant 44 : index
    %c0_83 = arith.constant 0 : index
    %75 = vector.load %arg8[%c44_81, %c44_82, %c0_83] : memref<66x66x4xf32, #tpu.memory_space<vmem>>, vector<16x16x4xf32>
    %76 = vector.shape_cast %75 : vector<16x16x4xf32> to vector<256x4xf32>
    %77 = tpu.concatenate %60, %62, %64, %66, %68, %70, %72, %74, %76 in 1 : vector<256x4xf32>, vector<256x4xf32>, vector<256x4xf32>, vector<256x4xf32>, vector<256x4xf32>, vector<256x4xf32>, vector<256x4xf32>, vector<256x4xf32>, vector<256x4xf32> -> vector<256x36xf32>
    %78 = arith.truncf %77 : vector<256x36xf32> to vector<256x36xbf16>
    %c1_84 = arith.constant 1 : index
    %c0_85 = arith.constant 0 : index
    %c0_86 = arith.constant 0 : index
    %79 = vector.load %arg3[%c1_84, %c0_85, %c0_86] : memref<3x36x8xbf16, #tpu.memory_space<vmem>>, vector<1x36x8xbf16>
    %80 = vector.shape_cast %79 : vector<1x36x8xbf16> to vector<36x8xbf16>
    %cst_87 = arith.constant dense<0.000000e+00> : vector<256x8xf32>
    %81 = tpu.matmul %78, %80, %cst_87 {dimension_numbers = #tpu.dot_dimension_numbers<[1], [0], [0], [1], [0, 0, 1, 1], [], []>} : vector<256x36xbf16>, vector<36x8xbf16>, vector<256x8xf32> -> vector<256x8xf32>
    %c2 = arith.constant 2 : index
    %c0_88 = arith.constant 0 : index
    %82 = vector.load %arg6[%c2, %c0_88] : memref<6x8xf32, #tpu.memory_space<vmem>>, vector<1x8xf32>
    %83 = vector.shape_cast %82 : vector<1x8xf32> to vector<8xf32>
    %84 = vector.shape_cast %83 : vector<8xf32> to vector<1x8xf32>
    %85 = vector.broadcast %84 : vector<1x8xf32> to vector<256x8xf32>
    %86 = arith.addf %81, %85 : vector<256x8xf32>
    %cst_89 = arith.constant 0.000000e+00 : f32
    %87 = vector.broadcast %cst_89 : f32 to vector<256x8xf32>
    %88 = arith.maximumf %86, %87 : vector<256x8xf32>
    %89 = arith.truncf %88 : vector<256x8xf32> to vector<256x8xbf16>
    %c0_90 = arith.constant 0 : index
    %c0_91 = arith.constant 0 : index
    %90 = vector.load %arg9[%c0_90, %c0_91] : memref<256x8xf32, #tpu.memory_space<vmem>>, vector<256x8xf32>
    %c2_92 = arith.constant 2 : index
    %c0_93 = arith.constant 0 : index
    %c0_94 = arith.constant 0 : index
    %91 = vector.load %arg5[%c2_92, %c0_93, %c0_94] : memref<5x8x8xbf16, #tpu.memory_space<vmem>>, vector<1x8x8xbf16>
    %92 = vector.shape_cast %91 : vector<1x8x8xbf16> to vector<8x8xbf16>
    %cst_95 = arith.constant dense<0.000000e+00> : vector<256x8xf32>
    %93 = tpu.matmul %89, %92, %cst_95 {dimension_numbers = #tpu.dot_dimension_numbers<[1], [0], [0], [1], [0, 0, 1, 1], [], []>} : vector<256x8xbf16>, vector<8x8xbf16>, vector<256x8xf32> -> vector<256x8xf32>
    %94 = arith.addf %90, %93 : vector<256x8xf32>
    %c0_96 = arith.constant 0 : index
    %c0_97 = arith.constant 0 : index
    %95 = vector.load %arg9[%c0_96, %c0_97] : memref<256x8xf32, #tpu.memory_space<vmem>>, vector<256x8xf32>
    tpu.vector_store %arg9[%c0_96, %c0_97], %94 {strides = array<i32>} : memref<256x8xf32, #tpu.memory_space<vmem>>, vector<256x8xf32>,
    %c14 = arith.constant 14 : index
    %c14_98 = arith.constant 14 : index
    %c0_99 = arith.constant 0 : index
    %96 = vector.load %arg8[%c14, %c14_98, %c0_99] : memref<66x66x4xf32, #tpu.memory_space<vmem>>, vector<16x16x4xf32>
    %97 = vector.shape_cast %96 : vector<16x16x4xf32> to vector<256x4xf32>
    %c14_100 = arith.constant 14 : index
    %c32_101 = arith.constant 32 : index
    %c0_102 = arith.constant 0 : index
    %98 = vector.load %arg8[%c14_100, %c32_101, %c0_102] : memref<66x66x4xf32, #tpu.memory_space<vmem>>, vector<16x16x4xf32>
    %99 = vector.shape_cast %98 : vector<16x16x4xf32> to vector<256x4xf32>
    %c14_103 = arith.constant 14 : index
    %c50 = arith.constant 50 : index
    %c0_104 = arith.constant 0 : index
    %100 = vector.load %arg8[%c14_103, %c50, %c0_104] : memref<66x66x4xf32, #tpu.memory_space<vmem>>, vector<16x16x4xf32>
    %101 = vector.shape_cast %100 : vector<16x16x4xf32> to vector<256x4xf32>
    %c32_105 = arith.constant 32 : index
    %c14_106 = arith.constant 14 : index
    %c0_107 = arith.constant 0 : index
    %102 = vector.load %arg8[%c32_105, %c14_106, %c0_107] : memref<66x66x4xf32, #tpu.memory_space<vmem>>, vector<16x16x4xf32>
    %103 = vector.shape_cast %102 : vector<16x16x4xf32> to vector<256x4xf32>
    %c32_108 = arith.constant 32 : index
    %c32_109 = arith.constant 32 : index
    %c0_110 = arith.constant 0 : index
    %104 = vector.load %arg8[%c32_108, %c32_109, %c0_110] : memref<66x66x4xf32, #tpu.memory_space<vmem>>, vector<16x16x4xf32>
    %105 = vector.shape_cast %104 : vector<16x16x4xf32> to vector<256x4xf32>
    %c32_111 = arith.constant 32 : index
    %c50_112 = arith.constant 50 : index
    %c0_113 = arith.constant 0 : index
    %106 = vector.load %arg8[%c32_111, %c50_112, %c0_113] : memref<66x66x4xf32, #tpu.memory_space<vmem>>, vector<16x16x4xf32>
    %107 = vector.shape_cast %106 : vector<16x16x4xf32> to vector<256x4xf32>
    %c50_114 = arith.constant 50 : index
    %c14_115 = arith.constant 14 : index
    %c0_116 = arith.constant 0 : index
    %108 = vector.load %arg8[%c50_114, %c14_115, %c0_116] : memref<66x66x4xf32, #tpu.memory_space<vmem>>, vector<16x16x4xf32>
    %109 = vector.shape_cast %108 : vector<16x16x4xf32> to vector<256x4xf32>
    %c50_117 = arith.constant 50 : index
    %c32_118 = arith.constant 32 : index
    %c0_119 = arith.constant 0 : index
    %110 = vector.load %arg8[%c50_117, %c32_118, %c0_119] : memref<66x66x4xf32, #tpu.memory_space<vmem>>, vector<16x16x4xf32>
    %111 = vector.shape_cast %110 : vector<16x16x4xf32> to vector<256x4xf32>
    %c50_120 = arith.constant 50 : index
    %c50_121 = arith.constant 50 : index
    %c0_122 = arith.constant 0 : index
    %112 = vector.load %arg8[%c50_120, %c50_121, %c0_122] : memref<66x66x4xf32, #tpu.memory_space<vmem>>, vector<16x16x4xf32>
    %113 = vector.shape_cast %112 : vector<16x16x4xf32> to vector<256x4xf32>
    %114 = tpu.concatenate %97, %99, %101, %103, %105, %107, %109, %111, %113 in 1 : vector<256x4xf32>, vector<256x4xf32>, vector<256x4xf32>, vector<256x4xf32>, vector<256x4xf32>, vector<256x4xf32>, vector<256x4xf32>, vector<256x4xf32>, vector<256x4xf32> -> vector<256x36xf32>
    %115 = arith.truncf %114 : vector<256x36xf32> to vector<256x36xbf16>
    %c2_123 = arith.constant 2 : index
    %c0_124 = arith.constant 0 : index
    %c0_125 = arith.constant 0 : index
    %116 = vector.load %arg3[%c2_123, %c0_124, %c0_125] : memref<3x36x8xbf16, #tpu.memory_space<vmem>>, vector<1x36x8xbf16>
    %117 = vector.shape_cast %116 : vector<1x36x8xbf16> to vector<36x8xbf16>
    %cst_126 = arith.constant dense<0.000000e+00> : vector<256x8xf32>
    %118 = tpu.matmul %115, %117, %cst_126 {dimension_numbers = #tpu.dot_dimension_numbers<[1], [0], [0], [1], [0, 0, 1, 1], [], []>} : vector<256x36xbf16>, vector<36x8xbf16>, vector<256x8xf32> -> vector<256x8xf32>
    %c3 = arith.constant 3 : index
    %c0_127 = arith.constant 0 : index
    %119 = vector.load %arg6[%c3, %c0_127] : memref<6x8xf32, #tpu.memory_space<vmem>>, vector<1x8xf32>
    %120 = vector.shape_cast %119 : vector<1x8xf32> to vector<8xf32>
    %121 = vector.shape_cast %120 : vector<8xf32> to vector<1x8xf32>
    %122 = vector.broadcast %121 : vector<1x8xf32> to vector<256x8xf32>
    %123 = arith.addf %118, %122 : vector<256x8xf32>
    %cst_128 = arith.constant 0.000000e+00 : f32
    %124 = vector.broadcast %cst_128 : f32 to vector<256x8xf32>
    %125 = arith.maximumf %123, %124 : vector<256x8xf32>
    %126 = arith.truncf %125 : vector<256x8xf32> to vector<256x8xbf16>
    %c0_129 = arith.constant 0 : index
    %c0_130 = arith.constant 0 : index
    %127 = vector.load %arg9[%c0_129, %c0_130] : memref<256x8xf32, #tpu.memory_space<vmem>>, vector<256x8xf32>
    %c3_131 = arith.constant 3 : index
    %c0_132 = arith.constant 0 : index
    %c0_133 = arith.constant 0 : index
    %128 = vector.load %arg5[%c3_131, %c0_132, %c0_133] : memref<5x8x8xbf16, #tpu.memory_space<vmem>>, vector<1x8x8xbf16>
    %129 = vector.shape_cast %128 : vector<1x8x8xbf16> to vector<8x8xbf16>
    %cst_134 = arith.constant dense<0.000000e+00> : vector<256x8xf32>
    %130 = tpu.matmul %126, %129, %cst_134 {dimension_numbers = #tpu.dot_dimension_numbers<[1], [0], [0], [1], [0, 0, 1, 1], [], []>} : vector<256x8xbf16>, vector<8x8xbf16>, vector<256x8xf32> -> vector<256x8xf32>
    %131 = arith.addf %127, %130 : vector<256x8xf32>
    %c0_135 = arith.constant 0 : index
    %c0_136 = arith.constant 0 : index
    %132 = vector.load %arg9[%c0_135, %c0_136] : memref<256x8xf32, #tpu.memory_space<vmem>>, vector<256x8xf32>
    tpu.vector_store %arg9[%c0_135, %c0_136], %131 {strides = array<i32>} : memref<256x8xf32, #tpu.memory_space<vmem>>, vector<256x8xf32>,
    %cst_137 = arith.constant dense<0.000000e+00> : vector<4xf32>
    %133 = vector.multi_reduction <add>, %6, %cst_137 [0] : vector<256x4xf32> to vector<4xf32>
    %134 = vector.shape_cast %133 : vector<4xf32> to vector<1x4xf32>
    %cst_138 = arith.constant 2.560000e+02 : f32
    %135 = vector.broadcast %cst_138 : f32 to vector<1x4xf32>
    %136 = arith.divf %134, %135 : vector<1x4xf32>
    %c0_139 = arith.constant 0 : index
    %c0_140 = arith.constant 0 : index
    %137 = vector.load %arg4[%c0_139, %c0_140] : memref<4x8xbf16, #tpu.memory_space<vmem>>, vector<4x8xbf16>
    %138 = arith.extf %137 : vector<4x8xbf16> to vector<4x8xf32>
    %cst_141 = arith.constant dense<0.000000e+00> : vector<1x8xf32>
    %139 = tpu.matmul %136, %138, %cst_141 {dimension_numbers = #tpu.dot_dimension_numbers<[1], [0], [0], [1], [0, 0, 1, 1], [], []>} : vector<1x4xf32>, vector<4x8xf32>, vector<1x8xf32> -> vector<1x8xf32>
    %c4 = arith.constant 4 : index
    %c0_142 = arith.constant 0 : index
    %140 = vector.load %arg6[%c4, %c0_142] : memref<6x8xf32, #tpu.memory_space<vmem>>, vector<1x8xf32>
    %141 = vector.shape_cast %140 : vector<1x8xf32> to vector<8xf32>
    %142 = vector.shape_cast %141 : vector<8xf32> to vector<1x8xf32>
    %143 = arith.addf %139, %142 : vector<1x8xf32>
    %cst_143 = arith.constant 0.000000e+00 : f32
    %144 = vector.broadcast %cst_143 : f32 to vector<1x8xf32>
    %145 = arith.maximumf %143, %144 : vector<1x8xf32>
    %146 = arith.truncf %145 : vector<1x8xf32> to vector<1x8xbf16>
    %147 = arith.extf %146 : vector<1x8xbf16> to vector<1x8xf32>
    %c4_144 = arith.constant 4 : index
    %c0_145 = arith.constant 0 : index
    %c0_146 = arith.constant 0 : index
    %148 = vector.load %arg5[%c4_144, %c0_145, %c0_146] : memref<5x8x8xbf16, #tpu.memory_space<vmem>>, vector<1x8x8xbf16>
    %149 = vector.shape_cast %148 : vector<1x8x8xbf16> to vector<8x8xbf16>
    %150 = arith.extf %149 : vector<8x8xbf16> to vector<8x8xf32>
    %cst_147 = arith.constant dense<0.000000e+00> : vector<1x8xf32>
    %151 = tpu.matmul %147, %150, %cst_147 {dimension_numbers = #tpu.dot_dimension_numbers<[1], [0], [0], [1], [0, 0, 1, 1], [], []>} : vector<1x8xf32>, vector<8x8xf32>, vector<1x8xf32> -> vector<1x8xf32>
    %c0_148 = arith.constant 0 : index
    %c0_149 = arith.constant 0 : index
    %152 = vector.load %arg9[%c0_148, %c0_149] : memref<256x8xf32, #tpu.memory_space<vmem>>, vector<256x8xf32>
    %153 = vector.broadcast %151 : vector<1x8xf32> to vector<256x8xf32>
    %154 = arith.addf %152, %153 : vector<256x8xf32>
    %c5 = arith.constant 5 : index
    %c0_150 = arith.constant 0 : index
    %155 = vector.load %arg6[%c5, %c0_150] : memref<6x8xf32, #tpu.memory_space<vmem>>, vector<1x8xf32>
    %156 = vector.shape_cast %155 : vector<1x8xf32> to vector<8xf32>
    %157 = vector.shape_cast %156 : vector<8xf32> to vector<1x8xf32>
    %158 = vector.broadcast %157 : vector<1x8xf32> to vector<256x8xf32>
    %159 = arith.addf %154, %158 : vector<256x8xf32>
    %cst_151 = arith.constant 0.000000e+00 : f32
    %160 = vector.broadcast %cst_151 : f32 to vector<256x8xf32>
    %161 = arith.maximumf %159, %160 : vector<256x8xf32>
    %162 = vector.shape_cast %161 : vector<256x8xf32> to vector<1x16x16x8xf32>
    %c0_152 = arith.constant 0 : index
    %c0_153 = arith.constant 0 : index
    %c0_154 = arith.constant 0 : index
    %c0_155 = arith.constant 0 : index
    %163 = vector.load %arg7[%c0_152, %c0_153, %c0_154, %c0_155] : memref<1x16x16x8xf32, #tpu.memory_space<vmem>>, vector<1x16x16x8xf32>
    tpu.vector_store %arg7[%c0_152, %c0_153, %c0_154, %c0_155], %162 {strides = array<i32>} : memref<1x16x16x8xf32, #tpu.memory_space<vmem>>, vector<1x16x16x8xf32>,
    return
  }
  func.func @transform_0(%arg0: i32) -> (i32, i32, i32, i32) {
    %c0_i32 = arith.constant 0 : i32
    %c0_i32_0 = arith.constant 0 : i32
    %c0_i32_1 = arith.constant 0 : i32
    %c0_i32_2 = arith.constant 0 : i32
    return %arg0, %c0_i32, %c0_i32_0, %c0_i32_1 : i32, i32, i32, i32
  }
  func.func @transform_1(%arg0: i32) -> (i32, i32) {
    %c0_i32 = arith.constant 0 : i32
    %c0_i32_0 = arith.constant 0 : i32
    %c0_i32_1 = arith.constant 0 : i32
    return %c0_i32, %c0_i32_0 : i32, i32
  }
  func.func @transform_2(%arg0: i32) -> (i32, i32, i32) {
    %c0_i32 = arith.constant 0 : i32
    %c0_i32_0 = arith.constant 0 : i32
    %c0_i32_1 = arith.constant 0 : i32
    %c0_i32_2 = arith.constant 0 : i32
    return %c0_i32, %c0_i32_0, %c0_i32_1 : i32, i32, i32
  }
  func.func @transform_3(%arg0: i32) -> (i32, i32) {
    %c0_i32 = arith.constant 0 : i32
    %c0_i32_0 = arith.constant 0 : i32
    %c0_i32_1 = arith.constant 0 : i32
    return %c0_i32, %c0_i32_0 : i32, i32
  }
  func.func @transform_4(%arg0: i32) -> (i32, i32, i32) {
    %c0_i32 = arith.constant 0 : i32
    %c0_i32_0 = arith.constant 0 : i32
    %c0_i32_1 = arith.constant 0 : i32
    %c0_i32_2 = arith.constant 0 : i32
    return %c0_i32, %c0_i32_0, %c0_i32_1 : i32, i32, i32
  }
  func.func @transform_5(%arg0: i32) -> (i32, i32) {
    %c0_i32 = arith.constant 0 : i32
    %c0_i32_0 = arith.constant 0 : i32
    %c0_i32_1 = arith.constant 0 : i32
    return %c0_i32, %c0_i32_0 : i32, i32
  }
  func.func @transform_6(%arg0: i32) -> (i32, i32, i32, i32) {
    %c0_i32 = arith.constant 0 : i32
    %c0_i32_0 = arith.constant 0 : i32
    %c0_i32_1 = arith.constant 0 : i32
    %c0_i32_2 = arith.constant 0 : i32
    return %arg0, %c0_i32, %c0_i32_0, %c0_i32_1 : i32, i32, i32, i32
  }
}

</mosaic_0001>

<bundles_post_ra>
// kernel: tpu_custom_call.1
= control target key start
LH: loop header
LB: loop body
LE: loop exit
PB: predicated region body
PF: predicated region fallthrough
CT: control target
= control target key end

     0   :  { %s11141_s21 = smov 0   ;;  %s18125_s0 = inlined_call_operand.vmem [shape: bf16[2,16,16,4], index: 0, kind: input, shape index: {}]   ;;  %s18126_s1 = inlined_call_operand.vmem [shape: bf16[4,8], index: 1, kind: input, shape index: {}]   ;;  %s18127_s2 = inlined_call_operand.vmem [shape: bf16[3,36,8], index: 2, kind: input, shape index: {}]   ;;  %s18128_s3 = inlined_call_operand.vmem [shape: bf16[4,8], index: 3, kind: input, shape index: {}]   ;;  %s18129_s4 = inlined_call_operand.vmem [shape: bf16[5,8,8], index: 4, kind: input, shape index: {}]   ;;  %s18130_s5 = inlined_call_operand.vmem [shape: f32[6,8], index: 5, kind: input, shape index: {}]   ;;  %s18131_s6 = inlined_call_operand.vmem [shape: f32[2,16,16,8], index: 6, kind: output, shape index: {}]  }
   0x1 LB: > { %s8481_s22 = sadd.s32 4294967295, %s11094_s21   ;;  %p8485_p0 = scmp.ge.s32.totalorder %s11094_s21, 1  ;;  %s11094_s21 = sphi %s11141_s21, %s16_s21  }
   0x2   : > { %p212_p1 = scmp.lt.s32.totalorder %s11094_s21, 3 }
   0x4   : > { %p213_p2 = pnand %p8485_p0, %p212_p1 }
   0x6   : > { %216 = sbr.rel (%p213_p2) target bundleno = 1573 (0x625), region = 44 }
   0xb   : > { %vm253_vm0 = vcmask 31744   ;;  %p11151_p3 = scmp.lt.s32.totalorder %s8481_s22, 1  ;;  %v18141_v0 = vmov 0.0   ;;  %s11097_s28 = smov 4   ;;  %vm1016_vm1 = vcmask 1041408   ;;  %vm1230_vm2 = vcmask 64512  }
   0xc   : > { %511 = vst.msk [vmem:[#allocation2 + $0x800] sm:$0xff] %vm253_vm0, %v18141_v0  ;;  %512 = vst.msk [vmem:[#allocation2 + $0x808] sm:$0xff] %vm253_vm0, %v18141_v0  ;;  %s11098_s29 = smov 8   ;;  %s11099_s30 = smov 12   ;;  %vm2854_vm3 = vcmask 97280   ;;  %vm2887_vm4 = vcmask 130048  }
   0xd   : > { %382 = vst.msk [vmem:[#allocation2 + $0x3f8] sm:$0xff] %vm253_vm0, %v18141_v0  ;;  %383 = vst.msk [vmem:[#allocation2 + $0x400] sm:$0xff] %vm253_vm0, %v18141_v0  ;;  %s19517_s22 = smov (!%p11151_p3, %s8481_s22), 1  ;;  %s11100_s7 = smov 16   ;;  %vm2920_vm5 = vcmask 162816   ;;  %vm2953_vm6 = vcmask 195584  }
   0xe   : > { %384 = vst.msk [vmem:[#allocation2 + $0x408] sm:$0xff] %vm253_vm0, %v18141_v0  ;;  %385 = vst.msk [vmem:[#allocation2 + $0x410] sm:$0xff] %vm253_vm0, %v18141_v0  ;;  %s8667_s24 = sshll.u32 %s19517_s22, 7  ;;  %s11101_s8 = smov 20   ;;  %vm2986_vm7 = vcmask 228352   ;;  %vm3019_vm8 = vcmask 261120  }
   0xf   : > { %386 = vst.msk [vmem:[#allocation2 + $0x418] sm:$0xff] %vm253_vm0, %v18141_v0  ;;  %387 = vst.msk [vmem:[#allocation2 + $0x420] sm:$0xff] %vm253_vm0, %v18141_v0  ;;  %s11885_s27 = scalar_lea.vmem %s18125_s0, %s8667_s24  ;;  %s11102_s11 = smov 24   ;;  %vm3093_vm9 = vcmask 293888   ;;  %vm1279_vm10 = vcmask 1043456   ;;  %vm262_vm11 = vcmask 25600  }
  0x10   : > { %388 = vst.msk [vmem:[#allocation2 + $0x428] sm:$0xff] %vm253_vm0, %v18141_v0  ;;  %391 = vst.msk [vmem:[#allocation2 + $0x440] sm:$0xff] %vm253_vm0, %v18141_v0  ;;  %v11888_v1 = vld [vmem:[%s11885_s27 + $0x8] sm:$0xff]   ;;  %v11891_v2 = vld [vmem:[%s11885_s27] sm:$0xff]   ;;  %s11103_s12 = smov 28   ;;  %s11104_s19 = smov 32  }
  0x11   : > { %392 = vst.msk [vmem:[#allocation2 + $0x448] sm:$0xff] %vm253_vm0, %v18141_v0  ;;  %393 = vst.msk [vmem:[#allocation2 + $0x450] sm:$0xff] %vm253_vm0, %v18141_v0  ;;  %v11894_v3 = vld [vmem:[%s11885_s27 + $0x18] sm:$0xff]   ;;  %v883_v4 = vunpack.c.l.bf16 %v11888_v1  ;;  %v884_v5 = vunpack.c.h.bf16 %v11888_v1  ;;  %v881_v6 = vunpack.c.l.bf16 %v11891_v2  ;;  %v882_v7 = vunpack.c.h.bf16 %v11891_v2  ;;  %v11901_v8 = vld [vmem:[%s11885_s27 + $0x10] sm:$0xff]   ;;  %8817 = vmatprep.mubr.msk.bf16.mxu0 %vm253_vm0, %v11891_v2  ;;  %s8668_s20 = sshll.u32 %s19517_s22, 8 }
  0x12   : > { %394 = vst.msk [vmem:[#allocation2 + $0x458] sm:$0xff] %vm253_vm0, %v18141_v0  ;;  %395 = vst.msk [vmem:[#allocation2 + $0x460] sm:$0xff] %vm253_vm0, %v18141_v0  ;;  %v11904_v9 = vld [vmem:[%s11885_s27 + $0x28] sm:$0xff]   ;;  %v887_v13 = vunpack.c.l.bf16 %v11894_v3  ;;  %v888_v14 = vunpack.c.h.bf16 %v11894_v3  ;;  %v885_v15 = vunpack.c.l.bf16 %v11901_v8  ;;  %v886_v16 = vunpack.c.h.bf16 %v11901_v8  ;;  %v11926_v27 = vld [vmem:[%s11885_s27 + $0x20] sm:$0xff]   ;;  %s18036_s24 = scalar_lea.vmem %s18131_s6, %s8668_s20 }
  0x13   : > { %396 = vst.msk [vmem:[#allocation2 + $0x468] sm:$0xff] %vm253_vm0, %v18141_v0  ;;  %397 = vst.msk [vmem:[#allocation2 + $0x470] sm:$0xff] %vm253_vm0, %v18141_v0  ;;  %v1513_v10 = vld [vmem:[#allocation2 + $0x800] sm:$0xff]  ;;  %v1514_v11 = vld [vmem:[#allocation2 + $0x808] sm:$0xff]  ;;  %v8028_v21 = vsel %vm253_vm0, %v881_v6, 0.0  ;;  %v8031_v25 = vsel %vm253_vm0, %v883_v4, 0.0  ;;  %v891_v34 = vunpack.c.l.bf16 %v11904_v9  ;;  %v892_v40 = vunpack.c.h.bf16 %v11904_v9 }
  0x14   : > { %400 = vst.msk [vmem:[#allocation2 + $0x488] sm:$0xff] %vm253_vm0, %v18141_v0  ;;  %401 = vst.msk [vmem:[#allocation2 + $0x490] sm:$0xff] %vm253_vm0, %v18141_v0  ;;  %v9145_v17 = vpack.i.bf16 %v1514_v11, %v1513_v10  ;;  %v8029_v26 = vsel %vm253_vm0, %v882_v7, 0.0  ;;  %v8033_v33 = vsel %vm253_vm0, %v884_v5, 0.0  ;;  %v11933_v35 = vld [vmem:[%s11885_s27 + $0x38] sm:$0xff]   ;;  %v11936_v36 = vld [vmem:[%s11885_s27 + $0x30] sm:$0xff]   ;;  %v889_v41 = vunpack.c.l.bf16 %v11926_v27 }
  0x15   : > { %402 = vst.msk [vmem:[#allocation2 + $0x498] sm:$0xff] %vm253_vm0, %v18141_v0  ;;  %403 = vst.msk [vmem:[#allocation2 + $0x4a0] sm:$0xff] %vm253_vm0, %v18141_v0  ;;  %v8030_v30 = vadd.f32 %v8029_v26, %v8028_v21  ;;  %v890_v42 = vunpack.c.h.bf16 %v11926_v27  ;;  %v8035_v43 = vsel %vm253_vm0, %v885_v15, 0.0  ;;  %v895_v44 = vunpack.c.l.bf16 %v11933_v35  ;;  %v11949_v47 = vld [vmem:[%s11885_s27 + $0x48] sm:$0xff]   ;;  %v11958_v50 = vld [vmem:[%s11885_s27 + $0x40] sm:$0xff]  }
  0x16   : > { %404 = vst.msk [vmem:[#allocation2 + $0x4a8] sm:$0xff] %vm253_vm0, %v18141_v0  ;;  %405 = vst.msk [vmem:[#allocation2 + $0x4b0] sm:$0xff] %vm253_vm0, %v18141_v0  ;;  %9146 = vrot.lane.b32.xlu1 %v9145_v17, %s11097_s28  ;;  %v896_v45 = vunpack.c.h.bf16 %v11933_v35  ;;  %v893_v46 = vunpack.c.l.bf16 %v11936_v36  ;;  %v8037_v54 = vsel %vm253_vm0, %v886_v16, 0.0  ;;  %v894_v55 = vunpack.c.h.bf16 %v11936_v36 }
  0x17   : > { %406 = vst.msk [vmem:[#allocation2 + $0x4b8] sm:$0xff] %vm253_vm0, %v18141_v0  ;;  %409 = vst.msk [vmem:[#allocation2 + $0x4d0] sm:$0xff] %vm253_vm0, %v18141_v0  ;;  %v8032_v39 = vadd.f32 %v8031_v25, %v8030_v30  ;;  %v899_v59 = vunpack.c.l.bf16 %v11949_v47  ;;  %v900_v60 = vunpack.c.h.bf16 %v11949_v47  ;;  %v8039_v61 = vsel %vm253_vm0, %v887_v13, 0.0 }
  0x18   : > { %410 = vst.msk [vmem:[#allocation2 + $0x4d8] sm:$0xff] %vm253_vm0, %v18141_v0  ;;  %411 = vst.msk [vmem:[#allocation2 + $0x4e0] sm:$0xff] %vm253_vm0, %v18141_v0  ;;  %v897_v62 = vunpack.c.l.bf16 %v11958_v50  ;;  %v8041_v10 = vsel %vm253_vm0, %v888_v14, 0.0  ;;  %v898_v11 = vunpack.c.h.bf16 %v11958_v50  ;;  %v8045_v21 = vsel %vm253_vm0, %v890_v42, 0.0 }
  0x19   : > { %412 = vst.msk [vmem:[#allocation2 + $0x4e8] sm:$0xff] %vm253_vm0, %v18141_v0  ;;  %413 = vst.msk [vmem:[#allocation2 + $0x4f0] sm:$0xff] %vm253_vm0, %v18141_v0  ;;  %v8034_v49 = vadd.f32 %v8033_v33, %v8032_v39  ;;  %v8047_v25 = vsel %vm253_vm0, %v891_v34, 0.0  ;;  %vm11105_vm12 = vmmov 0  }
  0x1a   : > { %414 = vst.msk [vmem:[#allocation2 + $0x4f8] sm:$0xff] %vm253_vm0, %v18141_v0  ;;  %415 = vst.msk [vmem:[#allocation2 + $0x500] sm:$0xff] %vm253_vm0, %v18141_v0 }
  0x1b   : > { %418 = vst.msk [vmem:[#allocation2 + $0x518] sm:$0xff] %vm253_vm0, %v18141_v0  ;;  %419 = vst.msk [vmem:[#allocation2 + $0x520] sm:$0xff] %vm253_vm0, %v18141_v0  ;;  %v8036_v58 = vadd.f32 %v8035_v43, %v8034_v49 }
  0x1c   : > { %420 = vst.msk [vmem:[#allocation2 + $0x528] sm:$0xff] %vm253_vm0, %v18141_v0  ;;  %421 = vst.msk [vmem:[#allocation2 + $0x530] sm:$0xff] %vm253_vm0, %v18141_v0 }
  0x1d   : > { %422 = vst.msk [vmem:[#allocation2 + $0x538] sm:$0xff] %vm253_vm0, %v18141_v0  ;;  %423 = vst.msk [vmem:[#allocation2 + $0x540] sm:$0xff] %vm253_vm0, %v18141_v0 }
  0x1e   : > { %424 = vst.msk [vmem:[#allocation2 + $0x548] sm:$0xff] %vm253_vm0, %v18141_v0  ;;  %427 = vst.msk [vmem:[#allocation2 + $0x560] sm:$0xff] %vm253_vm0, %v18141_v0 }
  0x1f   : > { %428 = vst.msk [vmem:[#allocation2 + $0x568] sm:$0xff] %vm253_vm0, %v18141_v0  ;;  %429 = vst.msk [vmem:[#allocation2 + $0x570] sm:$0xff] %vm253_vm0, %v18141_v0 }
  0x20   : > { %430 = vst.msk [vmem:[#allocation2 + $0x578] sm:$0xff] %vm253_vm0, %v18141_v0  ;;  %431 = vst.msk [vmem:[#allocation2 + $0x580] sm:$0xff] %vm253_vm0, %v18141_v0 }
  0x21   : > { %432 = vst.msk [vmem:[#allocation2 + $0x588] sm:$0xff] %vm253_vm0, %v18141_v0  ;;  %433 = vst.msk [vmem:[#allocation2 + $0x590] sm:$0xff] %vm253_vm0, %v18141_v0 }
  0x22   : > { %436 = vst.msk [vmem:[#allocation2 + $0x5a8] sm:$0xff] %vm253_vm0, %v18141_v0  ;;  %437 = vst.msk [vmem:[#allocation2 + $0x5b0] sm:$0xff] %vm253_vm0, %v18141_v0 }
  0x23   : > { %438 = vst.msk [vmem:[#allocation2 + $0x5b8] sm:$0xff] %vm253_vm0, %v18141_v0  ;;  %439 = vst.msk [vmem:[#allocation2 + $0x5c0] sm:$0xff] %vm253_vm0, %v18141_v0 }
  0x24   : > { %440 = vst.msk [vmem:[#allocation2 + $0x5c8] sm:$0xff] %vm253_vm0, %v18141_v0  ;;  %441 = vst.msk [vmem:[#allocation2 + $0x5d0] sm:$0xff] %vm253_vm0, %v18141_v0 }
  0x25   : > { %442 = vst.msk [vmem:[#allocation2 + $0x5d8] sm:$0xff] %vm253_vm0, %v18141_v0  ;;  %445 = vst.msk [vmem:[#allocation2 + $0x5f0] sm:$0xff] %vm253_vm0, %v18141_v0 }
  0x26   : > { %446 = vst.msk [vmem:[#allocation2 + $0x5f8] sm:$0xff] %vm253_vm0, %v18141_v0  ;;  %447 = vst.msk [vmem:[#allocation2 + $0x600] sm:$0xff] %vm253_vm0, %v18141_v0 }
  0x27   : > { %448 = vst.msk [vmem:[#allocation2 + $0x608] sm:$0xff] %vm253_vm0, %v18141_v0  ;;  %449 = vst.msk [vmem:[#allocation2 + $0x610] sm:$0xff] %vm253_vm0, %v18141_v0 }
  0x28   : > { %450 = vst.msk [vmem:[#allocation2 + $0x618] sm:$0xff] %vm253_vm0, %v18141_v0  ;;  %451 = vst.msk [vmem:[#allocation2 + $0x620] sm:$0xff] %vm253_vm0, %v18141_v0 }
  0x29   : > { %454 = vst.msk [vmem:[#allocation2 + $0x638] sm:$0xff] %vm253_vm0, %v18141_v0  ;;  %455 = vst.msk [vmem:[#allocation2 + $0x640] sm:$0xff] %vm253_vm0, %v18141_v0 }
  0x2a   : > { %456 = vst.msk [vmem:[#allocation2 + $0x648] sm:$0xff] %vm253_vm0, %v18141_v0  ;;  %457 = vst.msk [vmem:[#allocation2 + $0x650] sm:$0xff] %vm253_vm0, %v18141_v0 }
  0x2b   : > { %458 = vst.msk [vmem:[#allocation2 + $0x658] sm:$0xff] %vm253_vm0, %v18141_v0  ;;  %459 = vst.msk [vmem:[#allocation2 + $0x660] sm:$0xff] %vm253_vm0, %v18141_v0 }
  0x2c   : > { %460 = vst.msk [vmem:[#allocation2 + $0x668] sm:$0xff] %vm253_vm0, %v18141_v0  ;;  %463 = vst.msk [vmem:[#allocation2 + $0x680] sm:$0xff] %vm253_vm0, %v18141_v0 }
  0x2d   : > { %464 = vst.msk [vmem:[#allocation2 + $0x688] sm:$0xff] %vm253_vm0, %v18141_v0  ;;  %465 = vst.msk [vmem:[#allocation2 + $0x690] sm:$0xff] %vm253_vm0, %v18141_v0 }
  0x2e   : > { %466 = vst.msk [vmem:[#allocation2 + $0x698] sm:$0xff] %vm253_vm0, %v18141_v0  ;;  %467 = vst.msk [vmem:[#allocation2 + $0x6a0] sm:$0xff] %vm253_vm0, %v18141_v0 }
  0x2f   : > { %468 = vst.msk [vmem:[#allocation2 + $0x6a8] sm:$0xff] %vm253_vm0, %v18141_v0  ;;  %469 = vst.msk [vmem:[#allocation2 + $0x6b0] sm:$0xff] %vm253_vm0, %v18141_v0 }
  0x30   : > { %472 = vst.msk [vmem:[#allocation2 + $0x6c8] sm:$0xff] %vm253_vm0, %v18141_v0  ;;  %473 = vst.msk [vmem:[#allocation2 + $0x6d0] sm:$0xff] %vm253_vm0, %v18141_v0 }
  0x31   : > { %474 = vst.msk [vmem:[#allocation2 + $0x6d8] sm:$0xff] %vm253_vm0, %v18141_v0  ;;  %475 = vst.msk [vmem:[#allocation2 + $0x6e0] sm:$0xff] %vm253_vm0, %v18141_v0 }
  0x32   : > { %476 = vst.msk [vmem:[#allocation2 + $0x6e8] sm:$0xff] %vm253_vm0, %v18141_v0  ;;  %477 = vst.msk [vmem:[#allocation2 + $0x6f0] sm:$0xff] %vm253_vm0, %v18141_v0 }
  0x33   : > { %478 = vst.msk [vmem:[#allocation2 + $0x6f8] sm:$0xff] %vm253_vm0, %v18141_v0  ;;  %481 = vst.msk [vmem:[#allocation2 + $0x710] sm:$0xff] %vm253_vm0, %v18141_v0 }
  0x34   : > { %482 = vst.msk [vmem:[#allocation2 + $0x718] sm:$0xff] %vm253_vm0, %v18141_v0  ;;  %483 = vst.msk [vmem:[#allocation2 + $0x720] sm:$0xff] %vm253_vm0, %v18141_v0 }
  0x35   : > { %484 = vst.msk [vmem:[#allocation2 + $0x728] sm:$0xff] %vm253_vm0, %v18141_v0  ;;  %485 = vst.msk [vmem:[#allocation2 + $0x730] sm:$0xff] %vm253_vm0, %v18141_v0 }
  0x36   : > { %486 = vst.msk [vmem:[#allocation2 + $0x738] sm:$0xff] %vm253_vm0, %v18141_v0  ;;  %487 = vst.msk [vmem:[#allocation2 + $0x740] sm:$0xff] %vm253_vm0, %v18141_v0 }
  0x37   : > { %490 = vst.msk [vmem:[#allocation2 + $0x758] sm:$0xff] %vm253_vm0, %v18141_v0  ;;  %491 = vst.msk [vmem:[#allocation2 + $0x760] sm:$0xff] %vm253_vm0, %v18141_v0 }
  0x38   : > { %492 = vst.msk [vmem:[#allocation2 + $0x768] sm:$0xff] %vm253_vm0, %v18141_v0  ;;  %493 = vst.msk [vmem:[#allocation2 + $0x770] sm:$0xff] %vm253_vm0, %v18141_v0 }
  0x39   : > { %494 = vst.msk [vmem:[#allocation2 + $0x778] sm:$0xff] %vm253_vm0, %v18141_v0  ;;  %495 = vst.msk [vmem:[#allocation2 + $0x780] sm:$0xff] %vm253_vm0, %v18141_v0 }
  0x3a   : > { %496 = vst.msk [vmem:[#allocation2 + $0x788] sm:$0xff] %vm253_vm0, %v18141_v0  ;;  %499 = vst.msk [vmem:[#allocation2 + $0x7a0] sm:$0xff] %vm253_vm0, %v18141_v0 }
  0x3b   : > { %500 = vst.msk [vmem:[#allocation2 + $0x7a8] sm:$0xff] %vm253_vm0, %v18141_v0  ;;  %501 = vst.msk [vmem:[#allocation2 + $0x7b0] sm:$0xff] %vm253_vm0, %v18141_v0 }
  0x3c   : > { %502 = vst.msk [vmem:[#allocation2 + $0x7b8] sm:$0xff] %vm253_vm0, %v18141_v0  ;;  %503 = vst.msk [vmem:[#allocation2 + $0x7c0] sm:$0xff] %vm253_vm0, %v18141_v0 }
  0x3d   : > { %504 = vst.msk [vmem:[#allocation2 + $0x7c8] sm:$0xff] %vm253_vm0, %v18141_v0  ;;  %505 = vst.msk [vmem:[#allocation2 + $0x7d0] sm:$0xff] %vm253_vm0, %v18141_v0 }
  0x3e   : > { %508 = vst.msk [vmem:[#allocation2 + $0x7e8] sm:$0xff] %vm253_vm0, %v18141_v0  ;;  %509 = vst.msk [vmem:[#allocation2 + $0x7f0] sm:$0xff] %vm253_vm0, %v18141_v0 }
  0x3f   : > { %510 = vst.msk [vmem:[#allocation2 + $0x7f8] sm:$0xff] %vm253_vm0, %v18141_v0  ;;  %513 = vst.msk [vmem:[#allocation2 + $0x810] sm:$0xff] %vm253_vm0, %v18141_v0  ;;  %v1509_v12 = vld [vmem:[#allocation2 + $0x770] sm:$0xff] }
  0x40   : > { %514 = vst.msk [vmem:[#allocation2 + $0x818] sm:$0xff] %vm253_vm0, %v18141_v0  ;;  %517 = vst.msk [vmem:[#allocation2 + $0x830] sm:$0xff] %vm253_vm0, %v18141_v0  ;;  %v1510_v18 = vld [vmem:[#allocation2 + $0x778] sm:$0xff] }
  0x41   : > { %518 = vst.msk [vmem:[#allocation2 + $0x838] sm:$0xff] %vm253_vm0, %v18141_v0  ;;  %519 = vst.msk [vmem:[#allocation2 + $0x840] sm:$0xff] %vm253_vm0, %v18141_v0  ;;  %v9135_v22 = vpack.i.bf16 %v1510_v18, %v1509_v12 }
  0x42   : > { %520 = vst.msk [vmem:[#allocation2 + $0x848] sm:$0xff] %vm253_vm0, %v18141_v0  ;;  %521 = vst.msk [vmem:[#allocation2 + $0x850] sm:$0xff] %vm253_vm0, %v18141_v0 }
  0x43   : > { %522 = vst.msk [vmem:[#allocation2 + $0x858] sm:$0xff] %vm253_vm0, %v18141_v0  ;;  %523 = vst.msk [vmem:[#allocation2 + $0x860] sm:$0xff] %vm253_vm0, %v18141_v0  ;;  %v1511_v23 = vld [vmem:[#allocation2 + $0x7b8] sm:$0xff]  ;;  %v1512_v24 = vld [vmem:[#allocation2 + $0x7c0] sm:$0xff]  ;;  %9136 = vrot.lane.b32.xlu0 %v9135_v22, %s11097_s28 }
  0x44   : > { %527 = vst.msk [vmem:[#allocation2 + $0x880] sm:$0xff] %vm253_vm0, %v18141_v0  ;;  %528 = vst.msk [vmem:[#allocation2 + $0x888] sm:$0xff] %vm253_vm0, %v18141_v0  ;;  %v9140_v31 = vpack.i.bf16 %v1512_v24, %v1511_v23 }
  0x45   : > { %529 = vst.msk [vmem:[#allocation2 + $0x890] sm:$0xff] %vm253_vm0, %v18141_v0  ;;  %530 = vst.msk [vmem:[#allocation2 + $0x898] sm:$0xff] %vm253_vm0, %v18141_v0 }
  0x46   : > { %531 = vst.msk [vmem:[#allocation2 + $0x8a0] sm:$0xff] %vm253_vm0, %v18141_v0  ;;  %532 = vst.msk [vmem:[#allocation2 + $0x8a8] sm:$0xff] %vm253_vm0, %v18141_v0 }
  0x47   : > { %536 = vst.msk [vmem:[#allocation2 + $0x8c8] sm:$0xff] %vm253_vm0, %v18141_v0  ;;  %537 = vst.msk [vmem:[#allocation2 + $0x8d0] sm:$0xff] %vm253_vm0, %v18141_v0  ;;  %9141 = vrot.lane.b32.xlu0 %v9140_v31, %s11097_s28 }
  0x48   : > { %538 = vst.msk [vmem:[#allocation2 + $0x8d8] sm:$0xff] %vm253_vm0, %v18141_v0  ;;  %539 = vst.msk [vmem:[#allocation2 + $0x8e0] sm:$0xff] %vm253_vm0, %v18141_v0 }
  0x49   : > { %540 = vst.msk [vmem:[#allocation2 + $0x8e8] sm:$0xff] %vm253_vm0, %v18141_v0  ;;  %541 = vst.msk [vmem:[#allocation2 + $0x8f0] sm:$0xff] %vm253_vm0, %v18141_v0  ;;  %v1515_v19 = vld [vmem:[#allocation2 + $0x848] sm:$0xff]  ;;  %v1516_v20 = vld [vmem:[#allocation2 + $0x850] sm:$0xff] }
  0x4a   : > { %544 = vst.msk [vmem:[#allocation2 + $0x908] sm:$0xff] %vm253_vm0, %v18141_v0  ;;  %545 = vst.msk [vmem:[#allocation2 + $0x910] sm:$0xff] %vm253_vm0, %v18141_v0  ;;  %v9150_v28 = vpack.i.bf16 %v1516_v20, %v1515_v19 }
  0x4b   : > { %546 = vst.msk [vmem:[#allocation2 + $0x918] sm:$0xff] %vm253_vm0, %v18141_v0  ;;  %547 = vst.msk [vmem:[#allocation2 + $0x920] sm:$0xff] %vm253_vm0, %v18141_v0 }
  0x4c   : > { %548 = vst.msk [vmem:[#allocation2 + $0x928] sm:$0xff] %vm253_vm0, %v18141_v0  ;;  %549 = vst.msk [vmem:[#allocation2 + $0x930] sm:$0xff] %vm253_vm0, %v18141_v0  ;;  %v1517_v37 = vld [vmem:[#allocation2 + $0x890] sm:$0xff]  ;;  %v1518_v38 = vld [vmem:[#allocation2 + $0x898] sm:$0xff]  ;;  %9151 = vrot.lane.b32.xlu1 %v9150_v28, %s11097_s28 }
  0x4d   : > { %550 = vst.msk [vmem:[#allocation2 + $0x938] sm:$0xff] %vm253_vm0, %v18141_v0  ;;  %553 = vst.msk [vmem:[#allocation2 + $0x950] sm:$0xff] %vm253_vm0, %v18141_v0  ;;  %v9155_v51 = vpack.i.bf16 %v1518_v38, %v1517_v37  ;;  %v8051_v38 = vsel %vm253_vm0, %v893_v46, 0.0 }
  0x4e   : > { %554 = vst.msk [vmem:[#allocation2 + $0x958] sm:$0xff] %vm253_vm0, %v18141_v0  ;;  %555 = vst.msk [vmem:[#allocation2 + $0x960] sm:$0xff] %vm253_vm0, %v18141_v0 }
  0x4f   : > { %556 = vst.msk [vmem:[#allocation2 + $0x968] sm:$0xff] %vm253_vm0, %v18141_v0  ;;  %557 = vst.msk [vmem:[#allocation2 + $0x970] sm:$0xff] %vm253_vm0, %v18141_v0  ;;  %v1519_v29 = vld [vmem:[#allocation2 + $0x8d8] sm:$0xff]  ;;  %v1520_v32 = vld [vmem:[#allocation2 + $0x8e0] sm:$0xff]  ;;  %9156 = vrot.lane.b32.xlu0 %v9155_v51, %s11097_s28 }
  0x50   : > { %558 = vst.msk [vmem:[#allocation2 + $0x978] sm:$0xff] %vm253_vm0, %v18141_v0  ;;  %559 = vst.msk [vmem:[#allocation2 + $0x980] sm:$0xff] %vm253_vm0, %v18141_v0  ;;  %v9160_v48 = vpack.i.bf16 %v1520_v32, %v1519_v29  ;;  %v8049_v29 = vsel %vm253_vm0, %v892_v40, 0.0 }
  0x51   : > { %562 = vst.msk [vmem:[#allocation2 + $0x998] sm:$0xff] %vm253_vm0, %v18141_v0  ;;  %563 = vst.msk [vmem:[#allocation2 + $0x9a0] sm:$0xff] %vm253_vm0, %v18141_v0 }
  0x52   : > { %564 = vst.msk [vmem:[#allocation2 + $0x9a8] sm:$0xff] %vm253_vm0, %v18141_v0  ;;  %565 = vst.msk [vmem:[#allocation2 + $0x9b0] sm:$0xff] %vm253_vm0, %v18141_v0  ;;  %9161 = vrot.lane.b32.xlu1 %v9160_v48, %s11097_s28 }
  0x53   : > { %566 = vst.msk [vmem:[#allocation2 + $0x9b8] sm:$0xff] %vm253_vm0, %v18141_v0  ;;  %567 = vst.msk [vmem:[#allocation2 + $0x9c0] sm:$0xff] %vm253_vm0, %v18141_v0 }
  0x54   : > { %568 = vst.msk [vmem:[#allocation2 + $0x9c8] sm:$0xff] %vm253_vm0, %v18141_v0  ;;  %571 = vst.msk [vmem:[#allocation2 + $0x9e0] sm:$0xff] %vm253_vm0, %v18141_v0 }
  0x55   : > { %572 = vst.msk [vmem:[#allocation2 + $0x9e8] sm:$0xff] %vm253_vm0, %v18141_v0  ;;  %573 = vst.msk [vmem:[#allocation2 + $0x9f0] sm:$0xff] %vm253_vm0, %v18141_v0 }
  0x56   : > { %574 = vst.msk [vmem:[#allocation2 + $0x9f8] sm:$0xff] %vm253_vm0, %v18141_v0  ;;  %575 = vst.msk [vmem:[#allocation2 + $0xa00] sm:$0xff] %vm253_vm0, %v18141_v0 }
  0x57   : > { %576 = vst.msk [vmem:[#allocation2 + $0xa08] sm:$0xff] %vm253_vm0, %v18141_v0  ;;  %577 = vst.msk [vmem:[#allocation2 + $0xa10] sm:$0xff] %vm253_vm0, %v18141_v0 }
  0x58   : > { %580 = vst.msk [vmem:[#allocation2 + $0xa28] sm:$0xff] %vm253_vm0, %v18141_v0  ;;  %581 = vst.msk [vmem:[#allocation2 + $0xa30] sm:$0xff] %vm253_vm0, %v18141_v0 }
  0x59   : > { %582 = vst.msk [vmem:[#allocation2 + $0xa38] sm:$0xff] %vm253_vm0, %v18141_v0  ;;  %583 = vst.msk [vmem:[#allocation2 + $0xa40] sm:$0xff] %vm253_vm0, %v18141_v0 }
  0x5a   : > { %584 = vst.msk [vmem:[#allocation2 + $0xa48] sm:$0xff] %vm253_vm0, %v18141_v0  ;;  %585 = vst.msk [vmem:[#allocation2 + $0xa50] sm:$0xff] %vm253_vm0, %v18141_v0 }
  0x5b   : > { %586 = vst.msk [vmem:[#allocation2 + $0xa58] sm:$0xff] %vm253_vm0, %v18141_v0  ;;  %589 = vst.msk [vmem:[#allocation2 + $0xa70] sm:$0xff] %vm253_vm0, %v18141_v0 }
  0x5c   : > { %590 = vst.msk [vmem:[#allocation2 + $0xa78] sm:$0xff] %vm253_vm0, %v18141_v0  ;;  %591 = vst.msk [vmem:[#allocation2 + $0xa80] sm:$0xff] %vm253_vm0, %v18141_v0 }
  0x5d   : > { %592 = vst.msk [vmem:[#allocation2 + $0xa88] sm:$0xff] %vm253_vm0, %v18141_v0  ;;  %593 = vst.msk [vmem:[#allocation2 + $0xa90] sm:$0xff] %vm253_vm0, %v18141_v0 }
  0x5e   : > { %594 = vst.msk [vmem:[#allocation2 + $0xa98] sm:$0xff] %vm253_vm0, %v18141_v0  ;;  %595 = vst.msk [vmem:[#allocation2 + $0xaa0] sm:$0xff] %vm253_vm0, %v18141_v0 }
  0x5f   : > { %598 = vst.msk [vmem:[#allocation2 + $0xab8] sm:$0xff] %vm253_vm0, %v18141_v0  ;;  %599 = vst.msk [vmem:[#allocation2 + $0xac0] sm:$0xff] %vm253_vm0, %v18141_v0 }
  0x60   : > { %600 = vst.msk [vmem:[#allocation2 + $0xac8] sm:$0xff] %vm253_vm0, %v18141_v0  ;;  %601 = vst.msk [vmem:[#allocation2 + $0xad0] sm:$0xff] %vm253_vm0, %v18141_v0 }
  0x61   : > { %602 = vst.msk [vmem:[#allocation2 + $0xad8] sm:$0xff] %vm253_vm0, %v18141_v0  ;;  %603 = vst.msk [vmem:[#allocation2 + $0xae0] sm:$0xff] %vm253_vm0, %v18141_v0 }
  0x62   : > { %604 = vst.msk [vmem:[#allocation2 + $0xae8] sm:$0xff] %vm253_vm0, %v18141_v0  ;;  %607 = vst.msk [vmem:[#allocation2 + $0xb00] sm:$0xff] %vm253_vm0, %v18141_v0 }
  0x63   : > { %608 = vst.msk [vmem:[#allocation2 + $0xb08] sm:$0xff] %vm253_vm0, %v18141_v0  ;;  %609 = vst.msk [vmem:[#allocation2 + $0xb10] sm:$0xff] %vm253_vm0, %v18141_v0 }
  0x64   : > { %610 = vst.msk [vmem:[#allocation2 + $0xb18] sm:$0xff] %vm253_vm0, %v18141_v0  ;;  %611 = vst.msk [vmem:[#allocation2 + $0xb20] sm:$0xff] %vm253_vm0, %v18141_v0 }
  0x65   : > { %612 = vst.msk [vmem:[#allocation2 + $0xb28] sm:$0xff] %vm253_vm0, %v18141_v0  ;;  %613 = vst.msk [vmem:[#allocation2 + $0xb30] sm:$0xff] %vm253_vm0, %v18141_v0 }
  0x66   : > { %616 = vst.msk [vmem:[#allocation2 + $0xb48] sm:$0xff] %vm253_vm0, %v18141_v0  ;;  %617 = vst.msk [vmem:[#allocation2 + $0xb50] sm:$0xff] %vm253_vm0, %v18141_v0 }
  0x67   : > { %618 = vst.msk [vmem:[#allocation2 + $0xb58] sm:$0xff] %vm253_vm0, %v18141_v0  ;;  %619 = vst.msk [vmem:[#allocation2 + $0xb60] sm:$0xff] %vm253_vm0, %v18141_v0 }
  0x68   : > { %620 = vst.msk [vmem:[#allocation2 + $0xb68] sm:$0xff] %vm253_vm0, %v18141_v0  ;;  %621 = vst.msk [vmem:[#allocation2 + $0xb70] sm:$0xff] %vm253_vm0, %v18141_v0 }
  0x69   : > { %622 = vst.msk [vmem:[#allocation2 + $0xb78] sm:$0xff] %vm253_vm0, %v18141_v0  ;;  %625 = vst.msk [vmem:[#allocation2 + $0xb90] sm:$0xff] %vm253_vm0, %v18141_v0 }
  0x6a   : > { %626 = vst.msk [vmem:[#allocation2 + $0xb98] sm:$0xff] %vm253_vm0, %v18141_v0  ;;  %627 = vst.msk [vmem:[#allocation2 + $0xba0] sm:$0xff] %vm253_vm0, %v18141_v0 }
  0x6b   : > { %628 = vst.msk [vmem:[#allocation2 + $0xba8] sm:$0xff] %vm253_vm0, %v18141_v0  ;;  %629 = vst.msk [vmem:[#allocation2 + $0xbb0] sm:$0xff] %vm253_vm0, %v18141_v0 }
  0x6c   : > { %630 = vst.msk [vmem:[#allocation2 + $0xbb8] sm:$0xff] %vm253_vm0, %v18141_v0  ;;  %631 = vst.msk [vmem:[#allocation2 + $0xbc0] sm:$0xff] %vm253_vm0, %v18141_v0 }
  0x6d   : > { %634 = vst.msk [vmem:[#allocation2 + $0xbd8] sm:$0xff] %vm253_vm0, %v18141_v0  ;;  %635 = vst.msk [vmem:[#allocation2 + $0xbe0] sm:$0xff] %vm253_vm0, %v18141_v0 }
  0x6e   : > { %636 = vst.msk [vmem:[#allocation2 + $0xbe8] sm:$0xff] %vm253_vm0, %v18141_v0  ;;  %637 = vst.msk [vmem:[#allocation2 + $0xbf0] sm:$0xff] %vm253_vm0, %v18141_v0 }
  0x6f   : > { %638 = vst.msk [vmem:[#allocation2 + $0xbf8] sm:$0xff] %vm253_vm0, %v18141_v0  ;;  %639 = vst.msk [vmem:[#allocation2 + $0xc00] sm:$0xff] %vm253_vm0, %v18141_v0 }
  0x70   : > { %640 = vst.msk [vmem:[#allocation2 + $0xc08] sm:$0xff] %vm253_vm0, %v18141_v0  ;;  %643 = vst.msk [vmem:[#allocation2 + $0xc20] sm:$0xff] %vm253_vm0, %v18141_v0 }
  0x71   : > { %644 = vst.msk [vmem:[#allocation2 + $0xc28] sm:$0xff] %vm253_vm0, %v18141_v0  ;;  %645 = vst.msk [vmem:[#allocation2 + $0xc30] sm:$0xff] %vm253_vm0, %v18141_v0 }
  0x72   : > { %646 = vst.msk [vmem:[#allocation2 + $0xc38] sm:$0xff] %vm253_vm0, %v18141_v0  ;;  %647 = vst.msk [vmem:[#allocation2 + $0xc40] sm:$0xff] %vm253_vm0, %v18141_v0 }
  0x73   : > { %648 = vst.msk [vmem:[#allocation2 + $0xc48] sm:$0xff] %vm253_vm0, %v18141_v0  ;;  %649 = vst.msk [vmem:[#allocation2 + $0xc50] sm:$0xff] %vm253_vm0, %v18141_v0 }
  0x74   : > { %652 = vst.msk [vmem:[#allocation2 + $0xc68] sm:$0xff] %vm253_vm0, %v18141_v0  ;;  %653 = vst.msk [vmem:[#allocation2 + $0xc70] sm:$0xff] %vm253_vm0, %v18141_v0 }
  0x75   : > { %654 = vst.msk [vmem:[#allocation2 + $0xc78] sm:$0xff] %vm253_vm0, %v18141_v0  ;;  %655 = vst.msk [vmem:[#allocation2 + $0xc80] sm:$0xff] %vm253_vm0, %v18141_v0 }
  0x76   : > { %656 = vst.msk [vmem:[#allocation2 + $0xc88] sm:$0xff] %vm253_vm0, %v18141_v0  ;;  %657 = vst.msk [vmem:[#allocation2 + $0xc90] sm:$0xff] %vm253_vm0, %v18141_v0 }
  0x77   : > { %658 = vst.msk [vmem:[#allocation2 + $0xc98] sm:$0xff] %vm253_vm0, %v18141_v0  ;;  %661 = vst.msk [vmem:[#allocation2 + $0xcb0] sm:$0xff] %vm253_vm0, %v18141_v0 }
  0x78   : > { %662 = vst.msk [vmem:[#allocation2 + $0xcb8] sm:$0xff] %vm253_vm0, %v18141_v0  ;;  %663 = vst.msk [vmem:[#allocation2 + $0xcc0] sm:$0xff] %vm253_vm0, %v18141_v0 }
  0x79   : > { %664 = vst.msk [vmem:[#allocation2 + $0xcc8] sm:$0xff] %vm253_vm0, %v18141_v0  ;;  %665 = vst.msk [vmem:[#allocation2 + $0xcd0] sm:$0xff] %vm253_vm0, %v18141_v0 }
  0x7a   : > { %666 = vst.msk [vmem:[#allocation2 + $0xcd8] sm:$0xff] %vm253_vm0, %v18141_v0  ;;  %667 = vst.msk [vmem:[#allocation2 + $0xce0] sm:$0xff] %vm253_vm0, %v18141_v0 }
  0x7b   : > { %670 = vst.msk [vmem:[#allocation2 + $0xcf8] sm:$0xff] %vm253_vm0, %v18141_v0  ;;  %671 = vst.msk [vmem:[#allocation2 + $0xd00] sm:$0xff] %vm253_vm0, %v18141_v0 }
  0x7c   : > { %672 = vst.msk [vmem:[#allocation2 + $0xd08] sm:$0xff] %vm253_vm0, %v18141_v0  ;;  %673 = vst.msk [vmem:[#allocation2 + $0xd10] sm:$0xff] %vm253_vm0, %v18141_v0 }
  0x7d   : > { %674 = vst.msk [vmem:[#allocation2 + $0xd18] sm:$0xff] %vm253_vm0, %v18141_v0  ;;  %675 = vst.msk [vmem:[#allocation2 + $0xd20] sm:$0xff] %vm253_vm0, %v18141_v0 }
  0x7e   : > { %676 = vst.msk [vmem:[#allocation2 + $0xd28] sm:$0xff] %vm253_vm0, %v18141_v0  ;;  %679 = vst.msk [vmem:[#allocation2 + $0xd40] sm:$0xff] %vm253_vm0, %v18141_v0 }
  0x7f   : > { %680 = vst.msk [vmem:[#allocation2 + $0xd48] sm:$0xff] %vm253_vm0, %v18141_v0  ;;  %681 = vst.msk [vmem:[#allocation2 + $0xd50] sm:$0xff] %vm253_vm0, %v18141_v0 }
  0x80   : > { %682 = vst.msk [vmem:[#allocation2 + $0xd58] sm:$0xff] %vm253_vm0, %v18141_v0  ;;  %683 = vst.msk [vmem:[#allocation2 + $0xd60] sm:$0xff] %vm253_vm0, %v18141_v0 }
  0x81   : > { %684 = vst.msk [vmem:[#allocation2 + $0xd68] sm:$0xff] %vm253_vm0, %v18141_v0  ;;  %685 = vst.msk [vmem:[#allocation2 + $0xd70] sm:$0xff] %vm253_vm0, %v18141_v0 }
  0x82   : > { %689 = vst.msk [vmem:[#allocation2 + $0xd90] sm:$0xff] %vm253_vm0, %v18141_v0  ;;  %690 = vst.msk [vmem:[#allocation2 + $0xd98] sm:$0xff] %vm253_vm0, %v18141_v0 }
  0x83   : > { %691 = vst.msk [vmem:[#allocation2 + $0xda0] sm:$0xff] %vm253_vm0, %v18141_v0  ;;  %692 = vst.msk [vmem:[#allocation2 + $0xda8] sm:$0xff] %vm253_vm0, %v18141_v0 }
  0x84   : > { %693 = vst.msk [vmem:[#allocation2 + $0xdb0] sm:$0xff] %vm253_vm0, %v18141_v0  ;;  %694 = vst.msk [vmem:[#allocation2 + $0xdb8] sm:$0xff] %vm253_vm0, %v18141_v0 }
  0x85   : > { %698 = vst.msk [vmem:[#allocation2 + $0xdd8] sm:$0xff] %vm253_vm0, %v18141_v0  ;;  %699 = vst.msk [vmem:[#allocation2 + $0xde0] sm:$0xff] %vm253_vm0, %v18141_v0 }
  0x86   : > { %700 = vst.msk [vmem:[#allocation2 + $0xde8] sm:$0xff] %vm253_vm0, %v18141_v0  ;;  %701 = vst.msk [vmem:[#allocation2 + $0xdf0] sm:$0xff] %vm253_vm0, %v18141_v0 }
  0x87   : > { %702 = vst.msk [vmem:[#allocation2 + $0xdf8] sm:$0xff] %vm253_vm0, %v18141_v0  ;;  %703 = vst.msk [vmem:[#allocation2 + $0xe00] sm:$0xff] %vm253_vm0, %v18141_v0 }
  0x88   : > { %706 = vst.msk [vmem:[#allocation2 + $0xe18] sm:$0xff] %vm253_vm0, %v18141_v0  ;;  %707 = vst.msk [vmem:[#allocation2 + $0xe20] sm:$0xff] %vm253_vm0, %v18141_v0 }
  0x89   : > { %708 = vst.msk [vmem:[#allocation2 + $0xe28] sm:$0xff] %vm253_vm0, %v18141_v0  ;;  %709 = vst.msk [vmem:[#allocation2 + $0xe30] sm:$0xff] %vm253_vm0, %v18141_v0 }
  0x8a   : > { %710 = vst.msk [vmem:[#allocation2 + $0xe38] sm:$0xff] %vm253_vm0, %v18141_v0  ;;  %711 = vst.msk [vmem:[#allocation2 + $0xe40] sm:$0xff] %vm253_vm0, %v18141_v0 }
  0x8b   : > { %712 = vst.msk [vmem:[#allocation2 + $0xe48] sm:$0xff] %vm253_vm0, %v18141_v0  ;;  %715 = vst.msk [vmem:[#allocation2 + $0xe60] sm:$0xff] %vm253_vm0, %v18141_v0 }
  0x8c   : > { %716 = vst.msk [vmem:[#allocation2 + $0xe68] sm:$0xff] %vm253_vm0, %v18141_v0  ;;  %717 = vst.msk [vmem:[#allocation2 + $0xe70] sm:$0xff] %vm253_vm0, %v18141_v0 }
  0x8d   : > { %718 = vst.msk [vmem:[#allocation2 + $0xe78] sm:$0xff] %vm253_vm0, %v18141_v0  ;;  %719 = vst.msk [vmem:[#allocation2 + $0xe80] sm:$0xff] %vm253_vm0, %v18141_v0 }
  0x8e   : > { %720 = vst.msk [vmem:[#allocation2 + $0xe88] sm:$0xff] %vm253_vm0, %v18141_v0  ;;  %721 = vst.msk [vmem:[#allocation2 + $0xe90] sm:$0xff] %vm253_vm0, %v18141_v0 }
  0x8f   : > { %724 = vst.msk [vmem:[#allocation2 + $0xea8] sm:$0xff] %vm253_vm0, %v18141_v0  ;;  %725 = vst.msk [vmem:[#allocation2 + $0xeb0] sm:$0xff] %vm253_vm0, %v18141_v0 }
  0x90   : > { %726 = vst.msk [vmem:[#allocation2 + $0xeb8] sm:$0xff] %vm253_vm0, %v18141_v0  ;;  %727 = vst.msk [vmem:[#allocation2 + $0xec0] sm:$0xff] %vm253_vm0, %v18141_v0 }
  0x91   : > { %728 = vst.msk [vmem:[#allocation2 + $0xec8] sm:$0xff] %vm253_vm0, %v18141_v0  ;;  %729 = vst.msk [vmem:[#allocation2 + $0xed0] sm:$0xff] %vm253_vm0, %v18141_v0 }
  0x92   : > { %730 = vst.msk [vmem:[#allocation2 + $0xed8] sm:$0xff] %vm253_vm0, %v18141_v0  ;;  %733 = vst.msk [vmem:[#allocation2 + $0xef0] sm:$0xff] %vm253_vm0, %v18141_v0 }
  0x93   : > { %734 = vst.msk [vmem:[#allocation2 + $0xef8] sm:$0xff] %vm253_vm0, %v18141_v0  ;;  %735 = vst.msk [vmem:[#allocation2 + $0xf00] sm:$0xff] %vm253_vm0, %v18141_v0 }
  0x94   : > { %736 = vst.msk [vmem:[#allocation2 + $0xf08] sm:$0xff] %vm253_vm0, %v18141_v0  ;;  %737 = vst.msk [vmem:[#allocation2 + $0xf10] sm:$0xff] %vm253_vm0, %v18141_v0 }
  0x95   : > { %738 = vst.msk [vmem:[#allocation2 + $0xf18] sm:$0xff] %vm253_vm0, %v18141_v0  ;;  %739 = vst.msk [vmem:[#allocation2 + $0xf20] sm:$0xff] %vm253_vm0, %v18141_v0 }
  0x96   : > { %742 = vst.msk [vmem:[#allocation2 + $0xf38] sm:$0xff] %vm253_vm0, %v18141_v0  ;;  %743 = vst.msk [vmem:[#allocation2 + $0xf40] sm:$0xff] %vm253_vm0, %v18141_v0 }
  0x97   : > { %744 = vst.msk [vmem:[#allocation2 + $0xf48] sm:$0xff] %vm253_vm0, %v18141_v0  ;;  %745 = vst.msk [vmem:[#allocation2 + $0xf50] sm:$0xff] %vm253_vm0, %v18141_v0 }
  0x98   : > { %746 = vst.msk [vmem:[#allocation2 + $0xf58] sm:$0xff] %vm253_vm0, %v18141_v0  ;;  %747 = vst.msk [vmem:[#allocation2 + $0xf60] sm:$0xff] %vm253_vm0, %v18141_v0 }
  0x99   : > { %748 = vst.msk [vmem:[#allocation2 + $0xf68] sm:$0xff] %vm253_vm0, %v18141_v0  ;;  %751 = vst.msk [vmem:[#allocation2 + $0xf80] sm:$0xff] %vm253_vm0, %v18141_v0 }
  0x9a   : > { %752 = vst.msk [vmem:[#allocation2 + $0xf88] sm:$0xff] %vm253_vm0, %v18141_v0  ;;  %753 = vst.msk [vmem:[#allocation2 + $0xf90] sm:$0xff] %vm253_vm0, %v18141_v0 }
  0x9b   : > { %754 = vst.msk [vmem:[#allocation2 + $0xf98] sm:$0xff] %vm253_vm0, %v18141_v0  ;;  %755 = vst.msk [vmem:[#allocation2 + $0xfa0] sm:$0xff] %vm253_vm0, %v18141_v0 }
  0x9c   : > { %756 = vst.msk [vmem:[#allocation2 + $0xfa8] sm:$0xff] %vm253_vm0, %v18141_v0  ;;  %757 = vst.msk [vmem:[#allocation2 + $0xfb0] sm:$0xff] %vm253_vm0, %v18141_v0 }
  0x9d   : > { %760 = vst.msk [vmem:[#allocation2 + $0xfc8] sm:$0xff] %vm253_vm0, %v18141_v0  ;;  %761 = vst.msk [vmem:[#allocation2 + $0xfd0] sm:$0xff] %vm253_vm0, %v18141_v0 }
  0x9e   : > { %762 = vst.msk [vmem:[#allocation2 + $0xfd8] sm:$0xff] %vm253_vm0, %v18141_v0  ;;  %763 = vst.msk [vmem:[#allocation2 + $0xfe0] sm:$0xff] %vm253_vm0, %v18141_v0 }
  0x9f   : > { %764 = vst.msk [vmem:[#allocation2 + $0xfe8] sm:$0xff] %vm253_vm0, %v18141_v0  ;;  %765 = vst.msk [vmem:[#allocation2 + $0xff0] sm:$0xff] %vm253_vm0, %v18141_v0 }
  0xa0   : > { %766 = vst.msk [vmem:[#allocation2 + $0xff8] sm:$0xff] %vm253_vm0, %v18141_v0  ;;  %769 = vst.msk [vmem:[#allocation2 + $0x1010] sm:$0xff] %vm253_vm0, %v18141_v0 }
  0xa1   : > { %770 = vst.msk [vmem:[#allocation2 + $0x1018] sm:$0xff] %vm253_vm0, %v18141_v0  ;;  %771 = vst.msk [vmem:[#allocation2 + $0x1020] sm:$0xff] %vm253_vm0, %v18141_v0 }
  0xa2   : > { %772 = vst.msk [vmem:[#allocation2 + $0x1028] sm:$0xff] %vm253_vm0, %v18141_v0  ;;  %773 = vst.msk [vmem:[#allocation2 + $0x1030] sm:$0xff] %vm253_vm0, %v18141_v0 }
  0xa3   : > { %774 = vst.msk [vmem:[#allocation2 + $0x1038] sm:$0xff] %vm253_vm0, %v18141_v0  ;;  %775 = vst.msk [vmem:[#allocation2 + $0x1040] sm:$0xff] %vm253_vm0, %v18141_v0 }
  0xa4   : > { %778 = vst.msk [vmem:[#allocation2 + $0x1058] sm:$0xff] %vm253_vm0, %v18141_v0  ;;  %779 = vst.msk [vmem:[#allocation2 + $0x1060] sm:$0xff] %vm253_vm0, %v18141_v0 }
  0xa5   : > { %780 = vst.msk [vmem:[#allocation2 + $0x1068] sm:$0xff] %vm253_vm0, %v18141_v0  ;;  %781 = vst.msk [vmem:[#allocation2 + $0x1070] sm:$0xff] %vm253_vm0, %v18141_v0 }
  0xa6   : > { %782 = vst.msk [vmem:[#allocation2 + $0x1078] sm:$0xff] %vm253_vm0, %v18141_v0  ;;  %783 = vst.msk [vmem:[#allocation2 + $0x1080] sm:$0xff] %vm253_vm0, %v18141_v0 }
  0xa7   : > { %784 = vst.msk [vmem:[#allocation2 + $0x1088] sm:$0xff] %vm253_vm0, %v18141_v0  ;;  %787 = vst.msk [vmem:[#allocation2 + $0x10a0] sm:$0xff] %vm253_vm0, %v18141_v0 }
  0xa8   : > { %788 = vst.msk [vmem:[#allocation2 + $0x10a8] sm:$0xff] %vm253_vm0, %v18141_v0  ;;  %789 = vst.msk [vmem:[#allocation2 + $0x10b0] sm:$0xff] %vm253_vm0, %v18141_v0 }
  0xa9   : > { %790 = vst.msk [vmem:[#allocation2 + $0x10b8] sm:$0xff] %vm253_vm0, %v18141_v0  ;;  %791 = vst.msk [vmem:[#allocation2 + $0x10c0] sm:$0xff] %vm253_vm0, %v18141_v0 }
  0xaa   : > { %792 = vst.msk [vmem:[#allocation2 + $0x10c8] sm:$0xff] %vm253_vm0, %v18141_v0  ;;  %793 = vst.msk [vmem:[#allocation2 + $0x10d0] sm:$0xff] %vm253_vm0, %v18141_v0 }
  0xab   : > { %796 = vst.msk [vmem:[#allocation2 + $0x10e8] sm:$0xff] %vm253_vm0, %v18141_v0  ;;  %797 = vst.msk [vmem:[#allocation2 + $0x10f0] sm:$0xff] %vm253_vm0, %v18141_v0 }
  0xac   : > { %798 = vst.msk [vmem:[#allocation2 + $0x10f8] sm:$0xff] %vm253_vm0, %v18141_v0  ;;  %799 = vst.msk [vmem:[#allocation2 + $0x1100] sm:$0xff] %vm253_vm0, %v18141_v0 }
  0xad   : > { %800 = vst.msk [vmem:[#allocation2 + $0x1108] sm:$0xff] %vm253_vm0, %v18141_v0  ;;  %801 = vst.msk [vmem:[#allocation2 + $0x1110] sm:$0xff] %vm253_vm0, %v18141_v0 }
  0xae   : > { %802 = vst.msk [vmem:[#allocation2 + $0x1118] sm:$0xff] %vm253_vm0, %v18141_v0  ;;  %805 = vst.msk [vmem:[#allocation2 + $0x1130] sm:$0xff] %vm253_vm0, %v18141_v0 }
  0xaf   : > { %806 = vst.msk [vmem:[#allocation2 + $0x1138] sm:$0xff] %vm253_vm0, %v18141_v0  ;;  %807 = vst.msk [vmem:[#allocation2 + $0x1140] sm:$0xff] %vm253_vm0, %v18141_v0 }
  0xb0   : > { %808 = vst.msk [vmem:[#allocation2 + $0x1148] sm:$0xff] %vm253_vm0, %v18141_v0  ;;  %809 = vst.msk [vmem:[#allocation2 + $0x1150] sm:$0xff] %vm253_vm0, %v18141_v0 }
  0xb1   : > { %810 = vst.msk [vmem:[#allocation2 + $0x1158] sm:$0xff] %vm253_vm0, %v18141_v0  ;;  %811 = vst.msk [vmem:[#allocation2 + $0x1160] sm:$0xff] %vm253_vm0, %v18141_v0 }
  0xb2   : > { %814 = vst.msk [vmem:[#allocation2 + $0x1178] sm:$0xff] %vm253_vm0, %v18141_v0  ;;  %815 = vst.msk [vmem:[#allocation2 + $0x1180] sm:$0xff] %vm253_vm0, %v18141_v0 }
  0xb3   : > { %816 = vst.msk [vmem:[#allocation2 + $0x1188] sm:$0xff] %vm253_vm0, %v18141_v0  ;;  %817 = vst.msk [vmem:[#allocation2 + $0x1190] sm:$0xff] %vm253_vm0, %v18141_v0 }
  0xb4   : > { %818 = vst.msk [vmem:[#allocation2 + $0x1198] sm:$0xff] %vm253_vm0, %v18141_v0  ;;  %819 = vst.msk [vmem:[#allocation2 + $0x11a0] sm:$0xff] %vm253_vm0, %v18141_v0 }
  0xb5   : > { %820 = vst.msk [vmem:[#allocation2 + $0x11a8] sm:$0xff] %vm253_vm0, %v18141_v0  ;;  %823 = vst.msk [vmem:[#allocation2 + $0x11c0] sm:$0xff] %vm253_vm0, %v18141_v0 }
  0xb6   : > { %824 = vst.msk [vmem:[#allocation2 + $0x11c8] sm:$0xff] %vm253_vm0, %v18141_v0  ;;  %825 = vst.msk [vmem:[#allocation2 + $0x11d0] sm:$0xff] %vm253_vm0, %v18141_v0 }
  0xb7   : > { %826 = vst.msk [vmem:[#allocation2 + $0x11d8] sm:$0xff] %vm253_vm0, %v18141_v0  ;;  %827 = vst.msk [vmem:[#allocation2 + $0x11e0] sm:$0xff] %vm253_vm0, %v18141_v0 }
  0xb8   : > { %828 = vst.msk [vmem:[#allocation2 + $0x11e8] sm:$0xff] %vm253_vm0, %v18141_v0  ;;  %829 = vst.msk [vmem:[#allocation2 + $0x11f0] sm:$0xff] %vm253_vm0, %v18141_v0 }
  0xb9   : > { %832 = vst.msk [vmem:[#allocation2 + $0x1208] sm:$0xff] %vm253_vm0, %v18141_v0  ;;  %833 = vst.msk [vmem:[#allocation2 + $0x1210] sm:$0xff] %vm253_vm0, %v18141_v0 }
  0xba   : > { %834 = vst.msk [vmem:[#allocation2 + $0x1218] sm:$0xff] %vm253_vm0, %v18141_v0  ;;  %835 = vst.msk [vmem:[#allocation2 + $0x1220] sm:$0xff] %vm253_vm0, %v18141_v0 }
  0xbb   : > { %836 = vst.msk [vmem:[#allocation2 + $0x1228] sm:$0xff] %vm253_vm0, %v18141_v0  ;;  %837 = vst.msk [vmem:[#allocation2 + $0x1230] sm:$0xff] %vm253_vm0, %v18141_v0 }
  0xbc   : > { %838 = vst.msk [vmem:[#allocation2 + $0x1238] sm:$0xff] %vm253_vm0, %v18141_v0  ;;  %841 = vst.msk [vmem:[#allocation2 + $0x1250] sm:$0xff] %vm253_vm0, %v18141_v0 }
  0xbd   : > { %842 = vst.msk [vmem:[#allocation2 + $0x1258] sm:$0xff] %vm253_vm0, %v18141_v0  ;;  %843 = vst.msk [vmem:[#allocation2 + $0x1260] sm:$0xff] %vm253_vm0, %v18141_v0 }
  0xbe   : > { %844 = vst.msk [vmem:[#allocation2 + $0x1268] sm:$0xff] %vm253_vm0, %v18141_v0  ;;  %845 = vst.msk [vmem:[#allocation2 + $0x1270] sm:$0xff] %vm253_vm0, %v18141_v0 }
  0xbf   : > { %846 = vst.msk [vmem:[#allocation2 + $0x1278] sm:$0xff] %vm253_vm0, %v18141_v0  ;;  %847 = vst.msk [vmem:[#allocation2 + $0x1280] sm:$0xff] %vm253_vm0, %v18141_v0 }
  0xc0   : > { %916 = vst.msk [vmem:[#allocation2 + $0x968] sm:$0xff] %vm253_vm0, %v883_v4  ;;  %917 = vst.msk [vmem:[#allocation2 + $0x970] sm:$0xff] %vm253_vm0, %v884_v5  ;;  %v8038_v4 = vadd.f32 %v8037_v54, %v8036_v58 }
  0xc1   : > { %914 = vst.msk [vmem:[#allocation2 + $0x920] sm:$0xff] %vm253_vm0, %v881_v6  ;;  %915 = vst.msk [vmem:[#allocation2 + $0x928] sm:$0xff] %vm253_vm0, %v882_v7 }
  0xc2   : > { %920 = vst.msk [vmem:[#allocation2 + $0x9f8] sm:$0xff] %vm253_vm0, %v887_v13  ;;  %921 = vst.msk [vmem:[#allocation2 + $0xa00] sm:$0xff] %vm253_vm0, %v888_v14 }
  0xc3   : > { %918 = vst.msk [vmem:[#allocation2 + $0x9b0] sm:$0xff] %vm253_vm0, %v885_v15  ;;  %919 = vst.msk [vmem:[#allocation2 + $0x9b8] sm:$0xff] %vm253_vm0, %v886_v16  ;;  %v8040_v15 = vadd.f32 %v8039_v61, %v8038_v4  ;;  %v8043_v16 = vsel %vm253_vm0, %v889_v41, 0.0  ;;  %v8059_v4 = vsel %vm253_vm0, %v897_v62, 0.0 }
  0xc4   : > { %924 = vst.msk [vmem:[#allocation2 + $0xa88] sm:$0xff] %vm253_vm0, %v891_v34  ;;  %925 = vst.msk [vmem:[#allocation2 + $0xa90] sm:$0xff] %vm253_vm0, %v892_v40  ;;  %v8053_v40 = vsel %vm253_vm0, %v894_v55, 0.0 }
  0xc5   : > { %922 = vst.msk [vmem:[#allocation2 + $0xa40] sm:$0xff] %vm253_vm0, %v889_v41  ;;  %923 = vst.msk [vmem:[#allocation2 + $0xa48] sm:$0xff] %vm253_vm0, %v890_v42  ;;  %v8042_v14 = vadd.f32 %v8041_v10, %v8040_v15  ;;  %v12058_v10 = vld [vmem:[%s11885_s27 + $0x50] sm:$0xff]  }
  0xc6   : > { %928 = vst.msk [vmem:[#allocation2 + $0xb18] sm:$0xff] %vm253_vm0, %v895_v44  ;;  %929 = vst.msk [vmem:[#allocation2 + $0xb20] sm:$0xff] %vm253_vm0, %v896_v45  ;;  %v901_v15 = vunpack.c.l.bf16 %v12058_v10 }
  0xc7   : > { %v1523_v52 = vld [vmem:[#allocation2 + $0x968] sm:$0xff]  ;;  %v1524_v53 = vld [vmem:[#allocation2 + $0x970] sm:$0xff]  ;;  %926 = vst.msk [vmem:[#allocation2 + $0xad0] sm:$0xff] %vm253_vm0, %v893_v46  ;;  %927 = vst.msk [vmem:[#allocation2 + $0xad8] sm:$0xff] %vm253_vm0, %v894_v55  ;;  %v8044_v24 = vadd.f32 %v8043_v16, %v8042_v14 }
  0xc8   : > { %v1521_v56 = vld [vmem:[#allocation2 + $0x920] sm:$0xff]  ;;  %v1522_v57 = vld [vmem:[#allocation2 + $0x928] sm:$0xff]  ;;  %v11980_v63 = vpack.i.bf16 %v1524_v53, %v1523_v52  ;;  %932 = vst.msk [vmem:[#allocation2 + $0xba8] sm:$0xff] %vm253_vm0, %v899_v59  ;;  %933 = vst.msk [vmem:[#allocation2 + $0xbb0] sm:$0xff] %vm253_vm0, %v900_v60  ;;  %v8055_v52 = vsel %vm253_vm0, %v895_v44, 0.0 }
  0xc9   : > { %v11989_v5 = vpack.i.bf16 %v1522_v57, %v1521_v56  ;;  %v1527_v6 = vld [vmem:[#allocation2 + $0x9f8] sm:$0xff]  ;;  %v1528_v7 = vld [vmem:[#allocation2 + $0xa00] sm:$0xff]  ;;  %930 = vst.msk [vmem:[#allocation2 + $0xb60] sm:$0xff] %vm253_vm0, %v897_v62  ;;  %931 = vst.msk [vmem:[#allocation2 + $0xb68] sm:$0xff] %vm253_vm0, %v898_v11  ;;  %v8046_v28 = vadd.f32 %v8045_v21, %v8044_v24  ;;  %v8057_v57 = vsel %vm253_vm0, %v896_v45, 0.0  ;;  %v8061_v24 = vsel %vm253_vm0, %v898_v11, 0.0 }
  0xca   : > { %v1525_v12 = vld [vmem:[#allocation2 + $0x9b0] sm:$0xff]  ;;  %v1526_v13 = vld [vmem:[#allocation2 + $0x9b8] sm:$0xff]  ;;  %9171 = vrot.lane.b32.xlu1 %v11980_v63, %s11097_s28  ;;  %v12004_v17 = vpack.i.bf16 %v1528_v7, %v1527_v6  ;;  %v1544_v56 = vld [vmem:[#allocation2 + $0x7c6] sm:$0xff]  ;;  %934 = vst.msk [vmem:[#allocation2 + $0xbf0] sm:$0xff] %vm253_vm0, %v901_v15 }
  0xcb   : > { %9166 = vrot.lane.b32.xlu0 %v11989_v5, %s11097_s28  ;;  %v12008_v18 = vpack.i.bf16 %v1526_v13, %v1525_v12  ;;  %v1531_v19 = vld [vmem:[#allocation2 + $0xa88] sm:$0xff]  ;;  %v1532_v20 = vld [vmem:[#allocation2 + $0xa90] sm:$0xff]  ;;  %v8048_v33 = vadd.f32 %v8047_v25, %v8046_v28  ;;  %v1543_v55 = vld [vmem:[#allocation2 + $0x7be] sm:$0xff] }
  0xcc   : > { %v1529_v22 = vld [vmem:[#allocation2 + $0xa40] sm:$0xff]  ;;  %v1530_v23 = vld [vmem:[#allocation2 + $0xa48] sm:$0xff]  ;;  %v12016_v26 = vpack.i.bf16 %v1532_v20, %v1531_v19  ;;  %v1541_v44 = vld [vmem:[#allocation2 + $0x776] sm:$0xff]  ;;  %v9220_v12 = vpack.i.bf16 %v1544_v56, %v1543_v55  ;;  %v902_v20 = vunpack.c.h.bf16 %v12058_v10  ;;  %v8067_v56 = vsel %vm253_vm0, %v901_v15, 0.0 }
  0xcd   : > { %v12023_v30 = vpack.i.bf16 %v1530_v23, %v1529_v22  ;;  %v1535_v31 = vld [vmem:[#allocation2 + $0xb18] sm:$0xff]  ;;  %v1536_v32 = vld [vmem:[#allocation2 + $0xb20] sm:$0xff]  ;;  %v8050_v41 = vadd.f32 %v8049_v29, %v8048_v33  ;;  %v12064_v16 = vld [vmem:[%s11885_s27 + $0x68] sm:$0xff]  }
  0xce   : > { %9181 = vrot.lane.b32.xlu1 %v12004_v17, %s11097_s28  ;;  %v1533_v37 = vld [vmem:[#allocation2 + $0xad0] sm:$0xff]  ;;  %v1534_v34 = vld [vmem:[#allocation2 + $0xad8] sm:$0xff]  ;;  %v12030_v39 = vpack.i.bf16 %v1536_v32, %v1535_v31  ;;  %18527 = vst [vmem:[#allocation5_spill] sm:$0xff] %v12064_v16  ;;  %v12067_v14 = vld [vmem:[%s11885_s27 + $0x60] sm:$0xff]   ;;  %v18137_v21 = vunpack.c.l.bf16 %v12064_v16  ;;  %v18136_v22 = vunpack.c.h.bf16 %v12064_v16 }
  0xcf   : > { %9176 = vrot.lane.b32.xlu0 %v12008_v18, %s11097_s28  ;;  %v12035_v42 = vpack.i.bf16 %v1534_v34, %v1533_v37  ;;  %v1539_v43 = vld [vmem:[#allocation2 + $0xba8] sm:$0xff]  ;;  %v1540_v48 = vld [vmem:[#allocation2 + $0xbb0] sm:$0xff]  ;;  %v8052_v49 = vadd.f32 %v8051_v38, %v8050_v41  ;;  %v1542_v6 = vld [vmem:[#allocation2 + $0x77e] sm:$0xff]  ;;  %18528 = vst [vmem:[#allocation6_spill] sm:$0xff] %v12067_v14  ;;  %v18139_v31 = vunpack.c.l.bf16 %v12067_v14  ;;  %v18138_v37 = vunpack.c.h.bf16 %v12067_v14 }
  0xd0   : > { %v1537_v51 = vld [vmem:[#allocation2 + $0xb60] sm:$0xff]  ;;  %v1538_v46 = vld [vmem:[#allocation2 + $0xb68] sm:$0xff]  ;;  %v12042_v54 = vpack.i.bf16 %v1540_v48, %v1539_v43  ;;  %v12055_v7 = vld [vmem:[%s11885_s27 + $0x58] sm:$0xff]   ;;  %v9215_v25 = vpack.i.bf16 %v1542_v6, %v1541_v44  ;;  %935 = vst.msk [vmem:[#allocation2 + $0xbf8] sm:$0xff] %vm253_vm0, %v902_v20  ;;  %v8063_v38 = vsel %vm253_vm0, %v899_v59, 0.0  ;;  %v8065_v59 = vsel %vm253_vm0, %v900_v60, 0.0 }
  0xd1   : > { %v8054_v53 = vadd.f32 %v8053_v40, %v8052_v49  ;;  %v12049_v58 = vpack.i.bf16 %v1538_v46, %v1537_v51  ;;  %18526 = vst [vmem:[#allocation4_spill] sm:$0xff] %v12055_v7  ;;  %v903_v45 = vunpack.c.l.bf16 %v12055_v7  ;;  %v18140_v13 = vunpack.c.h.bf16 %v12055_v7  ;;  %v12070_v19 = vld [vmem:[%s11885_s27 + $0x78] sm:$0xff]   ;;  %v12078_v23 = vld [vmem:[%s11885_s27 + $0x70] sm:$0xff]   ;;  %v1545_v11 = vld [vmem:[#allocation2 + $0x806] sm:$0xff] }
  0xd2   : > { %9191 = vrot.lane.b32.xlu1 %v12016_v26, %s11097_s28  ;;  %18529 = vst [vmem:[#allocation7_spill] sm:$0xff] %v12070_v19  ;;  %18530 = vst [vmem:[#allocation8_spill] sm:$0xff] %v12078_v23  ;;  %v1547_v28 = vld [vmem:[#allocation2 + $0x84e] sm:$0xff]  ;;  %v1548_v29 = vld [vmem:[#allocation2 + $0x856] sm:$0xff]  ;;  %v18133_v34 = vunpack.c.l.bf16 %v12070_v19  ;;  %v18132_v41 = vunpack.c.h.bf16 %v12070_v19  ;;  %v18135_v40 = vunpack.c.l.bf16 %v12078_v23  ;;  %v18134_v43 = vunpack.c.h.bf16 %v12078_v23 }
  0xd3   : > { %9186 = vrot.lane.b32.xlu0 %v12023_v30, %s11097_s28  ;;  %v8056_v61 = vadd.f32 %v8055_v52, %v8054_v53  ;;  %936 = vst.msk [vmem:[#allocation2 + $0xc38] sm:$0xff] %vm253_vm0, %v903_v45  ;;  %937 = vst.msk [vmem:[#allocation2 + $0xc40] sm:$0xff] %vm253_vm0, %v18140_v13  ;;  %v1546_v33 = vld [vmem:[#allocation2 + $0x80e] sm:$0xff]  ;;  %v9230_v49 = vpack.i.bf16 %v1548_v29, %v1547_v28  ;;  %v1551_v46 = vld [vmem:[#allocation2 + $0x8de] sm:$0xff]  ;;  %v8071_v28 = vsel %vm253_vm0, %v903_v45, 0.0 }
  0xd4   : > { %940 = vst.msk [vmem:[#allocation2 + $0xcc8] sm:$0xff] %vm253_vm0, %v18137_v21  ;;  %941 = vst.msk [vmem:[#allocation2 + $0xcd0] sm:$0xff] %vm253_vm0, %v18136_v22  ;;  %v9225_v51 = vpack.i.bf16 %v1546_v33, %v1545_v11  ;;  %v1552_v52 = vld [vmem:[#allocation2 + $0x8e6] sm:$0xff]  ;;  %v1549_v55 = vld [vmem:[#allocation2 + $0x896] sm:$0xff] }
  0xd5   : > { %v8058_v62 = vadd.f32 %v8057_v57, %v8056_v61  ;;  %938 = vst.msk [vmem:[#allocation2 + $0xc80] sm:$0xff] %vm253_vm0, %v18139_v31  ;;  %939 = vst.msk [vmem:[#allocation2 + $0xc88] sm:$0xff] %vm253_vm0, %v18138_v37  ;;  %v1550_v60 = vld [vmem:[#allocation2 + $0x89e] sm:$0xff]  ;;  %v9240_v57 = vpack.i.bf16 %v1552_v52, %v1551_v46  ;;  %v1556_v6 = vld [vmem:[#allocation2 + $0x976] sm:$0xff] }
  0xd6   : > { %9201 = vrot.lane.b32.xlu1 %v12030_v39, %s11097_s28  ;;  %944 = vst.msk [vmem:[#allocation2 + $0xd58] sm:$0xff] %vm253_vm0, %v18133_v34  ;;  %945 = vst.msk [vmem:[#allocation2 + $0xd60] sm:$0xff] %vm253_vm0, %v18132_v41  ;;  %v9235_v61 = vpack.i.bf16 %v1550_v60, %v1549_v55  ;;  %v1559_v11 = vld [vmem:[#allocation2 + $0x9fe] sm:$0xff]  ;;  %v1560_v33 = vld [vmem:[#allocation2 + $0xa06] sm:$0xff] }
  0xd7   : > { %9196 = vrot.lane.b32.xlu0 %v12035_v42, %s11097_s28  ;;  %v8060_v32 = vadd.f32 %v8059_v4, %v8058_v62  ;;  %942 = vst.msk [vmem:[#allocation2 + $0xd10] sm:$0xff] %vm253_vm0, %v18135_v40  ;;  %943 = vst.msk [vmem:[#allocation2 + $0xd18] sm:$0xff] %vm253_vm0, %v18134_v43  ;;  %v1555_v4 = vld [vmem:[#allocation2 + $0x96e] sm:$0xff]  ;;  %v1553_v62 = vld [vmem:[#allocation2 + $0x926] sm:$0xff] }
  0xd8   : > { %v12139_v15 = vpack.i.bf16 %v1556_v6, %v1555_v4  ;;  %v1561_v46 = vld [vmem:[#allocation2 + $0xa46] sm:$0xff]  ;;  %v1562_v52 = vld [vmem:[#allocation2 + $0xa4e] sm:$0xff]  ;;  %v1567_v60 = vld [vmem:[#allocation2 + $0xb1e] sm:$0xff] }
  0xd9   : > { %v8062_v48 = vadd.f32 %v8061_v24, %v8060_v32  ;;  %v1554_v24 = vld [vmem:[#allocation2 + $0x92e] sm:$0xff]  ;;  %v12160_v55 = vpack.i.bf16 %v1562_v52, %v1561_v46  ;;  %v12196_v46 = vld [vmem:[#allocation2 + $0x9fa] sm:$0xff]  ;;  %v12240_v40 = vld [vmem:[#allocation2 + $0xba2] sm:$0xff] }
  0xda   : > { %9211 = vrot.lane.b32.xlu1 %v12042_v54, %s11097_s28  ;;  %v12142_v32 = vpack.i.bf16 %v1554_v24, %v1553_v62  ;;  %v1571_v6 = vld [vmem:[#allocation2 + $0xbae] sm:$0xff]  ;;  %v1569_v62 = vld [vmem:[#allocation2 + $0xb66] sm:$0xff]  ;;  %v12224_v41 = vld [vmem:[#allocation2 + $0xb1a] sm:$0xff]  ;;  %18543 = vst [vmem:[#allocation21_spill] sm:$0xff] %v12240_v40 }
  0xdb   : > { %9206 = vrot.lane.b32.xlu0 %v12049_v58, %s11097_s28  ;;  %v8064_v53 = vadd.f32 %v8063_v38, %v8062_v48  ;;  %v1557_v38 = vld [vmem:[#allocation2 + $0x9b6] sm:$0xff]  ;;  %v1570_v24 = vld [vmem:[#allocation2 + $0xb6e] sm:$0xff]  ;;  %18540 = vst [vmem:[#allocation18_spill] sm:$0xff] %v12224_v41  ;;  %v12246_v37 = vld [vmem:[#allocation2 + $0xb62] sm:$0xff] }
  0xdc   : > { %v12198_v52 = vld [vmem:[#allocation2 + $0x9aa] sm:$0xff]  ;;  %v12228_v43 = vld [vmem:[#allocation2 + $0xad2] sm:$0xff]  ;;  %v12244_v21 = vld [vmem:[#allocation2 + $0xb5a] sm:$0xff]  ;;  %18546 = vst [vmem:[#allocation24_spill] sm:$0xff] %v12246_v37 }
  0xdd   : > { %v8066_v44 = vadd.f32 %v8065_v59, %v8064_v53  ;;  %v1563_v59 = vld [vmem:[#allocation2 + $0xa8e] sm:$0xff]  ;;  %18533 = vst [vmem:[#allocation11_spill] sm:$0xff] %v12198_v52  ;;  %18542 = vst [vmem:[#allocation20_spill] sm:$0xff] %v12228_v43  ;;  %v1596_v13 = vld [vmem:[#allocation2 + $0xc3a] sm:$0xff] }
  0xde   : > { %9221 = vrot.lane.b32.xlu1 %v9220_v12, %s11098_s29  ;;  %v8069_v12 = vsel %vm253_vm0, %v902_v20, 0.0  ;;  %v1558_v20 = vld [vmem:[#allocation2 + $0x9be] sm:$0xff]  ;;  %v12226_v34 = vld [vmem:[#allocation2 + $0xaca] sm:$0xff]  ;;  %18545 = vst [vmem:[#allocation23_spill] sm:$0xff] %v12244_v21  ;;  %v1595_v31 = vld [vmem:[#allocation2 + $0xc32] sm:$0xff] }
  0xdf   : > { %9216 = vrot.lane.b32.xlu0 %v9215_v25, %s11098_s29  ;;  %v8068_v25 = vadd.f32 %v8067_v56, %v8066_v44  ;;  %v12152_v45 = vpack.i.bf16 %v1558_v20, %v1557_v38  ;;  %v1568_v56 = vld [vmem:[#allocation2 + $0xb26] sm:$0xff]  ;;  %v1566_v44 = vld [vmem:[#allocation2 + $0xade] sm:$0xff]  ;;  %18541 = vst [vmem:[#allocation19_spill] sm:$0xff] %v12226_v34 }
  0xe0   : > { %v12184_v38 = vld [vmem:[#allocation2 + $0x922] sm:$0xff]  ;;  %v12242_v22 = vld [vmem:[#allocation2 + $0xbaa] sm:$0xff] }
  0xe1   : > { %v8070_v29 = vadd.f32 %v8069_v12, %v8068_v25  ;;  %v1572_v12 = vld [vmem:[#allocation2 + $0xbb6] sm:$0xff]  ;;  %18544 = vst [vmem:[#allocation22_spill] sm:$0xff] %v12242_v22  ;;  %v1593_v0 = vld [vmem:[#allocation2 + $0xbea] sm:$0xff] }
  0xe2   : > { %9231 = vrot.lane.b32.xlu1 %v9230_v49, %s11098_s29  ;;  %v12148_v49 = vpack.i.bf16 %v1560_v33, %v1559_v11  ;;  %v12172_v25 = vpack.i.bf16 %v1572_v12, %v1571_v6  ;;  %v12180_v11 = vld [vmem:[#allocation2 + $0x96a] sm:$0xff]  ;;  %v12182_v33 = vld [vmem:[#allocation2 + $0x91a] sm:$0xff] }
  0xe3   : > { %9226 = vrot.lane.b32.xlu0 %v9225_v51, %s11098_s29  ;;  %v12144_v48 = vadd.f32 %v8071_v28, %v8070_v29  ;;  %v1564_v51 = vld [vmem:[#allocation2 + $0xa96] sm:$0xff]  ;;  %v12176_v28 = vpack.i.bf16 %v1570_v24, %v1569_v62  ;;  %v12178_v29 = vld [vmem:[#allocation2 + $0x962] sm:$0xff]  ;;  %v12210_v6 = vld [vmem:[#allocation2 + $0xa8a] sm:$0xff] }
  0xe4   : > { %v12156_v53 = vpack.i.bf16 %v1564_v51, %v1563_v59  ;;  %v9300_v20 = vpack.i.bf16 %v12180_v11, %v12178_v29  ;;  %v9295_v59 = vpack.i.bf16 %v12184_v38, %v12182_v33  ;;  %v12194_v51 = vld [vmem:[#allocation2 + $0x9f2] sm:$0xff]  ;;  %18536 = vst [vmem:[#allocation14_spill] sm:$0xff] %v12210_v6  ;;  %v12212_v12 = vld [vmem:[#allocation2 + $0xa3a] sm:$0xff]  ;;  %v12214_v62 = vld [vmem:[#allocation2 + $0xa42] sm:$0xff] }
  0xe5   : > { %18531 = vst [vmem:[#allocation9_spill] sm:$0xff] %v12144_v48  ;;  %18532 = vst [vmem:[#allocation10_spill] sm:$0xff] %v12194_v51  ;;  %v1594_v48 = vld [vmem:[#allocation2 + $0xbf2] sm:$0xff] }
  0xe6   : > { %9241 = vrot.lane.b32.xlu1 %v9240_v57, %s11098_s29  ;;  %v1565_v57 = vld [vmem:[#allocation2 + $0xad6] sm:$0xff]  ;;  %18537 = vst [vmem:[#allocation15_spill] sm:$0xff] %v12212_v12  ;;  %18538 = vst [vmem:[#allocation16_spill] sm:$0xff] %v12214_v62 }
  0xe7   : > { %9236 = vrot.lane.b32.xlu0 %v9235_v61, %s11098_s29  ;;  %v12164_v61 = vpack.i.bf16 %v1568_v56, %v1567_v60  ;;  %v12168_v4 = vpack.i.bf16 %v1566_v44, %v1565_v57  ;;  %v12200_v60 = vld [vmem:[#allocation2 + $0x9b2] sm:$0xff]  ;;  %v9310_v56 = vpack.i.bf16 %v12196_v46, %v12194_v51  ;;  %v12208_v44 = vld [vmem:[#allocation2 + $0xa82] sm:$0xff] }
  0xe8   : > { %18534 = vst [vmem:[#allocation12_spill] sm:$0xff] %v12200_v60  ;;  %v9305_v57 = vpack.i.bf16 %v12200_v60, %v12198_v52  ;;  %18535 = vst [vmem:[#allocation13_spill] sm:$0xff] %v12208_v44  ;;  %v9320_v24 = vpack.i.bf16 %v12210_v6, %v12208_v44  ;;  %v1657_v6 = vld [vmem:[#allocation2 + $0xbf6] sm:$0xff]  ;;  %v1658_v52 = vld [vmem:[#allocation2 + $0xbfe] sm:$0xff] }
  0xe9   : > { %v1661_v60 = vld [vmem:[#allocation2 + $0xc86] sm:$0xff] }
  0xea   : > { %9251 = vrot.lane.b32.xlu1 %v12139_v15, %s11098_s29 }
  0xeb   : > { %9246 = vrot.lane.b32.xlu0 %v12142_v32, %s11098_s29 }
  0xee   : > { %9261 = vrot.lane.b32.xlu1 %v12148_v49, %s11098_s29 }
  0xef   : > { %9256 = vrot.lane.b32.xlu0 %v12152_v45, %s11098_s29 }
  0xf2   : > { %9271 = vrot.lane.b32.xlu1 %v12156_v53, %s11098_s29 }
  0xf3   : > { %9266 = vrot.lane.b32.xlu0 %v12160_v55, %s11098_s29 }
  0xf6   : > { %9281 = vrot.lane.b32.xlu1 %v12164_v61, %s11098_s29 }
  0xf7   : > { %9276 = vrot.lane.b32.xlu0 %v12168_v4, %s11098_s29 }
  0xfa   : > { %9291 = vrot.lane.b32.xlu1 %v12172_v25, %s11098_s29 }
  0xfb   : > { %9286 = vrot.lane.b32.xlu0 %v12176_v28, %s11098_s29 }
  0xfe   : > { %9301 = vrot.lane.b32.xlu1 %v9300_v20, %s11099_s30  ;;  %v9315_v20 = vpack.i.bf16 %v12214_v62, %v12212_v12  ;;  %v1601_v12 = vld [vmem:[#allocation2 + $0xd0a] sm:$0xff]  ;;  %v1602_v62 = vld [vmem:[#allocation2 + $0xd12] sm:$0xff] }
  0xff   : > { %9296 = vrot.lane.b32.xlu0 %v9295_v59, %s11099_s30  ;;  %v12222_v59 = vld [vmem:[#allocation2 + $0xb12] sm:$0xff] }
 0x100   : > { %18539 = vst [vmem:[#allocation17_spill] sm:$0xff] %v12222_v59 }
 0x102   : > { %9311 = vrot.lane.b32.xlu1 %v9310_v56, %s11099_s30  ;;  %v12233_v56 = vpack.i.bf16 %v12224_v41, %v12222_v59  ;;  %v1597_v59 = vld [vmem:[#allocation2 + $0xc7a] sm:$0xff]  ;;  %v1598_v41 = vld [vmem:[#allocation2 + $0xc82] sm:$0xff] }
 0x103   : > { %9306 = vrot.lane.b32.xlu0 %v9305_v57, %s11099_s30  ;;  %v12238_v57 = vpack.i.bf16 %v12228_v43, %v12226_v34  ;;  %v12262_v34 = vpack.i.bf16 %v1596_v13, %v1595_v31  ;;  %v1600_v43 = vld [vmem:[#allocation2 + $0xcca] sm:$0xff]  ;;  %v1603_v13 = vld [vmem:[#allocation2 + $0xd52] sm:$0xff]  ;;  %v1604_v31 = vld [vmem:[#allocation2 + $0xd5a] sm:$0xff] }
 0x106   : > { %9321 = vrot.lane.b32.xlu1 %v9320_v24, %s11099_s30  ;;  %v12252_v24 = vpack.i.bf16 %v12242_v22, %v12240_v40  ;;  %v12266_v40 = vpack.i.bf16 %v1594_v48, %v1593_v0  ;;  %v1599_v22 = vld [vmem:[#allocation2 + $0xcc2] sm:$0xff]  ;;  %v12278_v0 = vpack.i.bf16 %v1604_v31, %v1603_v13  ;;  %v12282_v48 = vpack.i.bf16 %v1602_v62, %v1601_v12  ;;  %v12314_v12 = vpop.permute.xlu0 %9136  ;;  %v1633_v31 = vld [vmem:[#allocation2 + $0xd10] sm:$0xff] }
 0x107   : > { %9316 = vrot.lane.b32.xlu0 %v9315_v20, %s11099_s30  ;;  %v12258_v20 = vpack.i.bf16 %v12246_v37, %v12244_v21  ;;  %v12270_v21 = vpack.i.bf16 %v1600_v43, %v1599_v22  ;;  %v12274_v37 = vpack.i.bf16 %v1598_v41, %v1597_v59  ;;  %v1625_v22 = vld [vmem:[#allocation2 + $0xbf0] sm:$0xff]  ;;  %v1626_v41 = vld [vmem:[#allocation2 + $0xbf8] sm:$0xff]  ;;  %v1629_v43 = vld [vmem:[#allocation2 + $0xc80] sm:$0xff] }
 0x108   : > { %v1636_v59 = vld [vmem:[#allocation2 + $0xd60] sm:$0xff] }
 0x10a   : > { %9331 = vrot.lane.b32.xlu1 %v12233_v56, %s11099_s30 }
 0x10b   : > { %9326 = vrot.lane.b32.xlu0 %v12238_v57, %s11099_s30 }
 0x10e   : > { %9341 = vrot.lane.b32.xlu1 %v12252_v24, %s11099_s30 }
 0x10f   : > { %9336 = vrot.lane.b32.xlu0 %v12258_v20, %s11099_s30 }
 0x112   : > { %9351 = vrot.lane.b32.xlu1 %v12262_v34, %s11099_s30 }
 0x113   : > { %9346 = vrot.lane.b32.xlu0 %v12266_v40, %s11099_s30 }
 0x116   : > { %9361 = vrot.lane.b32.xlu1 %v12270_v21, %s11099_s30 }
 0x117   : > { %9356 = vrot.lane.b32.xlu0 %v12274_v37, %s11099_s30 }
 0x11a   : > { %9371 = vrot.lane.b32.xlu1 %v12278_v0, %s11099_s30 }
 0x11b   : > { %9366 = vrot.lane.b32.xlu0 %v12282_v48, %s11099_s30 }
 0x11e   : > { %9381 = vrot.lane.b32.xlu1 %v11980_v63, %s11100_s7  ;;  %v1627_v63 = vld [vmem:[#allocation2 + $0xc38] sm:$0xff] }
 0x11f   : > { %9376 = vrot.lane.b32.xlu0 %v11989_v5, %s11100_s7  ;;  %v1628_v5 = vld [vmem:[#allocation2 + $0xc40] sm:$0xff] }
 0x122   : > { %9391 = vrot.lane.b32.xlu1 %v12004_v17, %s11100_s7  ;;  %v12306_v17 = vpack.i.bf16 %v1628_v5, %v1627_v63  ;;  %v1634_v63 = vld [vmem:[#allocation2 + $0xd18] sm:$0xff]  ;;  %v12326_v5 = vpop.permute.xlu0 %9141 }
 0x123   : > { %9386 = vrot.lane.b32.xlu0 %v12008_v18, %s11100_s7  ;;  %v12310_v18 = vpack.i.bf16 %v1626_v41, %v1625_v22  ;;  %v12334_v41 = vpack.i.bf16 %v1634_v63, %v1633_v31 }
 0x126   : > { %9401 = vrot.lane.b32.xlu1 %v12016_v26, %s11100_s7  ;;  %v1631_v26 = vld [vmem:[#allocation2 + $0xcc8] sm:$0xff] }
 0x127   : > { %9396 = vrot.lane.b32.xlu0 %v12023_v30, %s11100_s7  ;;  %v1632_v30 = vld [vmem:[#allocation2 + $0xcd0] sm:$0xff] }
 0x128   : > { %v12318_v62 = vpack.i.bf16 %v1632_v30, %v1631_v26  ;;  %v12338_v30 = vpop.permute.xlu0 %9156 }
 0x12a   : > { %9411 = vrot.lane.b32.xlu1 %v12030_v39, %s11100_s7  ;;  %v12312_v39 = vpop.permute.xlu1 %9146 }
 0x12b   : > { %9406 = vrot.lane.b32.xlu0 %v12035_v42, %s11100_s7  ;;  %v1630_v42 = vld [vmem:[#allocation2 + $0xc88] sm:$0xff] }
 0x12e   : > { %9421 = vrot.lane.b32.xlu1 %v12042_v54, %s11100_s7  ;;  %v12322_v54 = vpack.i.bf16 %v1630_v42, %v1629_v43  ;;  %v12324_v13 = vpop.permute.xlu1 %9151 }
 0x12f   : > { %9416 = vrot.lane.b32.xlu0 %v12049_v58, %s11100_s7  ;;  %v1635_v58 = vld [vmem:[#allocation2 + $0xd58] sm:$0xff] }
 0x130   : > { %v12330_v22 = vpack.i.bf16 %v1636_v59, %v1635_v58 }
 0x132   : > { %9431 = vrot.lane.b32.xlu1 %v12306_v17, %s11100_s7  ;;  %v12336_v26 = vpop.permute.xlu1 %9161 }
 0x133   : > { %9426 = vrot.lane.b32.xlu0 %v12310_v18, %s11100_s7 }
 0x136   : > { %9441 = vrot.lane.b32.xlu1 %v12318_v62, %s11100_s7 }
 0x137   : > { %9436 = vrot.lane.b32.xlu0 %v12322_v54, %s11100_s7 }
 0x13a   : > { %9451 = vrot.lane.b32.xlu1 %v12330_v22, %s11100_s7 }
 0x13b   : > { %9446 = vrot.lane.b32.xlu0 %v12334_v41, %s11100_s7 }
 0x13c   : > { %v12344_v43 = vpop.permute.xlu1 %9171 }
 0x13d   : > { %v12346_v42 = vpop.permute.xlu0 %9166 }
 0x13e   : > { %9461 = vrot.lane.b32.xlu1 %v12139_v15, %s11101_s8 }
 0x13f   : > { %9456 = vrot.lane.b32.xlu0 %v12142_v32, %s11101_s8 }
 0x140   : > { %v12352_v58 = vpop.permute.xlu1 %9181 }
 0x141   : > { %v12354_v59 = vpop.permute.xlu0 %9176 }
 0x142   : > { %9471 = vrot.lane.b32.xlu1 %v12148_v49, %s11101_s8  ;;  %v1659_v49 = vld [vmem:[#allocation2 + $0xc3e] sm:$0xff] }
 0x143   : > { %9466 = vrot.lane.b32.xlu0 %v12152_v45, %s11101_s8  ;;  %v1660_v45 = vld [vmem:[#allocation2 + $0xc46] sm:$0xff] }
 0x144   : > { %v12360_v31 = vpop.permute.xlu1 %9191 }
 0x145   : > { %v12362_v63 = vpop.permute.xlu0 %9186 }
 0x146   : > { %9481 = vrot.lane.b32.xlu1 %v12156_v53, %s11101_s8 }
 0x147   : > { %9476 = vrot.lane.b32.xlu0 %v12160_v55, %s11101_s8  ;;  %v12382_v55 = vpack.i.bf16 %v1660_v45, %v1659_v49  ;;  %v1665_v45 = vld [vmem:[#allocation2 + $0xd16] sm:$0xff] }
 0x148   : > { %v12368_v15 = vpop.permute.xlu1 %9201 }
 0x149   : > { %18547 = vst [vmem:[#allocation25_spill] sm:$0xff] %v12368_v15  ;;  %v12370_v32 = vpop.permute.xlu0 %9196 }
 0x14a   : > { %18548 = vst [vmem:[#allocation26_spill] sm:$0xff] %v12370_v32  ;;  %9491 = vrot.lane.b32.xlu1 %v12164_v61, %s11101_s8  ;;  %v12386_v61 = vpack.i.bf16 %v1658_v52, %v1657_v6  ;;  %v1663_v32 = vld [vmem:[#allocation2 + $0xcce] sm:$0xff]  ;;  %v1668_v52 = vld [vmem:[#allocation2 + $0xd66] sm:$0xff]  ;;  %v962_v6 = vld [vmem:[%s18126_s1] sm:$0x3] }
 0x14b   : > { %9486 = vrot.lane.b32.xlu0 %v12168_v4, %s11101_s8  ;;  %v1664_v4 = vld [vmem:[#allocation2 + $0xcd6] sm:$0xff]  ;;  %9109 = vmatprep.subr.msk.bf16.mxu0 %vm1016_vm1, %v962_v6 }
 0x14c   : > { %v12376_v44 = vpop.permute.xlu1 %9211 }
 0x14d   : > { %18549 = vst [vmem:[#allocation27_spill] sm:$0xff] %v12376_v44  ;;  %v12378_v53 = vpop.permute.xlu0 %9206  ;;  %v1662_v44 = vld [vmem:[#allocation2 + $0xc8e] sm:$0xff] }
 0x14e   : > { %18550 = vst [vmem:[#allocation28_spill] sm:$0xff] %v12378_v53  ;;  %9501 = vrot.lane.b32.xlu1 %v12172_v25, %s11101_s8  ;;  %v12394_v53 = vpack.i.bf16 %v1664_v4, %v1663_v32  ;;  %v12398_v25 = vpack.i.bf16 %v1662_v44, %v1661_v60  ;;  %v1018_v32 = vsel %vm1016_vm1, %v962_v6, 0 }
 0x14f   : > { %9496 = vrot.lane.b32.xlu0 %v12176_v28, %s11101_s8  ;;  %v1667_v28 = vld [vmem:[#allocation2 + $0xd5e] sm:$0xff]  ;;  %8816 = vmatpush3.bf16.msra.mxu0 %v1018_v32 }
 0x150   : > { %v12388_v15 = vpop.permute.xlu1 %9221  ;;  %v12411_v60 = vpack.i.bf16 %v1668_v52, %v1667_v28  ;;  %v1697_v32 = vld [vmem:[#allocation2 + $0xe7a] sm:$0xff] }
 0x151   : > { %v12390_v51 = vpop.permute.xlu0 %9216 }
 0x152   : > { %18551 = vst [vmem:[#allocation29_spill] sm:$0xff] %v12390_v51  ;;  %9511 = vrot.lane.b32.xlu1 %v12382_v55, %s11101_s8  ;;  %v1666_v51 = vld [vmem:[#allocation2 + $0xd1e] sm:$0xff]  ;;  %8818 = vmatmul.mubr.msk.bf16.vlgmr.msra.gmra.mxu0 %vm253_vm0, %v11888_v1 }
 0x153   : > { %9506 = vrot.lane.b32.xlu0 %v12386_v61, %s11101_s8  ;;  %v12415_v44 = vpack.i.bf16 %v1666_v51, %v1665_v45  ;;  %8821 = vmatprep.mubr.msk.bf16.mxu0 %vm253_vm0, %v11901_v8 }
 0x154   : > { %v12403_v49 = vpop.permute.xlu1 %9231 }
 0x155   : > { %18552 = vst [vmem:[#allocation30_spill] sm:$0xff] %v12403_v49  ;;  %v12407_v4 = vpop.permute.xlu0 %9226 }
 0x156   : > { %9521 = vrot.lane.b32.xlu1 %v12394_v53, %s11101_s8 }
 0x157   : > { %9516 = vrot.lane.b32.xlu0 %v12398_v25, %s11101_s8 }
 0x158   : > { %v12419_v49 = vpop.permute.xlu1 %9241 }
 0x159   : > { %v12423_v6 = vpop.permute.xlu0 %9236 }
 0x15a   : > { %9531 = vrot.lane.b32.xlu1 %v12411_v60, %s11101_s8  ;;  %8822 = vmatmul.mubr.msk.bf16.gmra.mxu0 %vm253_vm0, %v11894_v3 }
 0x15b   : > { %9526 = vrot.lane.b32.xlu0 %v12415_v44, %s11101_s8  ;;  %8825 = vmatprep.mubr.msk.bf16.mxu0 %vm253_vm0, %v11926_v27 }
 0x15c   : > { %v12429_v28 = vpop.permute.xlu1 %9251 }
 0x15d   : > { %v12431_v51 = vpop.permute.xlu0 %9246 }
 0x15e   : > { %9541 = vrot.lane.b32.xlu1 %v12233_v56, %s11102_s11 }
 0x15f   : > { %9536 = vrot.lane.b32.xlu0 %v12238_v57, %s11102_s11  ;;  %v1693_v57 = vld [vmem:[#allocation2 + $0xdea] sm:$0xff] }
 0x160   : > { %v12439_v1 = vpop.permute.xlu1 %9261 }
 0x161   : > { %v12443_v2 = vpop.permute.xlu0 %9256 }
 0x162   : > { %9551 = vrot.lane.b32.xlu1 %v12252_v24, %s11102_s11  ;;  %8826 = vmatmul.mubr.msk.bf16.gmra.mxu0 %vm253_vm0, %v11904_v9 }
 0x163   : > { %9546 = vrot.lane.b32.xlu0 %v12258_v20, %s11102_s11  ;;  %v1691_v20 = vld [vmem:[#allocation2 + $0xda2] sm:$0xff]  ;;  %8829 = vmatprep.mubr.msk.bf16.mxu0 %vm253_vm0, %v11936_v36  ;;  %v1698_v36 = vld [vmem:[#allocation2 + $0xeba] sm:$0xff] }
 0x164   : > { %v12449_v56 = vpop.permute.xlu1 %9271 }
 0x165   : > { %18553 = vst [vmem:[#allocation31_spill] sm:$0xff] %v12449_v56  ;;  %v12451_v52 = vpop.permute.xlu0 %9266 }
 0x166   : > { %18554 = vst [vmem:[#allocation32_spill] sm:$0xff] %v12451_v52  ;;  %9561 = vrot.lane.b32.xlu1 %v12262_v34, %s11102_s11  ;;  %v1692_v34 = vld [vmem:[#allocation2 + $0xde2] sm:$0xff]  ;;  %v18598_v52 = vld [vmem:[#allocation12_spill] sm:$0xff] }
 0x167   : > { %9556 = vrot.lane.b32.xlu0 %v12266_v40, %s11102_s11  ;;  %v1690_v40 = vld [vmem:[#allocation2 + $0xd9a] sm:$0xff]  ;;  %v9590_v9 = vpack.i.bf16 %v1693_v57, %v1692_v34  ;;  %v1700_v34 = vld [vmem:[#allocation2 + $0xf02] sm:$0xff]  ;;  %v1701_v57 = vld [vmem:[#allocation2 + $0xf0a] sm:$0xff] }
 0x168   : > { %v12459_v3 = vpop.permute.xlu1 %9281  ;;  %v9585_v45 = vpack.i.bf16 %v1691_v20, %v1690_v40  ;;  %v1699_v20 = vld [vmem:[#allocation2 + $0xec2] sm:$0xff] }
 0x169   : > { %18555 = vst [vmem:[#allocation33_spill] sm:$0xff] %v12459_v3  ;;  %v12463_v8 = vpop.permute.xlu0 %9276  ;;  %v9610_v3 = vpack.i.bf16 %v1701_v57, %v1700_v34  ;;  %v1709_v34 = vld [vmem:[#allocation2 + $0xbb0] sm:$0xff] }
 0x16a   : > { %18556 = vst [vmem:[#allocation34_spill] sm:$0xff] %v12463_v8  ;;  %9571 = vrot.lane.b32.xlu1 %v12270_v21, %s11102_s11  ;;  %v1696_v21 = vld [vmem:[#allocation2 + $0xe72] sm:$0xff]  ;;  %8830 = vmatmul.mubr.msk.bf16.gmra.mxu0 %vm253_vm0, %v11933_v35  ;;  %v9605_v35 = vpack.i.bf16 %v1699_v20, %v1698_v36  ;;  %v1707_v36 = vld [vmem:[#allocation2 + $0xb68] sm:$0xff] }
 0x16b   : > { %9566 = vrot.lane.b32.xlu0 %v12274_v37, %s11102_s11  ;;  %v1695_v8 = vld [vmem:[#allocation2 + $0xe32] sm:$0xff]  ;;  %8833 = vmatprep.mubr.msk.bf16.mxu0 %vm253_vm0, %v11958_v50  ;;  %v1706_v50 = vld [vmem:[#allocation2 + $0xb60] sm:$0xff] }
 0x16c   : > { %v12469_v24 = vpop.permute.xlu1 %9291 }
 0x16d   : > { %18557 = vst [vmem:[#allocation35_spill] sm:$0xff] %v12469_v24  ;;  %v12471_v27 = vpop.permute.xlu0 %9286  ;;  %v1694_v24 = vld [vmem:[#allocation2 + $0xe2a] sm:$0xff] }
 0x16e   : > { %18558 = vst [vmem:[#allocation36_spill] sm:$0xff] %v12471_v27  ;;  %9581 = vrot.lane.b32.xlu1 %v12278_v0, %s11102_s11  ;;  %v9600_v0 = vpack.i.bf16 %v1697_v32, %v1696_v21 }
 0x16f   : > { %9576 = vrot.lane.b32.xlu0 %v12282_v48, %s11102_s11  ;;  %v9595_v48 = vpack.i.bf16 %v1695_v8, %v1694_v24  ;;  %v1702_v24 = vld [vmem:[#allocation2 + $0xad0] sm:$0xff] }
 0x170   : > { %v12479_v37 = vpop.permute.xlu1 %9301 }
 0x171   : > { %18559 = vst [vmem:[#allocation37_spill] sm:$0xff] %v12479_v37  ;;  %v12483_v27 = vpop.permute.xlu0 %9296 }
 0x172   : > { %18560 = vst [vmem:[#allocation38_spill] sm:$0xff] %v12483_v27  ;;  %9591 = vrot.lane.b32.xlu1 %v9590_v9, %s11102_s11  ;;  %v1704_v27 = vld [vmem:[#allocation2 + $0xb18] sm:$0xff]  ;;  %v1705_v9 = vld [vmem:[#allocation2 + $0xb20] sm:$0xff]  ;;  %8834 = vmatmul.mubr.msk.bf16.gmra.mxu0 %vm253_vm0, %v11949_v47 }
 0x173   : > { %9586 = vrot.lane.b32.xlu0 %v9585_v45, %s11102_s11  ;;  %v1703_v45 = vld [vmem:[#allocation2 + $0xad8] sm:$0xff]  ;;  %v9620_v32 = vpack.i.bf16 %v1705_v9, %v1704_v27  ;;  %8837 = vmatprep.mubr.msk.bf16.mxu0 %vm253_vm0, %v12058_v10 }
 0x174   : > { %v12487_v40 = vpop.permute.xlu1 %9311 }
 0x175   : > { %18561 = vst [vmem:[#allocation39_spill] sm:$0xff] %v12487_v40  ;;  %v12489_v37 = vpop.permute.xlu0 %9306  ;;  %v9189_v40 = vunpack.i.h.bf16 %v12362_v63 }
 0x176   : > { %18562 = vst [vmem:[#allocation40_spill] sm:$0xff] %v12489_v37  ;;  %9601 = vrot.lane.b32.xlu1 %v9600_v0, %s11102_s11  ;;  %v9615_v0 = vpack.i.bf16 %v1703_v45, %v1702_v24  ;;  %v1725_v45 = vld [vmem:[#allocation2 + $0xdf0] sm:$0xff] }
 0x177   : > { %9596 = vrot.lane.b32.xlu0 %v9595_v48, %s11102_s11  ;;  %v1708_v48 = vld [vmem:[#allocation2 + $0xba8] sm:$0xff] }
 0x178   : > { %v12495_v8 = vpop.permute.xlu1 %9321  ;;  %v9630_v47 = vpack.i.bf16 %v1709_v34, %v1708_v48 }
 0x179   : > { %18563 = vst [vmem:[#allocation41_spill] sm:$0xff] %v12495_v8  ;;  %v12499_v21 = vpop.permute.xlu0 %9316  ;;  %v9169_v8 = vunpack.i.h.bf16 %v12346_v42 }
 0x17a   : > { %18564 = vst [vmem:[#allocation42_spill] sm:$0xff] %v12499_v21  ;;  %9611 = vrot.lane.b32.xlu1 %v9610_v3, %s11102_s11  ;;  %v9625_v21 = vpack.i.bf16 %v1707_v36, %v1706_v50  ;;  %8838 = vmatmul.mubr.msk.bf16.gmra.mxu0 %vm253_vm0, %v12055_v7  ;;  %v1728_v36 = vld [vmem:[#allocation2 + $0xe78] sm:$0xff] }
 0x17b   : > { %9606 = vrot.lane.b32.xlu0 %v9605_v35, %s11102_s11  ;;  %8841 = vmatprep.mubr.msk.bf16.mxu0 %vm253_vm0, %v12067_v14  ;;  %v1730_v14 = vld [vmem:[#allocation2 + $0xec0] sm:$0xff] }
 0x17c   : > { %v12503_v57 = vpop.permute.xlu1 %9331 }
 0x17d   : > { %18565 = vst [vmem:[#allocation43_spill] sm:$0xff] %v12503_v57  ;;  %v12505_v20 = vpop.permute.xlu0 %9326  ;;  %v12679_v57 = vld [vmem:[#allocation2 + $0x608] sm:$0xff] }
 0x17e   : > { %18566 = vst [vmem:[#allocation44_spill] sm:$0xff] %v12505_v20  ;;  %9621 = vrot.lane.b32.xlu1 %v9620_v32, %s11103_s12  ;;  %v1722_v32 = vld [vmem:[#allocation2 + $0xda0] sm:$0xff] }
 0x17f   : > { %9616 = vrot.lane.b32.xlu0 %v9615_v0, %s11103_s12  ;;  %v1723_v0 = vld [vmem:[#allocation2 + $0xda8] sm:$0xff] }
 0x180   : > { %v12511_v3 = vpop.permute.xlu1 %9341  ;;  %v9665_v50 = vpack.i.bf16 %v1723_v0, %v1722_v32  ;;  %v1732_v32 = vld [vmem:[#allocation2 + $0xf08] sm:$0xff]  ;;  %v1733_v0 = vld [vmem:[#allocation2 + $0xf10] sm:$0xff] }
 0x181   : > { %18567 = vst [vmem:[#allocation45_spill] sm:$0xff] %v12511_v3  ;;  %v12515_v27 = vpop.permute.xlu0 %9336  ;;  %v1488_v3 = vld [vmem:[#allocation2 + $0x8da] sm:$0xff] }
 0x182   : > { %18568 = vst [vmem:[#allocation46_spill] sm:$0xff] %v12515_v27  ;;  %9631 = vrot.lane.b32.xlu1 %v9630_v47, %s11103_s12  ;;  %8842 = vmatmul.mubr.msk.bf16.gmra.mxu0 %vm253_vm0, %v12064_v16  ;;  %v1729_v47 = vld [vmem:[#allocation2 + $0xe80] sm:$0xff]  ;;  %v1727_v16 = vld [vmem:[#allocation2 + $0xe38] sm:$0xff] }
 0x183   : > { %9626 = vrot.lane.b32.xlu0 %v9625_v21, %s11103_s12  ;;  %8845 = vmatprep.mubr.msk.bf16.mxu0 %vm253_vm0, %v12078_v23 }
 0x184   : > { %v12519_v35 = vpop.permute.xlu1 %9351 }
 0x185   : > { %18569 = vst [vmem:[#allocation47_spill] sm:$0xff] %v12519_v35  ;;  %v12521_v9 = vpop.permute.xlu0 %9346 }
 0x186   : > { %18570 = vst [vmem:[#allocation48_spill] sm:$0xff] %v12521_v9  ;;  %9641 = vrot.lane.b32.xlu1 %v12306_v17, %s11103_s12  ;;  %v11055_v17 = vld [vmem:[%s18127_s2 + $0x10] ss:$0 sps:$4 sm:$0x33]   ;;  %v1487_v9 = vld [vmem:[#allocation2 + $0x8d2] sm:$0xff] }
 0x187   : > { %9636 = vrot.lane.b32.xlu0 %v12310_v18, %s11103_s12  ;;  %v1724_v18 = vld [vmem:[#allocation2 + $0xde8] sm:$0xff]  ;;  %9111 = vmatprep.subr.msk.bf16.mxu0 %vm1016_vm1, %v11055_v17  ;;  %v3143_v48 = vsel %vm1016_vm1, %v11055_v17, 0 }
 0x188   : > { %v12529_v10 = vpop.permute.xlu1 %9361  ;;  %8884 = vmatpush3.bf16.msra.mxu0 %v3143_v48  ;;  %v1726_v48 = vld [vmem:[#allocation2 + $0xe30] sm:$0xff] }
 0x189   : > { %18571 = vst [vmem:[#allocation49_spill] sm:$0xff] %v12529_v10  ;;  %v12533_v24 = vpop.permute.xlu0 %9356 }
 0x18a   : > { %18572 = vst [vmem:[#allocation50_spill] sm:$0xff] %v12533_v24  ;;  %9651 = vrot.lane.b32.xlu1 %v12318_v62, %s11103_s12  ;;  %v9670_v62 = vpack.i.bf16 %v1725_v45, %v1724_v18  ;;  %8846 = vmatmul.mubr.msk.bf16.gmra.mxu0 %vm253_vm0, %v12070_v19  ;;  %v11057_v18 = vld [vmem:[%s18127_s2] sm:$0xff]   ;;  %v9675_v45 = vpack.i.bf16 %v1727_v16, %v1726_v48  ;;  %v1731_v19 = vld [vmem:[#allocation2 + $0xec8] sm:$0xff]  ;;  %v1734_v16 = vld [vmem:[#allocation2 + $0xad6] sm:$0xff] }
 0x18b   : > { %9646 = vrot.lane.b32.xlu0 %v12322_v54, %s11103_s12  ;;  %v11056_v54 = vld [vmem:[%s18127_s2 + $0x8] sm:$0xff]   ;;  %v1735_v48 = vld [vmem:[#allocation2 + $0xade] sm:$0xff] }
 0x18c   : > { %v12542_v21 = vpop.permute.xlu1 %9371  ;;  %8885 = vmatprep.subr.bf16.mxu0 %v11056_v54  ;;  %v12626_v24 = vld [vmem:[#allocation2 + $0xe3e] sm:$0xff] }
 0x18d   : > { %18573 = vst [vmem:[#allocation51_spill] sm:$0xff] %v12542_v21  ;;  %v12546_v34 = vpop.permute.xlu0 %9366  ;;  %8886 = vmatpush3.bf16.msra.mxu0 %v11056_v54  ;;  %v9685_v54 = vpack.i.bf16 %v1731_v19, %v1730_v14  ;;  %v1739_v14 = vld [vmem:[#allocation2 + $0xb6e] sm:$0xff]  ;;  %v12624_v21 = vld [vmem:[#allocation2 + $0xe36] sm:$0xff] }
 0x18e   : > { %18574 = vst [vmem:[#allocation52_spill] sm:$0xff] %v12546_v34  ;;  %9661 = vrot.lane.b32.xlu1 %v12330_v22, %s11103_s12  ;;  %8887 = vmatprep.subr.bf16.mxu0 %v11057_v18  ;;  %v12622_v34 = vld [vmem:[#allocation2 + $0xe86] sm:$0xff] }
 0x18f   : > { %9656 = vrot.lane.b32.xlu0 %v12334_v41, %s11103_s12  ;;  %v9680_v41 = vpack.i.bf16 %v1729_v47, %v1728_v36  ;;  %v1736_v36 = vld [vmem:[#allocation2 + $0xb1e] sm:$0xff]  ;;  %v1737_v47 = vld [vmem:[#allocation2 + $0xb26] sm:$0xff] }
 0x190   : > { %v12557_v17 = vpop.permute.xlu1 %9381 }
 0x191   : > { %18575 = vst [vmem:[#allocation53_spill] sm:$0xff] %v12557_v17  ;;  %v12561_v22 = vpop.permute.xlu0 %9376  ;;  %8888 = vmatpush3.bf16.msra.mxu0 %v11057_v18  ;;  %v9695_v18 = vpack.i.bf16 %v1735_v48, %v1734_v16  ;;  %v9149_v48 = vunpack.i.h.bf16 %v12312_v39  ;;  %v1486_v17 = vld [vmem:[#allocation2 + $0x892] sm:$0xff] }
 0x192   : > { %18576 = vst [vmem:[#allocation54_spill] sm:$0xff] %v12561_v22  ;;  %9671 = vrot.lane.b32.xlu1 %v9670_v62, %s11103_s12  ;;  %v9690_v62 = vpack.i.bf16 %v1733_v0, %v1732_v32 }
 0x193   : > { %9666 = vrot.lane.b32.xlu0 %v9665_v50, %s11103_s12 }
 0x194   : > { %v12568_v23 = vpop.permute.xlu1 %9391 }
 0x195   : > { %18577 = vst [vmem:[#allocation55_spill] sm:$0xff] %v12568_v23  ;;  %v12570_v7 = vpop.permute.xlu0 %9386  ;;  %v9700_v23 = vpack.i.bf16 %v1737_v47, %v1736_v36  ;;  %v1482_v47 = vld [vmem:[#allocation2 + $0x802] sm:$0xff] }
 0x196   : > { %18578 = vst [vmem:[#allocation56_spill] sm:$0xff] %v12570_v7  ;;  %9681 = vrot.lane.b32.xlu1 %v9680_v41, %s11103_s12  ;;  %v1740_v7 = vld [vmem:[#allocation2 + $0xbae] sm:$0xff]  ;;  %v1741_v41 = vld [vmem:[#allocation2 + $0xbb6] sm:$0xff] }
 0x197   : > { %9676 = vrot.lane.b32.xlu0 %v9675_v45, %s11103_s12  ;;  %v1738_v45 = vld [vmem:[#allocation2 + $0xb66] sm:$0xff]  ;;  %v9710_v0 = vpack.i.bf16 %v1741_v41, %v1740_v7  ;;  %v9138_v7 = vunpack.i.l.bf16 %v12314_v12 }
 0x198   : > { %v12574_v50 = vpop.permute.xlu1 %9401 }
 0x199   : > { %18579 = vst [vmem:[#allocation57_spill] sm:$0xff] %v12574_v50  ;;  %v12576_v22 = vpop.permute.xlu0 %9396  ;;  %v9143_v50 = vunpack.i.l.bf16 %v12326_v5 }
 0x19a   : > { %18580 = vst [vmem:[#allocation58_spill] sm:$0xff] %v12576_v22  ;;  %9691 = vrot.lane.b32.xlu1 %v9690_v62, %s11103_s12  ;;  %v9705_v22 = vpack.i.bf16 %v1739_v14, %v1738_v45  ;;  %v12599_v45 = vld [vmem:[#allocation2 + $0xdee] sm:$0xff]  ;;  %v12601_v14 = vld [vmem:[#allocation2 + $0xdf6] sm:$0xff] }
 0x19b   : > { %9686 = vrot.lane.b32.xlu0 %v9685_v54, %s11103_s12  ;;  %v1481_v54 = vld [vmem:[#allocation2 + $0x7fa] sm:$0xff] }
 0x19c   : > { %v12580_v32 = vpop.permute.xlu1 %9411 }
 0x19d   : > { %18581 = vst [vmem:[#allocation59_spill] sm:$0xff] %v12580_v32  ;;  %v12582_v19 = vpop.permute.xlu0 %9406  ;;  %v9153_v32 = vunpack.i.l.bf16 %v12324_v13 }
 0x19e   : > { %18582 = vst [vmem:[#allocation60_spill] sm:$0xff] %v12582_v19  ;;  %9701 = vrot.lane.b32.xlu1 %v9700_v23, %s11104_s19  ;;  %v9148_v23 = vunpack.i.l.bf16 %v12312_v39  ;;  %v1483_v39 = vld [vmem:[#allocation2 + $0x842] sm:$0xff]  ;;  %v9154_v19 = vunpack.i.h.bf16 %v12324_v13  ;;  %v12632_v13 = vsel %vm253_vm0, %v1482_v47, %v9149_v48  ;;  %v9163_v47 = vunpack.i.l.bf16 %v12336_v26 }
 0x19f   : > { %9696 = vrot.lane.b32.xlu0 %v9695_v18, %s11104_s19  ;;  %v1477_v18 = vld [vmem:[#allocation2 + $0x76a] sm:$0xff]  ;;  %v9159_v48 = vunpack.i.h.bf16 %v12338_v30  ;;  %v12668_v20 = vsel %vm253_vm0, %v1483_v39, %v9153_v32  ;;  %v9168_v32 = vunpack.i.l.bf16 %v12346_v42 }
 0x1a0   : > { %v12586_v62 = vpop.permute.xlu1 %9421  ;;  %v12635_v10 = vsel %vm253_vm0, %v1477_v18, %v9138_v7  ;;  %v12651_v7 = vld [vmem:[#allocation2 + $0xf16] sm:$0xff] }
 0x1a1   : > { %18583 = vst [vmem:[#allocation61_spill] sm:$0xff] %v12586_v62  ;;  %v12588_v36 = vpop.permute.xlu0 %9416  ;;  %v1484_v62 = vld [vmem:[#allocation2 + $0x84a] sm:$0xff]  ;;  %v12701_v37 = vsel %vm253_vm0, %v1486_v17, %v9159_v48  ;;  %v12717_v17 = vld [vmem:[#allocation2 + $0x6a0] sm:$0xff] }
 0x1a2   : > { %18584 = vst [vmem:[#allocation62_spill] sm:$0xff] %v12588_v36  ;;  %9711 = vrot.lane.b32.xlu1 %v9710_v0, %s11104_s19  ;;  %v9139_v0 = vunpack.i.h.bf16 %v12314_v12  ;;  %v12608_v36 = vld [vmem:[#allocation2 + $0xdae] sm:$0xff]  ;;  %v9144_v12 = vunpack.i.h.bf16 %v12326_v5  ;;  %v12654_v18 = vsel %vm253_vm0, %v1484_v62, %v9154_v19  ;;  %v9173_v62 = vunpack.i.l.bf16 %v12344_v43 }
 0x1a3   : > { %9706 = vrot.lane.b32.xlu0 %v9705_v22, %s11104_s19  ;;  %v1478_v22 = vld [vmem:[#allocation2 + $0x772] sm:$0xff] }
 0x1a4   : > { %v12592_v16 = vpop.permute.xlu1 %9431  ;;  %v1479_v5 = vld [vmem:[#allocation2 + $0x7b2] sm:$0xff]  ;;  %v12642_v27 = vsel %vm253_vm0, %v1478_v22, %v9139_v0  ;;  %v9158_v0 = vunpack.i.l.bf16 %v12338_v30  ;;  %v9174_v22 = vunpack.i.h.bf16 %v12344_v43  ;;  %v12698_v43 = vsel %vm253_vm0, %v1487_v9, %v9163_v47 }
 0x1a5   : > { %18585 = vst [vmem:[#allocation63_spill] sm:$0xff] %v12592_v16  ;;  %v12597_v41 = vpop.permute.xlu0 %9426  ;;  %v12606_v16 = vld [vmem:[#allocation2 + $0xda6] sm:$0xff]  ;;  %v12674_v30 = vsel %vm253_vm0, %v1479_v5, %v9143_v50  ;;  %v12688_v50 = vld [vmem:[#allocation2 + $0x610] sm:$0xff]  ;;  %v12715_v9 = vld [vmem:[#allocation2 + $0x698] sm:$0xff]  ;;  %v9178_v47 = vunpack.i.l.bf16 %v12354_v59 }
 0x1a6   : > { %18586 = vst [vmem:[#allocation64_spill] sm:$0xff] %v12597_v41  ;;  %9721 = vrot.lane.b32.xlu1 %v12382_v55, %s11104_s19  ;;  %v12613_v41 = vld [vmem:[#allocation2 + $0xe7e] sm:$0xff]  ;;  %v12692_v5 = vld [vmem:[#allocation2 + $0x5c8] sm:$0xff]  ;;  %v12736_v42 = vsel %vm253_vm0, %v12180_v11, %v9174_v22  ;;  %v9188_v11 = vunpack.i.l.bf16 %v12362_v63 }
 0x1a7   : > { %9716 = vrot.lane.b32.xlu0 %v12386_v61, %s11104_s19  ;;  %v12629_v61 = vsel %vm253_vm0, %v1481_v54, %v9148_v23  ;;  %v9164_v54 = vunpack.i.h.bf16 %v12336_v26  ;;  %v12649_v23 = vld [vmem:[#allocation2 + $0xf0e] sm:$0xff]  ;;  %v12762_v22 = vld [vmem:[#allocation2 + $0x6e0] sm:$0xff] }
 0x1a8   : > { %v12618_v55 = vpop.permute.xlu1 %9441  ;;  %18594 = vst [vmem:[#allocation71_spill] sm:$0xff] %v12762_v22  ;;  %v18596_v63 = vld [vmem:[#allocation10_spill] sm:$0xff]  ;;  %v12829_v22 = vld [vmem:[#allocation2 + $0x848] sm:$0xff] }
 0x1a9   : > { %18587 = vst [vmem:[#allocation65_spill] sm:$0xff] %v12618_v55  ;;  %v1480_v55 = vld [vmem:[#allocation2 + $0x7ba] sm:$0xff]  ;;  %v12637_v35 = vpop.permute.xlu0 %9436 }
 0x1aa   : > { %18588 = vst [vmem:[#allocation66_spill] sm:$0xff] %v12637_v35  ;;  %9731 = vrot.lane.b32.xlu1 %v12394_v53, %s11104_s19  ;;  %v12663_v53 = vld [vmem:[#allocation2 + $0xec6] sm:$0xff]  ;;  %v12665_v35 = vld [vmem:[#allocation2 + $0xece] sm:$0xff]  ;;  %v12671_v19 = vsel %vm253_vm0, %v1480_v55, %v9144_v12 }
 0x1ab   : > { %9726 = vrot.lane.b32.xlu0 %v12398_v25, %s11104_s19  ;;  %v1485_v25 = vld [vmem:[#allocation2 + $0x88a] sm:$0xff]  ;;  %v12690_v55 = vld [vmem:[#allocation2 + $0x5c0] sm:$0xff] }
 0x1ac   : > { %v12677_v26 = vpop.permute.xlu1 %9451  ;;  %v12708_v12 = vsel %vm253_vm0, %v1485_v25, %v9158_v0  ;;  %v12730_v25 = vld [vmem:[#allocation2 + $0x650] sm:$0xff]  ;;  %v12749_v0 = vld [vmem:[#allocation2 + $0x728] sm:$0xff] }
 0x1ad   : > { %18589 = vst [vmem:[#allocation67_spill] sm:$0xff] %v12677_v26  ;;  %v12684_v39 = vpop.permute.xlu0 %9446  ;;  %v12695_v26 = vsel %vm253_vm0, %v1488_v3, %v9164_v54  ;;  %v9183_v3 = vunpack.i.l.bf16 %v12352_v58  ;;  %v9179_v54 = vunpack.i.h.bf16 %v12354_v59  ;;  %v12744_v59 = vsel %vm253_vm0, %v12184_v38, %v9169_v8  ;;  %v12760_v8 = vld [vmem:[#allocation2 + $0x730] sm:$0xff]  ;;  %v18601_v38 = vld [vmem:[#allocation11_spill] sm:$0xff] }
 0x1ae   : > { %18590 = vst [vmem:[#allocation68_spill] sm:$0xff] %v12684_v39  ;;  %9741 = vrot.lane.b32.xlu1 %v12411_v60, %s11104_s19  ;;  %v9184_v39 = vunpack.i.h.bf16 %v12352_v58  ;;  %v12721_v60 = vsel %vm253_vm0, %v12178_v29, %v9173_v62  ;;  %v12740_v29 = vsel %vm253_vm0, %v12182_v33, %v9168_v32  ;;  %v9194_v62 = vunpack.i.h.bf16 %v12360_v31  ;;  %v12764_v32 = vld [vmem:[#allocation2 + $0x6e8] sm:$0xff] }
 0x1af   : > { %9736 = vrot.lane.b32.xlu0 %v12415_v44, %s11104_s19  ;;  %v12732_v44 = vld [vmem:[#allocation2 + $0x658] sm:$0xff]  ;;  %v18593_v33 = vpack.i.bf16 %v12601_v14, %v12599_v45  ;;  %v12776_v45 = vsel %vm253_vm0, %v18598_v52, %v9179_v54  ;;  %v18600_v14 = vpack.i.bf16 %v12608_v36, %v12606_v16  ;;  %v18607_v36 = vld [vmem:[#allocation14_spill] sm:$0xff] }
 0x1b0   : > { %v12724_v48 = vpop.permute.xlu1 %9461  ;;  %18599 = vst [vmem:[#allocation12_spill] sm:$0xff] %v12776_v45  ;;  %v12793_v54 = vld [vmem:[#allocation2 + $0x7b8] sm:$0xff]  ;;  %v12795_v45 = vld [vmem:[#allocation2 + $0x7c0] sm:$0xff]  ;;  %v12799_v16 = vsel %vm253_vm0, %v18607_v36, %v9194_v62  ;;  %v18612_v62 = vld [vmem:[#allocation16_spill] sm:$0xff] }
 0x1b1   : > { %18591 = vst [vmem:[#allocation69_spill] sm:$0xff] %v12724_v48  ;;  %v12747_v58 = vpop.permute.xlu0 %9456  ;;  %v9193_v48 = vunpack.i.l.bf16 %v12360_v31  ;;  %v12768_v31 = vsel %vm253_vm0, %v12196_v46, %v9184_v39  ;;  %v12786_v46 = vsel %vm253_vm0, %v18601_v38, %v9178_v47  ;;  %v18603_v39 = vld [vmem:[#allocation25_spill] sm:$0xff]  ;;  %18608 = vst [vmem:[#allocation14_spill] sm:$0xff] %v12799_v16  ;;  %v12818_v36 = vsel %vm253_vm0, %v18612_v62, %v9189_v40  ;;  %v18616_v38 = vld [vmem:[#allocation27_spill] sm:$0xff] }
 0x1b2   : > { %18592 = vst [vmem:[#allocation70_spill] sm:$0xff] %v12747_v58  ;;  %9751 = vrot.lane.b32.xlu1 %v18593_v33, %s11104_s19  ;;  %18595 = vst [vmem:[#allocation72_spill] sm:$0xff] %v12768_v31  ;;  %v12772_v58 = vsel %vm253_vm0, %v18596_v63, %v9183_v3  ;;  %v9204_v31 = vunpack.i.h.bf16 %v18603_v39  ;;  %v9203_v3 = vunpack.i.l.bf16 %v18603_v39  ;;  %v18604_v63 = vld [vmem:[#allocation26_spill] sm:$0xff]  ;;  %v12808_v33 = vld [vmem:[#allocation2 + $0x770] sm:$0xff]  ;;  %v9214_v16 = vunpack.i.h.bf16 %v18616_v38 }
 0x1b3   : > { %18597 = vst [vmem:[#allocation10_spill] sm:$0xff] %v12772_v58  ;;  %9746 = vrot.lane.b32.xlu0 %v18600_v14, %s11104_s19  ;;  %18602 = vst [vmem:[#allocation11_spill] sm:$0xff] %v12786_v46  ;;  %v9199_v58 = vunpack.i.h.bf16 %v18604_v63  ;;  %v9198_v14 = vunpack.i.l.bf16 %v18604_v63  ;;  %v18610_v46 = vld [vmem:[#allocation13_spill] sm:$0xff]  ;;  %v18614_v63 = vld [vmem:[#allocation15_spill] sm:$0xff]  ;;  %v18617_v39 = vpack.i.bf16 %v12622_v34, %v12613_v41 }
 0x1b4   : > { %v12791_v52 = vpop.permute.xlu1 %9471  ;;  %18606 = vst [vmem:[#allocation26_spill] sm:$0xff] %v12793_v54  ;;  %v12814_v56 = vsel %vm253_vm0, %v18610_v46, %v9193_v48  ;;  %18613 = vst [vmem:[#allocation16_spill] sm:$0xff] %v12818_v36  ;;  %v9213_v48 = vunpack.i.l.bf16 %v18616_v38  ;;  %v18618_v46 = vld [vmem:[#allocation28_spill] sm:$0xff]  ;;  %v12842_v34 = vld [vmem:[#allocation2 + $0x800] sm:$0xff] }
 0x1b5   : > { %18605 = vst [vmem:[#allocation25_spill] sm:$0xff] %v12791_v52  ;;  %v12802_v47 = vpop.permute.xlu0 %9466  ;;  %v12810_v52 = vld [vmem:[#allocation2 + $0x778] sm:$0xff]  ;;  %18611 = vst [vmem:[#allocation13_spill] sm:$0xff] %v12814_v56  ;;  %v9209_v56 = vunpack.i.h.bf16 %v18618_v46  ;;  %v9208_v40 = vunpack.i.l.bf16 %v18618_v46  ;;  %v12844_v41 = vld [vmem:[#allocation2 + $0x808] sm:$0xff] }
 0x1b6   : > { %18609 = vst [vmem:[#allocation73_spill] sm:$0xff] %v12802_v47  ;;  %v12822_v47 = vsel %vm253_vm0, %v18614_v63, %v9188_v11  ;;  %9761 = vrot.lane.b32.xlu1 %v18617_v39, %s11104_s19  ;;  %v18619_v11 = vpack.i.bf16 %v12626_v24, %v12624_v21  ;;  %v12840_v63 = vld [vmem:[#allocation2 + $0x850] sm:$0xff]  ;;  %18620 = vst [vmem:[#allocation27_spill] sm:$0xff] %v12842_v34  ;;  %v18622_v39 = vld [vmem:[#allocation18_spill] sm:$0xff] }
 0x1b7   : > { %18615 = vst [vmem:[#allocation15_spill] sm:$0xff] %v12822_v47  ;;  %18621 = vst [vmem:[#allocation28_spill] sm:$0xff] %v12844_v41  ;;  %v12848_v38 = vsel %vm253_vm0, %v18622_v39, %v9204_v31  ;;  %v18624_v36 = vld [vmem:[#allocation17_spill] sm:$0xff]  ;;  %v18626_v47 = vld [vmem:[#allocation20_spill] sm:$0xff]  ;;  %v9224_v31 = vunpack.i.h.bf16 %v12388_v15  ;;  %v9223_v39 = vunpack.i.l.bf16 %v12388_v15 }
 0x1b8   : > { %9756 = vrot.lane.b32.xlu0 %v18619_v11, %s11104_s19  ;;  %18623 = vst [vmem:[#allocation18_spill] sm:$0xff] %v12848_v38  ;;  %v12852_v46 = vsel %vm253_vm0, %v18624_v36, %v9203_v3  ;;  %v12856_v24 = vsel %vm253_vm0, %v18626_v47, %v9199_v58  ;;  %v12858_v21 = vpop.permute.xlu1 %9481  ;;  %v18629_v62 = vld [vmem:[#allocation19_spill] sm:$0xff]  ;;  %v18631_v38 = vld [vmem:[#allocation29_spill] sm:$0xff]  ;;  %v12873_v58 = vld [vmem:[#allocation2 + $0x8e0] sm:$0xff] }
 0x1b9   : > { %18625 = vst [vmem:[#allocation17_spill] sm:$0xff] %v12852_v46  ;;  %18627 = vst [vmem:[#allocation20_spill] sm:$0xff] %v12856_v24  ;;  %v12864_v54 = vsel %vm253_vm0, %v18629_v62, %v9198_v14  ;;  %v9219_v3 = vunpack.i.h.bf16 %v18631_v38  ;;  %v12869_v36 = vpop.permute.xlu0 %9476  ;;  %v12871_v46 = vld [vmem:[#allocation2 + $0x8d8] sm:$0xff]  ;;  %v18633_v47 = vld [vmem:[#allocation22_spill] sm:$0xff]  ;;  %v9218_v11 = vunpack.i.l.bf16 %v18631_v38  ;;  %v18634_v14 = vpack.i.bf16 %v12651_v7, %v12649_v23 }
 0x1ba   : > { %18628 = vst [vmem:[#allocation74_spill] sm:$0xff] %v12858_v21  ;;  %18630 = vst [vmem:[#allocation19_spill] sm:$0xff] %v12864_v54  ;;  %v12877_v21 = vsel %vm253_vm0, %v18633_v47, %v9214_v16  ;;  %v12890_v24 = vld [vmem:[#allocation2 + $0x898] sm:$0xff]  ;;  %v18636_v38 = vld [vmem:[#allocation24_spill] sm:$0xff]  ;;  %v18641_v62 = vpack.i.bf16 %v12665_v35, %v12663_v53  ;;  %v12922_v35 = vsel %vm1230_vm2, %v12674_v30, %v9223_v39  ;;  %v9239_v30 = vunpack.i.h.bf16 %v12423_v6 }
 0x1bb   : > { %18632 = vst [vmem:[#allocation29_spill] sm:$0xff] %v12869_v36  ;;  %9771 = vrot.lane.b32.xlu1 %v18634_v14, %s11104_s19  ;;  %v12888_v36 = vld [vmem:[#allocation2 + $0x890] sm:$0xff]  ;;  %v18635_v54 = vld [vmem:[#allocation21_spill] sm:$0xff]  ;;  %v12898_v47 = vsel %vm253_vm0, %v18636_v38, %v9209_v56  ;;  %v18638_v23 = vld [vmem:[#allocation23_spill] sm:$0xff]  ;;  %v12926_v53 = vsel %vm1230_vm2, %v12642_v27, %v9219_v3  ;;  %v18644_v27 = vpack.i.bf16 %v12688_v50, %v12679_v57 }
 0x1bc   : > { %v12894_v16 = vsel %vm253_vm0, %v18635_v54, %v9213_v48  ;;  %18637 = vst [vmem:[#allocation22_spill] sm:$0xff] %v12898_v47  ;;  %v12902_v7 = vsel %vm253_vm0, %v18638_v23, %v9208_v40  ;;  %v18640_v14 = vld [vmem:[#allocation30_spill] sm:$0xff]  ;;  %9766 = vrot.lane.b32.xlu0 %v18641_v62, %s11104_s19  ;;  %v3723_v34 = vld [vmem:[#allocation2 + $0x968] sm:$0xff]  ;;  %v9229_v54 = vunpack.i.h.bf16 %v12407_v4  ;;  %v9228_v48 = vunpack.i.l.bf16 %v12407_v4  ;;  %v12912_v56 = vpop.permute.xlu1 %9491  ;;  %v3724_v38 = vld [vmem:[#allocation2 + $0x970] sm:$0xff] }
 0x1bd   : > { %18639 = vst [vmem:[#allocation21_spill] sm:$0xff] %v12902_v7  ;;  %v9234_v15 = vunpack.i.h.bf16 %v18640_v14  ;;  %v9233_v41 = vunpack.i.l.bf16 %v18640_v14  ;;  %18642 = vst [vmem:[#allocation24_spill] sm:$0xff] %v12912_v56  ;;  %v3721_v23 = vld [vmem:[#allocation2 + $0x920] sm:$0xff]  ;;  %v3722_v47 = vld [vmem:[#allocation2 + $0x928] sm:$0xff]  ;;  %v12918_v7 = vsel %vm1230_vm2, %v12671_v19, %v9224_v31  ;;  %v12928_v4 = vpop.permute.xlu0 %9486  ;;  %v12934_v14 = vsel %vm1230_vm2, %v12635_v10, %v9218_v11 }
 0x1be   : > { %18643 = vst [vmem:[#allocation23_spill] sm:$0xff] %v12928_v4  ;;  %v9244_v19 = vunpack.i.h.bf16 %v12419_v49  ;;  %v9243_v31 = vunpack.i.l.bf16 %v12419_v49  ;;  %v3727_v39 = vld [vmem:[#allocation2 + $0x9f8] sm:$0xff]  ;;  %v3728_v3 = vld [vmem:[#allocation2 + $0xa00] sm:$0xff]  ;;  %v9238_v10 = vunpack.i.l.bf16 %v12423_v6  ;;  %v18645_v11 = vpack.i.bf16 %v12692_v5, %v12690_v55  ;;  %v3725_v4 = vld [vmem:[#allocation2 + $0x9b0] sm:$0xff] }
 0x1bf   : > { %9781 = vrot.lane.b32.xlu1 %v18644_v27, %s11097_s28  ;;  %v12945_v62 = vsel %vm1230_vm2, %v12654_v18, %v9234_v15  ;;  %v12952_v49 = vpack.i.bf16 %v3724_v38, %v3723_v34  ;;  %v12954_v40 = vpack.i.bf16 %v3722_v47, %v3721_v23  ;;  %v3726_v57 = vld [vmem:[#allocation2 + $0x9b8] sm:$0xff]  ;;  %v12958_v50 = vsel %vm1230_vm2, %v12668_v20, %v9233_v41 }
 0x1c0   : > { %9776 = vrot.lane.b32.xlu0 %v18645_v11, %s11097_s28  ;;  %v12962_v18 = vsel %vm1230_vm2, %v12632_v13, %v9229_v54  ;;  %v12966_v6 = vsel %vm1230_vm2, %v12629_v61, %v9228_v48  ;;  %v9253_v55 = vunpack.i.l.bf16 %v12429_v28  ;;  %v12969_v5 = vpop.permute.xlu1 %9501  ;;  %v12971_v34 = vld [vmem:[#allocation2 + $0x614] sm:$0xff]  ;;  %v9254_v15 = vunpack.i.h.bf16 %v12429_v28  ;;  %v12980_v54 = vld [vmem:[#allocation2 + $0x61c] sm:$0xff]  ;;  %v12982_v61 = vld [vmem:[#allocation2 + $0x5cc] sm:$0xff] }
 0x1c1   : > { %18646 = vst [vmem:[#allocation30_spill] sm:$0xff] %v12952_v49  ;;  %18647 = vst [vmem:[#allocation75_spill] sm:$0xff] %v12954_v40  ;;  %v9249_v47 = vunpack.i.h.bf16 %v12431_v51  ;;  %v9248_v20 = vunpack.i.l.bf16 %v12431_v51  ;;  %v12976_v41 = vpop.permute.xlu0 %9496  ;;  %v12978_v13 = vpack.i.bf16 %v3728_v3, %v3727_v39  ;;  %v12984_v48 = vld [vmem:[#allocation2 + $0x5d4] sm:$0xff]  ;;  %v12988_v38 = vsel %vm1230_vm2, %v12695_v26, %v9244_v19 }
 0x1c2   : > { %18648 = vst [vmem:[#allocation76_spill] sm:$0xff] %v12969_v5  ;;  %18649 = vst [vmem:[#allocation77_spill] sm:$0xff] %v12976_v41  ;;  %v12992_v28 = vsel %vm1230_vm2, %v12698_v43, %v9243_v31  ;;  %v12996_v51 = vsel %vm1230_vm2, %v12701_v37, %v9239_v30  ;;  %v18652_v23 = vpack.i.bf16 %v12717_v17, %v12715_v9  ;;  %v9264_v26 = vunpack.i.h.bf16 %v12439_v1  ;;  %v13015_v31 = vld [vmem:[#allocation2 + $0x6a4] sm:$0xff]  ;;  %v13017_v9 = vld [vmem:[#allocation2 + $0x6ac] sm:$0xff] }
 0x1c3   : > { %18650 = vst [vmem:[#allocation78_spill] sm:$0xff] %v12978_v13  ;;  %18651 = vst [vmem:[#allocation79_spill] sm:$0xff] %v12982_v61  ;;  %v13002_v27 = vpack.i.bf16 %v3726_v57, %v3725_v4  ;;  %v13006_v39 = vsel %vm1230_vm2, %v12708_v12, %v9238_v10  ;;  %v9263_v43 = vunpack.i.l.bf16 %v12439_v1  ;;  %v9258_v19 = vunpack.i.l.bf16 %v12443_v2  ;;  %v18660_v10 = vld [vmem:[#allocation31_spill] sm:$0xff]  ;;  %v18673_v41 = vld [vmem:[#allocation12_spill] sm:$0xff] }
 0x1c4   : > { %9791 = vrot.lane.b32.xlu1 %v18652_v23, %s11097_s28  ;;  %v18654_v37 = vpack.i.bf16 %v12732_v44, %v12730_v25  ;;  %18655 = vst [vmem:[#allocation81_spill] sm:$0xff] %v13015_v31  ;;  %18656 = vst [vmem:[#allocation82_spill] sm:$0xff] %v13017_v9  ;;  %v13021_v17 = vsel %vm1230_vm2, %v12721_v60, %v9253_v55  ;;  %v9259_v12 = vunpack.i.h.bf16 %v12443_v2  ;;  %v13024_v4 = vpop.permute.xlu1 %9511  ;;  %v13030_v25 = vld [vmem:[#allocation2 + $0x65c] sm:$0xff]  ;;  %v13032_v44 = vld [vmem:[#allocation2 + $0x664] sm:$0xff]  ;;  %v9273_v11 = vunpack.i.l.bf16 %v18660_v10 }
 0x1c5   : > { %18653 = vst [vmem:[#allocation80_spill] sm:$0xff] %v13002_v27  ;;  %18657 = vst [vmem:[#allocation83_spill] sm:$0xff] %v13024_v4  ;;  %v13036_v3 = vsel %vm1230_vm2, %v12736_v42, %v9254_v15  ;;  %v13040_v60 = vsel %vm1230_vm2, %v12740_v29, %v9248_v20  ;;  %v13044_v2 = vsel %vm1230_vm2, %v12744_v59, %v9249_v47  ;;  %v13047_v57 = vpop.permute.xlu0 %9506  ;;  %v13049_v55 = vld [vmem:[#allocation2 + $0x734] sm:$0xff]  ;;  %v9274_v23 = vunpack.i.h.bf16 %v18660_v10  ;;  %v13060_v15 = vld [vmem:[#allocation2 + $0x73c] sm:$0xff] }
 0x1c6   : > { %9786 = vrot.lane.b32.xlu0 %v18654_v37, %s11097_s28  ;;  %18658 = vst [vmem:[#allocation84_spill] sm:$0xff] %v13030_v25  ;;  %18659 = vst [vmem:[#allocation85_spill] sm:$0xff] %v13032_v44  ;;  %v18663_v37 = vld [vmem:[#allocation32_spill] sm:$0xff]  ;;  %v18664_v29 = vpack.i.bf16 %v12760_v8, %v12749_v0  ;;  %v18668_v10 = vld [vmem:[#allocation10_spill] sm:$0xff] }
 0x1c7   : > { %18661 = vst [vmem:[#allocation31_spill] sm:$0xff] %v13047_v57  ;;  %18662 = vst [vmem:[#allocation86_spill] sm:$0xff] %v13049_v55  ;;  %v9269_v30 = vunpack.i.h.bf16 %v18663_v37  ;;  %v9268_v42 = vunpack.i.l.bf16 %v18663_v37  ;;  %v13062_v47 = vld [vmem:[#allocation2 + $0x6ec] sm:$0xff]  ;;  %v13064_v20 = vld [vmem:[#allocation2 + $0x6f4] sm:$0xff]  ;;  %v13068_v1 = vsel %vm1230_vm2, %v18668_v10, %v9263_v43  ;;  %v13086_v43 = vsel %vm1230_vm2, %v18673_v41, %v9259_v12 }
 0x1c8   : > { %9801 = vrot.lane.b32.xlu1 %v18664_v29, %s11097_s28  ;;  %18665 = vst [vmem:[#allocation32_spill] sm:$0xff] %v13060_v15  ;;  %18666 = vst [vmem:[#allocation87_spill] sm:$0xff] %v13062_v47  ;;  %v18669_v37 = vld [vmem:[#allocation72_spill] sm:$0xff]  ;;  %v18670_v4 = vld [vmem:[#allocation11_spill] sm:$0xff] }
 0x1c9   : > { %18667 = vst [vmem:[#allocation88_spill] sm:$0xff] %v13064_v20  ;;  %v13072_v57 = vsel %vm1230_vm2, %v18669_v37, %v9264_v26  ;;  %v13076_v0 = vsel %vm1230_vm2, %v18670_v4, %v9258_v19  ;;  %v18671_v8 = vld [vmem:[#allocation71_spill] sm:$0xff]  ;;  %v18674_v10 = vld [vmem:[#allocation33_spill] sm:$0xff]  ;;  %v18675_v37 = vld [vmem:[#allocation34_spill] sm:$0xff]  ;;  %v13091_v19 = vpop.permute.xlu1 %9521  ;;  %v13102_v41 = vpop.permute.xlu0 %9516 }
 0x1ca   : > { %v18672_v29 = vpack.i.bf16 %v12764_v32, %v18671_v8  ;;  %v9284_v5 = vunpack.i.h.bf16 %v18674_v10  ;;  %v9283_v26 = vunpack.i.l.bf16 %v18674_v10  ;;  %v9278_v56 = vunpack.i.l.bf16 %v18675_v37  ;;  %18676 = vst [vmem:[#allocation10_spill] sm:$0xff] %v13091_v19  ;;  %v13093_v4 = vld [vmem:[#allocation2 + $0x7c4] sm:$0xff]  ;;  %v13095_v31 = vld [vmem:[#allocation2 + $0x7cc] sm:$0xff]  ;;  %v18679_v32 = vld [vmem:[#allocation13_spill] sm:$0xff] }
 0x1cb   : > { %18677 = vst [vmem:[#allocation72_spill] sm:$0xff] %v13093_v4  ;;  %18678 = vst [vmem:[#allocation11_spill] sm:$0xff] %v13095_v31  ;;  %v13099_v8 = vsel %vm1230_vm2, %v18679_v32, %v9273_v11  ;;  %v13108_v59 = vld [vmem:[#allocation2 + $0x77c] sm:$0xff]  ;;  %v13110_v19 = vld [vmem:[#allocation2 + $0x784] sm:$0xff] }
 0x1cc   : > { %9796 = vrot.lane.b32.xlu0 %v18672_v29, %s11097_s28  ;;  %v9279_v29 = vunpack.i.h.bf16 %v18675_v37  ;;  %18680 = vst [vmem:[#allocation71_spill] sm:$0xff] %v13102_v41  ;;  %18681 = vst [vmem:[#allocation12_spill] sm:$0xff] %v13108_v59  ;;  %v18683_v25 = vld [vmem:[#allocation14_spill] sm:$0xff]  ;;  %v18684_v11 = vld [vmem:[#allocation15_spill] sm:$0xff] }
 0x1cd   : > { %18682 = vst [vmem:[#allocation33_spill] sm:$0xff] %v13110_v19  ;;  %v13114_v44 = vsel %vm1230_vm2, %v18683_v25, %v9274_v23  ;;  %v13118_v32 = vsel %vm1230_vm2, %v18684_v11, %v9268_v42  ;;  %v18685_v37 = vld [vmem:[#allocation16_spill] sm:$0xff]  ;;  %v18686_v12 = vld [vmem:[#allocation35_spill] sm:$0xff]  ;;  %v18687_v10 = vld [vmem:[#allocation26_spill] sm:$0xff] }
 0x1ce   : > { %v13122_v41 = vsel %vm1230_vm2, %v18685_v37, %v9269_v30  ;;  %v9293_v55 = vunpack.i.l.bf16 %v18686_v12  ;;  %v18688_v47 = vpack.i.bf16 %v12795_v45, %v18687_v10  ;;  %v13129_v20 = vld [vmem:[#allocation2 + $0x854] sm:$0xff]  ;;  %v9294_v25 = vunpack.i.h.bf16 %v18686_v12  ;;  %v13140_v37 = vld [vmem:[#allocation2 + $0x85c] sm:$0xff]  ;;  %v13142_v45 = vld [vmem:[#allocation2 + $0x80c] sm:$0xff] }
 0x1cf   : > { %18689 = vst [vmem:[#allocation34_spill] sm:$0xff] %v13129_v20  ;;  %v18690_v23 = vld [vmem:[#allocation36_spill] sm:$0xff]  ;;  %v18691_v30 = vpack.i.bf16 %v12810_v52, %v12808_v33  ;;  %18692 = vst [vmem:[#allocation13_spill] sm:$0xff] %v13140_v37  ;;  %v18695_v10 = vld [vmem:[#allocation17_spill] sm:$0xff]  ;;  %v13158_v52 = vpop.permute.xlu1 %9531 }
 0x1d0   : > { %9811 = vrot.lane.b32.xlu1 %v18688_v47, %s11097_s28  ;;  %v9289_v15 = vunpack.i.h.bf16 %v18690_v23  ;;  %v9288_v42 = vunpack.i.l.bf16 %v18690_v23  ;;  %18693 = vst [vmem:[#allocation14_spill] sm:$0xff] %v13142_v45  ;;  %v13144_v47 = vld [vmem:[#allocation2 + $0x814] sm:$0xff]  ;;  %v13148_v12 = vsel %vm1230_vm2, %v18695_v10, %v9283_v26  ;;  %v18697_v9 = vld [vmem:[#allocation18_spill] sm:$0xff]  ;;  %v18699_v61 = vld [vmem:[#allocation19_spill] sm:$0xff] }
 0x1d1   : > { %9806 = vrot.lane.b32.xlu0 %v18691_v30, %s11097_s28  ;;  %18694 = vst [vmem:[#allocation15_spill] sm:$0xff] %v13144_v47  ;;  %18696 = vst [vmem:[#allocation16_spill] sm:$0xff] %v13148_v12  ;;  %v13152_v23 = vsel %vm1230_vm2, %v18697_v9, %v9284_v5  ;;  %v13156_v33 = vsel %vm1230_vm2, %v18699_v61, %v9278_v56  ;;  %v18701_v11 = vld [vmem:[#allocation20_spill] sm:$0xff]  ;;  %v18702_v31 = vld [vmem:[#allocation37_spill] sm:$0xff]  ;;  %v13169_v9 = vpop.permute.xlu0 %9526  ;;  %v13177_v61 = vsel %vm1230_vm2, %v12894_v16, %v9293_v55 }
 0x1d2   : > { %18698 = vst [vmem:[#allocation35_spill] sm:$0xff] %v13152_v23  ;;  %18700 = vst [vmem:[#allocation26_spill] sm:$0xff] %v13158_v52  ;;  %v13164_v4 = vsel %vm1230_vm2, %v18701_v11, %v9279_v29  ;;  %v9304_v26 = vunpack.i.h.bf16 %v18702_v31  ;;  %v9303_v10 = vunpack.i.l.bf16 %v18702_v31  ;;  %v18703_v12 = vld [vmem:[#allocation38_spill] sm:$0xff]  ;;  %v13173_v56 = vld [vmem:[#allocation2 + $0x8ec] sm:$0xff]  ;;  %v18705_v29 = vpack.i.bf16 %v12840_v63, %v12829_v22 }
 0x1d3   : > { %v9298_v5 = vunpack.i.l.bf16 %v18703_v12  ;;  %18704 = vst [vmem:[#allocation36_spill] sm:$0xff] %v13169_v9  ;;  %v13171_v23 = vld [vmem:[#allocation2 + $0x8e4] sm:$0xff]  ;;  %v9299_v30 = vunpack.i.h.bf16 %v18703_v12  ;;  %v13188_v52 = vld [vmem:[#allocation2 + $0x89c] sm:$0xff]  ;;  %v13194_v16 = vsel %vm1230_vm2, %v12877_v21, %v9294_v25  ;;  %v18711_v11 = vld [vmem:[#allocation28_spill] sm:$0xff] }
 0x1d4   : > { %9821 = vrot.lane.b32.xlu1 %v18705_v29, %s11097_s28  ;;  %18706 = vst [vmem:[#allocation17_spill] sm:$0xff] %v13188_v52  ;;  %v13190_v9 = vld [vmem:[#allocation2 + $0x8a4] sm:$0xff]  ;;  %v18707_v55 = vld [vmem:[#allocation21_spill] sm:$0xff]  ;;  %v18714_v21 = vld [vmem:[#allocation40_spill] sm:$0xff] }
 0x1d5   : > { %v13198_v12 = vsel %vm1230_vm2, %v18707_v55, %v9288_v42  ;;  %v18708_v22 = vld [vmem:[#allocation22_spill] sm:$0xff]  ;;  %v18710_v29 = vld [vmem:[#allocation39_spill] sm:$0xff]  ;;  %v3755_v20 = vld [vmem:[#allocation2 + $0x974] sm:$0xff]  ;;  %v9309_v25 = vunpack.i.h.bf16 %v18714_v21  ;;  %v9308_v59 = vunpack.i.l.bf16 %v18714_v21  ;;  %v13212_v42 = vpop.permute.xlu1 %9541  ;;  %v13234_v21 = vsel %vm2854_vm3, %v12926_v53, %v9299_v30 }
 0x1d6   : > { %v13202_v63 = vsel %vm1230_vm2, %v18708_v22, %v9289_v15  ;;  %v9313_v31 = vunpack.i.l.bf16 %v18710_v29  ;;  %v18712_v45 = vld [vmem:[#allocation27_spill] sm:$0xff]  ;;  %v9314_v37 = vunpack.i.h.bf16 %v18710_v29  ;;  %18715 = vst [vmem:[#allocation19_spill] sm:$0xff] %v13212_v42  ;;  %v3756_v55 = vld [vmem:[#allocation2 + $0x97c] sm:$0xff]  ;;  %v3754_v19 = vld [vmem:[#allocation2 + $0x934] sm:$0xff]  ;;  %v18720_v30 = vpack.i.bf16 %v12890_v24, %v12888_v36 }
 0x1d7   : > { %18709 = vst [vmem:[#allocation18_spill] sm:$0xff] %v13202_v63  ;;  %v18713_v47 = vpack.i.bf16 %v18711_v11, %v18712_v45  ;;  %v3753_v22 = vld [vmem:[#allocation2 + $0x92c] sm:$0xff]  ;;  %v13218_v63 = vsel %vm2854_vm3, %v12922_v35, %v9303_v10  ;;  %v13222_v45 = vsel %vm2854_vm3, %v12918_v7, %v9304_v26  ;;  %v13228_v11 = vpop.permute.xlu0 %9536  ;;  %v18717_v15 = vld [vmem:[#allocation41_spill] sm:$0xff]  ;;  %v18718_v42 = vld [vmem:[#allocation42_spill] sm:$0xff] }
 0x1d8   : > { %18716 = vst [vmem:[#allocation20_spill] sm:$0xff] %v13228_v11  ;;  %v9324_v35 = vunpack.i.h.bf16 %v18717_v15  ;;  %v9323_v10 = vunpack.i.l.bf16 %v18717_v15  ;;  %v9318_v7 = vunpack.i.l.bf16 %v18718_v42  ;;  %v3759_v26 = vld [vmem:[#allocation2 + $0xa04] sm:$0xff]  ;;  %v13245_v29 = vsel %vm2854_vm3, %v12958_v50, %v9313_v31  ;;  %v3757_v52 = vld [vmem:[#allocation2 + $0x9bc] sm:$0xff] }
 0x1d9   : > { %9816 = vrot.lane.b32.xlu0 %v18713_v47, %s11097_s28  ;;  %v13226_v47 = vsel %vm2854_vm3, %v12934_v14, %v9298_v5  ;;  %v18719_v14 = vpack.i.bf16 %v12873_v58, %v12871_v46  ;;  %v3760_v5 = vld [vmem:[#allocation2 + $0xa0c] sm:$0xff]  ;;  %v9319_v53 = vunpack.i.h.bf16 %v18718_v42  ;;  %v13252_v15 = vpack.i.bf16 %v3756_v55, %v3755_v20  ;;  %v3758_v46 = vld [vmem:[#allocation2 + $0x9c4] sm:$0xff]  ;;  %v13269_v20 = vpop.permute.xlu1 %9551 }
 0x1da   : > { %v13254_v11 = vpack.i.bf16 %v3754_v19, %v3753_v22  ;;  %v13258_v58 = vsel %vm2854_vm3, %v12945_v62, %v9314_v37  ;;  %v13262_v50 = vsel %vm2854_vm3, %v12966_v6, %v9308_v59  ;;  %v13266_v31 = vsel %vm2854_vm3, %v12962_v18, %v9309_v25  ;;  %v18723_v24 = vld [vmem:[#allocation43_spill] sm:$0xff]  ;;  %18724 = vst [vmem:[#allocation21_spill] sm:$0xff] %v13269_v20  ;;  %v13271_v19 = vld [vmem:[#allocation2 + $0x95c] sm:$0xff]  ;;  %v18726_v55 = vld [vmem:[#allocation44_spill] sm:$0xff] }
 0x1db   : > { %9831 = vrot.lane.b32.xlu1 %v18719_v14, %s11097_s28  ;;  %18721 = vst [vmem:[#allocation37_spill] sm:$0xff] %v13252_v15  ;;  %v9333_v36 = vunpack.i.l.bf16 %v18723_v24  ;;  %18725 = vst [vmem:[#allocation22_spill] sm:$0xff] %v13271_v19  ;;  %v9334_v42 = vunpack.i.h.bf16 %v18723_v24  ;;  %v9329_v22 = vunpack.i.h.bf16 %v18726_v55  ;;  %v9328_v62 = vunpack.i.l.bf16 %v18726_v55  ;;  %v13276_v37 = vpop.permute.xlu0 %9546  ;;  %v13280_v59 = vld [vmem:[#allocation2 + $0x964] sm:$0xff]  ;;  %v13282_v18 = vld [vmem:[#allocation2 + $0x914] sm:$0xff] }
 0x1dc   : > { %18722 = vst [vmem:[#allocation38_spill] sm:$0xff] %v13254_v11  ;;  %18727 = vst [vmem:[#allocation39_spill] sm:$0xff] %v13276_v37  ;;  %v13278_v6 = vpack.i.bf16 %v3760_v5, %v3759_v26  ;;  %v13284_v25 = vld [vmem:[#allocation2 + $0x91c] sm:$0xff]  ;;  %v13288_v14 = vsel %vm2854_vm3, %v12992_v28, %v9323_v10  ;;  %v13296_v24 = vsel %vm2854_vm3, %v13006_v39, %v9318_v7  ;;  %v13311_v39 = vld [vmem:[#allocation2 + $0x9ec] sm:$0xff] }
 0x1dd   : > { %9826 = vrot.lane.b32.xlu0 %v18720_v30, %s11097_s28  ;;  %18729 = vst [vmem:[#allocation27_spill] sm:$0xff] %v13280_v59  ;;  %18730 = vst [vmem:[#allocation40_spill] sm:$0xff] %v13282_v18  ;;  %v13292_v30 = vsel %vm2854_vm3, %v12988_v38, %v9324_v35  ;;  %v13300_v26 = vpack.i.bf16 %v3758_v46, %v3757_v52  ;;  %v13304_v5 = vsel %vm2854_vm3, %v12996_v51, %v9319_v53  ;;  %v18733_v55 = vld [vmem:[#allocation45_spill] sm:$0xff]  ;;  %v18734_v37 = vld [vmem:[#allocation46_spill] sm:$0xff]  ;;  %v13320_v7 = vpop.permute.xlu1 %9561 }
 0x1de   : > { %18728 = vst [vmem:[#allocation28_spill] sm:$0xff] %v13278_v6  ;;  %18731 = vst [vmem:[#allocation41_spill] sm:$0xff] %v13284_v25  ;;  %v9344_v28 = vunpack.i.h.bf16 %v18733_v55  ;;  %v9343_v10 = vunpack.i.l.bf16 %v18733_v55  ;;  %v9338_v38 = vunpack.i.l.bf16 %v18734_v37  ;;  %v13313_v35 = vld [vmem:[#allocation2 + $0x9f4] sm:$0xff]  ;;  %v13317_v52 = vsel %vm2854_vm3, %v13021_v17, %v9333_v36  ;;  %v13326_v55 = vld [vmem:[#allocation2 + $0x9a4] sm:$0xff] }
 0x1df   : > { %9841 = vrot.lane.b32.xlu1 %v12952_v49, %s11097_s28  ;;  %18732 = vst [vmem:[#allocation42_spill] sm:$0xff] %v13300_v26  ;;  %18735 = vst [vmem:[#allocation43_spill] sm:$0xff] %v13311_v39  ;;  %v9339_v51 = vunpack.i.h.bf16 %v18734_v37  ;;  %v13332_v49 = vsel %vm2854_vm3, %v13036_v3, %v9334_v42  ;;  %v13336_v17 = vsel %vm2854_vm3, %v13040_v60, %v9328_v62  ;;  %v18740_v37 = vld [vmem:[#allocation47_spill] sm:$0xff]  ;;  %v13345_v46 = vld [vmem:[#allocation2 + $0xa7c] sm:$0xff] }
 0x1e0   : > { %18736 = vst [vmem:[#allocation44_spill] sm:$0xff] %v13313_v35  ;;  %18737 = vst [vmem:[#allocation45_spill] sm:$0xff] %v13320_v7  ;;  %v13340_v36 = vsel %vm2854_vm3, %v13044_v2, %v9329_v22  ;;  %v9353_v53 = vunpack.i.l.bf16 %v18740_v37  ;;  %v13343_v7 = vpop.permute.xlu0 %9556  ;;  %v9354_v20 = vunpack.i.h.bf16 %v18740_v37  ;;  %v18743_v18 = vld [vmem:[#allocation48_spill] sm:$0xff]  ;;  %v13354_v2 = vld [vmem:[#allocation2 + $0xa84] sm:$0xff]  ;;  %v13362_v62 = vsel %vm2854_vm3, %v13068_v1, %v9343_v10 }
 0x1e1   : > { %9836 = vrot.lane.b32.xlu0 %v12954_v40, %s11097_s28  ;;  %18738 = vst [vmem:[#allocation46_spill] sm:$0xff] %v13326_v55  ;;  %v13328_v40 = vld [vmem:[#allocation2 + $0x9ac] sm:$0xff]  ;;  %18741 = vst [vmem:[#allocation47_spill] sm:$0xff] %v13343_v7  ;;  %v9349_v25 = vunpack.i.h.bf16 %v18743_v18  ;;  %v9348_v3 = vunpack.i.l.bf16 %v18743_v18  ;;  %v13356_v42 = vld [vmem:[#allocation2 + $0xa34] sm:$0xff]  ;;  %v13366_v18 = vsel %vm2854_vm3, %v13072_v57, %v9344_v28  ;;  %v13370_v37 = vsel %vm2854_vm3, %v13076_v0, %v9338_v38  ;;  %v13387_v39 = vpop.permute.xlu1 %9571 }
 0x1e2   : > { %18739 = vst [vmem:[#allocation89_spill] sm:$0xff] %v13328_v40  ;;  %18742 = vst [vmem:[#allocation90_spill] sm:$0xff] %v13345_v46  ;;  %v13358_v22 = vld [vmem:[#allocation2 + $0xa3c] sm:$0xff]  ;;  %v13378_v7 = vld [vmem:[#allocation2 + $0xb14] sm:$0xff]  ;;  %v13382_v1 = vsel %vm2854_vm3, %v13086_v43, %v9339_v51  ;;  %v13395_v60 = vsel %vm2854_vm3, %v13099_v8, %v9353_v53  ;;  %v18755_v53 = vpack.i.bf16 %v12980_v54, %v12971_v34 }
 0x1e3   : > { %9851 = vrot.lane.b32.xlu1 %v12978_v13, %s11097_s28  ;;  %18744 = vst [vmem:[#allocation48_spill] sm:$0xff] %v13354_v2  ;;  %18745 = vst [vmem:[#allocation91_spill] sm:$0xff] %v13356_v42  ;;  %v13376_v13 = vld [vmem:[#allocation2 + $0xb0c] sm:$0xff]  ;;  %v18749_v57 = vld [vmem:[#allocation49_spill] sm:$0xff]  ;;  %v13410_v40 = vsel %vm2854_vm3, %v13118_v32, %v9348_v3  ;;  %v13414_v8 = vsel %vm2854_vm3, %v13122_v41, %v9349_v25 }
 0x1e4   : > { %18746 = vst [vmem:[#allocation92_spill] sm:$0xff] %v13358_v22  ;;  %18747 = vst [vmem:[#allocation93_spill] sm:$0xff] %v13376_v13  ;;  %v9364_v28 = vunpack.i.h.bf16 %v18749_v57  ;;  %v9363_v10 = vunpack.i.l.bf16 %v18749_v57  ;;  %v18750_v0 = vld [vmem:[#allocation50_spill] sm:$0xff]  ;;  %v13391_v35 = vld [vmem:[#allocation2 + $0xacc] sm:$0xff]  ;;  %v13398_v43 = vpop.permute.xlu0 %9566 }
 0x1e5   : > { %9846 = vrot.lane.b32.xlu0 %v13002_v27, %s11097_s28  ;;  %18748 = vst [vmem:[#allocation94_spill] sm:$0xff] %v13378_v7  ;;  %v9358_v38 = vunpack.i.l.bf16 %v18750_v0  ;;  %18751 = vst [vmem:[#allocation49_spill] sm:$0xff] %v13387_v39  ;;  %v13389_v27 = vld [vmem:[#allocation2 + $0xac4] sm:$0xff]  ;;  %v9359_v55 = vunpack.i.h.bf16 %v18750_v0  ;;  %v13406_v39 = vsel %vm2854_vm3, %v13114_v44, %v9354_v20  ;;  %v13422_v57 = vld [vmem:[#allocation2 + $0xb9c] sm:$0xff] }
 0x1e6   : > { %18752 = vst [vmem:[#allocation50_spill] sm:$0xff] %v13389_v27  ;;  %18753 = vst [vmem:[#allocation95_spill] sm:$0xff] %v13391_v35  ;;  %v18757_v44 = vld [vmem:[#allocation51_spill] sm:$0xff]  ;;  %v18758_v32 = vld [vmem:[#allocation52_spill] sm:$0xff] }
 0x1e7   : > { %18754 = vst [vmem:[#allocation96_spill] sm:$0xff] %v13398_v43  ;;  %9861 = vrot.lane.b32.xlu1 %v18755_v53, %s11098_s29  ;;  %18756 = vst [vmem:[#allocation97_spill] sm:$0xff] %v13422_v57  ;;  %v9374_v20 = vunpack.i.h.bf16 %v18757_v44  ;;  %v9373_v51 = vunpack.i.l.bf16 %v18757_v44  ;;  %v9368_v3 = vunpack.i.l.bf16 %v18758_v32  ;;  %v18759_v41 = vld [vmem:[#allocation79_spill] sm:$0xff]  ;;  %v13435_v53 = vld [vmem:[#allocation2 + $0xb54] sm:$0xff]  ;;  %v13458_v27 = vsel %vm2854_vm3, %v13164_v4, %v9359_v55 }
 0x1e8   : > { %v18760_v25 = vpack.i.bf16 %v12984_v48, %v18759_v41  ;;  %v13433_v54 = vld [vmem:[#allocation2 + $0xba4] sm:$0xff]  ;;  %18761 = vst [vmem:[#allocation51_spill] sm:$0xff] %v13435_v53  ;;  %v13437_v0 = vld [vmem:[#allocation2 + $0xb5c] sm:$0xff]  ;;  %v18763_v43 = vld [vmem:[#allocation16_spill] sm:$0xff]  ;;  %v13449_v48 = vsel %vm2854_vm3, %v13156_v33, %v9358_v38  ;;  %v9369_v41 = vunpack.i.h.bf16 %v18758_v32  ;;  %v13463_v42 = vpop.permute.xlu0 %9576 }
 0x1e9   : > { %18762 = vst [vmem:[#allocation52_spill] sm:$0xff] %v13437_v0  ;;  %v13441_v13 = vsel %vm2854_vm3, %v18763_v43, %v9363_v10  ;;  %v18764_v44 = vld [vmem:[#allocation35_spill] sm:$0xff]  ;;  %v18767_v10 = vld [vmem:[#allocation53_spill] sm:$0xff]  ;;  %v18773_v4 = vld [vmem:[#allocation82_spill] sm:$0xff]  ;;  %v13483_v59 = vsel %vm2854_vm3, %v13177_v61, %v9373_v51  ;;  %v13491_v26 = vsel %vm2854_vm3, %v13198_v12, %v9368_v3 }
 0x1ea   : > { %9856 = vrot.lane.b32.xlu0 %v18760_v25, %s11098_s29  ;;  %v13445_v7 = vsel %vm2854_vm3, %v18764_v44, %v9364_v28  ;;  %v13452_v25 = vpop.permute.xlu1 %9581  ;;  %v13454_v34 = vld [vmem:[#allocation2 + $0xc2c] sm:$0xff]  ;;  %v9384_v43 = vunpack.i.h.bf16 %v18767_v10  ;;  %v9383_v35 = vunpack.i.l.bf16 %v18767_v10  ;;  %v18768_v28 = vld [vmem:[#allocation54_spill] sm:$0xff]  ;;  %18769 = vst [vmem:[#allocation35_spill] sm:$0xff] %v13463_v42  ;;  %v13465_v33 = vld [vmem:[#allocation2 + $0xc34] sm:$0xff] }
 0x1eb   : > { %18765 = vst [vmem:[#allocation79_spill] sm:$0xff] %v13452_v25  ;;  %18766 = vst [vmem:[#allocation16_spill] sm:$0xff] %v13454_v34  ;;  %v9378_v44 = vunpack.i.l.bf16 %v18768_v28  ;;  %v13467_v38 = vld [vmem:[#allocation2 + $0xbe4] sm:$0xff]  ;;  %v13469_v32 = vld [vmem:[#allocation2 + $0xbec] sm:$0xff]  ;;  %v9379_v25 = vunpack.i.h.bf16 %v18768_v28  ;;  %v13487_v28 = vsel %vm2854_vm3, %v13194_v16, %v9374_v20 }
 0x1ec   : > { %18770 = vst [vmem:[#allocation53_spill] sm:$0xff] %v13467_v38  ;;  %18771 = vst [vmem:[#allocation54_spill] sm:$0xff] %v13469_v32  ;;  %v18772_v22 = vld [vmem:[#allocation55_spill] sm:$0xff]  ;;  %v18774_v55 = vld [vmem:[#allocation81_spill] sm:$0xff]  ;;  %v13511_v3 = vsel %vm2887_vm4, %v13218_v63, %v9383_v35 }
 0x1ed   : > { %v9393_v46 = vunpack.i.l.bf16 %v18772_v22  ;;  %v18775_v2 = vpack.i.bf16 %v18773_v4, %v18774_v55  ;;  %v3787_v19 = vld [vmem:[#allocation2 + $0xcbc] sm:$0xff]  ;;  %v18777_v55 = vld [vmem:[#allocation84_spill] sm:$0xff]  ;;  %v3788_v42 = vld [vmem:[#allocation2 + $0xcc4] sm:$0xff] }
 0x1ee   : > { %v18776_v4 = vld [vmem:[#allocation85_spill] sm:$0xff]  ;;  %v18779_v61 = vld [vmem:[#allocation18_spill] sm:$0xff]  ;;  %v18780_v16 = vld [vmem:[#allocation56_spill] sm:$0xff]  ;;  %v13503_v57 = vpop.permute.xlu1 %9591 }
 0x1ef   : > { %9871 = vrot.lane.b32.xlu1 %v18775_v2, %s11098_s29  ;;  %v9394_v2 = vunpack.i.h.bf16 %v18772_v22  ;;  %v18778_v10 = vpack.i.bf16 %v18776_v4, %v18777_v55  ;;  %v3785_v53 = vld [vmem:[#allocation2 + $0xc74] sm:$0xff]  ;;  %v3786_v0 = vld [vmem:[#allocation2 + $0xc7c] sm:$0xff]  ;;  %v13500_v51 = vsel %vm2854_vm3, %v18779_v61, %v9369_v41  ;;  %v9388_v20 = vunpack.i.l.bf16 %v18780_v16  ;;  %18781 = vst [vmem:[#allocation55_spill] sm:$0xff] %v13503_v57  ;;  %v13522_v55 = vpop.permute.xlu0 %9586  ;;  %v3791_v61 = vld [vmem:[#allocation2 + $0xd4c] sm:$0xff] }
 0x1f0   : > { %v13519_v41 = vsel %vm2887_vm4, %v13226_v47, %v9378_v44  ;;  %v9389_v4 = vunpack.i.h.bf16 %v18780_v16  ;;  %18782 = vst [vmem:[#allocation82_spill] sm:$0xff] %v13522_v55  ;;  %v13526_v22 = vsel %vm2887_vm4, %v13234_v21, %v9379_v25  ;;  %v13530_v63 = vsel %vm2887_vm4, %v13245_v29, %v9393_v46  ;;  %v18784_v35 = vld [vmem:[#allocation86_spill] sm:$0xff]  ;;  %v3792_v16 = vld [vmem:[#allocation2 + $0xd54] sm:$0xff]  ;;  %v3790_v55 = vld [vmem:[#allocation2 + $0xd0c] sm:$0xff] }
 0x1f1   : > { %9866 = vrot.lane.b32.xlu0 %v18778_v10, %s11098_s29  ;;  %v13515_v10 = vsel %vm2887_vm4, %v13222_v45, %v9384_v43  ;;  %v18783_v45 = vld [vmem:[#allocation32_spill] sm:$0xff]  ;;  %v13536_v47 = vpack.i.bf16 %v3788_v42, %v3787_v19  ;;  %v13538_v44 = vpack.i.bf16 %v3786_v0, %v3785_v53  ;;  %v3789_v12 = vld [vmem:[#allocation2 + $0xd04] sm:$0xff]  ;;  %v13542_v21 = vsel %vm2887_vm4, %v13258_v58, %v9394_v2  ;;  %v18788_v25 = vld [vmem:[#allocation57_spill] sm:$0xff] }
 0x1f2   : > { %v18785_v43 = vpack.i.bf16 %v18783_v45, %v18784_v35  ;;  %v9404_v57 = vunpack.i.h.bf16 %v18788_v25  ;;  %v9403_v29 = vunpack.i.l.bf16 %v18788_v25  ;;  %v18789_v46 = vld [vmem:[#allocation58_spill] sm:$0xff]  ;;  %v18790_v45 = vld [vmem:[#allocation88_spill] sm:$0xff]  ;;  %v18791_v35 = vld [vmem:[#allocation87_spill] sm:$0xff]  ;;  %v13553_v42 = vsel %vm2887_vm4, %v13262_v50, %v9388_v20 }
 0x1f3   : > { %18786 = vst [vmem:[#allocation81_spill] sm:$0xff] %v13536_v47  ;;  %18787 = vst [vmem:[#allocation85_spill] sm:$0xff] %v13538_v44  ;;  %v9398_v38 = vunpack.i.l.bf16 %v18789_v46  ;;  %v18792_v19 = vpack.i.bf16 %v18790_v45, %v18791_v35  ;;  %v9399_v0 = vunpack.i.h.bf16 %v18789_v46  ;;  %v18793_v53 = vld [vmem:[#allocation59_spill] sm:$0xff]  ;;  %v13562_v25 = vsel %vm2887_vm4, %v13266_v31, %v9389_v4  ;;  %v18795_v44 = vld [vmem:[#allocation60_spill] sm:$0xff]  ;;  %v13565_v45 = vpop.permute.xlu0 %9596 }
 0x1f4   : > { %9881 = vrot.lane.b32.xlu1 %v18785_v43, %s11098_s29  ;;  %v9414_v58 = vunpack.i.h.bf16 %v18793_v53  ;;  %v9413_v2 = vunpack.i.l.bf16 %v18793_v53  ;;  %v13558_v43 = vpop.permute.xlu1 %9601  ;;  %v9408_v47 = vunpack.i.l.bf16 %v18795_v44  ;;  %18796 = vst [vmem:[#allocation18_spill] sm:$0xff] %v13565_v45  ;;  %v13567_v35 = vpack.i.bf16 %v3792_v16, %v3791_v61  ;;  %v18799_v46 = vld [vmem:[#allocation61_spill] sm:$0xff]  ;;  %v18800_v32 = vld [vmem:[#allocation62_spill] sm:$0xff]  ;;  %v18801_v34 = vld [vmem:[#allocation11_spill] sm:$0xff] }
 0x1f5   : > { %9876 = vrot.lane.b32.xlu0 %v18792_v19, %s11098_s29  ;;  %18794 = vst [vmem:[#allocation84_spill] sm:$0xff] %v13558_v43  ;;  %v13569_v50 = vpack.i.bf16 %v3790_v55, %v3789_v12  ;;  %v9409_v20 = vunpack.i.h.bf16 %v18795_v44  ;;  %v9424_v19 = vunpack.i.h.bf16 %v18799_v46  ;;  %v9423_v53 = vunpack.i.l.bf16 %v18799_v46  ;;  %v18802_v31 = vld [vmem:[#allocation72_spill] sm:$0xff]  ;;  %v18804_v44 = vld [vmem:[#allocation33_spill] sm:$0xff] }
 0x1f6   : > { %18797 = vst [vmem:[#allocation56_spill] sm:$0xff] %v13567_v35  ;;  %v9418_v43 = vunpack.i.l.bf16 %v18800_v32  ;;  %v18803_v4 = vpack.i.bf16 %v18801_v34, %v18802_v31  ;;  %v13581_v45 = vsel %vm2887_vm4, %v13288_v14, %v9403_v29  ;;  %v13585_v12 = vsel %vm2887_vm4, %v13292_v30, %v9404_v57  ;;  %v18805_v16 = vld [vmem:[#allocation12_spill] sm:$0xff]  ;;  %v18827_v35 = vld [vmem:[#allocation67_spill] sm:$0xff] }
 0x1f7   : > { %18798 = vst [vmem:[#allocation32_spill] sm:$0xff] %v13569_v50  ;;  %v13589_v55 = vsel %vm2887_vm4, %v13296_v24, %v9398_v38  ;;  %v9419_v61 = vunpack.i.h.bf16 %v18800_v32  ;;  %v18806_v46 = vpack.i.bf16 %v18804_v44, %v18805_v16  ;;  %v13598_v34 = vsel %vm2887_vm4, %v13304_v5, %v9399_v0  ;;  %v18807_v24 = vld [vmem:[#allocation63_spill] sm:$0xff]  ;;  %v18810_v0 = vld [vmem:[#allocation64_spill] sm:$0xff] }
 0x1f8   : > { %9891 = vrot.lane.b32.xlu1 %v18803_v4, %s11098_s29  ;;  %v13602_v14 = vsel %vm2887_vm4, %v13317_v52, %v9413_v2  ;;  %v13606_v30 = vsel %vm2887_vm4, %v13332_v49, %v9414_v58  ;;  %v9433_v57 = vunpack.i.l.bf16 %v18807_v24  ;;  %v13609_v38 = vpop.permute.xlu1 %9611  ;;  %v13611_v32 = vld [vmem:[#allocation2 + $0xa88] sm:$0xff]  ;;  %v13615_v29 = vsel %vm2887_vm4, %v13336_v17, %v9408_v47  ;;  %v13620_v2 = vpop.permute.xlu0 %9606  ;;  %v13622_v49 = vld [vmem:[#allocation2 + $0xa90] sm:$0xff]  ;;  %v13624_v58 = vld [vmem:[#allocation2 + $0xa40] sm:$0xff] }
 0x1f9   : > { %9886 = vrot.lane.b32.xlu0 %v18806_v46, %s11098_s29  ;;  %18808 = vst [vmem:[#allocation86_spill] sm:$0xff] %v13609_v38  ;;  %18809 = vst [vmem:[#allocation57_spill] sm:$0xff] %v13611_v32  ;;  %v9434_v5 = vunpack.i.h.bf16 %v18807_v24  ;;  %v9429_v31 = vunpack.i.h.bf16 %v18810_v0  ;;  %v9428_v52 = vunpack.i.l.bf16 %v18810_v0  ;;  %v13626_v4 = vld [vmem:[#allocation2 + $0xa48] sm:$0xff]  ;;  %v13630_v44 = vsel %vm2887_vm4, %v13340_v36, %v9409_v20  ;;  %v18815_v46 = vld [vmem:[#allocation13_spill] sm:$0xff] }
 0x1fa   : > { %18811 = vst [vmem:[#allocation58_spill] sm:$0xff] %v13620_v2  ;;  %18812 = vst [vmem:[#allocation88_spill] sm:$0xff] %v13622_v49  ;;  %v13634_v17 = vsel %vm2887_vm4, %v13362_v62, %v9423_v53  ;;  %v13638_v47 = vsel %vm2887_vm4, %v13366_v18, %v9424_v19  ;;  %v13642_v16 = vsel %vm2887_vm4, %v13370_v37, %v9418_v43  ;;  %v18816_v24 = vld [vmem:[#allocation34_spill] sm:$0xff]  ;;  %v13648_v38 = vld [vmem:[#allocation2 + $0xb18] sm:$0xff] }
 0x1fb   : > { %18813 = vst [vmem:[#allocation87_spill] sm:$0xff] %v13624_v58  ;;  %18814 = vst [vmem:[#allocation59_spill] sm:$0xff] %v13626_v4  ;;  %v18817_v0 = vpack.i.bf16 %v18815_v46, %v18816_v24  ;;  %v13650_v36 = vld [vmem:[#allocation2 + $0xb20] sm:$0xff]  ;;  %v13654_v62 = vsel %vm2887_vm4, %v13382_v1, %v9419_v61  ;;  %v18820_v20 = vld [vmem:[#allocation65_spill] sm:$0xff] }
 0x1fc   : > { %18818 = vst [vmem:[#allocation60_spill] sm:$0xff] %v13648_v38  ;;  %18819 = vst [vmem:[#allocation61_spill] sm:$0xff] %v13650_v36  ;;  %v9444_v18 = vunpack.i.h.bf16 %v18820_v20  ;;  %v9443_v19 = vunpack.i.l.bf16 %v18820_v20  ;;  %v18821_v53 = vld [vmem:[#allocation66_spill] sm:$0xff]  ;;  %v18822_v43 = vld [vmem:[#allocation15_spill] sm:$0xff]  ;;  %v13672_v61 = vpop.permute.xlu1 %9621  ;;  %v9454_v20 = vunpack.i.h.bf16 %v18827_v35 }
 0x1fd   : > { %9901 = vrot.lane.b32.xlu1 %v18817_v0, %s11098_s29  ;;  %v9438_v37 = vunpack.i.l.bf16 %v18821_v53  ;;  %v18823_v2 = vld [vmem:[#allocation14_spill] sm:$0xff]  ;;  %v13663_v46 = vld [vmem:[#allocation2 + $0xad0] sm:$0xff]  ;;  %v13665_v24 = vld [vmem:[#allocation2 + $0xad8] sm:$0xff]  ;;  %v13669_v0 = vsel %vm2887_vm4, %v13395_v60, %v9433_v57  ;;  %v9439_v1 = vunpack.i.h.bf16 %v18821_v53  ;;  %v13688_v60 = vsel %vm2887_vm4, %v13414_v8, %v9429_v31  ;;  %v13690_v57 = vpop.permute.xlu0 %9616 }
 0x1fe   : > { %v18824_v50 = vpack.i.bf16 %v18822_v43, %v18823_v2  ;;  %18825 = vst [vmem:[#allocation62_spill] sm:$0xff] %v13663_v46  ;;  %18826 = vst [vmem:[#allocation11_spill] sm:$0xff] %v13665_v24  ;;  %v13684_v2 = vsel %vm2887_vm4, %v13410_v40, %v9428_v52  ;;  %v13694_v43 = vld [vmem:[#allocation2 + $0xba8] sm:$0xff]  ;;  %v18829_v40 = vpack.i.bf16 %v13173_v56, %v13171_v23  ;;  %v13705_v31 = vld [vmem:[#allocation2 + $0xbb0] sm:$0xff] }
 0x1ff   : > { %v13707_v52 = vld [vmem:[#allocation2 + $0xb60] sm:$0xff]  ;;  %v13709_v53 = vld [vmem:[#allocation2 + $0xb68] sm:$0xff]  ;;  %v13713_v38 = vsel %vm2887_vm4, %v13441_v13, %v9443_v19  ;;  %v13721_v23 = vsel %vm2887_vm4, %v13449_v48, %v9438_v37  ;;  %v13728_v46 = vld [vmem:[#allocation2 + $0xc38] sm:$0xff]  ;;  %v13732_v13 = vsel %vm2887_vm4, %v13458_v27, %v9439_v1 }
 0x200   : > { %9896 = vrot.lane.b32.xlu0 %v18824_v50, %s11098_s29  ;;  %v13680_v50 = vsel %vm2887_vm4, %v13406_v39, %v9434_v5  ;;  %v9453_v39 = vunpack.i.l.bf16 %v18827_v35  ;;  %v18828_v5 = vld [vmem:[#allocation68_spill] sm:$0xff]  ;;  %18830 = vst [vmem:[#allocation72_spill] sm:$0xff] %v13707_v52  ;;  %18831 = vst [vmem:[#allocation33_spill] sm:$0xff] %v13709_v53  ;;  %v13717_v35 = vsel %vm2887_vm4, %v13445_v7, %v9444_v18  ;;  %v18835_v19 = vld [vmem:[#allocation69_spill] sm:$0xff]  ;;  %v13737_v37 = vpop.permute.xlu1 %9631 }
 0x201   : > { %v9448_v58 = vunpack.i.l.bf16 %v18828_v5  ;;  %9911 = vrot.lane.b32.xlu1 %v18829_v40, %s11098_s29  ;;  %v9449_v56 = vunpack.i.h.bf16 %v18828_v5  ;;  %v18832_v40 = vld [vmem:[#allocation17_spill] sm:$0xff]  ;;  %18834 = vst [vmem:[#allocation12_spill] sm:$0xff] %v13728_v46  ;;  %v9464_v7 = vunpack.i.h.bf16 %v18835_v19  ;;  %v9463_v18 = vunpack.i.l.bf16 %v18835_v19  ;;  %v18836_v24 = vld [vmem:[#allocation70_spill] sm:$0xff]  ;;  %18837 = vst [vmem:[#allocation63_spill] sm:$0xff] %v13737_v37  ;;  %v13747_v27 = vpop.permute.xlu0 %9626 }
 0x202   : > { %v18833_v8 = vpack.i.bf16 %v13190_v9, %v18832_v40  ;;  %v9458_v48 = vunpack.i.l.bf16 %v18836_v24  ;;  %v13739_v5 = vld [vmem:[#allocation2 + $0xc40] sm:$0xff]  ;;  %v13741_v36 = vld [vmem:[#allocation2 + $0xbf0] sm:$0xff]  ;;  %v13743_v9 = vld [vmem:[#allocation2 + $0xbf8] sm:$0xff]  ;;  %18842 = vst [vmem:[#allocation65_spill] sm:$0xff] %v13747_v27  ;;  %v13755_v49 = vsel %vm2887_vm4, %v13483_v59, %v9453_v39  ;;  %v13759_v37 = vsel %vm2887_vm4, %v13487_v28, %v9454_v20 }
 0x203   : > { %18838 = vst [vmem:[#allocation64_spill] sm:$0xff] %v13739_v5  ;;  %18839 = vst [vmem:[#allocation13_spill] sm:$0xff] %v13741_v36  ;;  %v18841_v40 = vld [vmem:[#allocation25_spill] sm:$0xff]  ;;  %v3819_v32 = vld [vmem:[#allocation2 + $0xcc8] sm:$0xff]  ;;  %v13770_v59 = vsel %vm2887_vm4, %v13500_v51, %v9449_v56  ;;  %v13785_v20 = vsel %vm2920_vm5, %v13515_v10, %v9464_v7 }
 0x204   : > { %9906 = vrot.lane.b32.xlu0 %v18833_v8, %s11098_s29  ;;  %18840 = vst [vmem:[#allocation34_spill] sm:$0xff] %v13743_v9  ;;  %v9459_v8 = vunpack.i.h.bf16 %v18836_v24  ;;  %v9473_v4 = vunpack.i.l.bf16 %v18841_v40  ;;  %18843 = vst [vmem:[#allocation66_spill] sm:$0xff] %v13755_v49  ;;  %v13763_v24 = vsel %vm2887_vm4, %v13491_v26, %v9448_v58  ;;  %v9474_v27 = vunpack.i.h.bf16 %v18841_v40  ;;  %v3820_v1 = vld [vmem:[#allocation2 + $0xcd0] sm:$0xff]  ;;  %v3817_v19 = vld [vmem:[#allocation2 + $0xc80] sm:$0xff]  ;;  %v13792_v40 = vpop.permute.xlu1 %9641 }
 0x205   : > { %18844 = vst [vmem:[#allocation15_spill] sm:$0xff] %v13759_v37  ;;  %9921 = vrot.lane.b32.xlu1 %v13252_v15, %s11098_s29  ;;  %v3818_v52 = vld [vmem:[#allocation2 + $0xc88] sm:$0xff]  ;;  %v18845_v39 = vld [vmem:[#allocation73_spill] sm:$0xff]  ;;  %v13781_v58 = vsel %vm2920_vm5, %v13511_v3, %v9463_v18  ;;  %v13789_v51 = vsel %vm2920_vm5, %v13519_v41, %v9458_v48  ;;  %v13802_v18 = vpop.permute.xlu0 %9636  ;;  %v13804_v10 = vpack.i.bf16 %v3820_v1, %v3819_v32  ;;  %v3824_v48 = vld [vmem:[#allocation2 + $0xd60] sm:$0xff] }
 0x206   : > { %v9468_v49 = vunpack.i.l.bf16 %v18845_v39  ;;  %v9469_v56 = vunpack.i.h.bf16 %v18845_v39  ;;  %v13796_v26 = vsel %vm2920_vm5, %v13526_v22, %v9459_v8  ;;  %v13800_v3 = vsel %vm2920_vm5, %v13530_v63, %v9473_v4  ;;  %v3823_v41 = vld [vmem:[#allocation2 + $0xd58] sm:$0xff]  ;;  %v18848_v28 = vld [vmem:[#allocation74_spill] sm:$0xff]  ;;  %v3821_v63 = vld [vmem:[#allocation2 + $0xd10] sm:$0xff] }
 0x207   : > { %18846 = vst [vmem:[#allocation14_spill] sm:$0xff] %v13804_v10  ;;  %v13806_v7 = vpack.i.bf16 %v3818_v52, %v3817_v19  ;;  %v13810_v39 = vsel %vm2920_vm5, %v13542_v21, %v9474_v27  ;;  %v9484_v37 = vunpack.i.h.bf16 %v18848_v28  ;;  %v9483_v22 = vunpack.i.l.bf16 %v18848_v28  ;;  %v18849_v8 = vld [vmem:[#allocation29_spill] sm:$0xff]  ;;  %v18850_v1 = vld [vmem:[#allocation24_spill] sm:$0xff]  ;;  %v18851_v19 = vld [vmem:[#allocation42_spill] sm:$0xff] }
 0x208   : > { %9916 = vrot.lane.b32.xlu0 %v13254_v11, %s11098_s29  ;;  %v9478_v11 = vunpack.i.l.bf16 %v18849_v8  ;;  %v3822_v32 = vld [vmem:[#allocation2 + $0xd18] sm:$0xff]  ;;  %v13819_v4 = vsel %vm2920_vm5, %v13553_v42, %v9468_v49  ;;  %v9479_v52 = vunpack.i.h.bf16 %v18849_v8  ;;  %v9494_v21 = vunpack.i.h.bf16 %v18850_v1  ;;  %v13832_v10 = vpop.permute.xlu1 %9651  ;;  %v18854_v49 = vld [vmem:[#allocation76_spill] sm:$0xff] }
 0x209   : > { %18847 = vst [vmem:[#allocation67_spill] sm:$0xff] %v13806_v7  ;;  %9931 = vrot.lane.b32.xlu1 %v13278_v6, %s11098_s29  ;;  %v9493_v27 = vunpack.i.l.bf16 %v18850_v1  ;;  %v13828_v28 = vsel %vm2920_vm5, %v13562_v25, %v9469_v56  ;;  %v18852_v6 = vld [vmem:[#allocation23_spill] sm:$0xff]  ;;  %v13834_v42 = vpack.i.bf16 %v3824_v48, %v3823_v41  ;;  %v9504_v8 = vunpack.i.h.bf16 %v18854_v49  ;;  %v18855_v1 = vld [vmem:[#allocation77_spill] sm:$0xff]  ;;  %v13839_v46 = vpop.permute.xlu0 %9646 }
 0x20a   : > { %v9489_v15 = vunpack.i.h.bf16 %v18852_v6  ;;  %v9488_v7 = vunpack.i.l.bf16 %v18852_v6  ;;  %v9503_v36 = vunpack.i.l.bf16 %v18854_v49  ;;  %v9498_v9 = vunpack.i.l.bf16 %v18855_v1  ;;  %v18857_v48 = vld [vmem:[#allocation27_spill] sm:$0xff]  ;;  %v18858_v49 = vld [vmem:[#allocation22_spill] sm:$0xff] }
 0x20b   : > { %18853 = vst [vmem:[#allocation68_spill] sm:$0xff] %v13834_v42  ;;  %v13845_v25 = vsel %vm2920_vm5, %v13581_v45, %v9483_v22  ;;  %v13849_v6 = vsel %vm2920_vm5, %v13585_v12, %v9484_v37  ;;  %v13853_v56 = vsel %vm2920_vm5, %v13589_v55, %v9478_v11  ;;  %v9499_v41 = vunpack.i.h.bf16 %v18855_v1  ;;  %v18861_v55 = vld [vmem:[#allocation83_spill] sm:$0xff]  ;;  %v18862_v22 = vld [vmem:[#allocation41_spill] sm:$0xff]  ;;  %v18863_v1 = vld [vmem:[#allocation40_spill] sm:$0xff] }
 0x20c   : > { %9926 = vrot.lane.b32.xlu0 %v18851_v19, %s11098_s29  ;;  %v13841_v19 = vpack.i.bf16 %v3822_v32, %v3821_v63  ;;  %v18859_v63 = vpack.i.bf16 %v18857_v48, %v18858_v49  ;;  %v13860_v32 = vld [vmem:[#allocation2 + $0xa94] sm:$0xff]  ;;  %v13864_v45 = vsel %vm2920_vm5, %v13598_v34, %v9479_v52  ;;  %v13868_v12 = vsel %vm2920_vm5, %v13602_v14, %v9493_v27  ;;  %v13879_v49 = vld [vmem:[#allocation2 + $0xa9c] sm:$0xff] }
 0x20d   : > { %18860 = vst [vmem:[#allocation69_spill] sm:$0xff] %v13860_v32  ;;  %v13872_v11 = vsel %vm2920_vm5, %v13606_v30, %v9494_v21  ;;  %v9513_v37 = vunpack.i.l.bf16 %v18861_v55  ;;  %v18864_v48 = vpack.i.bf16 %v18862_v22, %v18863_v1  ;;  %18865 = vst [vmem:[#allocation70_spill] sm:$0xff] %v13879_v49  ;;  %v13883_v34 = vld [vmem:[#allocation2 + $0xa54] sm:$0xff]  ;;  %v13887_v14 = vsel %vm2920_vm5, %v13615_v29, %v9488_v7  ;;  %v18868_v21 = vld [vmem:[#allocation31_spill] sm:$0xff]  ;;  %v13895_v22 = vpop.permute.xlu1 %9661 }
 0x20e   : > { %18856 = vst [vmem:[#allocation17_spill] sm:$0xff] %v13841_v19  ;;  %9941 = vrot.lane.b32.xlu1 %v18859_v63, %s11099_s30  ;;  %v13881_v63 = vld [vmem:[#allocation2 + $0xa4c] sm:$0xff]  ;;  %18867 = vst [vmem:[#allocation73_spill] sm:$0xff] %v13883_v34  ;;  %v13891_v30 = vsel %vm2920_vm5, %v13630_v44, %v9489_v15  ;;  %v9514_v52 = vunpack.i.h.bf16 %v18861_v55  ;;  %v9508_v27 = vunpack.i.l.bf16 %v18868_v21  ;;  %v13899_v1 = vsel %vm2920_vm5, %v13634_v17, %v9503_v36  ;;  %v13910_v44 = vpop.permute.xlu0 %9656  ;;  %v18869_v55 = vld [vmem:[#allocation10_spill] sm:$0xff] }
 0x20f   : > { %18866 = vst [vmem:[#allocation25_spill] sm:$0xff] %v13881_v63  ;;  %v13907_v29 = vsel %vm2920_vm5, %v13642_v16, %v9498_v9  ;;  %v9509_v15 = vunpack.i.h.bf16 %v18868_v21  ;;  %v13914_v7 = vsel %vm2920_vm5, %v13654_v62, %v9499_v41  ;;  %v9523_v19 = vunpack.i.l.bf16 %v18869_v55  ;;  %v18870_v17 = vld [vmem:[#allocation44_spill] sm:$0xff]  ;;  %v18871_v36 = vld [vmem:[#allocation43_spill] sm:$0xff]  ;;  %v13940_v16 = vld [vmem:[#allocation2 + $0xadc] sm:$0xff] }
 0x210   : > { %9936 = vrot.lane.b32.xlu0 %v18864_v48, %s11099_s30  ;;  %v13903_v48 = vsel %vm2920_vm5, %v13638_v47, %v9504_v8  ;;  %v18872_v42 = vpack.i.bf16 %v18870_v17, %v18871_v36  ;;  %v13925_v9 = vld [vmem:[#allocation2 + $0xb24] sm:$0xff]  ;;  %v13927_v8 = vld [vmem:[#allocation2 + $0xb2c] sm:$0xff]  ;;  %v13931_v62 = vsel %vm2920_vm5, %v13669_v0, %v9513_v37  ;;  %v9524_v41 = vunpack.i.h.bf16 %v18869_v55  ;;  %v18876_v17 = vld [vmem:[#allocation89_spill] sm:$0xff]  ;;  %18879 = vst [vmem:[#allocation24_spill] sm:$0xff] %v13940_v16 }
 0x211   : > { %18873 = vst [vmem:[#allocation74_spill] sm:$0xff] %v13925_v9  ;;  %18874 = vst [vmem:[#allocation29_spill] sm:$0xff] %v13927_v8  ;;  %v18875_v21 = vld [vmem:[#allocation71_spill] sm:$0xff]  ;;  %v18877_v36 = vld [vmem:[#allocation46_spill] sm:$0xff]  ;;  %v13946_v34 = vsel %vm2920_vm5, %v13680_v50, %v9514_v52  ;;  %v13950_v0 = vsel %vm2920_vm5, %v13684_v2, %v9508_v27  ;;  %v13954_v32 = vpop.permute.xlu1 %9671  ;;  %v13968_v52 = vsel %vm2920_vm5, %v13713_v38, %v9523_v19 }
 0x212   : > { %9951 = vrot.lane.b32.xlu1 %v18872_v42, %s11099_s30  ;;  %v9519_v5 = vunpack.i.h.bf16 %v18875_v21  ;;  %v9518_v42 = vunpack.i.l.bf16 %v18875_v21  ;;  %v18878_v47 = vpack.i.bf16 %v18876_v17, %v18877_v36  ;;  %v13942_v63 = vld [vmem:[#allocation2 + $0xae4] sm:$0xff]  ;;  %v18881_v37 = vld [vmem:[#allocation36_spill] sm:$0xff]  ;;  %18882 = vst [vmem:[#allocation76_spill] sm:$0xff] %v13954_v32  ;;  %v13962_v50 = vpop.permute.xlu0 %9666  ;;  %v13980_v2 = vsel %vm2920_vm5, %v13717_v35, %v9524_v41  ;;  %v18900_v8 = vld [vmem:[#allocation49_spill] sm:$0xff] }
 0x213   : > { %18880 = vst [vmem:[#allocation23_spill] sm:$0xff] %v13942_v63  ;;  %v9529_v55 = vunpack.i.h.bf16 %v18881_v37  ;;  %v9528_v21 = vunpack.i.l.bf16 %v18881_v37  ;;  %v18883_v17 = vld [vmem:[#allocation19_spill] sm:$0xff]  ;;  %v18884_v27 = vld [vmem:[#allocation20_spill] sm:$0xff] }
 0x214   : > { %9946 = vrot.lane.b32.xlu0 %v18878_v47, %s11099_s30  ;;  %v13958_v47 = vsel %vm2920_vm5, %v13688_v60, %v9509_v15  ;;  %v9544_v36 = vunpack.i.h.bf16 %v18883_v17  ;;  %v9543_v49 = vunpack.i.l.bf16 %v18883_v17  ;;  %v9539_v37 = vunpack.i.h.bf16 %v18884_v27  ;;  %v18885_v60 = vld [vmem:[#allocation48_spill] sm:$0xff]  ;;  %v18886_v15 = vld [vmem:[#allocation90_spill] sm:$0xff] }
 0x215   : > { %v9538_v32 = vunpack.i.l.bf16 %v18884_v27  ;;  %v18887_v53 = vpack.i.bf16 %v18885_v60, %v18886_v15  ;;  %v13984_v38 = vsel %vm2920_vm5, %v13721_v23, %v9518_v42  ;;  %v13988_v19 = vsel %vm2920_vm5, %v13732_v13, %v9519_v5  ;;  %v18889_v60 = vld [vmem:[#allocation92_spill] sm:$0xff]  ;;  %v18893_v23 = vld [vmem:[#allocation21_spill] sm:$0xff]  ;;  %v14005_v5 = vpop.permute.xlu1 %9681 }
 0x216   : > { %v13997_v17 = vsel %vm2920_vm5, %v13763_v24, %v9528_v21  ;;  %v14001_v35 = vsel %vm2920_vm5, %v13770_v59, %v9529_v55  ;;  %v9554_v41 = vunpack.i.h.bf16 %v18893_v23  ;;  %v9553_v13 = vunpack.i.l.bf16 %v18893_v23  ;;  %v18895_v23 = vld [vmem:[#allocation45_spill] sm:$0xff] }
 0x217   : > { %9961 = vrot.lane.b32.xlu1 %v18887_v53, %s11099_s30  ;;  %v18890_v53 = vld [vmem:[#allocation91_spill] sm:$0xff]  ;;  %18892 = vst [vmem:[#allocation77_spill] sm:$0xff] %v14001_v35  ;;  %v2956_v42 = vsel %vm2953_vm6, %v13781_v58, %v9543_v49  ;;  %v2954_v59 = vsel %vm2953_vm6, %v13789_v51, %v9538_v32  ;;  %v2955_v55 = vsel %vm2953_vm6, %v13796_v26, %v9539_v37  ;;  %v9564_v9 = vunpack.i.h.bf16 %v18895_v23  ;;  %v18896_v58 = vld [vmem:[#allocation94_spill] sm:$0xff]  ;;  %v18897_v49 = vld [vmem:[#allocation93_spill] sm:$0xff] }
 0x218   : > { %v18891_v15 = vpack.i.bf16 %v18889_v60, %v18890_v53  ;;  %v2957_v60 = vsel %vm2953_vm6, %v13785_v20, %v9544_v36  ;;  %v18894_v53 = vld [vmem:[#allocation39_spill] sm:$0xff]  ;;  %v9563_v16 = vunpack.i.l.bf16 %v18895_v23  ;;  %v18898_v20 = vpack.i.bf16 %v18896_v58, %v18897_v49  ;;  %v18902_v26 = vld [vmem:[#allocation50_spill] sm:$0xff]  ;;  %v18904_v49 = vld [vmem:[#allocation96_spill] sm:$0xff] }
 0x219   : > { %v9549_v24 = vunpack.i.h.bf16 %v18894_v53  ;;  %v9548_v21 = vunpack.i.l.bf16 %v18894_v53  ;;  %v18899_v36 = vld [vmem:[#allocation47_spill] sm:$0xff]  ;;  %v9574_v27 = vunpack.i.h.bf16 %v18900_v8  ;;  %v9573_v51 = vunpack.i.l.bf16 %v18900_v8  ;;  %v14043_v35 = vpop.permute.xlu1 %9691 }
 0x21a   : > { %9956 = vrot.lane.b32.xlu0 %v18891_v15, %s11099_s30  ;;  %v14013_v15 = vpop.permute.xlu0 %9676  ;;  %v9559_v63 = vunpack.i.h.bf16 %v18899_v36  ;;  %v9558_v53 = vunpack.i.l.bf16 %v18899_v36  ;;  %v18901_v32 = vld [vmem:[#allocation95_spill] sm:$0xff]  ;;  %v14035_v23 = vsel %vm2953_vm6, %v13800_v3, %v9553_v13  ;;  %v14039_v58 = vsel %vm2953_vm6, %v13810_v39, %v9554_v41  ;;  %18905 = vst [vmem:[#allocation27_spill] sm:$0xff] %v14043_v35 }
 0x21b   : > { %9971 = vrot.lane.b32.xlu1 %v18898_v20, %s11099_s30  ;;  %v18903_v37 = vpack.i.bf16 %v18901_v32, %v18902_v26  ;;  %v9569_v20 = vunpack.i.h.bf16 %v18904_v49  ;;  %v9568_v36 = vunpack.i.l.bf16 %v18904_v49  ;;  %v2958_v8 = vsel %vm2953_vm6, %v13819_v4, %v9548_v21 }
 0x21c   : > { %v2959_v32 = vsel %vm2953_vm6, %v13828_v28, %v9549_v24  ;;  %v9624_v3 = vunpack.i.h.bf16 %v13672_v61  ;;  %v9623_v13 = vunpack.i.l.bf16 %v13672_v61  ;;  %v14055_v39 = vsel %vm2953_vm6, %v13845_v25, %v9563_v16  ;;  %v18906_v28 = vld [vmem:[#allocation97_spill] sm:$0xff]  ;;  %v18908_v16 = vld [vmem:[#allocation52_spill] sm:$0xff] }
 0x21d   : > { %v14059_v41 = vsel %vm2953_vm6, %v13849_v6, %v9564_v9  ;;  %v9618_v4 = vunpack.i.l.bf16 %v13690_v57  ;;  %v18907_v24 = vpack.i.bf16 %v13433_v54, %v18906_v28  ;;  %v14069_v61 = vsel %vm2953_vm6, %v13853_v56, %v9558_v53  ;;  %v18909_v54 = vld [vmem:[#allocation51_spill] sm:$0xff]  ;;  %v9702_v53 = vpop.permute.xlu1 %9701 }
 0x21e   : > { %9966 = vrot.lane.b32.xlu0 %v18903_v37, %s11099_s30  ;;  %v14051_v26 = vpop.permute.xlu0 %9686  ;;  %v9619_v37 = vunpack.i.h.bf16 %v13690_v57  ;;  %v14073_v25 = vsel %vm2953_vm6, %v13864_v45, %v9559_v63  ;;  %v14077_v6 = vsel %vm2953_vm6, %v13868_v12, %v9573_v51  ;;  %v14081_v57 = vsel %vm2953_vm6, %v13872_v11, %v9574_v27  ;;  %v18911_v63 = vld [vmem:[#allocation79_spill] sm:$0xff] }
 0x21f   : > { %9981 = vrot.lane.b32.xlu1 %v18907_v24, %s11099_s30  ;;  %v18910_v9 = vpack.i.bf16 %v18908_v16, %v18909_v54  ;;  %v14089_v56 = vsel %vm2953_vm6, %v13887_v14, %v9568_v36  ;;  %v14093_v45 = vsel %vm2953_vm6, %v13891_v30, %v9569_v20  ;;  %v9584_v12 = vunpack.i.h.bf16 %v18911_v63  ;;  %v18912_v30 = vld [vmem:[#allocation16_spill] sm:$0xff]  ;;  %v18914_v54 = vld [vmem:[#allocation65_spill] sm:$0xff] }
 0x220   : > { %v9583_v21 = vunpack.i.l.bf16 %v18911_v63  ;;  %v2989_v11 = vsel %vm2986_vm7, %v2956_v42, %v9623_v13  ;;  %v2990_v27 = vsel %vm2986_vm7, %v2957_v60, %v9624_v3  ;;  %v9704_v51 = vunpack.i.h.bf16 %v9702_v53  ;;  %v18915_v13 = vld [vmem:[#allocation54_spill] sm:$0xff] }
 0x221   : > { %v9703_v49 = vunpack.i.l.bf16 %v9702_v53  ;;  %v2987_v24 = vsel %vm2986_vm7, %v2954_v59, %v9618_v4  ;;  %v2988_v14 = vsel %vm2986_vm7, %v2955_v55, %v9619_v37  ;;  %v18913_v20 = vpack.i.bf16 %v13465_v33, %v18912_v30  ;;  %v18916_v59 = vld [vmem:[#allocation53_spill] sm:$0xff]  ;;  %v18918_v55 = vld [vmem:[#allocation35_spill] sm:$0xff] }
 0x222   : > { %9976 = vrot.lane.b32.xlu0 %v18910_v9, %s11099_s30  ;;  %v9697_v28 = vpop.permute.xlu0 %9696  ;;  %v9629_v9 = vunpack.i.h.bf16 %v18914_v54  ;;  %v9628_v42 = vunpack.i.l.bf16 %v18914_v54  ;;  %v3023_v3 = vsel %vm3019_vm8, %v2990_v27, %v9704_v51  ;;  %v18917_v4 = vpack.i.bf16 %v18915_v13, %v18916_v59 }
 0x223   : > { %v9699_v36 = vunpack.i.h.bf16 %v9697_v28  ;;  %v9698_v16 = vunpack.i.l.bf16 %v9697_v28  ;;  %9991 = vrot.lane.b32.xlu1 %v18913_v20, %s11099_s30  ;;  %v3022_v60 = vsel %vm3019_vm8, %v2989_v11, %v9703_v49  ;;  %v9579_v37 = vunpack.i.h.bf16 %v18918_v55  ;;  %v9712_v28 = vpop.permute.xlu1 %9711  ;;  %v18919_v20 = vld [vmem:[#allocation63_spill] sm:$0xff] }
 0x224   : > { %v3053_v63 = vpack.c.bf16 %v3023_v3, %v3022_v60  ;;  %v9578_v30 = vunpack.i.l.bf16 %v18918_v55  ;;  %v9634_v54 = vunpack.i.h.bf16 %v18919_v20  ;;  %v9633_v11 = vunpack.i.l.bf16 %v18919_v20  ;;  %v18921_v60 = vld [vmem:[#allocation85_spill] sm:$0xff]  ;;  %v18922_v20 = vld [vmem:[#allocation56_spill] sm:$0xff] }
 0x225   : > { %v3020_v53 = vsel %vm3019_vm8, %v2987_v24, %v9698_v16  ;;  %v3021_v33 = vsel %vm3019_vm8, %v2988_v14, %v9699_v36  ;;  %v9714_v49 = vunpack.i.h.bf16 %v9712_v28  ;;  %v9713_v35 = vunpack.i.l.bf16 %v9712_v28 }
 0x226   : > { %9986 = vrot.lane.b32.xlu0 %v18917_v4, %s11099_s30  ;;  %v9707_v27 = vpop.permute.xlu0 %9706  ;;  %v3052_v51 = vpack.c.bf16 %v3021_v33, %v3020_v53  ;;  %v18920_v4 = vld [vmem:[#allocation81_spill] sm:$0xff]  ;;  %v2991_v24 = vsel %vm2986_vm7, %v2958_v8, %v9628_v42  ;;  %v2992_v14 = vsel %vm2986_vm7, %v2959_v32, %v9629_v9  ;;  %v9639_v36 = vunpack.i.h.bf16 %v13802_v18  ;;  %v8819_v9 = vpop.f32.mrf.mxu0 }
 0x227   : > { %v9709_v13 = vunpack.i.h.bf16 %v9707_v27  ;;  %v9708_v59 = vunpack.i.l.bf16 %v9707_v27  ;;  %10001 = vrot.lane.b32.xlu1 %v18920_v4, %s11099_s30  ;;  %v9638_v16 = vunpack.i.l.bf16 %v13802_v18  ;;  %v14130_v3 = vsel %vm2953_vm6, %v13899_v1, %v9583_v21  ;;  %v9722_v18 = vpop.permute.xlu1 %9721 }
 0x228   : > { %8889 = vmatprep.mubr.msk.bf16.mxu0 %vm3093_vm9, %v3052_v51  ;;  %v14134_v55 = vsel %vm2953_vm6, %v13903_v48, %v9584_v12  ;;  %v14141_v42 = vsel %vm2953_vm6, %v13907_v29, %v9578_v30  ;;  %v2993_v1 = vsel %vm2986_vm7, %v14035_v23, %v9633_v11  ;;  %v2994_v21 = vsel %vm2986_vm7, %v14039_v58, %v9634_v54  ;;  %v1054_v27 = vpop.f32.mrf.mxu0  ;;  %v18923_v23 = vld [vmem:[#allocation55_spill] sm:$0xff]  ;;  %v18924_v54 = vld [vmem:[#allocation32_spill] sm:$0xff]  ;;  %v14166_v11 = vld [vmem:[%s18130_s5] ss:$0 sm:$0xff] }
 0x229   : > { %v3024_v8 = vsel %vm3019_vm8, %v2991_v24, %v9708_v59  ;;  %v3025_v32 = vsel %vm3019_vm8, %v2992_v14, %v9709_v13  ;;  %8890 = vmatmul.mubr.msk.bf16.vlgmr.msra.gmra.mxu0 %vm3093_vm9, %v3053_v63  ;;  %v3026_v53 = vsel %vm3019_vm8, %v2993_v1, %v9713_v35  ;;  %v3027_v33 = vsel %vm3019_vm8, %v2994_v21, %v9714_v49 }
 0x22a   : > { %9996 = vrot.lane.b32.xlu0 %v18921_v60, %s11099_s30  ;;  %v9717_v48 = vpop.permute.xlu0 %9716  ;;  %v3054_v12 = vpack.c.bf16 %v3025_v32, %v3024_v8  ;;  %v14153_v29 = vsel %vm2953_vm6, %v13914_v7, %v9579_v37  ;;  %v2995_v58 = vsel %vm2986_vm7, %v14069_v61, %v9638_v16  ;;  %v2996_v35 = vsel %vm2986_vm7, %v14073_v25, %v9639_v36  ;;  %v8820_v25 = vpop.f32.mrf.mxu0  ;;  %v18925_v32 = vld [vmem:[#allocation30_spill] sm:$0xff] }
 0x22b   : > { %v9719_v28 = vunpack.i.h.bf16 %v9717_v48  ;;  %v9718_v63 = vunpack.i.l.bf16 %v9717_v48  ;;  %10011 = vrot.lane.b32.xlu1 %v18922_v20, %s11099_s30  ;;  %v9593_v7 = vunpack.i.l.bf16 %v18923_v23  ;;  %v9644_v37 = vunpack.i.h.bf16 %v13792_v40  ;;  %v14172_v49 = vpop.permute.xlu1 %9731 }
 0x22c   : > { %8893 = vmatprep.mubr.msk.bf16.mxu0 %vm3093_vm9, %v3054_v12  ;;  %v9643_v13 = vunpack.i.l.bf16 %v13792_v40  ;;  %v9649_v59 = vunpack.i.h.bf16 %v13839_v46  ;;  %v9648_v24 = vunpack.i.l.bf16 %v13839_v46  ;;  %v3055_v36 = vpack.c.bf16 %v3027_v33, %v3026_v53  ;;  %v1057_v48 = vpop.f32.mrf.mxu0  ;;  %v18926_v12 = vld [vmem:[#allocation82_spill] sm:$0xff] }
 0x22d   : > { %v3028_v51 = vsel %vm3019_vm8, %v2995_v58, %v9718_v63  ;;  %v3029_v61 = vsel %vm3019_vm8, %v2996_v35, %v9719_v28  ;;  %v9724_v16 = vunpack.i.h.bf16 %v9722_v18  ;;  %v9723_v8 = vunpack.i.l.bf16 %v9722_v18  ;;  %v18927_v58 = vld [vmem:[#allocation75_spill] sm:$0xff] }
 0x22e   : > { %10006 = vrot.lane.b32.xlu0 %v18924_v54, %s11099_s30  ;;  %v9727_v14 = vpop.permute.xlu0 %9726  ;;  %v1063_v1 = vadd.f32 %v8819_v9, %v14166_v11  ;;  %v1066_v21 = vadd.f32 %v8820_v25, %v14166_v11  ;;  %v9589_v28 = vunpack.i.h.bf16 %v18926_v12  ;;  %v3056_v46 = vpack.c.bf16 %v3029_v61, %v3028_v51  ;;  %v8823_v25 = vpop.f32.mrf.mxu0  ;;  %v18933_v54 = vld [vmem:[#allocation59_spill] sm:$0xff] }
 0x22f   : > { %10021 = vrot.lane.b32.xlu1 %v18925_v32, %s11100_s7  ;;  %v9729_v63 = vunpack.i.h.bf16 %v9727_v14  ;;  %v9728_v40 = vunpack.i.l.bf16 %v9727_v14  ;;  %v14186_v53 = vsel %vm2953_vm6, %v13931_v62, %v9593_v7  ;;  %v9588_v18 = vunpack.i.l.bf16 %v18926_v12  ;;  %v14190_v9 = vpop.permute.xlu1 %9741  ;;  %v18929_v32 = vld [vmem:[#allocation80_spill] sm:$0xff] }
 0x230   : > { %v1055_v33 = vadd.f32 %v14166_v11, %v1054_v27  ;;  %v1058_v35 = vadd.f32 %v14166_v11, %v1057_v48  ;;  %v2997_v14 = vsel %vm2986_vm7, %v14055_v39, %v9643_v13  ;;  %v2998_v51 = vsel %vm2986_vm7, %v14059_v41, %v9644_v37  ;;  %v1229_v27 = vld [vmem:[%s18129_s4] sm:$0xf] }
 0x231   : > { %8894 = vmatmul.mubr.msk.bf16.gmra.mxu0 %vm3093_vm9, %v3055_v36  ;;  %v2999_v62 = vsel %vm2986_vm7, %v14089_v56, %v9648_v24  ;;  %v3000_v7 = vsel %vm2986_vm7, %v14093_v45, %v9649_v59  ;;  %v3030_v36 = vsel %vm3019_vm8, %v2997_v14, %v9723_v8  ;;  %v3031_v39 = vsel %vm3019_vm8, %v2998_v51, %v9724_v16  ;;  %v18928_v13 = vld [vmem:[#allocation78_spill] sm:$0xff]  ;;  %v1070_v56 = vpop.f32.mrf.mxu0  ;;  %v18931_v51 = vld [vmem:[#allocation57_spill] sm:$0xff] }
 0x232   : > { %10016 = vrot.lane.b32.xlu0 %v18927_v58, %s11100_s7  ;;  %v9737_v61 = vpop.permute.xlu0 %9736  ;;  %8897 = vmatprep.mubr.msk.bf16.mxu0 %vm3093_vm9, %v3056_v46  ;;  %v1183_v41 = vmax.f32 %v1063_v1, 0.0  ;;  %v1184_v37 = vmax.f32 %v1066_v21, 0.0  ;;  %v9654_v24 = vunpack.i.h.bf16 %v13832_v10  ;;  %v3032_v45 = vsel %vm3019_vm8, %v2999_v62, %v9728_v40 }
 0x233   : > { %10031 = vrot.lane.b32.xlu1 %v18928_v13, %s11100_s7  ;;  %v3033_v59 = vsel %vm3019_vm8, %v3000_v7, %v9729_v63  ;;  %v9653_v8 = vunpack.i.l.bf16 %v13832_v10  ;;  %v9659_v16 = vunpack.i.h.bf16 %v13910_v44  ;;  %v14217_v48 = vpop.permute.xlu1 %9751  ;;  %v1181_v12 = vmax.f32 %v1055_v33, 0.0  ;;  %9110 = vmatprep.subr.msk.bf16.mxu1 %vm1279_vm10, %v1229_v27  ;;  %v8824_v21 = vpop.f32.mrf.mxu0  ;;  %v18930_v10 = vld [vmem:[#allocation88_spill] sm:$0xff] }
 0x234   : > { %v1182_v1 = vmax.f32 %v1058_v35, 0.0  ;;  %v9658_v58 = vunpack.i.l.bf16 %v13910_v44  ;;  %v9734_v40 = vunpack.i.h.bf16 %v14172_v49  ;;  %v9733_v63 = vunpack.i.l.bf16 %v14172_v49  ;;  %v18934_v49 = vld [vmem:[#allocation87_spill] sm:$0xff] }
 0x235   : > { %v3057_v14 = vpack.c.bf16 %v3031_v39, %v3030_v36  ;;  %v18932_v62 = vpack.i.bf16 %v18930_v10, %v18931_v51  ;;  %v3058_v7 = vpack.c.bf16 %v3033_v59, %v3032_v45  ;;  %v1214_v33 = vpack.c.bf16 %v1184_v37, %v1183_v41 }
 0x236   : > { %10026 = vrot.lane.b32.xlu0 %v18929_v32, %s11100_s7  ;;  %v14223_v46 = vpop.permute.xlu0 %9746  ;;  %v1071_v35 = vadd.f32 %v14166_v11, %v1070_v56  ;;  %v1281_v13 = vsel %vm1279_vm10, %v1229_v27, 0  ;;  %v1073_v32 = vpop.f32.mrf.mxu0  ;;  %v9739_v44 = vunpack.i.h.bf16 %v9737_v61  ;;  %v9738_v30 = vunpack.i.l.bf16 %v9737_v61  ;;  %v18937_v56 = vld [vmem:[#allocation61_spill] sm:$0xff] }
 0x237   : > { %10041 = vrot.lane.b32.xlu1 %v18932_v62, %s11100_s7  ;;  %v18935_v20 = vpack.i.bf16 %v18933_v54, %v18934_v49  ;;  %v1079_v36 = vadd.f32 %v8823_v25, %v14166_v11  ;;  %8850 = vmatpush3.bf16.msra.mxu1 %v1281_v13  ;;  %v1082_v39 = vadd.f32 %v8824_v21, %v14166_v11  ;;  %v18936_v45 = vunpack.i.h.bf16 %v18923_v23 }
 0x238   : > { %v2974_v27 = vsel %vm2953_vm6, %v13950_v0, %v9588_v18  ;;  %v2975_v61 = vsel %vm2953_vm6, %v13958_v47, %v9589_v28  ;;  %v1213_v54 = vpack.c.bf16 %v1182_v1, %v1181_v12  ;;  %v8827_v25 = vpop.f32.mrf.mxu0  ;;  %v3001_v37 = vsel %vm2986_vm7, %v14077_v6, %v9653_v8  ;;  %v18938_v6 = vld [vmem:[#allocation60_spill] sm:$0xff]  ;;  %v18941_v12 = vld [vmem:[#allocation62_spill] sm:$0xff] }
 0x239   : > { %v14241_v41 = vsel %vm2953_vm6, %v13946_v34, %v18936_v45  ;;  %8898 = vmatmul.mubr.msk.bf16.gmra.mxu0 %vm3093_vm9, %v3057_v14  ;;  %v3002_v23 = vsel %vm2986_vm7, %v14081_v57, %v9654_v24  ;;  %v3003_v34 = vsel %vm2986_vm7, %v14141_v42, %v9658_v58  ;;  %v3004_v0 = vsel %vm2986_vm7, %v14153_v29, %v9659_v16  ;;  %v18940_v16 = vld [vmem:[#allocation11_spill] sm:$0xff] }
 0x23a   : > { %10036 = vrot.lane.b32.xlu0 %v18935_v20, %s11100_s7  ;;  %v14248_v20 = vpop.permute.xlu1 %9761  ;;  %v14258_v18 = vpop.permute.xlu0 %9756  ;;  %8901 = vmatprep.mubr.msk.bf16.mxu0 %vm3093_vm9, %v3058_v7  ;;  %v3034_v47 = vsel %vm3019_vm8, %v3001_v37, %v9733_v63  ;;  %v3035_v28 = vsel %vm3019_vm8, %v3002_v23, %v9734_v40  ;;  %v18939_v59 = vpack.i.bf16 %v18937_v56, %v18938_v6  ;;  %v1185_v57 = vmax.f32 %v1071_v35, 0.0  ;;  %v18943_v40 = vld [vmem:[#allocation84_spill] sm:$0xff] }
 0x23b   : > { %8851 = vmatprep.mubr.msk.bf16.mxu1 %vm1230_vm2, %v1213_v54  ;;  %v1074_v42 = vadd.f32 %v14166_v11, %v1073_v32  ;;  %v1086_v24 = vpop.f32.mrf.mxu0  ;;  %v3036_v29 = vsel %vm3019_vm8, %v3003_v34, %v9738_v30  ;;  %v3037_v8 = vsel %vm3019_vm8, %v3004_v0, %v9739_v44  ;;  %v18942_v1 = vpack.i.bf16 %v18940_v16, %v18941_v12  ;;  %v18946_v37 = vld [vmem:[#allocation72_spill] sm:$0xff] }
 0x23c   : > { %10051 = vrot.lane.b32.xlu1 %v18939_v59, %s11100_s7  ;;  %v1187_v21 = vmax.f32 %v1079_v36, 0.0  ;;  %v1188_v58 = vmax.f32 %v1082_v39, 0.0  ;;  %8852 = vmatmul.mubr.msk.bf16.vlgmr.msra.gmra.mxu1 %vm1230_vm2, %v1214_v33  ;;  %v9603_v63 = vunpack.i.l.bf16 %v18943_v40  ;;  %v9664_v14 = vunpack.i.h.bf16 %v13895_v22  ;;  %v18949_v16 = vld [vmem:[#allocation64_spill] sm:$0xff] }
 0x23d   : > { %v9663_v10 = vunpack.i.l.bf16 %v13895_v22  ;;  %v1186_v30 = vmax.f32 %v1074_v42, 0.0  ;;  %v8828_v62 = vpop.f32.mrf.mxu0  ;;  %v9669_v7 = vunpack.i.h.bf16 %v13962_v50  ;;  %v9668_v35 = vunpack.i.l.bf16 %v13962_v50  ;;  %v18945_v50 = vld [vmem:[#allocation33_spill] sm:$0xff] }
 0x23e   : > { %10046 = vrot.lane.b32.xlu0 %v18942_v1, %s11100_s7  ;;  %v14279_v51 = vpop.permute.xlu1 %9771  ;;  %v9744_v13 = vunpack.i.h.bf16 %v14190_v9  ;;  %v14284_v32 = vpop.permute.xlu0 %9766  ;;  %v3059_v44 = vpack.c.bf16 %v3035_v28, %v3034_v47  ;;  %v9743_v33 = vunpack.i.l.bf16 %v14190_v9  ;;  %v9748_v49 = vunpack.i.l.bf16 %v14223_v46  ;;  %v18952_v1 = vld [vmem:[#allocation34_spill] sm:$0xff] }
 0x23f   : > { %v18944_v22 = vpack.i.bf16 %v13705_v31, %v13694_v43  ;;  %v3060_v36 = vpack.c.bf16 %v3037_v8, %v3036_v29  ;;  %v1215_v39 = vpack.c.bf16 %v1186_v30, %v1185_v57  ;;  %v1089_v45 = vpop.f32.mrf.mxu0  ;;  %v9749_v54 = vunpack.i.h.bf16 %v14223_v46  ;;  %v18948_v31 = vld [vmem:[#allocation18_spill] sm:$0xff] }
 0x240   : > { %v18947_v23 = vpack.i.bf16 %v18945_v50, %v18946_v37  ;;  %v1216_v34 = vpack.c.bf16 %v1188_v58, %v1187_v21  ;;  %v1095_v9 = vadd.f32 %v8827_v25, %v14166_v11  ;;  %v1087_v0 = vadd.f32 %v14166_v11, %v1086_v24  ;;  %v18953_v21 = vld [vmem:[#allocation13_spill] sm:$0xff] }
 0x241   : > { %10061 = vrot.lane.b32.xlu1 %v18944_v22, %s11100_s7  ;;  %v9604_v47 = vunpack.i.h.bf16 %v18943_v40  ;;  %v14302_v43 = vsel %vm2953_vm6, %v13968_v52, %v9603_v63  ;;  %v9599_v28 = vunpack.i.h.bf16 %v18948_v31  ;;  %v9598_v46 = vunpack.i.l.bf16 %v18948_v31  ;;  %8902 = vmatmul.mubr.msk.bf16.gmra.mxu0 %vm3093_vm9, %v3059_v44  ;;  %v8831_v6 = vpop.f32.mrf.mxu0 }
 0x242   : > { %10056 = vrot.lane.b32.xlu0 %v18947_v23, %s11100_s7  ;;  %v14307_v56 = vpop.permute.xlu1 %9781  ;;  %8855 = vmatprep.mubr.msk.bf16.mxu1 %vm1230_vm2, %v1215_v39  ;;  %v3005_v25 = vsel %vm2986_vm7, %v14130_v3, %v9663_v10  ;;  %v3006_v59 = vsel %vm2986_vm7, %v14134_v55, %v9664_v14  ;;  %v3007_v52 = vsel %vm2986_vm7, %v2974_v27, %v9668_v35  ;;  %v14316_v42 = vpop.permute.xlu0 %9776  ;;  %v18950_v3 = vld [vmem:[#allocation12_spill] sm:$0xff]  ;;  %v1191_v40 = vmax.f32 %v1095_v9, 0.0  ;;  %v18957_v23 = vld [vmem:[#allocation67_spill] sm:$0xff] }
 0x243   : > { %v3008_v57 = vsel %vm2986_vm7, %v2975_v61, %v9669_v7  ;;  %8905 = vmatprep.mubr.msk.bf16.mxu0 %vm3093_vm9, %v3060_v36  ;;  %v3038_v24 = vsel %vm3019_vm8, %v3005_v25, %v9743_v33  ;;  %v3039_v29 = vsel %vm3019_vm8, %v3006_v59, %v9744_v13  ;;  %v3040_v8 = vsel %vm3019_vm8, %v3007_v52, %v9748_v49  ;;  %v1102_v27 = vpop.f32.mrf.mxu0 }
 0x244   : > { %v18951_v12 = vpack.i.bf16 %v18949_v16, %v18950_v3  ;;  %v1098_v55 = vadd.f32 %v8828_v62, %v14166_v11  ;;  %v3041_v61 = vsel %vm3019_vm8, %v3008_v57, %v9749_v54  ;;  %v18954_v58 = vpack.i.bf16 %v18952_v1, %v18953_v21  ;;  %8856 = vmatmul.mubr.msk.bf16.gmra.mxu1 %vm1230_vm2, %v1216_v34  ;;  %v18955_v62 = vld [vmem:[#allocation76_spill] sm:$0xff] }
 0x245   : > { %v1189_v63 = vmax.f32 %v1087_v0, 0.0  ;;  %v1090_v14 = vadd.f32 %v14166_v11, %v1089_v45  ;;  %v14336_v10 = vsel %vm2953_vm6, %v13980_v2, %v9604_v47  ;;  %v2978_v30 = vsel %vm2953_vm6, %v13984_v38, %v9598_v46  ;;  %v8832_v44 = vpop.f32.mrf.mxu0  ;;  %v18956_v38 = vld [vmem:[#allocation14_spill] sm:$0xff] }
 0x246   : > { %10071 = vrot.lane.b32.xlu1 %v18951_v12, %s11100_s7  ;;  %10066 = vrot.lane.b32.xlu0 %v18954_v58, %s11100_s7  ;;  %v9674_v7 = vunpack.i.h.bf16 %v18955_v62  ;;  %v14341_v35 = vpop.permute.xlu1 %9791  ;;  %v1192_v13 = vmax.f32 %v1098_v55, 0.0  ;;  %v9673_v33 = vunpack.i.l.bf16 %v18955_v62  ;;  %v9679_v49 = vunpack.i.h.bf16 %v14013_v15  ;;  %v14346_v36 = vpop.permute.xlu0 %9786  ;;  %v18958_v47 = vld [vmem:[#allocation58_spill] sm:$0xff]  ;;  %v18960_v55 = vld [vmem:[#allocation17_spill] sm:$0xff] }
 0x247   : > { %v9678_v22 = vunpack.i.l.bf16 %v14013_v15  ;;  %v1190_v39 = vmax.f32 %v1090_v14, 0.0  ;;  %v9754_v2 = vunpack.i.h.bf16 %v14217_v48  ;;  %v9753_v45 = vunpack.i.l.bf16 %v14217_v48  ;;  %v1105_v37 = vpop.f32.mrf.mxu0 }
 0x248   : > { %v3061_v54 = vpack.c.bf16 %v3039_v29, %v3038_v24  ;;  %v3062_v50 = vpack.c.bf16 %v3041_v61, %v3040_v8  ;;  %v1218_v34 = vpack.c.bf16 %v1192_v13, %v1191_v40  ;;  %v14355_v15 = vadd.f32 %v8831_v6, %v14166_v11  ;;  %v18959_v29 = vld [vmem:[#allocation68_spill] sm:$0xff] }
 0x249   : > { %v1217_v9 = vpack.c.bf16 %v1190_v39, %v1189_v63  ;;  %v14358_v0 = vadd.f32 %v14166_v11, %v1102_v27  ;;  %v2979_v48 = vsel %vm2953_vm6, %v13988_v19, %v9599_v28  ;;  %v9609_v31 = vunpack.i.h.bf16 %v18958_v47  ;;  %v14368_v52 = vpop.f32.mrf.mxu0 }
 0x24a   : > { %10081 = vrot.lane.b32.xlu1 %v18956_v38, %s11100_s7  ;;  %10076 = vrot.lane.b32.xlu0 %v18957_v23, %s11100_s7  ;;  %v9759_v46 = vunpack.i.h.bf16 %v14258_v18  ;;  %v9758_v25 = vunpack.i.l.bf16 %v14258_v18  ;;  %v14366_v59 = vpop.permute.xlu1 %9801  ;;  %v9608_v6 = vunpack.i.l.bf16 %v18958_v47  ;;  %v3009_v57 = vsel %vm2986_vm7, %v14186_v53, %v9673_v33  ;;  %v14376_v24 = vpop.permute.xlu0 %9796 }
 0x24b   : > { %8906 = vmatmul.mubr.msk.bf16.gmra.mxu0 %vm3093_vm9, %v3061_v54  ;;  %v3010_v19 = vsel %vm2986_vm7, %v14241_v41, %v9674_v7  ;;  %v3011_v28 = vsel %vm2986_vm7, %v2978_v30, %v9678_v22  ;;  %8859 = vmatprep.mubr.msk.bf16.mxu1 %vm1230_vm2, %v1217_v9  ;;  %v3012_v18 = vsel %vm2986_vm7, %v2979_v48, %v9679_v49  ;;  %v1193_v8 = vmax.f32 %v14358_v0, 0.0  ;;  %v14390_v16 = vpop.f32.mrf.mxu0  ;;  %v18962_v22 = vld [vmem:[#allocation37_spill] sm:$0xff] }
 0x24c   : > { %8909 = vmatprep.mubr.msk.bf16.mxu0 %vm3093_vm9, %v3062_v50  ;;  %v14385_v53 = vadd.f32 %v8832_v44, %v14166_v11  ;;  %v14388_v41 = vadd.f32 %v14166_v11, %v1105_v37  ;;  %v14393_v3 = vsel %vm3019_vm8, %v3009_v57, %v9753_v45  ;;  %v14396_v12 = vsel %vm3019_vm8, %v3010_v19, %v9754_v2  ;;  %v18963_v45 = vld [vmem:[#allocation38_spill] sm:$0xff]  ;;  %v18966_v19 = vld [vmem:[#allocation28_spill] sm:$0xff] }
 0x24d   : > { %v1195_v27 = vmax.f32 %v14355_v15, 0.0  ;;  %8860 = vmatmul.mubr.msk.bf16.gmra.mxu1 %vm1230_vm2, %v1218_v34  ;;  %v14403_v61 = vsel %vm3019_vm8, %v3011_v28, %v9758_v25  ;;  %v14406_v1 = vsel %vm3019_vm8, %v3012_v18, %v9759_v46  ;;  %v14412_v63 = vpop.f32.mrf.mxu0  ;;  %v18961_v14 = vmov 0.0   ;;  %v18964_v34 = vld [vmem:[#allocation77_spill] sm:$0xff]  ;;  %v18965_v25 = vld [vmem:[#allocation26_spill] sm:$0xff] }
 0x24e   : > { %10091 = vrot.lane.b32.xlu1 %v18959_v29, %s11100_s7  ;;  %10086 = vrot.lane.b32.xlu0 %v18960_v55, %s11100_s7  ;;  %v14408_v21 = vpop.permute.xlu1 %9811  ;;  %v1196_v58 = vmax.f32 %v14385_v53, 0.0  ;;  %v1194_v40 = vmax.f32 %v14388_v41, 0.0  ;;  %398 = vst.msk [vmem:[#allocation2 + $0x478] sm:$0x3] %vm262_vm11, %v18961_v14  ;;  %389 = vst.msk [vmem:[#allocation2 + $0x430] sm:$0x3] %vm262_vm11, %v18961_v14  ;;  %v9684_v30 = vunpack.i.h.bf16 %v14005_v5  ;;  %v9683_v62 = vunpack.i.l.bf16 %v14005_v5  ;;  %v14514_v44 = vpop.permute.xlu0 %9806 }
 0x24f   : > { %407 = vst.msk [vmem:[#allocation2 + $0x4c0] sm:$0x3] %vm262_vm11, %v18961_v14  ;;  %416 = vst.msk [vmem:[#allocation2 + $0x508] sm:$0x3] %vm262_vm11, %v18961_v14  ;;  %v9689_v7 = vunpack.i.h.bf16 %v14051_v26  ;;  %v9688_v13 = vunpack.i.l.bf16 %v14051_v26  ;;  %v9764_v33 = vunpack.i.h.bf16 %v14248_v20  ;;  %v9763_v49 = vunpack.i.l.bf16 %v14248_v20  ;;  %v1121_v5 = vpop.f32.mrf.mxu0  ;;  %v18967_v53 = vld [vmem:[#allocation42_spill] sm:$0xff] }
 0x250   : > { %425 = vst.msk [vmem:[#allocation2 + $0x550] sm:$0x3] %vm262_vm11, %v18961_v14  ;;  %434 = vst.msk [vmem:[#allocation2 + $0x598] sm:$0x3] %vm262_vm11, %v18961_v14  ;;  %v3063_v39 = vpack.c.bf16 %v14396_v12, %v14393_v3  ;;  %v1219_v2 = vpack.c.bf16 %v1194_v40, %v1193_v8  ;;  %v3064_v26 = vpack.c.bf16 %v14406_v1, %v14403_v61  ;;  %v9769_v15 = vunpack.i.h.bf16 %v14284_v32  ;;  %v18968_v3 = vld [vmem:[#allocation86_spill] sm:$0xff] }
 0x251   : > { %443 = vst.msk [vmem:[#allocation2 + $0x5e0] sm:$0x3] %vm262_vm11, %v18961_v14  ;;  %452 = vst.msk [vmem:[#allocation2 + $0x628] sm:$0x3] %vm262_vm11, %v18961_v14  ;;  %v1220_v20 = vpack.c.bf16 %v1196_v58, %v1195_v27  ;;  %v1127_v54 = vadd.f32 %v14368_v52, %v14166_v11  ;;  %v1119_v50 = vadd.f32 %v14166_v11, %v14390_v16  ;;  %v9768_v0 = vunpack.i.l.bf16 %v14284_v32  ;;  %v8839_v46 = vpop.f32.mrf.mxu0 }
 0x252   : > { %461 = vst.msk [vmem:[#allocation2 + $0x670] sm:$0x3] %vm262_vm11, %v18961_v14  ;;  %470 = vst.msk [vmem:[#allocation2 + $0x6b8] sm:$0x3] %vm262_vm11, %v18961_v14  ;;  %10101 = vrot.lane.b32.xlu1 %v18962_v22, %s11101_s8  ;;  %10096 = vrot.lane.b32.xlu0 %v18963_v45, %s11101_s8  ;;  %v2982_v37 = vsel %vm2953_vm6, %v13997_v17, %v9608_v6  ;;  %v2983_v9 = vsel %vm2953_vm6, %v18964_v34, %v9609_v31  ;;  %v14547_v48 = vpop.permute.xlu1 %9821  ;;  %v9533_v52 = vunpack.i.l.bf16 %v18965_v25  ;;  %v14554_v47 = vpop.permute.xlu0 %9816  ;;  %v18974_v34 = vld [vmem:[#allocation73_spill] sm:$0xff] }
 0x253   : > { %479 = vst.msk [vmem:[#allocation2 + $0x700] sm:$0x3] %vm262_vm11, %v18961_v14  ;;  %488 = vst.msk [vmem:[#allocation2 + $0x748] sm:$0x3] %vm262_vm11, %v18961_v14  ;;  %8910 = vmatmul.mubr.msk.bf16.gmra.mxu0 %vm3093_vm9, %v3063_v39  ;;  %v3013_v57 = vsel %vm2986_vm7, %v14302_v43, %v9683_v62  ;;  %v3014_v17 = vsel %vm2986_vm7, %v14336_v10, %v9684_v30  ;;  %v1130_v32 = vadd.f32 %v14412_v63, %v14166_v11  ;;  %v1134_v10 = vpop.f32.mrf.mxu0  ;;  %v18969_v63 = vld [vmem:[#allocation66_spill] sm:$0xff] }
 0x254   : > { %497 = vst.msk [vmem:[#allocation2 + $0x790] sm:$0x3] %vm262_vm11, %v18961_v14  ;;  %506 = vst.msk [vmem:[#allocation2 + $0x7d8] sm:$0x3] %vm262_vm11, %v18961_v14  ;;  %8913 = vmatprep.mubr.msk.bf16.mxu0 %vm3093_vm9, %v3064_v26  ;;  %8863 = vmatprep.mubr.msk.bf16.mxu1 %vm1230_vm2, %v1219_v2  ;;  %v3015_v31 = vsel %vm2986_vm7, %v2982_v37, %v9688_v13  ;;  %v3016_v6 = vsel %vm2986_vm7, %v2983_v9, %v9689_v7  ;;  %v1197_v43 = vmax.f32 %v1119_v50, 0.0  ;;  %v18970_v7 = vld [vmem:[#allocation27_spill] sm:$0xff] }
 0x255   : > { %515 = vst.msk [vmem:[#allocation2 + $0x820] sm:$0x3] %vm262_vm11, %v18961_v14  ;;  %524 = vst.msk [vmem:[#allocation2 + $0x868] sm:$0x3] %vm262_vm11, %v18961_v14  ;;  %v1122_v28 = vadd.f32 %v14166_v11, %v1121_v5  ;;  %v3046_v18 = vsel %vm3019_vm8, %v3013_v57, %v9763_v49  ;;  %v3047_v8 = vsel %vm3019_vm8, %v3014_v17, %v9764_v33  ;;  %v1199_v41 = vmax.f32 %v1127_v54, 0.0  ;;  %v8840_v40 = vpop.f32.mrf.mxu0  ;;  %v18971_v2 = vld [vmem:[#allocation70_spill] sm:$0xff] }
 0x256   : > { %551 = vst.msk [vmem:[#allocation2 + $0x940] sm:$0x3] %vm262_vm11, %v18961_v14  ;;  %560 = vst.msk [vmem:[#allocation2 + $0x988] sm:$0x3] %vm262_vm11, %v18961_v14  ;;  %10111 = vrot.lane.b32.xlu1 %v18966_v19, %s11101_s8  ;;  %10106 = vrot.lane.b32.xlu0 %v18967_v53, %s11101_s8  ;;  %v1200_v16 = vmax.f32 %v1130_v32, 0.0  ;;  %v9613_v12 = vunpack.i.l.bf16 %v18968_v3  ;;  %v3048_v27 = vsel %vm3019_vm8, %v3015_v31, %v9768_v0  ;;  %v14573_v1 = vpop.permute.xlu1 %9831  ;;  %v9614_v62 = vunpack.i.h.bf16 %v18968_v3  ;;  %v14579_v33 = vpop.permute.xlu0 %9826  ;;  %v18972_v5 = vld [vmem:[#allocation69_spill] sm:$0xff] }
 0x257   : > { %569 = vst.msk [vmem:[#allocation2 + $0x9d0] sm:$0x3] %vm262_vm11, %v18961_v14  ;;  %578 = vst.msk [vmem:[#allocation2 + $0xa18] sm:$0x3] %vm262_vm11, %v18961_v14  ;;  %8864 = vmatmul.mubr.msk.bf16.gmra.mxu1 %vm1230_vm2, %v1220_v20  ;;  %v3049_v61 = vsel %vm3019_vm8, %v3016_v6, %v9769_v15  ;;  %v1198_v58 = vmax.f32 %v1122_v28, 0.0  ;;  %v2951_v30 = vsel %vm2920_vm5, %v18969_v63, %v9533_v52  ;;  %v9693_v13 = vunpack.i.l.bf16 %v18970_v7  ;;  %v3843_v20 = vld [vmem:[#allocation2 + $0xbb4] sm:$0xff]  ;;  %v1137_v50 = vpop.f32.mrf.mxu0 }
 0x258   : > { %587 = vst.msk [vmem:[#allocation2 + $0xa60] sm:$0x3] %vm262_vm11, %v18961_v14  ;;  %596 = vst.msk [vmem:[#allocation2 + $0xaa8] sm:$0x3] %vm262_vm11, %v18961_v14  ;;  %v1135_v49 = vadd.f32 %v14166_v11, %v1134_v10  ;;  %v9694_v22 = vunpack.i.h.bf16 %v18970_v7  ;;  %v9773_v39 = vunpack.i.l.bf16 %v14279_v51  ;;  %v18973_v45 = vpack.i.bf16 %v18971_v2, %v18972_v5  ;;  %v18975_v9 = vld [vmem:[#allocation25_spill] sm:$0xff]  ;;  %v3841_v57 = vld [vmem:[#allocation2 + $0xb6c] sm:$0xff] }
 0x259   : > { %605 = vst.msk [vmem:[#allocation2 + $0xaf0] sm:$0x3] %vm262_vm11, %v18961_v14  ;;  %614 = vst.msk [vmem:[#allocation2 + $0xb38] sm:$0x3] %vm262_vm11, %v18961_v14  ;;  %v3065_v26 = vpack.c.bf16 %v3047_v8, %v3046_v18  ;;  %v1221_v54 = vpack.c.bf16 %v1198_v58, %v1197_v43  ;;  %v9774_v37 = vunpack.i.h.bf16 %v14279_v51  ;;  %v18976_v15 = vpack.i.bf16 %v18974_v34, %v18975_v9  ;;  %v3844_v52 = vld [vmem:[#allocation2 + $0xbbc] sm:$0xff]  ;;  %v3842_v17 = vld [vmem:[#allocation2 + $0xb74] sm:$0xff]  ;;  %v8843_v18 = vpop.f32.mrf.mxu0 }
 0x25a   : > { %623 = vst.msk [vmem:[#allocation2 + $0xb80] sm:$0x3] %vm262_vm11, %v18961_v14  ;;  %632 = vst.msk [vmem:[#allocation2 + $0xbc8] sm:$0x3] %vm262_vm11, %v18961_v14  ;;  %10121 = vrot.lane.b32.xlu1 %v18973_v45, %s11101_s8  ;;  %v3066_v0 = vpack.c.bf16 %v3049_v61, %v3048_v27  ;;  %v1222_v32 = vpack.c.bf16 %v1200_v16, %v1199_v41  ;;  %v1143_v31 = vadd.f32 %v8839_v46, %v14166_v11  ;;  %v18978_v19 = vld [vmem:[#allocation15_spill] sm:$0xff]  ;;  %v14600_v51 = vpop.permute.xlu1 %9841  ;;  %v14605_v41 = vpop.permute.xlu0 %9836  ;;  %v18980_v27 = vld [vmem:[#allocation74_spill] sm:$0xff] }
 0x25b   : > { %641 = vst.msk [vmem:[#allocation2 + $0xc10] sm:$0x3] %vm262_vm11, %v18961_v14  ;;  %650 = vst.msk [vmem:[#allocation2 + $0xc58] sm:$0x3] %vm262_vm11, %v18961_v14  ;;  %10116 = vrot.lane.b32.xlu0 %v18976_v15, %s11101_s8  ;;  %v18977_v6 = vunpack.i.h.bf16 %v18965_v25  ;;  %v2984_v28 = vsel %vm2953_vm6, %v2951_v30, %v9613_v12  ;;  %8914 = vmatmul.mubr.msk.bf16.gmra.mxu0 %vm3093_vm9, %v3065_v26  ;;  %v1146_v10 = vadd.f32 %v8840_v40, %v14166_v11  ;;  %v18979_v12 = vld [vmem:[#allocation29_spill] sm:$0xff]  ;;  %v1150_v63 = vpop.f32.mrf.mxu0  ;;  %v18983_v7 = vld [vmem:[#allocation24_spill] sm:$0xff] }
 0x25c   : > { %659 = vst.msk [vmem:[#allocation2 + $0xca0] sm:$0x3] %vm262_vm11, %v18961_v14  ;;  %668 = vst.msk [vmem:[#allocation2 + $0xce8] sm:$0x3] %vm262_vm11, %v18961_v14  ;;  %v3017_v53 = vsel %vm2986_vm7, %v2984_v28, %v9693_v13  ;;  %8917 = vmatprep.mubr.msk.bf16.mxu0 %vm3093_vm9, %v3066_v0  ;;  %v1201_v46 = vmax.f32 %v1135_v49, 0.0  ;;  %8867 = vmatprep.mubr.msk.bf16.mxu1 %vm1230_vm2, %v1221_v54  ;;  %v1138_v25 = vadd.f32 %v14166_v11, %v1137_v50  ;;  %v3847_v49 = vld [vmem:[#allocation2 + $0xc44] sm:$0xff] }
 0x25d   : > { %677 = vst.msk [vmem:[#allocation2 + $0xd30] sm:$0x3] %vm262_vm11, %v18961_v14  ;;  %686 = vst.msk [vmem:[#allocation2 + $0xd78] sm:$0x3] %vm262_vm11, %v18961_v14  ;;  %v2952_v43 = vsel %vm2920_vm5, %v18978_v19, %v18977_v6  ;;  %v3050_v3 = vsel %vm3019_vm8, %v3017_v53, %v9773_v39  ;;  %v18981_v61 = vpack.i.bf16 %v18979_v12, %v18980_v27  ;;  %v3848_v2 = vld [vmem:[#allocation2 + $0xc4c] sm:$0xff]  ;;  %v1204_v5 = vmax.f32 %v1146_v10, 0.0  ;;  %v8844_v50 = vpop.f32.mrf.mxu0 }
 0x25e   : > { %713 = vst.msk [vmem:[#allocation2 + $0xe50] sm:$0x3] %vm262_vm11, %v18961_v14  ;;  %722 = vst.msk [vmem:[#allocation2 + $0xe98] sm:$0x3] %vm262_vm11, %v18961_v14  ;;  %v2985_v8 = vsel %vm2953_vm6, %v2952_v43, %v9614_v62  ;;  %v10140_v58 = vpack.i.bf16 %v3844_v52, %v3843_v20  ;;  %v10135_v40 = vpack.i.bf16 %v3842_v17, %v3841_v57  ;;  %v18982_v62 = vld [vmem:[#allocation23_spill] sm:$0xff]  ;;  %v1202_v39 = vmax.f32 %v1138_v25, 0.0  ;;  %v14622_v45 = vpop.permute.xlu1 %9851 }
 0x25f   : > { %731 = vst.msk [vmem:[#allocation2 + $0xee0] sm:$0x3] %vm262_vm11, %v18961_v14  ;;  %740 = vst.msk [vmem:[#allocation2 + $0xf28] sm:$0x3] %vm262_vm11, %v18961_v14  ;;  %v3018_v16 = vsel %vm2986_vm7, %v2985_v8, %v9694_v22  ;;  %10131 = vrot.lane.b32.xlu1 %v18981_v61, %s11101_s8  ;;  %v18984_v13 = vpack.i.bf16 %v18982_v62, %v18983_v7  ;;  %v1203_v22 = vmax.f32 %v1143_v31, 0.0  ;;  %8868 = vmatmul.mubr.msk.bf16.gmra.mxu1 %vm1230_vm2, %v1222_v32  ;;  %v3845_v26 = vld [vmem:[#allocation2 + $0xbfc] sm:$0xff]  ;;  %v1153_v0 = vpop.f32.mrf.mxu0 }
 0x260   : > { %749 = vst.msk [vmem:[#allocation2 + $0xf70] sm:$0x3] %vm262_vm11, %v18961_v14  ;;  %758 = vst.msk [vmem:[#allocation2 + $0xfb8] sm:$0x3] %vm262_vm11, %v18961_v14  ;;  %v3051_v30 = vsel %vm3019_vm8, %v3018_v16, %v9774_v37  ;;  %v3846_v20 = vld [vmem:[#allocation2 + $0xc04] sm:$0xff]  ;;  %v1151_v54 = vadd.f32 %v14166_v11, %v1150_v63  ;;  %v14625_v37 = vpop.permute.xlu0 %9846  ;;  %v1223_v34 = vpack.c.bf16 %v1202_v39, %v1201_v46  ;;  %v3851_v57 = vld [vmem:[#allocation2 + $0xcd4] sm:$0xff] }
 0x261   : > { %767 = vst.msk [vmem:[#allocation2 + $0x1000] sm:$0x3] %vm262_vm11, %v18961_v14  ;;  %776 = vst.msk [vmem:[#allocation2 + $0x1048] sm:$0x3] %vm262_vm11, %v18961_v14  ;;  %10126 = vrot.lane.b32.xlu0 %v18984_v13, %s11101_s8  ;;  %v3067_v9 = vpack.c.bf16 %v3051_v30, %v3050_v3  ;;  %v10150_v15 = vpack.i.bf16 %v3848_v2, %v3847_v49  ;;  %v10145_v52 = vpack.i.bf16 %v3846_v20, %v3845_v26  ;;  %v3852_v17 = vld [vmem:[#allocation2 + $0xcdc] sm:$0xff]  ;;  %v3849_v43 = vld [vmem:[#allocation2 + $0xc8c] sm:$0xff]  ;;  %v8847_v53 = vpop.f32.mrf.mxu0 }
 0x262   : > { %785 = vst.msk [vmem:[#allocation2 + $0x1090] sm:$0x3] %vm262_vm11, %v18961_v14  ;;  %794 = vst.msk [vmem:[#allocation2 + $0x10d8] sm:$0x3] %vm262_vm11, %v18961_v14  ;;  %v1224_v32 = vpack.c.bf16 %v1204_v5, %v1203_v22  ;;  %v1159_v31 = vadd.f32 %v8843_v18, %v14166_v11  ;;  %v1162_v6 = vadd.f32 %v8844_v50, %v14166_v11  ;;  %v14632_v19 = vpop.permute.xlu1 %9861  ;;  %v3850_v28 = vld [vmem:[#allocation2 + $0xc94] sm:$0xff]  ;;  %v1205_v10 = vmax.f32 %v1151_v54, 0.0 }
 0x263   : > { %803 = vst.msk [vmem:[#allocation2 + $0x1120] sm:$0x3] %vm262_vm11, %v18961_v14  ;;  %812 = vst.msk [vmem:[#allocation2 + $0x1168] sm:$0x3] %vm262_vm11, %v18961_v14  ;;  %10141 = vrot.lane.b32.xlu1 %v10140_v58, %s11101_s8  ;;  %8918 = vmatmul.mubr.msk.bf16.gmra.mxu0 %vm3093_vm9, %v3067_v9  ;;  %v1154_v8 = vadd.f32 %v14166_v11, %v1153_v0  ;;  %v14639_v25 = vpack.i.bf16 %v3852_v17, %v3851_v57  ;;  %v1166_v16 = vpop.f32.mrf.mxu0  ;;  %v3855_v12 = vld [vmem:[#allocation2 + $0xd64] sm:$0xff]  ;;  %v3856_v27 = vld [vmem:[#allocation2 + $0xd6c] sm:$0xff] }
 0x264   : > { %821 = vst.msk [vmem:[#allocation2 + $0x11b0] sm:$0x3] %vm262_vm11, %v18961_v14  ;;  %830 = vst.msk [vmem:[#allocation2 + $0x11f8] sm:$0x3] %vm262_vm11, %v18961_v14  ;;  %8871 = vmatprep.mubr.msk.bf16.mxu1 %vm1230_vm2, %v1223_v34  ;;  %v14636_v46 = vpop.permute.xlu0 %9856  ;;  %v14642_v3 = vpack.i.bf16 %v3850_v28, %v3849_v43  ;;  %v1207_v61 = vmax.f32 %v1159_v31, 0.0  ;;  %v1208_v58 = vmax.f32 %v1162_v6, 0.0  ;;  %v1167_v49 = vadd.f32 %v14166_v11, %v1166_v16 }
 0x265   : > { %839 = vst.msk [vmem:[#allocation2 + $0x1240] sm:$0x3] %vm262_vm11, %v18961_v14  ;;  %848 = vst.msk [vmem:[#allocation2 + $0x1288] sm:$0x3] %vm262_vm11, %v18961_v14  ;;  %10136 = vrot.lane.b32.xlu0 %v10135_v40, %s11101_s8  ;;  %v1206_v18 = vmax.f32 %v1154_v8, 0.0  ;;  %v3853_v63 = vld [vmem:[#allocation2 + $0xd1c] sm:$0xff]  ;;  %v8848_v7 = vpop.f32.mrf.mxu0  ;;  %v14652_v2 = vpack.i.bf16 %v3856_v27, %v3855_v12  ;;  %v1175_v26 = vadd.f32 %v8847_v53, %v14166_v11 }
 0x266   : > { %v14645_v40 = vpop.permute.xlu1 %9871  ;;  %v3854_v30 = vld [vmem:[#allocation2 + $0xd24] sm:$0xff]  ;;  %v1226_v39 = vpack.c.bf16 %v1208_v58, %v1207_v61  ;;  %v1178_v20 = vadd.f32 %v8848_v7, %v14166_v11  ;;  %v1209_v50 = vmax.f32 %v1167_v49, 0.0  ;;  %v3866_v28 = vld [vmem:[#allocation2 + $0xd94] sm:$0xff]  ;;  %v3872_v27 = vld [vmem:[#allocation2 + $0xe6c] sm:$0xff] }
 0x267   : > { %10151 = vrot.lane.b32.xlu1 %v10150_v15, %s11101_s8  ;;  %8872 = vmatmul.mubr.msk.bf16.gmra.mxu1 %vm1230_vm2, %v1224_v32  ;;  %v1225_v62 = vpack.c.bf16 %v1206_v18, %v1205_v10  ;;  %v1169_v22 = vpop.f32.mrf.mxu0  ;;  %v14657_v5 = vpack.i.bf16 %v3854_v30, %v3853_v63  ;;  %v1211_v0 = vmax.f32 %v1175_v26, 0.0  ;;  %v3869_v31 = vld [vmem:[#allocation2 + $0xde4] sm:$0xff]  ;;  %v3867_v10 = vld [vmem:[#allocation2 + $0xd9c] sm:$0xff]  ;;  %v18993_v16 = vld [vmem:[#allocation32_spill] sm:$0xff] }
 0x268   : > { %v14647_v13 = vpop.permute.xlu0 %9866  ;;  %v1170_v34 = vadd.f32 %v14166_v11, %v1169_v22  ;;  %v3868_v11 = vld [vmem:[#allocation2 + $0xddc] sm:$0xff]  ;;  %v8559_v53 = vld [vmem:[%s18129_s4 + $0x4] sm:$0xf]  ;;  %v10195_v12 = vpack.i.bf16 %v3867_v10, %v3866_v28  ;;  %v3873_v61 = vld [vmem:[#allocation2 + $0xe74] sm:$0xff] }
 0x269   : > { %10146 = vrot.lane.b32.xlu0 %v10145_v52, %s11101_s8  ;;  %18985 = vst [vmem:[#allocation22_spill] sm:$0xff] %v14647_v13  ;;  %8875 = vmatprep.mubr.msk.bf16.mxu1 %vm1230_vm2, %v1225_v62  ;;  %v1212_v52 = vmax.f32 %v1178_v20, 0.0  ;;  %v10200_v18 = vpack.i.bf16 %v3869_v31, %v3868_v11  ;;  %v3870_v63 = vld [vmem:[#allocation2 + $0xe24] sm:$0xff]  ;;  %v3871_v30 = vld [vmem:[#allocation2 + $0xe2c] sm:$0xff]  ;;  %v10210_v7 = vpack.i.bf16 %v3873_v61, %v3872_v27  ;;  %v3876_v22 = vld [vmem:[#allocation2 + $0xefc] sm:$0xff] }
 0x26a   : > { %v14661_v54 = vpop.permute.xlu1 %9881  ;;  %v1210_v15 = vmax.f32 %v1170_v34, 0.0  ;;  %9112 = vmatprep.subr.msk.bf16.mxu1 %vm1279_vm10, %v8559_v53  ;;  %v10205_v49 = vpack.i.bf16 %v3871_v30, %v3870_v63  ;;  %v3874_v20 = vld [vmem:[#allocation2 + $0xeb4] sm:$0xff]  ;;  %v3878_v31 = vld [vmem:[#allocation2 + $0xf44] sm:$0xff]  ;;  %v3888_v30 = vld [vmem:[#allocation2 + $0x10ac] sm:$0xff] }
 0x26b   : > { %10161 = vrot.lane.b32.xlu1 %v14639_v25, %s11101_s8  ;;  %18986 = vst [vmem:[#allocation83_spill] sm:$0xff] %v14661_v54  ;;  %v1228_v6 = vpack.c.bf16 %v1212_v52, %v1211_v0  ;;  %v3880_v52 = vld [vmem:[#allocation2 + $0xf8c] sm:$0xff]  ;;  %v3676_v54 = vld [vmem:[#allocation2 + $0x724] sm:$0xff] }
 0x26c   : > { %v14664_v9 = vpop.permute.xlu0 %9876  ;;  %v1227_v17 = vpack.c.bf16 %v1210_v15, %v1209_v50  ;;  %v3875_v50 = vld [vmem:[#allocation2 + $0xebc] sm:$0xff] }
 0x26d   : > { %10156 = vrot.lane.b32.xlu0 %v14642_v3, %s11101_s8  ;;  %18987 = vst [vmem:[#allocation41_spill] sm:$0xff] %v14664_v9  ;;  %v10215_v0 = vpack.i.bf16 %v3875_v50, %v3874_v20  ;;  %v3670_v9 = vld [vmem:[#allocation2 + $0x64c] sm:$0xff] }
 0x26e   : > { %v14671_v57 = vpop.permute.xlu1 %9891 }
 0x26f   : > { %10171 = vrot.lane.b32.xlu1 %v14652_v2, %s11101_s8  ;;  %8876 = vmatmul.mubr.msk.bf16.gmra.mxu1 %vm1230_vm2, %v1226_v39  ;;  %18988 = vst [vmem:[#allocation40_spill] sm:$0xff] %v14671_v57  ;;  %v3877_v39 = vld [vmem:[#allocation2 + $0xf04] sm:$0xff] }
 0x270   : > { %v14673_v32 = vpop.permute.xlu0 %9886  ;;  %8879 = vmatprep.mubr.msk.bf16.mxu1 %vm1230_vm2, %v1227_v17  ;;  %v10220_v15 = vpack.i.bf16 %v3877_v39, %v3876_v22  ;;  %v3881_v17 = vld [vmem:[#allocation2 + $0xf94] sm:$0xff]  ;;  %v3886_v22 = vld [vmem:[#allocation2 + $0x1064] sm:$0xff]  ;;  %v3887_v39 = vld [vmem:[#allocation2 + $0x106c] sm:$0xff] }
 0x271   : > { %10166 = vrot.lane.b32.xlu0 %v14657_v5, %s11101_s8  ;;  %18989 = vst [vmem:[#allocation31_spill] sm:$0xff] %v14673_v32  ;;  %v10230_v10 = vpack.i.bf16 %v3881_v17, %v3880_v52  ;;  %v14853_v32 = vld [vmem:[#allocation2 + $0x1030] sm:$0xff] }
 0x272   : > { %v14680_v43 = vpop.permute.xlu1 %9901  ;;  %19023 = vst [vmem:[#allocation35_spill] sm:$0xff] %v14853_v32  ;;  %v3678_v32 = vld [vmem:[#allocation2 + $0x76c] sm:$0xff] }
 0x273   : > { %10181 = vrot.lane.b32.xlu1 %v18920_v4, %s11102_s11  ;;  %18990 = vst [vmem:[#allocation10_spill] sm:$0xff] %v14680_v43  ;;  %v18992_v4 = vld [vmem:[#allocation56_spill] sm:$0xff]  ;;  %v9788_v43 = vunpack.i.l.bf16 %v14346_v36 }
 0x274   : > { %v14682_v8 = vpop.permute.xlu0 %9896 }
 0x275   : > { %10176 = vrot.lane.b32.xlu0 %v18921_v60, %s11102_s11  ;;  %18991 = vst [vmem:[#allocation44_spill] sm:$0xff] %v14682_v8  ;;  %v3437_v60 = vsel %vm1279_vm10, %v8559_v53, 0  ;;  %v9793_v8 = vunpack.i.l.bf16 %v14341_v35 }
 0x276   : > { %v14694_v58 = vpop.permute.xlu1 %9911  ;;  %8922 = vmatpush3.bf16.msra.mxu1 %v3437_v60 }
 0x277   : > { %10191 = vrot.lane.b32.xlu1 %v18992_v4, %s11102_s11  ;;  %8880 = vmatmul.mubr.msk.bf16.gmra.mxu1 %vm1230_vm2, %v1228_v6  ;;  %18994 = vst [vmem:[#allocation43_spill] sm:$0xff] %v14694_v58  ;;  %v3879_v6 = vld [vmem:[#allocation2 + $0xf4c] sm:$0xff]  ;;  %v3884_v4 = vld [vmem:[#allocation2 + $0x101c] sm:$0xff]  ;;  %v9794_v58 = vunpack.i.h.bf16 %v14341_v35 }
 0x278   : > { %v14696_v62 = vpop.permute.xlu0 %9906  ;;  %v10225_v53 = vpack.i.bf16 %v3879_v6, %v3878_v31  ;;  %v11058_v6 = vld [vmem:[%s18127_s2 + $0x24] ss:$0 sps:$4 sm:$0x33]   ;;  %v3675_v35 = vld [vmem:[#allocation2 + $0x71c] sm:$0xff] }
 0x279   : > { %10186 = vrot.lane.b32.xlu0 %v18993_v16, %s11102_s11  ;;  %18995 = vst [vmem:[#allocation71_spill] sm:$0xff] %v14696_v62  ;;  %v3882_v16 = vld [vmem:[#allocation2 + $0xfd4] sm:$0xff]  ;;  %9113 = vmatprep.subr.msk.bf16.mxu0 %vm1016_vm1, %v11058_v6  ;;  %v14845_v62 = vld [vmem:[#allocation2 + $0x1028] sm:$0xff] }
 0x27a   : > { %v14700_v26 = vpop.permute.xlu1 %9921  ;;  %19021 = vst [vmem:[#allocation54_spill] sm:$0xff] %v14845_v62  ;;  %v3680_v62 = vld [vmem:[#allocation2 + $0x7b4] sm:$0xff] }
 0x27b   : > { %10201 = vrot.lane.b32.xlu1 %v10200_v18, %s11102_s11  ;;  %18996 = vst [vmem:[#allocation89_spill] sm:$0xff] %v14700_v26  ;;  %v3885_v18 = vld [vmem:[#allocation2 + $0x1024] sm:$0xff] }
 0x27c   : > { %v14702_v34 = vpop.permute.xlu0 %9916  ;;  %v10240_v61 = vpack.i.bf16 %v3885_v18, %v3884_v4  ;;  %v3898_v18 = vld [vmem:[#allocation2 + $0xda0] sm:$0xff] }
 0x27d   : > { %10196 = vrot.lane.b32.xlu0 %v10195_v12, %s11102_s11  ;;  %18997 = vst [vmem:[#allocation46_spill] sm:$0xff] %v14702_v34  ;;  %v3883_v12 = vld [vmem:[#allocation2 + $0xfdc] sm:$0xff]  ;;  %v3669_v34 = vld [vmem:[#allocation2 + $0x644] sm:$0xff] }
 0x27e   : > { %v14706_v11 = vpop.permute.xlu1 %9931  ;;  %v10235_v63 = vpack.i.bf16 %v3883_v12, %v3882_v16  ;;  %v3899_v16 = vld [vmem:[#allocation2 + $0xda8] sm:$0xff]  ;;  %v5325_v12 = vsel %vm1016_vm1, %v11058_v6, 0  ;;  %v11060_v6 = vld [vmem:[%s18127_s2 + $0x14] sm:$0xff]  }
 0x27f   : > { %10211 = vrot.lane.b32.xlu1 %v10210_v7, %s11102_s11  ;;  %18998 = vst [vmem:[#allocation36_spill] sm:$0xff] %v14706_v11  ;;  %v3889_v7 = vld [vmem:[#allocation2 + $0x10b4] sm:$0xff]  ;;  %8956 = vmatpush3.bf16.msra.mxu0 %v5325_v12  ;;  %v3907_v12 = vld [vmem:[#allocation2 + $0xec8] sm:$0xff] }
 0x280   : > { %v14708_v28 = vpop.permute.xlu0 %9926  ;;  %v10250_v50 = vpack.i.bf16 %v3889_v7, %v3888_v30  ;;  %v3904_v30 = vld [vmem:[#allocation2 + $0xe78] sm:$0xff]  ;;  %v3905_v7 = vld [vmem:[#allocation2 + $0xe80] sm:$0xff] }
 0x281   : > { %10206 = vrot.lane.b32.xlu0 %v10205_v49, %s11102_s11  ;;  %18999 = vst [vmem:[#allocation19_spill] sm:$0xff] %v14708_v28  ;;  %v3671_v28 = vld [vmem:[#allocation2 + $0x68c] sm:$0xff]  ;;  %v3672_v11 = vld [vmem:[#allocation2 + $0x694] sm:$0xff] }
 0x282   : > { %v14712_v60 = vpop.permute.xlu1 %9941 }
 0x283   : > { %10221 = vrot.lane.b32.xlu1 %v10220_v15, %s11102_s11  ;;  %19000 = vst [vmem:[#allocation20_spill] sm:$0xff] %v14712_v60  ;;  %v10245_v15 = vpack.i.bf16 %v3887_v39, %v3886_v22  ;;  %v3902_v39 = vld [vmem:[#allocation2 + $0xe30] sm:$0xff] }
 0x284   : > { %v14714_v27 = vpop.permute.xlu0 %9936  ;;  %v14829_v60 = vld [vmem:[#allocation2 + $0xfac] sm:$0xff] }
 0x285   : > { %10216 = vrot.lane.b32.xlu0 %v10215_v0, %s11102_s11  ;;  %19001 = vst [vmem:[#allocation48_spill] sm:$0xff] %v14714_v27  ;;  %v9778_v27 = vunpack.i.l.bf16 %v14316_v42 }
 0x286   : > { %v14718_v49 = vpop.permute.xlu1 %9951 }
 0x287   : > { %10231 = vrot.lane.b32.xlu1 %v10230_v10, %s11102_s11  ;;  %19002 = vst [vmem:[#allocation90_spill] sm:$0xff] %v14718_v49  ;;  %v3900_v10 = vld [vmem:[#allocation2 + $0xde8] sm:$0xff]  ;;  %v9779_v49 = vunpack.i.h.bf16 %v14316_v42 }
 0x288   : > { %v14720_v20 = vpop.permute.xlu0 %9946 }
 0x289   : > { %10226 = vrot.lane.b32.xlu0 %v10225_v53, %s11102_s11  ;;  %19003 = vst [vmem:[#allocation92_spill] sm:$0xff] %v14720_v20  ;;  %v3901_v53 = vld [vmem:[#allocation2 + $0xdf0] sm:$0xff]  ;;  %v14819_v20 = vld [vmem:[#allocation2 + $0xfa4] sm:$0xff] }
 0x28a   : > { %v14724_v0 = vpop.permute.xlu1 %9961 }
 0x28b   : > { %10241 = vrot.lane.b32.xlu1 %v10240_v61, %s11102_s11  ;;  %19004 = vst [vmem:[#allocation91_spill] sm:$0xff] %v14724_v0  ;;  %v14831_v0 = vld [vmem:[#allocation2 + $0xf5c] sm:$0xff] }
 0x28c   : > { %v14726_v52 = vpop.permute.xlu0 %9956  ;;  %19018 = vst [vmem:[#allocation79_spill] sm:$0xff] %v14831_v0  ;;  %v14895_v0 = vld [vmem:[#allocation2 + $0xff4] sm:$0xff] }
 0x28d   : > { %10236 = vrot.lane.b32.xlu0 %v10235_v63, %s11102_s11  ;;  %19005 = vst [vmem:[#allocation21_spill] sm:$0xff] %v14726_v52  ;;  %v10275_v63 = vpack.i.bf16 %v3899_v16, %v3898_v18  ;;  %v3906_v16 = vld [vmem:[#allocation2 + $0xec0] sm:$0xff]  ;;  %19029 = vst [vmem:[#allocation82_spill] sm:$0xff] %v14895_v0 }
 0x28e   : > { %v14730_v17 = vpop.permute.xlu1 %9971  ;;  %v3666_v52 = vld [vmem:[#allocation2 + $0x5bc] sm:$0xff] }
 0x28f   : > { %10251 = vrot.lane.b32.xlu1 %v10250_v50, %s11102_s11  ;;  %19006 = vst [vmem:[#allocation39_spill] sm:$0xff] %v14730_v17  ;;  %v3903_v50 = vld [vmem:[#allocation2 + $0xe38] sm:$0xff]  ;;  %v14872_v13 = vsel %vm253_vm0, %v3666_v52, %v9779_v49 }
 0x290   : > { %v14732_v31 = vpop.permute.xlu0 %9966  ;;  %v3665_v17 = vld [vmem:[#allocation2 + $0x5b4] sm:$0xff] }
 0x291   : > { %10246 = vrot.lane.b32.xlu0 %v10245_v15, %s11102_s11  ;;  %19007 = vst [vmem:[#allocation45_spill] sm:$0xff] %v14732_v31  ;;  %v9784_v31 = vunpack.i.h.bf16 %v14307_v56 }
 0x292   : > { %v14741_v4 = vpop.permute.xlu1 %9981 }
 0x293   : > { %10261 = vrot.lane.b32.xlu1 %v18956_v38, %s11103_s12  ;;  %19008 = vst [vmem:[#allocation94_spill] sm:$0xff] %v14741_v4  ;;  %v10280_v38 = vpack.i.bf16 %v3901_v53, %v3900_v10  ;;  %v3908_v10 = vld [vmem:[#allocation2 + $0xf08] sm:$0xff]  ;;  %v3909_v53 = vld [vmem:[#allocation2 + $0xf10] sm:$0xff]  ;;  %v14809_v4 = vld [vmem:[#allocation2 + $0xf58] sm:$0xff] }
 0x294   : > { %v14745_v61 = vpop.permute.xlu0 %9976 }
 0x295   : > { %10256 = vrot.lane.b32.xlu0 %v18957_v23, %s11103_s12  ;;  %19009 = vst [vmem:[#allocation93_spill] sm:$0xff] %v14745_v61  ;;  %v11059_v23 = vld [vmem:[%s18127_s2 + $0x1c] sm:$0xff]  }
 0x296   : > { %v14754_v22 = vpop.permute.xlu1 %9991  ;;  %8957 = vmatprep.subr.bf16.mxu0 %v11059_v23  ;;  %v14805_v61 = vld [vmem:[#allocation2 + $0xfa0] sm:$0xff] }
 0x297   : > { %10271 = vrot.lane.b32.xlu1 %v18959_v29, %s11103_s12  ;;  %19010 = vst [vmem:[#allocation47_spill] sm:$0xff] %v14754_v22  ;;  %8958 = vmatpush3.bf16.msra.mxu0 %v11059_v23  ;;  %v10290_v29 = vpack.i.bf16 %v3905_v7, %v3904_v30  ;;  %v10295_v23 = vpack.i.bf16 %v3907_v12, %v3906_v16  ;;  %v14773_v7 = vld [vmem:[#allocation2 + $0xdf4] sm:$0xff]  ;;  %v14793_v16 = vld [vmem:[#allocation2 + $0xf1c] sm:$0xff] }
 0x298   : > { %v14756_v15 = vpop.permute.xlu0 %9986  ;;  %8959 = vmatprep.subr.bf16.mxu0 %v11060_v6 }
 0x299   : > { %10266 = vrot.lane.b32.xlu0 %v18960_v55, %s11103_s12  ;;  %19011 = vst [vmem:[#allocation49_spill] sm:$0xff] %v14756_v15  ;;  %v10285_v55 = vpack.i.bf16 %v3903_v50, %v3902_v39  ;;  %v14775_v39 = vld [vmem:[#allocation2 + $0xdfc] sm:$0xff]  ;;  %v14777_v50 = vld [vmem:[#allocation2 + $0xdac] sm:$0xff]  ;;  %v3668_v15 = vld [vmem:[#allocation2 + $0x604] sm:$0xff] }
 0x29a   : > { %v14763_v18 = vpop.permute.xlu1 %10001 }
 0x29b   : > { %10281 = vrot.lane.b32.xlu1 %v10280_v38, %s11103_s12  ;;  %19012 = vst [vmem:[#allocation95_spill] sm:$0xff] %v14763_v18  ;;  %8960 = vmatpush3.bf16.msra.mxu0 %v11060_v6  ;;  %v10300_v38 = vpack.i.bf16 %v3909_v53, %v3908_v10  ;;  %v14779_v18 = vld [vmem:[#allocation2 + $0xdb4] sm:$0xff]  ;;  %v14782_v6 = vld [vmem:[#allocation2 + $0xe84] sm:$0xff] }
 0x29c   : > { %v14765_v14 = vpop.permute.xlu0 %9996  ;;  %v14789_v10 = vld [vmem:[#allocation2 + $0xe44] sm:$0xff]  ;;  %v14791_v53 = vld [vmem:[#allocation2 + $0xf14] sm:$0xff] }
 0x29d   : > { %10276 = vrot.lane.b32.xlu0 %v10275_v63, %s11103_s12  ;;  %19013 = vst [vmem:[#allocation50_spill] sm:$0xff] %v14765_v14  ;;  %v3667_v14 = vld [vmem:[#allocation2 + $0x5fc] sm:$0xff] }
 0x29e   : > { %v14769_v30 = vpop.permute.xlu1 %10011 }
 0x29f   : > { %10291 = vrot.lane.b32.xlu1 %v10290_v29, %s11103_s12  ;;  %19014 = vst [vmem:[#allocation96_spill] sm:$0xff] %v14769_v30  ;;  %v14784_v29 = vld [vmem:[#allocation2 + $0xe8c] sm:$0xff]  ;;  %v14799_v30 = vld [vmem:[#allocation2 + $0xed4] sm:$0xff] }
 0x2a0   : > { %v14771_v63 = vpop.permute.xlu0 %10006 }
 0x2a1   : > { %10286 = vrot.lane.b32.xlu0 %v10285_v55, %s11103_s12  ;;  %19015 = vst [vmem:[#allocation97_spill] sm:$0xff] %v14771_v63  ;;  %v14786_v55 = vld [vmem:[#allocation2 + $0xe3c] sm:$0xff]  ;;  %v14797_v63 = vld [vmem:[#allocation2 + $0xecc] sm:$0xff] }
 0x2a2   : > { %v14795_v12 = vpop.permute.xlu1 %10021 }
 0x2a3   : > { %10301 = vrot.lane.b32.xlu1 %v10300_v38, %s11103_s12  ;;  %19016 = vst [vmem:[#allocation52_spill] sm:$0xff] %v14795_v12  ;;  %v14801_v38 = vld [vmem:[#allocation2 + $0xf98] sm:$0xff]  ;;  %v9783_v12 = vunpack.i.l.bf16 %v14307_v56  ;;  %v14860_v56 = vsel %vm253_vm0, %v3668_v15, %v9784_v31  ;;  %v14875_v31 = vsel %vm253_vm0, %v3665_v17, %v9778_v27  ;;  %v9803_v15 = vunpack.i.l.bf16 %v14366_v59  ;;  %v14893_v17 = vld [vmem:[#allocation2 + $0xfec] sm:$0xff] }
 0x2a4   : > { %v14803_v22 = vpop.permute.xlu0 %10016  ;;  %19026 = vst [vmem:[#allocation85_spill] sm:$0xff] %v14860_v56  ;;  %v3674_v56 = vld [vmem:[#allocation2 + $0x6dc] sm:$0xff]  ;;  %19028 = vst [vmem:[#allocation30_spill] sm:$0xff] %v14893_v17  ;;  %v14907_v27 = vsel %vm253_vm0, %v3669_v34, %v9788_v43  ;;  %v19034_v43 = vpack.i.bf16 %v14775_v39, %v14773_v7  ;;  %v19043_v7 = vpack.i.bf16 %v14784_v29, %v14782_v6 }
 0x2a5   : > { %10296 = vrot.lane.b32.xlu0 %v10295_v23, %s11103_s12  ;;  %19017 = vst [vmem:[#allocation51_spill] sm:$0xff] %v14803_v22  ;;  %v14807_v23 = vld [vmem:[#allocation2 + $0xf50] sm:$0xff]  ;;  %v14833_v22 = vld [vmem:[#allocation2 + $0xf64] sm:$0xff]  ;;  %v14863_v57 = vsel %vm253_vm0, %v3667_v14, %v9783_v12  ;;  %v9804_v14 = vunpack.i.h.bf16 %v14366_v59  ;;  %v14891_v59 = vld [vmem:[#allocation2 + $0x103c] sm:$0xff] }
 0x2a6   : > { %19019 = vst [vmem:[#allocation16_spill] sm:$0xff] %v14833_v22  ;;  %v14835_v26 = vpop.permute.xlu1 %10031  ;;  %v3673_v12 = vld [vmem:[#allocation2 + $0x6d4] sm:$0xff]  ;;  %v14901_v22 = vsel %vm253_vm0, %v3671_v28, %v9793_v8  ;;  %v9809_v8 = vunpack.i.h.bf16 %v14514_v44  ;;  %v14956_v39 = vld [vmem:[#allocation2 + $0x107c] sm:$0xff] }
 0x2a7   : > { %10311 = vrot.lane.b32.xlu1 %v14639_v25, %s11104_s19  ;;  %19020 = vst [vmem:[#allocation65_spill] sm:$0xff] %v14835_v26  ;;  %v9789_v26 = vunpack.i.h.bf16 %v14346_v36  ;;  %v14857_v25 = vld [vmem:[#allocation2 + $0xfe8] sm:$0xff]  ;;  %v9799_v36 = vunpack.i.h.bf16 %v14376_v24  ;;  %v14925_v34 = vld [vmem:[#allocation2 + $0x1078] sm:$0xff]  ;;  %v14928_v28 = vsel %vm253_vm0, %v3676_v54, %v9804_v14 }
 0x2a8   : > { %v14851_v42 = vpop.permute.xlu0 %10026  ;;  %19025 = vst [vmem:[#allocation81_spill] sm:$0xff] %v14857_v25  ;;  %v14913_v25 = vld [vmem:[#allocation2 + $0x10c0] sm:$0xff]  ;;  %19036 = vst [vmem:[#allocation59_spill] sm:$0xff] %v14925_v34  ;;  %v14978_v17 = vsel %vm253_vm0, %v3678_v32, %v9809_v8  ;;  %v14989_v34 = vld [vmem:[#allocation2 + $0x418] sm:$0xff]  ;;  %v9833_v32 = vunpack.i.l.bf16 %v14573_v1  ;;  %v9829_v8 = vunpack.i.h.bf16 %v14579_v33 }
 0x2a9   : > { %10306 = vrot.lane.b32.xlu0 %v14642_v3, %s11104_s19  ;;  %19022 = vst [vmem:[#allocation53_spill] sm:$0xff] %v14851_v42  ;;  %v14855_v3 = vld [vmem:[#allocation2 + $0xfe0] sm:$0xff]  ;;  %v9798_v42 = vunpack.i.l.bf16 %v14376_v24  ;;  %v14904_v24 = vsel %vm253_vm0, %v3670_v9, %v9789_v26  ;;  %19033 = vst [vmem:[#allocation88_spill] sm:$0xff] %v14913_v25  ;;  %v9808_v9 = vunpack.i.l.bf16 %v14514_v44  ;;  %v14923_v26 = vld [vmem:[#allocation2 + $0x1070] sm:$0xff]  ;;  %v19038_v44 = vpack.i.bf16 %v14779_v18, %v14777_v50 }
 0x2aa   : > { %19024 = vst [vmem:[#allocation63_spill] sm:$0xff] %v14855_v3  ;;  %v14885_v49 = vpop.permute.xlu1 %10041  ;;  %19030 = vst [vmem:[#allocation75_spill] sm:$0xff] %v14904_v24  ;;  %v14911_v3 = vld [vmem:[#allocation2 + $0x10b8] sm:$0xff]  ;;  %v3684_v24 = vld [vmem:[#allocation2 + $0x844] sm:$0xff]  ;;  %v14942_v54 = vsel %vm253_vm0, %v3674_v56, %v9799_v36  ;;  %v9823_v56 = vunpack.i.l.bf16 %v14547_v48  ;;  %v9818_v36 = vunpack.i.l.bf16 %v14554_v47 }
 0x2ab   : > { %10321 = vrot.lane.b32.xlu1 %v14652_v2, %s11104_s19  ;;  %v14881_v2 = vld [vmem:[#allocation2 + $0x1034] sm:$0xff]  ;;  %19027 = vst [vmem:[#allocation55_spill] sm:$0xff] %v14885_v49  ;;  %v3679_v49 = vld [vmem:[#allocation2 + $0x7ac] sm:$0xff]  ;;  %19032 = vst [vmem:[#allocation80_spill] sm:$0xff] %v14911_v3 }
 0x2ac   : > { %v14909_v52 = vpop.permute.xlu0 %10036  ;;  %19035 = vst [vmem:[#allocation57_spill] sm:$0xff] %v14923_v26  ;;  %19037 = vst [vmem:[#allocation87_spill] sm:$0xff] %v14928_v28  ;;  %v3683_v14 = vld [vmem:[#allocation2 + $0x83c] sm:$0xff]  ;;  %v14952_v50 = vld [vmem:[#allocation2 + $0x10c4] sm:$0xff] }
 0x2ad   : > { %10316 = vrot.lane.b32.xlu0 %v14657_v5, %s11104_s19  ;;  %v14898_v5 = vsel %vm253_vm0, %v3672_v11, %v9794_v58  ;;  %19031 = vst [vmem:[#allocation78_spill] sm:$0xff] %v14909_v52  ;;  %v9814_v58 = vunpack.i.h.bf16 %v14408_v21  ;;  %v9813_v11 = vunpack.i.l.bf16 %v14408_v21  ;;  %v14931_v52 = vsel %vm253_vm0, %v3675_v35, %v9803_v15  ;;  %v3677_v21 = vld [vmem:[#allocation2 + $0x764] sm:$0xff]  ;;  %v14967_v18 = vld [vmem:[#allocation2 + $0x458] sm:$0xff]  ;;  %19041 = vst [vmem:[#allocation11_spill] sm:$0xff] %v14978_v17 }
 0x2ae   : > { %v14945_v35 = vsel %vm253_vm0, %v3673_v12, %v9798_v42  ;;  %v9824_v15 = vunpack.i.h.bf16 %v14547_v48  ;;  %v14948_v28 = vpop.permute.xlu1 %10051  ;;  %v9819_v42 = vunpack.i.h.bf16 %v14554_v47  ;;  %v14969_v3 = vld [vmem:[#allocation2 + $0x460] sm:$0xff]  ;;  %v14981_v47 = vsel %vm253_vm0, %v3677_v21, %v9808_v9  ;;  %v14987_v26 = vld [vmem:[#allocation2 + $0x410] sm:$0xff] }
 0x2af   : > { %10331 = vrot.lane.b32.xlu1 %v19034_v43, %s11104_s19  ;;  %v3681_v43 = vld [vmem:[#allocation2 + $0x7f4] sm:$0xff]  ;;  %19039 = vst [vmem:[#allocation61_spill] sm:$0xff] %v14948_v28  ;;  %v14965_v28 = vld [vmem:[#allocation2 + $0x1084] sm:$0xff]  ;;  %v14972_v25 = vsel %vm253_vm0, %v3680_v62, %v9814_v58  ;;  %v14975_v48 = vsel %vm253_vm0, %v3679_v49, %v9813_v11  ;;  %19042 = vst [vmem:[#allocation62_spill] sm:$0xff] %v14981_v47  ;;  %v9834_v49 = vunpack.i.h.bf16 %v14573_v1 }
 0x2b0   : > { %v14961_v12 = vpop.permute.xlu0 %10046  ;;  %19044 = vst [vmem:[#allocation84_spill] sm:$0xff] %v14987_v26  ;;  %v3687_v62 = vld [vmem:[#allocation2 + $0x8cc] sm:$0xff]  ;;  %v3688_v58 = vld [vmem:[#allocation2 + $0x8d4] sm:$0xff]  ;;  %v3685_v11 = vld [vmem:[#allocation2 + $0x884] sm:$0xff]  ;;  %v19045_v9 = vpack.i.bf16 %v14789_v10, %v14786_v55  ;;  %v15001_v29 = vsel %vm253_vm0, %v3684_v24, %v9824_v15  ;;  %v15015_v10 = vsel %vm253_vm0, %v3683_v14, %v9823_v56  ;;  %v9844_v14 = vunpack.i.h.bf16 %v14600_v51 }
 0x2b1   : > { %10326 = vrot.lane.b32.xlu0 %v19038_v44, %s11104_s19  ;;  %v14954_v44 = vld [vmem:[#allocation2 + $0x10cc] sm:$0xff]  ;;  %19040 = vst [vmem:[#allocation60_spill] sm:$0xff] %v14961_v12  ;;  %v3682_v12 = vld [vmem:[#allocation2 + $0x7fc] sm:$0xff]  ;;  %v9843_v56 = vunpack.i.l.bf16 %v14600_v51  ;;  %v15051_v51 = vsel %vm253_vm0, %v3687_v62, %v9833_v32  ;;  %v11080_v32 = vld [vmem:[#allocation2 + $0x964] sm:$0xff] }
 0x2b2   : > { %v3686_v21 = vld [vmem:[#allocation2 + $0x88c] sm:$0xff]  ;;  %v15018_v24 = vsel %vm253_vm0, %v3682_v12, %v9819_v42  ;;  %v15027_v1 = vld [vmem:[#allocation2 + $0x422] sm:$0xff]  ;;  %v15031_v6 = vld [vmem:[#allocation2 + $0x956] sm:$0xff]  ;;  %v9839_v42 = vunpack.i.h.bf16 %v14605_v41 }
 0x2b3   : > { %10341 = vrot.lane.b32.xlu1 %v19043_v7, %s11104_s19  ;;  %v9828_v7 = vunpack.i.l.bf16 %v14579_v33  ;;  %v15004_v0 = vpop.permute.xlu1 %10061  ;;  %v15010_v47 = vld [vmem:[#allocation2 + $0x46a] sm:$0xff]  ;;  %v15012_v55 = vld [vmem:[#allocation2 + $0x472] sm:$0xff]  ;;  %v15021_v33 = vsel %vm253_vm0, %v3681_v43, %v9818_v36  ;;  %19048 = vst [vmem:[#allocation18_spill] sm:$0xff] %v15027_v1  ;;  %19050 = vst [vmem:[#allocation12_spill] sm:$0xff] %v15031_v6  ;;  %v9838_v43 = vunpack.i.l.bf16 %v14605_v41  ;;  %v19051_v36 = vpack.i.bf16 %v14793_v16, %v14791_v53 }
 0x2b4   : > { %19046 = vst [vmem:[#allocation33_spill] sm:$0xff] %v15004_v0  ;;  %v15023_v15 = vpop.permute.xlu0 %10056  ;;  %v15029_v17 = vld [vmem:[#allocation2 + $0x42a] sm:$0xff]  ;;  %v15041_v12 = vld [vmem:[#allocation2 + $0x95e] sm:$0xff]  ;;  %v15048_v0 = vsel %vm253_vm0, %v3688_v58, %v9834_v49  ;;  %v15054_v26 = vsel %vm253_vm0, %v3686_v21, %v9829_v8  ;;  %v19055_v41 = vpack.i.bf16 %v14799_v30, %v14797_v63  ;;  %v9854_v58 = vunpack.i.h.bf16 %v14622_v45  ;;  %v11083_v6 = vld [vmem:[#allocation2 + $0x914] sm:$0xff] }
 0x2b5   : > { %10336 = vrot.lane.b32.xlu0 %v19045_v9, %s11104_s19  ;;  %19047 = vst [vmem:[#allocation72_spill] sm:$0xff] %v15023_v15  ;;  %19049 = vst [vmem:[#allocation64_spill] sm:$0xff] %v15029_v17  ;;  %v15043_v9 = vld [vmem:[#allocation2 + $0x90e] sm:$0xff]  ;;  %v15045_v15 = vld [vmem:[#allocation2 + $0x916] sm:$0xff]  ;;  %v15063_v16 = vsel %vm253_vm0, %v3685_v11, %v9828_v7  ;;  %v9853_v49 = vunpack.i.l.bf16 %v14622_v45  ;;  %v9849_v30 = vunpack.i.h.bf16 %v14625_v37  ;;  %v9848_v63 = vunpack.i.l.bf16 %v14625_v37 }
 0x2b6   : > { %19052 = vst [vmem:[#allocation34_spill] sm:$0xff] %v15041_v12  ;;  %19053 = vst [vmem:[#allocation13_spill] sm:$0xff] %v15043_v9  ;;  %v15071_v8 = vld [vmem:[#allocation2 + $0x968] sm:$0xff]  ;;  %v15081_v45 = vld [vmem:[#allocation2 + $0x970] sm:$0xff]  ;;  %v15088_v53 = vsel %vm253_vm0, %v11080_v32, %v9844_v14  ;;  %v15097_v7 = vsel %vm253_vm0, %v11083_v6, %v9838_v43  ;;  %v19062_v9 = vpack.i.bf16 %v14805_v61, %v14801_v38  ;;  %v9864_v14 = vunpack.i.h.bf16 %v14632_v19 }
 0x2b7   : > { %10351 = vrot.lane.b32.xlu1 %v19051_v36, %s11104_s19  ;;  %19054 = vst [vmem:[#allocation76_spill] sm:$0xff] %v15045_v15  ;;  %19057 = vst [vmem:[#allocation67_spill] sm:$0xff] %v15071_v8  ;;  %v15083_v36 = vld [vmem:[#allocation2 + $0x920] sm:$0xff]  ;;  %v19064_v6 = vpack.i.bf16 %v14809_v4, %v14807_v23  ;;  %v15115_v32 = vld [vmem:[#allocation2 + $0x932] sm:$0xff] }
 0x2b8   : > { %v15067_v62 = vpop.permute.xlu1 %10071  ;;  %v15075_v21 = vpop.permute.xlu0 %10066  ;;  %19059 = vst [vmem:[#allocation68_spill] sm:$0xff] %v15081_v45  ;;  %19060 = vst [vmem:[#allocation17_spill] sm:$0xff] %v15083_v36  ;;  %v15103_v15 = vld [vmem:[#allocation2 + $0x97a] sm:$0xff]  ;;  %v15113_v43 = vld [vmem:[#allocation2 + $0x982] sm:$0xff] }
 0x2b9   : > { %10346 = vrot.lane.b32.xlu0 %v19055_v41, %s11104_s19  ;;  %19056 = vst [vmem:[#allocation14_spill] sm:$0xff] %v15067_v62  ;;  %19058 = vst [vmem:[#allocation58_spill] sm:$0xff] %v15075_v21  ;;  %v15085_v41 = vld [vmem:[#allocation2 + $0x928] sm:$0xff]  ;;  %v11081_v62 = vld [vmem:[#allocation2 + $0x95c] sm:$0xff] }
 0x2ba   : > { %19061 = vst [vmem:[#allocation37_spill] sm:$0xff] %v15085_v41  ;;  %v15091_v37 = vsel %vm253_vm0, %v11081_v62, %v9843_v56  ;;  %v11082_v21 = vld [vmem:[#allocation2 + $0x91c] sm:$0xff]  ;;  %19063 = vst [vmem:[#allocation38_spill] sm:$0xff] %v15103_v15  ;;  %v9863_v56 = vunpack.i.l.bf16 %v14632_v19  ;;  %v9859_v62 = vunpack.i.h.bf16 %v14636_v46  ;;  %v11084_v38 = vld [vmem:[#allocation2 + $0x9f4] sm:$0xff] }
 0x2bb   : > { %v15094_v11 = vsel %vm253_vm0, %v11082_v21, %v9839_v42  ;;  %10361 = vrot.lane.b32.xlu1 %v19062_v9, %s11103_s12  ;;  %v9858_v42 = vunpack.i.l.bf16 %v14636_v46  ;;  %19065 = vst [vmem:[#allocation77_spill] sm:$0xff] %v15113_v43  ;;  %19066 = vst [vmem:[#allocation26_spill] sm:$0xff] %v15115_v32  ;;  %v15117_v61 = vld [vmem:[#allocation2 + $0x93a] sm:$0xff]  ;;  %v15120_v9 = vsel %vm253_vm0, %v11084_v38, %v9854_v58  ;;  %v11085_v19 = vld [vmem:[#allocation2 + $0x9ec] sm:$0xff]  ;;  %v9874_v38 = vunpack.i.h.bf16 %v14645_v40 }
 0x2bc   : > { %19067 = vst [vmem:[#allocation28_spill] sm:$0xff] %v15117_v61  ;;  %v15123_v21 = vsel %vm253_vm0, %v11085_v19, %v9853_v49  ;;  %v15125_v46 = vpop.permute.xlu1 %10081  ;;  %v11087_v1 = vld [vmem:[#allocation2 + $0x9a4] sm:$0xff]  ;;  %v9873_v49 = vunpack.i.l.bf16 %v14645_v40  ;;  %v15139_v19 = vpop.permute.xlu0 %10076  ;;  %v15143_v4 = vld [vmem:[#allocation2 + $0xe6e] sm:$0xff]  ;;  %v19077_v41 = vld [vmem:[#allocation85_spill] sm:$0xff] }
 0x2bd   : > { %10356 = vrot.lane.b32.xlu0 %v19064_v6, %s11103_s12  ;;  %19068 = vst [vmem:[#allocation42_spill] sm:$0xff] %v15125_v46  ;;  %v11086_v6 = vld [vmem:[#allocation2 + $0x9ac] sm:$0xff]  ;;  %v15135_v58 = vsel %vm253_vm0, %v11087_v1, %v9848_v63  ;;  %19069 = vst [vmem:[#allocation86_spill] sm:$0xff] %v15139_v19  ;;  %v19072_v8 = vld [vmem:[#allocation22_spill] sm:$0xff] }
 0x2be   : > { %v15132_v12 = vsel %vm253_vm0, %v11086_v6, %v9849_v30  ;;  %v15141_v46 = vld [vmem:[#allocation2 + $0xe66] sm:$0xff]  ;;  %19071 = vst [vmem:[#allocation27_spill] sm:$0xff] %v15143_v4  ;;  %v9869_v23 = vunpack.i.h.bf16 %v19072_v8  ;;  %v9868_v36 = vunpack.i.l.bf16 %v19072_v8  ;;  %v19073_v30 = vpack.i.bf16 %v14829_v60, %v14819_v20  ;;  %v15155_v63 = vld [vmem:[#allocation2 + $0xe1e] sm:$0xff]  ;;  %v19078_v40 = vld [vmem:[#allocation16_spill] sm:$0xff] }
 0x2bf   : > { %19070 = vst [vmem:[#allocation66_spill] sm:$0xff] %v15141_v46  ;;  %19074 = vst [vmem:[#allocation70_spill] sm:$0xff] %v15155_v63  ;;  %v15157_v6 = vld [vmem:[#allocation2 + $0xe26] sm:$0xff]  ;;  %v15159_v19 = vld [vmem:[#allocation2 + $0xe78] sm:$0xff]  ;;  %v15163_v8 = vsel %vm1230_vm2, %v14863_v57, %v9863_v56  ;;  %v15167_v60 = vsel %vm1230_vm2, %v19077_v41, %v9864_v14  ;;  %v15171_v20 = vsel %vm1230_vm2, %v14875_v31, %v9858_v42 }
 0x2c0   : > { %10371 = vrot.lane.b32.xlu1 %v19073_v30, %s11104_s19  ;;  %19075 = vst [vmem:[#allocation69_spill] sm:$0xff] %v15157_v6  ;;  %19076 = vst [vmem:[#allocation73_spill] sm:$0xff] %v15159_v19  ;;  %v15175_v30 = vsel %vm1230_vm2, %v14872_v13, %v9859_v62  ;;  %v19079_v1 = vld [vmem:[#allocation79_spill] sm:$0xff]  ;;  %v15181_v61 = vld [vmem:[#allocation2 + $0xe80] sm:$0xff]  ;;  %v15190_v43 = vpop.permute.xlu1 %10091  ;;  %v15196_v62 = vsel %vm1230_vm2, %v14901_v22, %v9873_v49  ;;  %v15213_v13 = vsel %vm1230_vm2, %v14907_v27, %v9868_v36 }
 0x2c1   : > { %v19080_v32 = vpack.i.bf16 %v19078_v40, %v19079_v1  ;;  %19081 = vst [vmem:[#allocation25_spill] sm:$0xff] %v15181_v61  ;;  %v15183_v57 = vld [vmem:[#allocation2 + $0xe30] sm:$0xff]  ;;  %v15185_v56 = vld [vmem:[#allocation2 + $0xe38] sm:$0xff]  ;;  %v19084_v41 = vld [vmem:[#allocation83_spill] sm:$0xff]  ;;  %v15203_v40 = vpop.permute.xlu0 %10086 }
 0x2c2   : > { %19082 = vst [vmem:[#allocation15_spill] sm:$0xff] %v15183_v57  ;;  %19083 = vst [vmem:[#allocation29_spill] sm:$0xff] %v15185_v56  ;;  %v9884_v14 = vunpack.i.h.bf16 %v19084_v41  ;;  %v9883_v31 = vunpack.i.l.bf16 %v19084_v41  ;;  %v19085_v42 = vld [vmem:[#allocation41_spill] sm:$0xff]  ;;  %v15207_v45 = vld [vmem:[#allocation2 + $0x4a0] sm:$0xff] }
 0x2c3   : > { %10366 = vrot.lane.b32.xlu0 %v19080_v32, %s11104_s19  ;;  %v9878_v15 = vunpack.i.l.bf16 %v19085_v42  ;;  %19086 = vst [vmem:[#allocation74_spill] sm:$0xff] %v15190_v43  ;;  %v15200_v32 = vsel %vm1230_vm2, %v14898_v5, %v9874_v38  ;;  %v9879_v1 = vunpack.i.h.bf16 %v19085_v42  ;;  %19087 = vst [vmem:[#allocation23_spill] sm:$0xff] %v15203_v40  ;;  %v15209_v43 = vld [vmem:[#allocation2 + $0x4a8] sm:$0xff]  ;;  %v19092_v38 = vld [vmem:[#allocation54_spill] sm:$0xff] }
 0x2c4   : > { %19088 = vst [vmem:[#allocation24_spill] sm:$0xff] %v15207_v45  ;;  %19089 = vst [vmem:[#allocation56_spill] sm:$0xff] %v15209_v43  ;;  %v19090_v22 = vld [vmem:[#allocation75_spill] sm:$0xff]  ;;  %v19097_v36 = vld [vmem:[#allocation40_spill] sm:$0xff]  ;;  %v15249_v19 = vsel %vm1230_vm2, %v14931_v52, %v9883_v31 }
 0x2c5   : > { %v15217_v49 = vsel %vm1230_vm2, %v19090_v22, %v9869_v23  ;;  %v19091_v5 = vld [vmem:[#allocation35_spill] sm:$0xff]  ;;  %v9894_v23 = vunpack.i.h.bf16 %v19097_v36  ;;  %v9893_v22 = vunpack.i.l.bf16 %v19097_v36  ;;  %v15241_v40 = vld [vmem:[#allocation2 + $0x4f0] sm:$0xff]  ;;  %19105 = vst [vmem:[#allocation41_spill] sm:$0xff] %v15249_v19  ;;  %v19108_v17 = vld [vmem:[#allocation10_spill] sm:$0xff]  ;;  %v15269_v19 = vpop.permute.xlu0 %10096 }
 0x2c6   : > { %v19093_v42 = vpack.i.bf16 %v19091_v5, %v19092_v38  ;;  %v15227_v63 = vld [vmem:[#allocation2 + $0xe42] sm:$0xff]  ;;  %v15229_v6 = vld [vmem:[#allocation2 + $0xe4a] sm:$0xff]  ;;  %v19099_v38 = vld [vmem:[#allocation81_spill] sm:$0xff]  ;;  %19102 = vst [vmem:[#allocation16_spill] sm:$0xff] %v15241_v40  ;;  %v9904_v52 = vunpack.i.h.bf16 %v19108_v17  ;;  %v9903_v31 = vunpack.i.l.bf16 %v19108_v17 }
 0x2c7   : > { %19094 = vst [vmem:[#allocation32_spill] sm:$0xff] %v15227_v63  ;;  %19095 = vst [vmem:[#allocation22_spill] sm:$0xff] %v15229_v6  ;;  %v15231_v27 = vld [vmem:[#allocation2 + $0x4e8] sm:$0xff]  ;;  %v15245_v56 = vld [vmem:[#allocation2 + $0xe92] sm:$0xff] }
 0x2c8   : > { %10381 = vrot.lane.b32.xlu1 %v19093_v42, %s11103_s12  ;;  %19096 = vst [vmem:[#allocation85_spill] sm:$0xff] %v15231_v27  ;;  %v19098_v46 = vld [vmem:[#allocation31_spill] sm:$0xff]  ;;  %19104 = vst [vmem:[#allocation83_spill] sm:$0xff] %v15245_v56  ;;  %v19118_v56 = vld [vmem:[#allocation30_spill] sm:$0xff] }
 0x2c9   : > { %v9889_v4 = vunpack.i.h.bf16 %v19098_v46  ;;  %v9888_v5 = vunpack.i.l.bf16 %v19098_v46  ;;  %v19100_v42 = vld [vmem:[#allocation63_spill] sm:$0xff]  ;;  %v15257_v46 = vsel %vm1230_vm2, %v14945_v35, %v9878_v15  ;;  %19109 = vst [vmem:[#allocation35_spill] sm:$0xff] %v15269_v19  ;;  %v15273_v35 = vld [vmem:[#allocation2 + $0x4fa] sm:$0xff]  ;;  %v19111_v15 = vld [vmem:[#allocation44_spill] sm:$0xff] }
 0x2ca   : > { %v19101_v41 = vpack.i.bf16 %v19099_v38, %v19100_v42  ;;  %v15243_v57 = vld [vmem:[#allocation2 + $0xe8a] sm:$0xff]  ;;  %v15259_v38 = vpop.permute.xlu1 %10101  ;;  %v15265_v42 = vsel %vm1230_vm2, %v14942_v54, %v9879_v1  ;;  %19110 = vst [vmem:[#allocation54_spill] sm:$0xff] %v15273_v35  ;;  %v19112_v54 = vpack.i.bf16 %v14891_v59, %v14881_v2  ;;  %v15289_v19 = vld [vmem:[#allocation2 + $0x4ba] sm:$0xff]  ;;  %v15297_v2 = vsel %vm1230_vm2, %v14972_v25, %v9894_v23 }
 0x2cb   : > { %19103 = vst [vmem:[#allocation79_spill] sm:$0xff] %v15243_v57  ;;  %v19106_v36 = vld [vmem:[#allocation87_spill] sm:$0xff]  ;;  %19107 = vst [vmem:[#allocation75_spill] sm:$0xff] %v15259_v38  ;;  %v9898_v38 = vunpack.i.l.bf16 %v19111_v15  ;;  %v19115_v59 = vld [vmem:[#allocation62_spill] sm:$0xff] }
 0x2cc   : > { %10376 = vrot.lane.b32.xlu0 %v19101_v41, %s11103_s12  ;;  %v15253_v61 = vsel %vm1230_vm2, %v19106_v36, %v9884_v14  ;;  %v9899_v36 = vunpack.i.h.bf16 %v19111_v15  ;;  %10391 = vrot.lane.b32.xlu1 %v19112_v54, %s11104_s19  ;;  %v15285_v41 = vld [vmem:[#allocation2 + $0x502] sm:$0xff]  ;;  %v15287_v14 = vld [vmem:[#allocation2 + $0x4b2] sm:$0xff]  ;;  %19114 = vst [vmem:[#allocation31_spill] sm:$0xff] %v15289_v19  ;;  %v15293_v15 = vsel %vm1230_vm2, %v14975_v48, %v9893_v22 }
 0x2cd   : > { %19113 = vst [vmem:[#allocation40_spill] sm:$0xff] %v15287_v14  ;;  %v15301_v54 = vsel %vm1230_vm2, %v19115_v59, %v9888_v5  ;;  %v19116_v1 = vld [vmem:[#allocation11_spill] sm:$0xff]  ;;  %v19117_v57 = vld [vmem:[#allocation82_spill] sm:$0xff]  ;;  %v19133_v19 = vld [vmem:[#allocation57_spill] sm:$0xff] }
 0x2ce   : > { %v15305_v17 = vsel %vm1230_vm2, %v19116_v1, %v9889_v4  ;;  %v19119_v27 = vpack.i.bf16 %v19117_v57, %v19118_v56  ;;  %v15311_v40 = vld [vmem:[#allocation2 + $0x9e6] sm:$0xff]  ;;  %v15317_v59 = vpop.permute.xlu1 %10111  ;;  %v15319_v6 = vld [vmem:[#allocation2 + $0x9ee] sm:$0xff]  ;;  %v15321_v4 = vld [vmem:[#allocation2 + $0x99e] sm:$0xff]  ;;  %v15327_v57 = vsel %vm1230_vm2, %v15015_v10, %v9903_v31  ;;  %v15331_v56 = vsel %vm1230_vm2, %v15001_v29, %v9904_v52 }
 0x2cf   : > { %19120 = vst [vmem:[#allocation81_spill] sm:$0xff] %v15311_v40  ;;  %v19121_v48 = vld [vmem:[#allocation43_spill] sm:$0xff]  ;;  %19123 = vst [vmem:[#allocation63_spill] sm:$0xff] %v15317_v59  ;;  %v15341_v59 = vsel %vm1230_vm2, %v15021_v33, %v9898_v38  ;;  %v15345_v10 = vsel %vm1230_vm2, %v15018_v24, %v9899_v36  ;;  %v19127_v31 = vld [vmem:[#allocation89_spill] sm:$0xff] }
 0x2d0   : > { %10386 = vrot.lane.b32.xlu0 %v19119_v27, %s11104_s19  ;;  %v9914_v22 = vunpack.i.h.bf16 %v19121_v48  ;;  %v9913_v25 = vunpack.i.l.bf16 %v19121_v48  ;;  %v19122_v23 = vld [vmem:[#allocation71_spill] sm:$0xff]  ;;  %19124 = vst [vmem:[#allocation87_spill] sm:$0xff] %v15321_v4  ;;  %v15333_v27 = vpop.permute.xlu0 %10106  ;;  %v9924_v45 = vunpack.i.h.bf16 %v19127_v31  ;;  %v9923_v29 = vunpack.i.l.bf16 %v19127_v31  ;;  %v19128_v52 = vld [vmem:[#allocation88_spill] sm:$0xff]  ;;  %v15353_v48 = vld [vmem:[#allocation2 + $0x9f8] sm:$0xff] }
 0x2d1   : > { %v9909_v63 = vunpack.i.h.bf16 %v19122_v23  ;;  %v9908_v5 = vunpack.i.l.bf16 %v19122_v23  ;;  %v15323_v1 = vld [vmem:[#allocation2 + $0x9a6] sm:$0xff]  ;;  %19126 = vst [vmem:[#allocation44_spill] sm:$0xff] %v15333_v27  ;;  %v19129_v27 = vld [vmem:[#allocation80_spill] sm:$0xff] }
 0x2d2   : > { %19125 = vst [vmem:[#allocation10_spill] sm:$0xff] %v15323_v1  ;;  %v19130_v43 = vpack.i.bf16 %v19128_v52, %v19129_v27  ;;  %v19131_v23 = vld [vmem:[#allocation46_spill] sm:$0xff]  ;;  %v19132_v38 = vld [vmem:[#allocation59_spill] sm:$0xff]  ;;  %v15369_v27 = vld [vmem:[#allocation2 + $0x9b8] sm:$0xff] }
 0x2d3   : > { %v9919_v14 = vunpack.i.h.bf16 %v19131_v23  ;;  %v9918_v33 = vunpack.i.l.bf16 %v19131_v23  ;;  %v19134_v24 = vpack.i.bf16 %v19132_v38, %v19133_v19  ;;  %v15365_v35 = vld [vmem:[#allocation2 + $0xa00] sm:$0xff]  ;;  %v15373_v23 = vsel %vm1230_vm2, %v15051_v51, %v9913_v25  ;;  %v15389_v31 = vld [vmem:[#allocation2 + $0xa0a] sm:$0xff] }
 0x2d4   : > { %10401 = vrot.lane.b32.xlu1 %v19130_v43, %s11103_s12  ;;  %v15367_v43 = vld [vmem:[#allocation2 + $0x9b0] sm:$0xff]  ;;  %v15377_v19 = vsel %vm1230_vm2, %v15048_v0, %v9914_v22  ;;  %v15381_v52 = vsel %vm1230_vm2, %v15063_v16, %v9908_v5  ;;  %v15385_v38 = vsel %vm1230_vm2, %v15054_v26, %v9909_v63  ;;  %19136 = vst [vmem:[#allocation11_spill] sm:$0xff] %v15389_v31  ;;  %v19138_v25 = vld [vmem:[#allocation19_spill] sm:$0xff]  ;;  %v15395_v22 = vpop.permute.xlu0 %10116 }
 0x2d5   : > { %10396 = vrot.lane.b32.xlu0 %v19134_v24, %s11103_s12  ;;  %v15387_v24 = vpop.permute.xlu1 %10121  ;;  %v19137_v36 = vld [vmem:[#allocation36_spill] sm:$0xff]  ;;  %v9929_v1 = vunpack.i.h.bf16 %v19138_v25  ;;  %v9928_v0 = vunpack.i.l.bf16 %v19138_v25  ;;  %19139 = vst [vmem:[#allocation82_spill] sm:$0xff] %v15395_v22  ;;  %v15399_v5 = vld [vmem:[#allocation2 + $0x9c2] sm:$0xff]  ;;  %v15405_v63 = vsel %vm1230_vm2, %v15091_v37, %v9923_v29  ;;  %v15421_v40 = vsel %vm1230_vm2, %v15097_v7, %v9918_v33 }
 0x2d6   : > { %19135 = vst [vmem:[#allocation62_spill] sm:$0xff] %v15387_v24  ;;  %v9934_v4 = vunpack.i.h.bf16 %v19137_v36  ;;  %v9933_v51 = vunpack.i.l.bf16 %v19137_v36  ;;  %v15397_v16 = vld [vmem:[#allocation2 + $0xa12] sm:$0xff]  ;;  %19140 = vst [vmem:[#allocation30_spill] sm:$0xff] %v15399_v5  ;;  %v15401_v26 = vld [vmem:[#allocation2 + $0x9ca] sm:$0xff]  ;;  %v15409_v24 = vsel %vm1230_vm2, %v15088_v53, %v9924_v45  ;;  %v19142_v36 = vpack.i.bf16 %v14954_v44, %v14952_v50 }
 0x2d7   : > { %19141 = vst [vmem:[#allocation43_spill] sm:$0xff] %v15401_v26  ;;  %v15425_v37 = vsel %vm1230_vm2, %v15094_v11, %v9919_v14  ;;  %v19143_v53 = vld [vmem:[#allocation20_spill] sm:$0xff]  ;;  %v19144_v50 = vpack.i.bf16 %v14965_v28, %v14956_v39  ;;  %v15463_v14 = vsel %vm1230_vm2, %v15132_v12, %v9929_v1  ;;  %v19151_v5 = vld [vmem:[#allocation90_spill] sm:$0xff]  ;;  %v15481_v1 = vld [vmem:[#allocation2 + $0xec8] sm:$0xff] }
 0x2d8   : > { %10411 = vrot.lane.b32.xlu1 %v19142_v36, %s11104_s19  ;;  %v9944_v45 = vunpack.i.h.bf16 %v19143_v53  ;;  %v9943_v29 = vunpack.i.l.bf16 %v19143_v53  ;;  %v15433_v44 = vld [vmem:[#allocation2 + $0xef6] sm:$0xff]  ;;  %v15443_v53 = vld [vmem:[#allocation2 + $0xefe] sm:$0xff]  ;;  %v15445_v25 = vld [vmem:[#allocation2 + $0xeae] sm:$0xff]  ;;  %v15451_v39 = vsel %vm1230_vm2, %v15123_v21, %v9933_v51  ;;  %v15465_v11 = vpop.permute.xlu0 %10126  ;;  %v9954_v26 = vunpack.i.h.bf16 %v19151_v5  ;;  %19156 = vst [vmem:[#allocation36_spill] sm:$0xff] %v15481_v1 }
 0x2d9   : > { %10406 = vrot.lane.b32.xlu0 %v19144_v50, %s11104_s19  ;;  %v19145_v36 = vld [vmem:[#allocation48_spill] sm:$0xff]  ;;  %v15437_v33 = vpop.permute.xlu1 %10131  ;;  %19147 = vst [vmem:[#allocation89_spill] sm:$0xff] %v15445_v25  ;;  %v15455_v50 = vsel %vm1230_vm2, %v15120_v9, %v9934_v4  ;;  %19149 = vst [vmem:[#allocation80_spill] sm:$0xff] %v15465_v11  ;;  %v9953_v21 = vunpack.i.l.bf16 %v19151_v5  ;;  %v15479_v12 = vld [vmem:[#allocation2 + $0xec0] sm:$0xff] }
 0x2da   : > { %v9939_v22 = vunpack.i.h.bf16 %v19145_v36  ;;  %v9938_v7 = vunpack.i.l.bf16 %v19145_v36  ;;  %19146 = vst [vmem:[#allocation71_spill] sm:$0xff] %v15437_v33  ;;  %v15447_v28 = vld [vmem:[#allocation2 + $0xeb6] sm:$0xff]  ;;  %v15459_v36 = vsel %vm1230_vm2, %v15135_v58, %v9928_v0  ;;  %v15467_v33 = vld [vmem:[#allocation2 + $0xf08] sm:$0xff]  ;;  %v19153_v58 = vpack.i.bf16 %v14969_v3, %v14967_v18  ;;  %19155 = vst [vmem:[#allocation57_spill] sm:$0xff] %v15479_v12 }
 0x2db   : > { %19148 = vst [vmem:[#allocation88_spill] sm:$0xff] %v15447_v28  ;;  %19150 = vst [vmem:[#allocation46_spill] sm:$0xff] %v15467_v33  ;;  %v19152_v51 = vld [vmem:[#allocation92_spill] sm:$0xff]  ;;  %v15485_v0 = vsel %vm2854_vm3, %v15163_v8, %v9943_v29  ;;  %v15489_v5 = vsel %vm2854_vm3, %v15167_v60, %v9944_v45  ;;  %v19159_v60 = vld [vmem:[#allocation91_spill] sm:$0xff]  ;;  %v19167_v12 = vpack.i.bf16 %v15012_v55, %v15010_v47 }
 0x2dc   : > { %v9949_v31 = vunpack.i.h.bf16 %v19152_v51  ;;  %v9948_v9 = vunpack.i.l.bf16 %v19152_v51  ;;  %10421 = vrot.lane.b32.xlu1 %v19153_v58, %s11097_s28  ;;  %v15477_v4 = vld [vmem:[#allocation2 + $0xf10] sm:$0xff]  ;;  %v15501_v58 = vsel %vm2854_vm3, %v15171_v20, %v9938_v7  ;;  %v15505_v8 = vsel %vm2854_vm3, %v15175_v30, %v9939_v22  ;;  %v15515_v25 = vpop.permute.xlu0 %10136  ;;  %v15521_v22 = vld [vmem:[#allocation2 + $0x538] sm:$0xff]  ;;  %v15561_v47 = vld [vmem:[#allocation2 + $0xf22] sm:$0xff] }
 0x2dd   : > { %19154 = vst [vmem:[#allocation59_spill] sm:$0xff] %v15477_v4  ;;  %v19157_v51 = vld [vmem:[#allocation84_spill] sm:$0xff]  ;;  %v9964_v45 = vunpack.i.h.bf16 %v19159_v60  ;;  %v9963_v29 = vunpack.i.l.bf16 %v19159_v60  ;;  %19163 = vst [vmem:[#allocation48_spill] sm:$0xff] %v15515_v25  ;;  %v15525_v60 = vld [vmem:[#allocation2 + $0xeda] sm:$0xff] }
 0x2de   : > { %v19158_v11 = vpack.i.bf16 %v14989_v34, %v19157_v51  ;;  %v15509_v34 = vpop.permute.xlu1 %10141  ;;  %v19162_v51 = vld [vmem:[#allocation21_spill] sm:$0xff]  ;;  %19164 = vst [vmem:[#allocation90_spill] sm:$0xff] %v15521_v22  ;;  %19166 = vst [vmem:[#allocation84_spill] sm:$0xff] %v15525_v60  ;;  %v15537_v20 = vsel %vm2854_vm3, %v15213_v13, %v9948_v9  ;;  %v15541_v30 = vsel %vm2854_vm3, %v15217_v49, %v9949_v31  ;;  %v19171_v9 = vld [vmem:[#allocation64_spill] sm:$0xff] }
 0x2df   : > { %19160 = vst [vmem:[#allocation19_spill] sm:$0xff] %v15509_v34  ;;  %v9959_v3 = vunpack.i.h.bf16 %v19162_v51  ;;  %v9958_v18 = vunpack.i.l.bf16 %v19162_v51  ;;  %v15523_v7 = vld [vmem:[#allocation2 + $0xed2] sm:$0xff]  ;;  %v15529_v34 = vsel %vm2854_vm3, %v15196_v62, %v9953_v21  ;;  %v15533_v51 = vsel %vm2854_vm3, %v15200_v32, %v9954_v26  ;;  %v19169_v62 = vld [vmem:[#allocation39_spill] sm:$0xff]  ;;  %v19172_v4 = vld [vmem:[#allocation18_spill] sm:$0xff] }
 0x2e0   : > { %10416 = vrot.lane.b32.xlu0 %v19158_v11, %s11097_s28  ;;  %v15511_v11 = vld [vmem:[#allocation2 + $0x530] sm:$0xff]  ;;  %19165 = vst [vmem:[#allocation92_spill] sm:$0xff] %v15523_v7  ;;  %10431 = vrot.lane.b32.xlu1 %v19167_v12, %s11098_s29  ;;  %v15547_v1 = vld [vmem:[#allocation2 + $0x578] sm:$0xff]  ;;  %v9974_v21 = vunpack.i.h.bf16 %v19169_v62  ;;  %v9973_v32 = vunpack.i.l.bf16 %v19169_v62  ;;  %v19173_v49 = vpack.i.bf16 %v19171_v9, %v19172_v4  ;;  %v15557_v31 = vld [vmem:[#allocation2 + $0x580] sm:$0xff]  ;;  %v15569_v62 = vsel %vm2854_vm3, %v15253_v61, %v9964_v45  ;;  %v15587_v45 = vpop.permute.xlu0 %10146 }
 0x2e1   : > { %19161 = vst [vmem:[#allocation20_spill] sm:$0xff] %v15511_v11  ;;  %19168 = vst [vmem:[#allocation91_spill] sm:$0xff] %v15547_v1  ;;  %v19170_v26 = vld [vmem:[#allocation45_spill] sm:$0xff] }
 0x2e2   : > { %v9969_v33 = vunpack.i.h.bf16 %v19170_v26  ;;  %v9968_v13 = vunpack.i.l.bf16 %v19170_v26  ;;  %19174 = vst [vmem:[#allocation21_spill] sm:$0xff] %v15557_v31  ;;  %v15559_v25 = vld [vmem:[#allocation2 + $0xf1a] sm:$0xff]  ;;  %19176 = vst [vmem:[#allocation45_spill] sm:$0xff] %v15561_v47  ;;  %v15571_v26 = vpop.permute.xlu1 %10151  ;;  %v15591_v4 = vld [vmem:[#allocation2 + $0x592] sm:$0xff]  ;;  %v15609_v22 = vsel %vm2854_vm3, %v15293_v15, %v9973_v32 }
 0x2e3   : > { %19175 = vst [vmem:[#allocation39_spill] sm:$0xff] %v15559_v25  ;;  %v19177_v55 = vld [vmem:[#allocation41_spill] sm:$0xff]  ;;  %19178 = vst [vmem:[#allocation64_spill] sm:$0xff] %v15571_v26  ;;  %v15589_v26 = vld [vmem:[#allocation2 + $0x58a] sm:$0xff] }
 0x2e4   : > { %10426 = vrot.lane.b32.xlu0 %v19173_v49, %s11098_s29  ;;  %v15565_v12 = vsel %vm2854_vm3, %v19177_v55, %v9963_v29  ;;  %v15579_v49 = vsel %vm2854_vm3, %v15257_v46, %v9958_v18  ;;  %v15583_v29 = vsel %vm2854_vm3, %v15265_v42, %v9959_v3  ;;  %v19179_v55 = vld [vmem:[#allocation94_spill] sm:$0xff]  ;;  %19180 = vst [vmem:[#allocation18_spill] sm:$0xff] %v15587_v45  ;;  %19181 = vst [vmem:[#allocation41_spill] sm:$0xff] %v15589_v26  ;;  %v19183_v11 = vld [vmem:[#allocation93_spill] sm:$0xff] }
 0x2e5   : > { %v9984_v28 = vunpack.i.h.bf16 %v19179_v55  ;;  %v9983_v61 = vunpack.i.l.bf16 %v19179_v55  ;;  %19182 = vst [vmem:[#allocation94_spill] sm:$0xff] %v15591_v4  ;;  %v9979_v9 = vunpack.i.h.bf16 %v19183_v11  ;;  %v9978_v7 = vunpack.i.l.bf16 %v19183_v11  ;;  %v19184_v46 = vld [vmem:[#allocation34_spill] sm:$0xff]  ;;  %v19185_v18 = vld [vmem:[#allocation12_spill] sm:$0xff]  ;;  %v19190_v3 = vld [vmem:[#allocation13_spill] sm:$0xff] }
 0x2e6   : > { %v19186_v60 = vpack.i.bf16 %v19184_v46, %v19185_v18  ;;  %v15603_v55 = vld [vmem:[#allocation2 + $0x542] sm:$0xff]  ;;  %v15605_v45 = vld [vmem:[#allocation2 + $0x54a] sm:$0xff]  ;;  %v15613_v11 = vsel %vm2854_vm3, %v15297_v2, %v9974_v21  ;;  %v15621_v46 = vsel %vm2854_vm3, %v15305_v17, %v9969_v33  ;;  %v15627_v25 = vld [vmem:[#allocation2 + $0xa76] sm:$0xff] }
 0x2e7   : > { %19187 = vst [vmem:[#allocation93_spill] sm:$0xff] %v15603_v55  ;;  %19188 = vst [vmem:[#allocation34_spill] sm:$0xff] %v15605_v45  ;;  %v19189_v18 = vld [vmem:[#allocation76_spill] sm:$0xff]  ;;  %v15629_v15 = vld [vmem:[#allocation2 + $0xa7e] sm:$0xff]  ;;  %v15657_v17 = vsel %vm2854_vm3, %v15341_v59, %v9978_v7  ;;  %v15661_v26 = vsel %vm2854_vm3, %v15345_v10, %v9979_v9 }
 0x2e8   : > { %10441 = vrot.lane.b32.xlu1 %v19186_v60, %s11099_s30  ;;  %v15617_v60 = vsel %vm2854_vm3, %v15301_v54, %v9968_v13  ;;  %v19191_v42 = vpack.i.bf16 %v19189_v18, %v19190_v3  ;;  %19192 = vst [vmem:[#allocation12_spill] sm:$0xff] %v15627_v25  ;;  %19193 = vst [vmem:[#allocation76_spill] sm:$0xff] %v15629_v15  ;;  %v19194_v32 = vld [vmem:[#allocation47_spill] sm:$0xff]  ;;  %v19195_v47 = vld [vmem:[#allocation49_spill] sm:$0xff]  ;;  %v15634_v13 = vpop.permute.xlu1 %10161  ;;  %v15648_v3 = vsel %vm2854_vm3, %v15331_v56, %v9984_v28 }
 0x2e9   : > { %v9994_v2 = vunpack.i.h.bf16 %v19194_v32  ;;  %v9993_v21 = vunpack.i.l.bf16 %v19194_v32  ;;  %v9988_v54 = vunpack.i.l.bf16 %v19195_v47  ;;  %19196 = vst [vmem:[#allocation13_spill] sm:$0xff] %v15634_v13  ;;  %v15638_v33 = vld [vmem:[#allocation2 + $0xa2e] sm:$0xff]  ;;  %v15640_v1 = vld [vmem:[#allocation2 + $0xa36] sm:$0xff]  ;;  %v9989_v18 = vunpack.i.h.bf16 %v19195_v47  ;;  %v15651_v32 = vpop.permute.xlu0 %10156  ;;  %v19207_v7 = vld [vmem:[#allocation50_spill] sm:$0xff] }
 0x2ea   : > { %10436 = vrot.lane.b32.xlu0 %v19191_v42, %s11099_s30  ;;  %19197 = vst [vmem:[#allocation47_spill] sm:$0xff] %v15638_v33  ;;  %19198 = vst [vmem:[#allocation49_spill] sm:$0xff] %v15640_v1  ;;  %v15644_v42 = vsel %vm2854_vm3, %v15327_v57, %v9983_v61  ;;  %v19200_v57 = vld [vmem:[#allocation95_spill] sm:$0xff]  ;;  %v19201_v56 = vld [vmem:[#allocation68_spill] sm:$0xff]  ;;  %v9999_v9 = vunpack.i.h.bf16 %v19207_v7  ;;  %v9998_v55 = vunpack.i.l.bf16 %v19207_v7 }
 0x2eb   : > { %19199 = vst [vmem:[#allocation98_spill] sm:$0xff] %v15651_v32  ;;  %v10003_v61 = vunpack.i.l.bf16 %v19200_v57  ;;  %v19202_v28 = vld [vmem:[#allocation67_spill] sm:$0xff]  ;;  %v15672_v13 = vld [vmem:[#allocation2 + $0xa90] sm:$0xff]  ;;  %v15677_v59 = vld [vmem:[%s18127_s2 + $0x38] ss:$0 sps:$4 sm:$0x33]   ;;  %v10004_v10 = vunpack.i.h.bf16 %v19200_v57  ;;  %v15694_v45 = vsel %vm2854_vm3, %v15373_v23, %v9993_v21  ;;  %v15698_v57 = vsel %vm2854_vm3, %v15377_v19, %v9994_v2 }
 0x2ec   : > { %v19203_v4 = vpack.i.bf16 %v19201_v56, %v19202_v28  ;;  %v15670_v32 = vld [vmem:[#allocation2 + $0xa88] sm:$0xff]  ;;  %19205 = vst [vmem:[#allocation68_spill] sm:$0xff] %v15672_v13  ;;  %19206 = vst [vmem:[#allocation67_spill] sm:$0xff] %v15677_v59  ;;  %v19209_v56 = vld [vmem:[#allocation17_spill] sm:$0xff]  ;;  %v15702_v7 = vsel %vm2854_vm3, %v15381_v52, %v9988_v54  ;;  %9115 = vmatprep.subr.msk.bf16.mxu0 %vm1016_vm1, %v15677_v59  ;;  %v15711_v47 = vsel %vm2854_vm3, %v15385_v38, %v9989_v18 }
 0x2ed   : > { %19204 = vst [vmem:[#allocation95_spill] sm:$0xff] %v15670_v32  ;;  %v15688_v25 = vld [vmem:[#allocation2 + $0xa40] sm:$0xff]  ;;  %v15690_v15 = vld [vmem:[#allocation2 + $0xa48] sm:$0xff]  ;;  %v19215_v21 = vld [vmem:[#allocation97_spill] sm:$0xff]  ;;  %v15715_v2 = vpop.permute.xlu0 %10166 }
 0x2ee   : > { %10451 = vrot.lane.b32.xlu1 %v19203_v4, %s11100_s7  ;;  %v19208_v4 = vld [vmem:[#allocation37_spill] sm:$0xff]  ;;  %19211 = vst [vmem:[#allocation50_spill] sm:$0xff] %v15688_v25  ;;  %v10008_v19 = vunpack.i.l.bf16 %v19215_v21  ;;  %v15721_v33 = vld [vmem:[#allocation2 + $0xaa2] sm:$0xff]  ;;  %v10009_v38 = vunpack.i.h.bf16 %v19215_v21  ;;  %v19219_v18 = vld [vmem:[#allocation52_spill] sm:$0xff]  ;;  %v15749_v21 = vsel %vm2854_vm3, %v15425_v37, %v9999_v9 }
 0x2ef   : > { %v19210_v28 = vpack.i.bf16 %v19208_v4, %v19209_v56  ;;  %19212 = vst [vmem:[#allocation37_spill] sm:$0xff] %v15690_v15  ;;  %v19213_v4 = vld [vmem:[#allocation96_spill] sm:$0xff]  ;;  %v15719_v54 = vld [vmem:[#allocation2 + $0xa9a] sm:$0xff]  ;;  %19218 = vst [vmem:[#allocation99_spill] sm:$0xff] %v15721_v33  ;;  %v10023_v1 = vunpack.i.l.bf16 %v19219_v18 }
 0x2f0   : > { %v10013_v56 = vunpack.i.l.bf16 %v19213_v4  ;;  %v10014_v23 = vunpack.i.h.bf16 %v19213_v4  ;;  %19216 = vst [vmem:[#allocation96_spill] sm:$0xff] %v15715_v2  ;;  %19217 = vst [vmem:[#allocation97_spill] sm:$0xff] %v15719_v54  ;;  %v19220_v4 = vld [vmem:[#allocation77_spill] sm:$0xff]  ;;  %v19221_v31 = vld [vmem:[#allocation38_spill] sm:$0xff]  ;;  %v15789_v9 = vsel %vm2854_vm3, %v15463_v14, %v10009_v38 }
 0x2f1   : > { %10446 = vrot.lane.b32.xlu0 %v19210_v28, %s11100_s7  ;;  %v15705_v28 = vpop.permute.xlu1 %10171  ;;  %v19222_v59 = vpack.i.bf16 %v19220_v4, %v19221_v31  ;;  %v15735_v2 = vld [vmem:[#allocation2 + $0xa52] sm:$0xff]  ;;  %v15737_v32 = vld [vmem:[#allocation2 + $0xa5a] sm:$0xff]  ;;  %v10024_v31 = vunpack.i.h.bf16 %v19219_v18  ;;  %v15756_v25 = vld [vmem:[#allocation2 + $0xf86] sm:$0xff]  ;;  %v15793_v54 = vsel %vm2887_vm4, %v15485_v0, %v10023_v1 }
 0x2f2   : > { %19214 = vst [vmem:[#allocation17_spill] sm:$0xff] %v15705_v28  ;;  %v15725_v28 = vsel %vm2854_vm3, %v15405_v63, %v10003_v61  ;;  %19223 = vst [vmem:[#allocation52_spill] sm:$0xff] %v15735_v2  ;;  %v15741_v63 = vsel %vm2854_vm3, %v15409_v24, %v10004_v10  ;;  %v15745_v61 = vsel %vm2854_vm3, %v15421_v40, %v9998_v55  ;;  %v19226_v4 = vld [vmem:[#allocation26_spill] sm:$0xff]  ;;  %v15758_v15 = vld [vmem:[#allocation2 + $0xf8e] sm:$0xff] }
 0x2f3   : > { %10461 = vrot.lane.b32.xlu1 %v19222_v59, %s11101_s8  ;;  %19224 = vst [vmem:[#allocation77_spill] sm:$0xff] %v15737_v32  ;;  %v19225_v59 = vld [vmem:[#allocation28_spill] sm:$0xff]  ;;  %19228 = vst [vmem:[#allocation38_spill] sm:$0xff] %v15756_v25  ;;  %v15762_v24 = vsel %vm2854_vm3, %v15451_v39, %v10013_v56  ;;  %v19231_v40 = vld [vmem:[#allocation51_spill] sm:$0xff]  ;;  %v15780_v39 = vsel %vm2854_vm3, %v15459_v36, %v10008_v19  ;;  %v15808_v14 = vsel %vm2887_vm4, %v15489_v5, %v10024_v31 }
 0x2f4   : > { %v19227_v52 = vpack.i.bf16 %v19225_v59, %v19226_v4  ;;  %19229 = vst [vmem:[#allocation28_spill] sm:$0xff] %v15758_v15  ;;  %19230 = vst [vmem:[#allocation26_spill] sm:$0xff] %v15762_v24  ;;  %v10019_v55 = vunpack.i.h.bf16 %v19231_v40  ;;  %v10018_v37 = vunpack.i.l.bf16 %v19231_v40  ;;  %v15770_v18 = vld [vmem:[#allocation2 + $0xf3e] sm:$0xff]  ;;  %v15776_v59 = vsel %vm2854_vm3, %v15455_v50, %v10014_v23  ;;  %v15783_v40 = vpop.permute.xlu0 %10176  ;;  %v19237_v36 = vld [vmem:[#allocation27_spill] sm:$0xff] }
 0x2f5   : > { %v15766_v10 = vpop.permute.xlu1 %10181  ;;  %19232 = vst [vmem:[#allocation51_spill] sm:$0xff] %v15770_v18  ;;  %19234 = vst [vmem:[#allocation101_spill] sm:$0xff] %v15776_v59  ;;  %v19235_v56 = vld [vmem:[#allocation65_spill] sm:$0xff]  ;;  %v19238_v23 = vld [vmem:[#allocation66_spill] sm:$0xff] }
 0x2f6   : > { %10456 = vrot.lane.b32.xlu0 %v19227_v52, %s11101_s8  ;;  %v15772_v52 = vld [vmem:[#allocation2 + $0xf46] sm:$0xff]  ;;  %v10033_v4 = vunpack.i.l.bf16 %v19235_v56  ;;  %19236 = vst [vmem:[#allocation65_spill] sm:$0xff] %v15783_v40  ;;  %v10034_v50 = vunpack.i.h.bf16 %v19235_v56  ;;  %v19239_v19 = vpack.i.bf16 %v19237_v36, %v19238_v23  ;;  %v15802_v33 = vld [vmem:[#allocation2 + $0xf98] sm:$0xff]  ;;  %v15824_v5 = vsel %vm2887_vm4, %v15501_v58, %v10018_v37 }
 0x2f7   : > { %19233 = vst [vmem:[#allocation100_spill] sm:$0xff] %v15772_v52  ;;  %19240 = vst [vmem:[#allocation27_spill] sm:$0xff] %v15802_v33  ;;  %v15804_v24 = vld [vmem:[#allocation2 + $0xfa0] sm:$0xff]  ;;  %v19242_v1 = vld [vmem:[#allocation53_spill] sm:$0xff]  ;;  %v15828_v31 = vsel %vm2887_vm4, %v15505_v8, %v10019_v55 }
 0x2f8   : > { %10471 = vrot.lane.b32.xlu1 %v19239_v19, %s11102_s11  ;;  %19241 = vst [vmem:[#allocation66_spill] sm:$0xff] %v15804_v24  ;;  %v10029_v0 = vunpack.i.h.bf16 %v19242_v1  ;;  %v10028_v38 = vunpack.i.l.bf16 %v19242_v1  ;;  %v19243_v56 = vld [vmem:[#allocation69_spill] sm:$0xff]  ;;  %v19244_v2 = vld [vmem:[#allocation70_spill] sm:$0xff]  ;;  %v15818_v19 = vld [vmem:[#allocation2 + $0xf50] sm:$0xff]  ;;  %v15840_v58 = vpop.permute.xlu0 %10186 }
 0x2f9   : > { %v19245_v36 = vpack.i.bf16 %v19243_v56, %v19244_v2  ;;  %19246 = vst [vmem:[#allocation53_spill] sm:$0xff] %v15818_v19  ;;  %v15820_v59 = vld [vmem:[#allocation2 + $0xf58] sm:$0xff]  ;;  %v19248_v1 = vld [vmem:[#allocation55_spill] sm:$0xff]  ;;  %v15832_v56 = vpop.permute.xlu1 %10191  ;;  %v19250_v23 = vld [vmem:[#allocation78_spill] sm:$0xff] }
 0x2fa   : > { %19247 = vst [vmem:[#allocation69_spill] sm:$0xff] %v15820_v59  ;;  %v10044_v25 = vunpack.i.h.bf16 %v19248_v1  ;;  %v10043_v2 = vunpack.i.l.bf16 %v19248_v1  ;;  %19249 = vst [vmem:[#allocation70_spill] sm:$0xff] %v15832_v56  ;;  %v10039_v18 = vunpack.i.h.bf16 %v19250_v23  ;;  %v10038_v52 = vunpack.i.l.bf16 %v19250_v23  ;;  %v15844_v55 = vld [vmem:[#allocation2 + $0x5c0] sm:$0xff]  ;;  %v15846_v37 = vld [vmem:[#allocation2 + $0x5c8] sm:$0xff] }
 0x2fb   : > { %10466 = vrot.lane.b32.xlu0 %v19245_v36, %s11102_s11  ;;  %v15836_v36 = vsel %vm2887_vm4, %v15529_v34, %v10033_v4  ;;  %19251 = vst [vmem:[#allocation55_spill] sm:$0xff] %v15840_v58  ;;  %19252 = vst [vmem:[#allocation78_spill] sm:$0xff] %v15844_v55  ;;  %v15850_v1 = vsel %vm2887_vm4, %v15533_v51, %v10034_v50  ;;  %v19254_v15 = vld [vmem:[#allocation61_spill] sm:$0xff]  ;;  %v15860_v33 = vld [vmem:[#allocation2 + $0xf62] sm:$0xff]  ;;  %v15866_v51 = vsel %vm2887_vm4, %v15537_v20, %v10028_v38 }
 0x2fc   : > { %19253 = vst [vmem:[#allocation102_spill] sm:$0xff] %v15846_v37  ;;  %v10054_v34 = vunpack.i.h.bf16 %v19254_v15  ;;  %v10053_v4 = vunpack.i.l.bf16 %v19254_v15  ;;  %v19255_v32 = vld [vmem:[#allocation25_spill] sm:$0xff]  ;;  %19258 = vst [vmem:[#allocation61_spill] sm:$0xff] %v15860_v33  ;;  %v15862_v24 = vld [vmem:[#allocation2 + $0xf6a] sm:$0xff]  ;;  %v15870_v50 = vsel %vm2887_vm4, %v15541_v30, %v10029_v0  ;;  %v15884_v20 = vsel %vm2887_vm4, %v15565_v12, %v10043_v2  ;;  %v15908_v2 = vpop.permute.xlu0 %10196 }
 0x2fd   : > { %v19256_v23 = vld [vmem:[#allocation73_spill] sm:$0xff]  ;;  %19259 = vst [vmem:[#allocation25_spill] sm:$0xff] %v15862_v24  ;;  %v19260_v15 = vld [vmem:[#allocation60_spill] sm:$0xff]  ;;  %v15878_v19 = vld [vmem:[#allocation2 + $0x608] sm:$0xff]  ;;  %v15888_v30 = vsel %vm2887_vm4, %v15569_v62, %v10044_v25  ;;  %v15891_v56 = vpop.permute.xlu1 %10201  ;;  %v15901_v12 = vsel %vm2887_vm4, %v15579_v49, %v10038_v52  ;;  %v15905_v25 = vsel %vm2887_vm4, %v15583_v29, %v10039_v18 }
 0x2fe   : > { %v19257_v13 = vpack.i.bf16 %v19255_v32, %v19256_v23  ;;  %v10049_v58 = vunpack.i.h.bf16 %v19260_v15  ;;  %v10048_v32 = vunpack.i.l.bf16 %v19260_v15  ;;  %v19262_v23 = vld [vmem:[#allocation15_spill] sm:$0xff]  ;;  %19264 = vst [vmem:[#allocation73_spill] sm:$0xff] %v15878_v19  ;;  %v15880_v59 = vld [vmem:[#allocation2 + $0x610] sm:$0xff]  ;;  %v19266_v0 = vld [vmem:[#allocation33_spill] sm:$0xff]  ;;  %v8891_v15 = vpop.f32.mrf.mxu0  ;;  %v15918_v37 = vsel %vm2887_vm4, %v15609_v22, %v10053_v4 }
 0x2ff   : > { %19265 = vst [vmem:[#allocation60_spill] sm:$0xff] %v15880_v59  ;;  %v10063_v38 = vunpack.i.l.bf16 %v19266_v0  ;;  %v10064_v62 = vunpack.i.h.bf16 %v19266_v0  ;;  %19270 = vst [vmem:[#allocation103_spill] sm:$0xff] %v15908_v2  ;;  %v15914_v55 = vld [vmem:[#allocation2 + $0x622] sm:$0xff]  ;;  %v15922_v49 = vsel %vm2887_vm4, %v15613_v11, %v10054_v34  ;;  %v19273_v29 = vld [vmem:[#allocation72_spill] sm:$0xff] }
 0x300   : > { %10481 = vrot.lane.b32.xlu1 %v19257_v13, %s11103_s12  ;;  %v19261_v13 = vld [vmem:[#allocation29_spill] sm:$0xff]  ;;  %19272 = vst [vmem:[#allocation105_spill] sm:$0xff] %v15914_v55  ;;  %v10058_v18 = vunpack.i.l.bf16 %v19273_v29  ;;  %v3179_v52 = vpop.f32.mrf.mxu0  ;;  %v19274_v0 = vld [vmem:[#allocation56_spill] sm:$0xff]  ;;  %v15937_v22 = vsel %vm2887_vm4, %v15617_v60, %v10048_v32  ;;  %v15941_v11 = vsel %vm2887_vm4, %v15621_v46, %v10049_v58  ;;  %v10059_v34 = vunpack.i.h.bf16 %v19273_v29  ;;  %v19279_v4 = vld [vmem:[#allocation22_spill] sm:$0xff] }
 0x301   : > { %v19263_v8 = vpack.i.bf16 %v19261_v13, %v19262_v23  ;;  %19267 = vst [vmem:[#allocation29_spill] sm:$0xff] %v15891_v56  ;;  %v15895_v13 = vld [vmem:[#allocation2 + $0xfaa] sm:$0xff]  ;;  %v15897_v23 = vld [vmem:[#allocation2 + $0xfb2] sm:$0xff]  ;;  %v15933_v24 = vld [vmem:[#allocation2 + $0x5da] sm:$0xff]  ;;  %v15957_v32 = vsel %vm2887_vm4, %v15644_v42, %v10063_v38  ;;  %v15961_v19 = vpop.permute.xlu1 %10211  ;;  %v15971_v42 = vpop.permute.xlu0 %10206 }
 0x302   : > { %19268 = vst [vmem:[#allocation15_spill] sm:$0xff] %v15895_v13  ;;  %19269 = vst [vmem:[#allocation33_spill] sm:$0xff] %v15897_v23  ;;  %v19275_v2 = vld [vmem:[#allocation24_spill] sm:$0xff]  ;;  %v19282_v46 = vld [vmem:[#allocation14_spill] sm:$0xff]  ;;  %v8892_v56 = vpop.f32.mrf.mxu0  ;;  %v15981_v59 = vsel %vm2887_vm4, %v15657_v17, %v10058_v18  ;;  %v15992_v38 = vsel %vm2887_vm4, %v15661_v26, %v10059_v34 }
 0x303   : > { %10476 = vrot.lane.b32.xlu0 %v19263_v8, %s11103_s12  ;;  %v15912_v8 = vld [vmem:[#allocation2 + $0x61a] sm:$0xff]  ;;  %v19276_v40 = vpack.i.bf16 %v19274_v0, %v19275_v2  ;;  %v15931_v33 = vld [vmem:[#allocation2 + $0x5d2] sm:$0xff]  ;;  %19278 = vst [vmem:[#allocation56_spill] sm:$0xff] %v15933_v24  ;;  %v10074_v58 = vunpack.i.h.bf16 %v19282_v46  ;;  %v10073_v29 = vunpack.i.l.bf16 %v19282_v46  ;;  %19283 = vst [vmem:[#allocation24_spill] sm:$0xff] %v15961_v19 }
 0x304   : > { %19271 = vst [vmem:[#allocation104_spill] sm:$0xff] %v15912_v8  ;;  %19277 = vst [vmem:[#allocation72_spill] sm:$0xff] %v15931_v33  ;;  %v19280_v2 = vld [vmem:[#allocation32_spill] sm:$0xff]  ;;  %v15975_v46 = vld [vmem:[#allocation2 + $0xb06] sm:$0xff] }
 0x305   : > { %10491 = vrot.lane.b32.xlu1 %v19276_v40, %s11097_s28  ;;  %v15947_v40 = vld [vmem:[%s18130_s5 + $0x1] ss:$0 sm:$0xff]  ;;  %v19281_v0 = vpack.i.bf16 %v19279_v4, %v19280_v2  ;;  %v15967_v4 = vsel %vm2887_vm4, %v15648_v3, %v10064_v62  ;;  %19284 = vst [vmem:[#allocation22_spill] sm:$0xff] %v15971_v42  ;;  %19285 = vst [vmem:[#allocation32_spill] sm:$0xff] %v15975_v46  ;;  %v15977_v60 = vld [vmem:[#allocation2 + $0xb0e] sm:$0xff]  ;;  %v16011_v26 = vsel %vm2887_vm4, %v15698_v57, %v10074_v58 }
 0x306   : > { %v3180_v2 = vadd.f32 %v15947_v40, %v3179_v52  ;;  %19286 = vst [vmem:[#allocation14_spill] sm:$0xff] %v15977_v60  ;;  %19287 = vst [vmem:[#allocation106_spill] sm:$0xff] %v15981_v59  ;;  %v19288_v8 = vld [vmem:[#allocation58_spill] sm:$0xff]  ;;  %v3188_v52 = vadd.f32 %v8891_v15, %v15947_v40  ;;  %v19289_v55 = vld [vmem:[#allocation16_spill] sm:$0xff] }
 0x307   : > { %10486 = vrot.lane.b32.xlu0 %v19281_v0, %s11104_s19  ;;  %v3191_v0 = vadd.f32 %v8892_v56, %v15947_v40  ;;  %v10069_v3 = vunpack.i.h.bf16 %v19288_v8  ;;  %v10068_v62 = vunpack.i.l.bf16 %v19288_v8  ;;  %v3182_v56 = vpop.f32.mrf.mxu0  ;;  %v19290_v13 = vld [vmem:[#allocation85_spill] sm:$0xff]  ;;  %19292 = vst [vmem:[#allocation58_spill] sm:$0xff] %v15992_v38  ;;  %v19293_v33 = vld [vmem:[#allocation42_spill] sm:$0xff]  ;;  %v19294_v8 = vld [vmem:[#allocation83_spill] sm:$0xff]  ;;  %v16023_v38 = vpop.permute.xlu0 %10216 }
 0x308   : > { %v19291_v23 = vpack.i.bf16 %v19289_v55, %v19290_v13  ;;  %v10084_v24 = vunpack.i.h.bf16 %v19293_v33  ;;  %v10083_v17 = vunpack.i.l.bf16 %v19293_v33  ;;  %v3183_v18 = vadd.f32 %v15947_v40, %v3182_v56  ;;  %v19295_v42 = vld [vmem:[#allocation79_spill] sm:$0xff]  ;;  %v16001_v19 = vld [vmem:[#allocation2 + $0xabe] sm:$0xff]  ;;  %19299 = vst [vmem:[#allocation42_spill] sm:$0xff] %v16011_v26  ;;  %v16025_v57 = vld [vmem:[#allocation2 + $0xad0] sm:$0xff] }
 0x309   : > { %v19296_v15 = vpack.i.bf16 %v19294_v8, %v19295_v42  ;;  %19297 = vst [vmem:[#allocation16_spill] sm:$0xff] %v16001_v19  ;;  %v16003_v59 = vld [vmem:[#allocation2 + $0xac6] sm:$0xff]  ;;  %v16007_v55 = vsel %vm2887_vm4, %v15694_v45, %v10073_v29  ;;  %v3309_v33 = vmax.f32 %v3191_v0, 0.0  ;;  %v8895_v13 = vpop.f32.mrf.mxu0  ;;  %v16017_v42 = vld [vmem:[#allocation2 + $0xb18] sm:$0xff]  ;;  %v3306_v29 = vmax.f32 %v3180_v2, 0.0  ;;  %19301 = vst [vmem:[#allocation83_spill] sm:$0xff] %v16025_v57 }
 0x30a   : > { %10501 = vrot.lane.b32.xlu1 %v19291_v23, %s11097_s28  ;;  %19298 = vst [vmem:[#allocation85_spill] sm:$0xff] %v16007_v55  ;;  %v16013_v23 = vpop.permute.xlu1 %10221  ;;  %v16019_v56 = vld [vmem:[#allocation2 + $0xb20] sm:$0xff]  ;;  %v3307_v55 = vmax.f32 %v3183_v18, 0.0  ;;  %v16027_v58 = vld [vmem:[#allocation2 + $0xad8] sm:$0xff]  ;;  %v16031_v0 = vsel %vm2887_vm4, %v15702_v7, %v10068_v62  ;;  %v16035_v34 = vsel %vm2887_vm4, %v15711_v47, %v10069_v3  ;;  %v3308_v46 = vmax.f32 %v3188_v52, 0.0  ;;  %v19307_v3 = vld [vmem:[#allocation31_spill] sm:$0xff] }
 0x30b   : > { %10496 = vrot.lane.b32.xlu0 %v19296_v15, %s11104_s19  ;;  %v19300_v8 = vld [vmem:[#allocation86_spill] sm:$0xff]  ;;  %19302 = vst [vmem:[#allocation79_spill] sm:$0xff] %v16027_v58  ;;  %v3195_v60 = vpop.f32.mrf.mxu0  ;;  %v16045_v26 = vsel %vm2887_vm4, %v15725_v28, %v10083_v17  ;;  %v16049_v7 = vsel %vm2887_vm4, %v15741_v63, %v10084_v24  ;;  %v19308_v62 = vld [vmem:[#allocation40_spill] sm:$0xff] }
 0x30c   : > { %v10079_v15 = vunpack.i.h.bf16 %v19300_v8  ;;  %v10078_v45 = vunpack.i.l.bf16 %v19300_v8  ;;  %v19303_v2 = vld [vmem:[#allocation54_spill] sm:$0xff]  ;;  %19305 = vst [vmem:[#allocation86_spill] sm:$0xff] %v16045_v26  ;;  %v3338_v47 = vpack.c.bf16 %v3307_v55, %v3306_v29  ;;  %v19309_v52 = vpack.i.bf16 %v19307_v3, %v19308_v62  ;;  %v16065_v24 = vld [vmem:[#allocation2 + $0xb32] sm:$0xff]  ;;  %v16069_v29 = vld [vmem:[#allocation2 + $0xaea] sm:$0xff] }
 0x30d   : > { %v19304_v18 = vpack.i.bf16 %v15285_v41, %v19303_v2  ;;  %19306 = vst [vmem:[#allocation54_spill] sm:$0xff] %v16049_v7  ;;  %v16057_v2 = vld [vmem:[#allocation2 + $0xb2a] sm:$0xff]  ;;  %v3339_v17 = vpack.c.bf16 %v3309_v33, %v3308_v46  ;;  %v8896_v26 = vpop.f32.mrf.mxu0  ;;  %19312 = vst [vmem:[#allocation40_spill] sm:$0xff] %v16065_v24  ;;  %v16067_v55 = vld [vmem:[#allocation2 + $0xae2] sm:$0xff]  ;;  %v3196_v46 = vadd.f32 %v15947_v40, %v3195_v60 }
 0x30e   : > { %19310 = vst [vmem:[#allocation31_spill] sm:$0xff] %v16057_v2  ;;  %v16061_v19 = vpop.permute.xlu1 %10231  ;;  %19314 = vst [vmem:[#allocation107_spill] sm:$0xff] %v16069_v29  ;;  %v16073_v3 = vsel %vm2887_vm4, %v15745_v61, %v10078_v45  ;;  %v16077_v62 = vsel %vm2887_vm4, %v15749_v21, %v10079_v15  ;;  %v3207_v33 = vadd.f32 %v8896_v26, %v15947_v40  ;;  %8923 = vmatprep.mubr.msk.bf16.mxu1 %vm1230_vm2, %v3338_v47  ;;  %v19318_v41 = vld [vmem:[#allocation75_spill] sm:$0xff]  ;;  %v19319_v21 = vld [vmem:[#allocation81_spill] sm:$0xff] }
 0x30f   : > { %10511 = vrot.lane.b32.xlu1 %v19304_v18, %s11098_s29  ;;  %10506 = vrot.lane.b32.xlu0 %v19309_v52, %s11098_s29  ;;  %v19311_v18 = vld [vmem:[#allocation23_spill] sm:$0xff]  ;;  %19315 = vst [vmem:[#allocation108_spill] sm:$0xff] %v16073_v3  ;;  %19316 = vst [vmem:[#allocation109_spill] sm:$0xff] %v16077_v62  ;;  %v16081_v52 = vpop.permute.xlu0 %10226  ;;  %v10104_v7 = vunpack.i.h.bf16 %v19318_v41  ;;  %v10103_v57 = vunpack.i.l.bf16 %v19318_v41  ;;  %v3204_v61 = vadd.f32 %v8895_v13, %v15947_v40  ;;  %v3198_v45 = vpop.f32.mrf.mxu0  ;;  %v16093_v26 = vld [vmem:[#allocation2 + $0x1016] sm:$0xff] }
 0x310   : > { %v10089_v8 = vunpack.i.h.bf16 %v19311_v18  ;;  %v10088_v28 = vunpack.i.l.bf16 %v19311_v18  ;;  %19313 = vst [vmem:[#allocation23_spill] sm:$0xff] %v16067_v55  ;;  %8924 = vmatmul.mubr.msk.bf16.vlgmr.msra.gmra.mxu1 %vm1230_vm2, %v3339_v17  ;;  %v19320_v60 = vpack.i.bf16 %v15319_v6, %v19319_v21  ;;  %19321 = vst [vmem:[#allocation75_spill] sm:$0xff] %v16093_v26  ;;  %v16095_v15 = vld [vmem:[#allocation2 + $0x101e] sm:$0xff]  ;;  %v19323_v47 = vld [vmem:[#allocation35_spill] sm:$0xff]  ;;  %v3199_v18 = vadd.f32 %v15947_v40, %v3198_v45 }
 0x311   : > { %19322 = vst [vmem:[#allocation81_spill] sm:$0xff] %v16095_v15  ;;  %v10098_v63 = vunpack.i.l.bf16 %v19323_v47  ;;  %v19324_v41 = vld [vmem:[#allocation10_spill] sm:$0xff]  ;;  %v19325_v62 = vld [vmem:[#allocation87_spill] sm:$0xff]  ;;  %v10099_v45 = vunpack.i.h.bf16 %v19323_v47  ;;  %v3313_v3 = vmax.f32 %v3207_v33, 0.0  ;;  %v8899_v58 = vpop.f32.mrf.mxu0  ;;  %v3310_v55 = vmax.f32 %v3196_v46, 0.0  ;;  %v19336_v26 = vld [vmem:[#allocation44_spill] sm:$0xff] }
 0x312   : > { %v19326_v13 = vpack.i.bf16 %v19324_v41, %v19325_v62  ;;  %v16109_v21 = vsel %vm2887_vm4, %v15780_v39, %v10088_v28  ;;  %v16116_v62 = vpop.permute.xlu1 %10241  ;;  %v16118_v41 = vld [vmem:[#allocation2 + $0xfce] sm:$0xff]  ;;  %v3311_v29 = vmax.f32 %v3199_v18, 0.0  ;;  %v16133_v33 = vsel %vm2920_vm5, %v15793_v54, %v10103_v57 }
 0x313   : > { %10521 = vrot.lane.b32.xlu1 %v19320_v60, %s11099_s30  ;;  %19327 = vst [vmem:[#allocation35_spill] sm:$0xff] %v16109_v21  ;;  %v16113_v60 = vsel %vm2887_vm4, %v15789_v9, %v10089_v8  ;;  %19329 = vst [vmem:[#allocation87_spill] sm:$0xff] %v16116_v62  ;;  %v19332_v17 = vld [vmem:[#allocation63_spill] sm:$0xff]  ;;  %v16123_v39 = vpop.permute.xlu0 %10236  ;;  %v16129_v28 = vld [vmem:[#allocation2 + $0x1030] sm:$0xff]  ;;  %v16137_v47 = vsel %vm2920_vm5, %v15808_v14, %v10104_v7  ;;  %v3312_v18 = vmax.f32 %v3204_v61, 0.0  ;;  %v10108_v54 = vunpack.i.l.bf16 %v19336_v26 }
 0x314   : > { %10516 = vrot.lane.b32.xlu0 %v19326_v13, %s11099_s30  ;;  %19328 = vst [vmem:[#allocation10_spill] sm:$0xff] %v16113_v60  ;;  %19330 = vst [vmem:[#allocation110_spill] sm:$0xff] %v16118_v41  ;;  %v16120_v13 = vld [vmem:[#allocation2 + $0xfd6] sm:$0xff]  ;;  %v10113_v6 = vunpack.i.l.bf16 %v19332_v17  ;;  %v16127_v8 = vld [vmem:[#allocation2 + $0x1028] sm:$0xff]  ;;  %v10114_v46 = vunpack.i.h.bf16 %v19332_v17  ;;  %v3211_v60 = vpop.f32.mrf.mxu0  ;;  %v19335_v9 = vpack.i.bf16 %v15365_v35, %v15353_v48  ;;  %v16146_v21 = vsel %vm2920_vm5, %v15824_v5, %v10098_v63  ;;  %v8853_v35 = vpop.f32.mrf.mxu1 }
 0x315   : > { %19331 = vst [vmem:[#allocation111_spill] sm:$0xff] %v16120_v13  ;;  %19333 = vst [vmem:[#allocation63_spill] sm:$0xff] %v16127_v8  ;;  %v3340_v57 = vpack.c.bf16 %v3311_v29, %v3310_v55  ;;  %v19337_v14 = vpack.i.bf16 %v15369_v27, %v15367_v43  ;;  %v16155_v61 = vld [vmem:[#allocation2 + $0xfe0] sm:$0xff]  ;;  %v16157_v17 = vld [vmem:[#allocation2 + $0xfe8] sm:$0xff]  ;;  %v16161_v48 = vsel %vm2920_vm5, %v15828_v31, %v10099_v45  ;;  %v10109_v5 = vunpack.i.h.bf16 %v19336_v26 }
 0x316   : > { %19334 = vst [vmem:[#allocation112_spill] sm:$0xff] %v16129_v28  ;;  %19338 = vst [vmem:[#allocation44_spill] sm:$0xff] %v16155_v61  ;;  %v3341_v63 = vpack.c.bf16 %v3313_v3, %v3312_v18  ;;  %v8900_v55 = vpop.f32.mrf.mxu0  ;;  %v16164_v29 = vpop.permute.xlu1 %10251  ;;  %v16171_v27 = vsel %vm2920_vm5, %v15836_v36, %v10113_v6  ;;  %v3212_v31 = vadd.f32 %v15947_v40, %v3211_v60  ;;  %v19343_v60 = vld [vmem:[#allocation11_spill] sm:$0xff]  ;;  %v16192_v43 = vld [vmem:[#allocation2 + $0x650] sm:$0xff] }
 0x317   : > { %10531 = vrot.lane.b32.xlu1 %v19335_v9, %s11100_s7  ;;  %19339 = vst [vmem:[#allocation113_spill] sm:$0xff] %v16157_v17  ;;  %19340 = vst [vmem:[#allocation114_spill] sm:$0xff] %v16164_v29  ;;  %v19341_v9 = vld [vmem:[#allocation62_spill] sm:$0xff]  ;;  %v3223_v45 = vadd.f32 %v8900_v55, %v15947_v40  ;;  %v16176_v26 = vpop.permute.xlu0 %10246  ;;  %8927 = vmatprep.mubr.msk.bf16.mxu1 %vm1230_vm2, %v3340_v57  ;;  %v1317_v3 = vpop.f32.mrf.mxu1  ;;  %v16181_v18 = vsel %vm2920_vm5, %v15850_v1, %v10114_v46  ;;  %v16194_v7 = vld [vmem:[#allocation2 + $0x658] sm:$0xff] }
 0x318   : > { %10526 = vrot.lane.b32.xlu0 %v19337_v14, %s11100_s7  ;;  %1446 = vst.msk [vmem:[#allocation3 + $0x10] sm:$0xff] %vm1230_vm2, %v8853_v35  ;;  %v10123_v14 = vunpack.i.l.bf16 %v19341_v9  ;;  %19342 = vst [vmem:[#allocation62_spill] sm:$0xff] %v16176_v26  ;;  %v10124_v35 = vunpack.i.h.bf16 %v19341_v9  ;;  %v3220_v36 = vadd.f32 %v8899_v58, %v15947_v40  ;;  %v3214_v6 = vpop.f32.mrf.mxu0  ;;  %8928 = vmatmul.mubr.msk.bf16.gmra.mxu1 %vm1230_vm2, %v3341_v63  ;;  %v19347_v58 = vld [vmem:[#allocation82_spill] sm:$0xff]  ;;  %v19348_v9 = vld [vmem:[#allocation43_spill] sm:$0xff] }
 0x319   : > { %v19344_v55 = vpack.i.bf16 %v15397_v16, %v19343_v60  ;;  %19345 = vst [vmem:[#allocation11_spill] sm:$0xff] %v16192_v43  ;;  %19346 = vst [vmem:[#allocation115_spill] sm:$0xff] %v16194_v7  ;;  %v16199_v1 = vsel %vm2920_vm5, %v15866_v51, %v10108_v54  ;;  %v10119_v46 = vunpack.i.h.bf16 %v19347_v58  ;;  %v10118_v63 = vunpack.i.l.bf16 %v19347_v58  ;;  %v19349_v60 = vld [vmem:[#allocation30_spill] sm:$0xff]  ;;  %v8854_v57 = vpop.f32.mrf.mxu1  ;;  %v16216_v58 = vld [vmem:[#allocation2 + $0xff2] sm:$0xff] }
 0x31a   : > { %1444 = vst.msk [vmem:[#allocation3] sm:$0xff] %vm1230_vm2, %v1317_v3  ;;  %v3215_v16 = vadd.f32 %v15947_v40, %v3214_v6  ;;  %v16210_v29 = vsel %vm2920_vm5, %v15870_v50, %v10109_v5  ;;  %v19351_v3 = vld [vmem:[#allocation71_spill] sm:$0xff]  ;;  %v3317_v54 = vmax.f32 %v3223_v45, 0.0  ;;  %v8903_v17 = vpop.f32.mrf.mxu0  ;;  %v16214_v8 = vpop.permute.xlu1 %10261  ;;  %19352 = vst [vmem:[#allocation82_spill] sm:$0xff] %v16216_v58  ;;  %v16218_v6 = vld [vmem:[#allocation2 + $0xffa] sm:$0xff]  ;;  %v3314_v50 = vmax.f32 %v3212_v31, 0.0 }
 0x31b   : > { %10541 = vrot.lane.b32.xlu1 %v19344_v55, %s11101_s8  ;;  %v19350_v55 = vpack.i.bf16 %v19348_v9, %v19349_v60  ;;  %v10134_v61 = vunpack.i.h.bf16 %v19351_v3  ;;  %v10133_v51 = vunpack.i.l.bf16 %v19351_v3  ;;  %19353 = vst [vmem:[#allocation43_spill] sm:$0xff] %v16218_v6  ;;  %1447 = vst.msk [vmem:[#allocation3 + $0x18] sm:$0xff] %vm1230_vm2, %v8854_v57  ;;  %v16223_v9 = vsel %vm2920_vm5, %v15884_v20, %v10123_v14  ;;  %v16225_v60 = vpop.permute.xlu0 %10256  ;;  %v19354_v28 = vld [vmem:[#allocation80_spill] sm:$0xff]  ;;  %v19370_v7 = vld [vmem:[#allocation90_spill] sm:$0xff] }
 0x31c   : > { %v3315_v5 = vmax.f32 %v3215_v16, 0.0  ;;  %v16231_v3 = vsel %vm2920_vm5, %v15888_v30, %v10124_v35  ;;  %v10129_v41 = vunpack.i.h.bf16 %v19354_v28  ;;  %v10128_v57 = vunpack.i.l.bf16 %v19354_v28  ;;  %v3227_v15 = vpop.f32.mrf.mxu0  ;;  %v19356_v28 = vld [vmem:[#allocation88_spill] sm:$0xff]  ;;  %v19357_v35 = vld [vmem:[#allocation89_spill] sm:$0xff]  ;;  %v19373_v26 = vld [vmem:[#allocation67_spill] sm:$0xff] }
 0x31d   : > { %10536 = vrot.lane.b32.xlu0 %v19350_v55, %s11101_s8  ;;  %v1320_v55 = vpop.f32.mrf.mxu1  ;;  %v3316_v13 = vmax.f32 %v3220_v36, 0.0  ;;  %v19355_v20 = vpack.i.bf16 %v15443_v53, %v15433_v44  ;;  %v16242_v14 = vsel %vm2920_vm5, %v15901_v12, %v10118_v63  ;;  %v16246_v30 = vsel %vm2920_vm5, %v15905_v25, %v10119_v46  ;;  %v19359_v25 = vld [vmem:[#allocation19_spill] sm:$0xff]  ;;  %v19366_v44 = vld [vmem:[#allocation57_spill] sm:$0xff] }
 0x31e   : > { %1445 = vst.msk [vmem:[#allocation3 + $0x8] sm:$0xff] %vm1230_vm2, %v1320_v55  ;;  %v3342_v31 = vpack.c.bf16 %v3315_v5, %v3314_v50  ;;  %v19358_v36 = vpack.i.bf16 %v19356_v28, %v19357_v35  ;;  %v16256_v16 = vsel %vm2920_vm5, %v15918_v37, %v10133_v51  ;;  %v16260_v12 = vsel %vm2920_vm5, %v15922_v49, %v10134_v61  ;;  %v8904_v50 = vpop.f32.mrf.mxu0  ;;  %v16263_v5 = vpop.permute.xlu1 %10271 }
 0x31f   : > { %10551 = vrot.lane.b32.xlu1 %v19355_v20, %s11102_s11  ;;  %v8857_v53 = vpop.f32.mrf.mxu1  ;;  %v10143_v46 = vunpack.i.l.bf16 %v19359_v25  ;;  %v3343_v63 = vpack.c.bf16 %v3317_v54, %v3316_v13  ;;  %v10144_v55 = vunpack.i.h.bf16 %v19359_v25  ;;  %v19360_v20 = vld [vmem:[#allocation48_spill] sm:$0xff]  ;;  %v3228_v35 = vadd.f32 %v15947_v40, %v3227_v15  ;;  %v16270_v51 = vpop.permute.xlu0 %10266  ;;  %v19362_v25 = vld [vmem:[#allocation46_spill] sm:$0xff] }
 0x320   : > { %1450 = vst.msk [vmem:[#allocation3 + $0x30] sm:$0xff] %vm1230_vm2, %v8857_v53  ;;  %v10138_v28 = vunpack.i.l.bf16 %v19360_v20  ;;  %v3239_v37 = vadd.f32 %v8904_v50, %v15947_v40  ;;  %8931 = vmatprep.mubr.msk.bf16.mxu1 %vm1230_vm2, %v3342_v31  ;;  %v16275_v13 = vsel %vm2920_vm5, %v15937_v22, %v10128_v57  ;;  %v16279_v61 = vsel %vm2920_vm5, %v15941_v11, %v10129_v41  ;;  %v3230_v15 = vpop.f32.mrf.mxu0  ;;  %v19361_v53 = vld [vmem:[#allocation59_spill] sm:$0xff]  ;;  %v19364_v57 = vld [vmem:[#allocation65_spill] sm:$0xff] }
 0x321   : > { %10546 = vrot.lane.b32.xlu0 %v19358_v36, %s11102_s11  ;;  %v1333_v49 = vpop.f32.mrf.mxu1  ;;  %v10183_v54 = vunpack.i.l.bf16 %v15766_v10  ;;  %v3236_v36 = vadd.f32 %v8903_v17, %v15947_v40  ;;  %8932 = vmatmul.mubr.msk.bf16.gmra.mxu1 %vm1230_vm2, %v3343_v63  ;;  %v19363_v31 = vpack.i.bf16 %v19361_v53, %v19362_v25  ;;  %v10184_v22 = vunpack.i.h.bf16 %v15766_v10  ;;  %v19365_v17 = vld [vmem:[#allocation36_spill] sm:$0xff]  ;;  %v19368_v25 = vld [vmem:[#allocation70_spill] sm:$0xff] }
 0x322   : > { %1448 = vst.msk [vmem:[#allocation3 + $0x20] sm:$0xff] %vm1230_vm2, %v1333_v49  ;;  %v10179_v50 = vunpack.i.h.bf16 %v19364_v57  ;;  %v10178_v11 = vunpack.i.l.bf16 %v19364_v57  ;;  %v3231_v41 = vadd.f32 %v15947_v40, %v3230_v15  ;;  %v19367_v45 = vpack.i.bf16 %v19365_v17, %v19366_v44  ;;  %v8907_v58 = vpop.f32.mrf.mxu0  ;;  %v16303_v6 = vpop.permute.xlu1 %10281 }
 0x323   : > { %10561 = vrot.lane.b32.xlu1 %v19363_v31, %s11103_s12  ;;  %v8858_v63 = vpop.f32.mrf.mxu1  ;;  %v16299_v53 = vsel %vm2920_vm5, %v15957_v32, %v10143_v46  ;;  %v10193_v10 = vunpack.i.l.bf16 %v19368_v25  ;;  %v3321_v31 = vmax.f32 %v3239_v37, 0.0  ;;  %v16308_v15 = vsel %vm2920_vm5, %v15967_v4, %v10144_v55  ;;  %v16314_v57 = vpop.permute.xlu0 %10276  ;;  %v19371_v4 = vld [vmem:[#allocation20_spill] sm:$0xff] }
 0x324   : > { %1451 = vst.msk [vmem:[#allocation3 + $0x38] sm:$0xff] %vm1230_vm2, %v8858_v63  ;;  %v3318_v32 = vmax.f32 %v3228_v35, 0.0  ;;  %v3319_v46 = vmax.f32 %v3231_v41, 0.0  ;;  %v5140_v37 = vsel %vm2953_vm6, %v16133_v33, %v10183_v54  ;;  %v10194_v49 = vunpack.i.h.bf16 %v19368_v25  ;;  %v3243_v63 = vpop.f32.mrf.mxu0  ;;  %v19374_v41 = vld [vmem:[#allocation84_spill] sm:$0xff] }
 0x325   : > { %10556 = vrot.lane.b32.xlu0 %v19367_v45, %s11103_s12  ;;  %v19369_v45 = vld [vmem:[#allocation106_spill] sm:$0xff]  ;;  %v1336_v17 = vpop.f32.mrf.mxu1  ;;  %v3320_v43 = vmax.f32 %v3236_v36, 0.0  ;;  %v19372_v55 = vpack.i.bf16 %v19370_v7, %v19371_v4  ;;  %v5141_v35 = vsel %vm2953_vm6, %v16137_v47, %v10184_v22  ;;  %v5138_v33 = vsel %vm2953_vm6, %v16146_v21, %v10178_v11  ;;  %v19375_v7 = vld [vmem:[#allocation92_spill] sm:$0xff] }
 0x326   : > { %v16312_v44 = vsel %vm2920_vm5, %v19369_v45, %v10138_v28  ;;  %v16325_v28 = vsel %vm1016_vm1, %v19373_v26, 0  ;;  %1449 = vst.msk [vmem:[#allocation3 + $0x28] sm:$0xff] %vm1230_vm2, %v1336_v17  ;;  %v5139_v54 = vsel %vm2953_vm6, %v16161_v48, %v10179_v50  ;;  %v3344_v36 = vpack.c.bf16 %v3319_v46, %v3318_v32  ;;  %v19377_v17 = vld [vmem:[#allocation55_spill] sm:$0xff]  ;;  %v8908_v21 = vpop.f32.mrf.mxu0  ;;  %v16344_v11 = vpop.permute.xlu1 %10291  ;;  %v19378_v48 = vld [vmem:[#allocation29_spill] sm:$0xff] }
 0x327   : > { %10571 = vrot.lane.b32.xlu1 %v19372_v55, %s11097_s28  ;;  %v19376_v25 = vpack.i.bf16 %v19374_v41, %v19375_v7  ;;  %v8861_v45 = vpop.f32.mrf.mxu1  ;;  %v16340_v26 = vsel %vm2953_vm6, %v16171_v27, %v10193_v10  ;;  %v10189_v4 = vunpack.i.h.bf16 %v19377_v17  ;;  %v10188_v47 = vunpack.i.l.bf16 %v19377_v17  ;;  %v16351_v27 = vpop.permute.xlu0 %10286  ;;  %v19381_v17 = vld [vmem:[#allocation91_spill] sm:$0xff] }
 0x328   : > { %v3345_v22 = vpack.c.bf16 %v3321_v31, %v3320_v43  ;;  %1454 = vst.msk [vmem:[#allocation3 + $0x50] sm:$0xff] %vm1230_vm2, %v8861_v45  ;;  %v10204_v50 = vunpack.i.h.bf16 %v19378_v48  ;;  %v10203_v32 = vunpack.i.l.bf16 %v19378_v48  ;;  %v3244_v46 = vadd.f32 %v15947_v40, %v3243_v63  ;;  %8935 = vmatprep.mubr.msk.bf16.mxu1 %vm1230_vm2, %v3344_v36  ;;  %v19379_v31 = vld [vmem:[#allocation103_spill] sm:$0xff]  ;;  %v3246_v45 = vpop.f32.mrf.mxu0  ;;  %v19380_v63 = vld [vmem:[#allocation21_spill] sm:$0xff] }
 0x329   : > { %10566 = vrot.lane.b32.xlu0 %v19376_v25, %s11104_s19  ;;  %v3255_v55 = vadd.f32 %v8908_v21, %v15947_v40  ;;  %v1349_v10 = vpop.f32.mrf.mxu1  ;;  %v16356_v43 = vsel %vm2953_vm6, %v16181_v18, %v10194_v49  ;;  %v10199_v41 = vunpack.i.h.bf16 %v19379_v31  ;;  %v10198_v7 = vunpack.i.l.bf16 %v19379_v31  ;;  %v19384_v31 = vld [vmem:[#allocation39_spill] sm:$0xff] }
 0x32a   : > { %v3252_v25 = vadd.f32 %v8907_v58, %v15947_v40  ;;  %8936 = vmatmul.mubr.msk.bf16.gmra.mxu1 %vm1230_vm2, %v3345_v22  ;;  %v19382_v21 = vpack.i.bf16 %v19380_v63, %v19381_v17  ;;  %1452 = vst.msk [vmem:[#allocation3 + $0x40] sm:$0xff] %vm1230_vm2, %v1349_v10  ;;  %v10264_v36 = vunpack.i.h.bf16 %v16214_v8  ;;  %v10263_v18 = vunpack.i.l.bf16 %v16214_v8  ;;  %v19383_v58 = vld [vmem:[#allocation45_spill] sm:$0xff]  ;;  %v16382_v2 = vpop.permute.xlu1 %10301 }
 0x32b   : > { %v10258_v49 = vunpack.i.l.bf16 %v16225_v60  ;;  %v3247_v48 = vadd.f32 %v15947_v40, %v3246_v45  ;;  %v19385_v62 = vpack.i.bf16 %v19383_v58, %v19384_v31  ;;  %v8862_v22 = vpop.f32.mrf.mxu1  ;;  %v5142_v63 = vsel %vm2953_vm6, %v16199_v1, %v10188_v47  ;;  %v19386_v58 = vld [vmem:[#allocation24_spill] sm:$0xff] }
 0x32c   : > { %10581 = vrot.lane.b32.xlu1 %v19382_v21, %s11097_s28  ;;  %v16379_v10 = vsel %vm2953_vm6, %v16210_v29, %v10189_v4  ;;  %v10259_v17 = vunpack.i.h.bf16 %v16225_v60  ;;  %v3325_v8 = vmax.f32 %v3255_v55, 0.0  ;;  %v8911_v21 = vpop.f32.mrf.mxu0  ;;  %1455 = vst.msk [vmem:[#allocation3 + $0x58] sm:$0xff] %vm1230_vm2, %v8862_v22  ;;  %v16387_v45 = vsel %vm2953_vm6, %v16223_v9, %v10203_v32  ;;  %v16393_v29 = vpop.permute.xlu0 %10296 }
 0x32d   : > { %10576 = vrot.lane.b32.xlu0 %v19385_v62, %s11104_s19  ;;  %v16391_v62 = vsel %vm2953_vm6, %v16231_v3, %v10204_v50  ;;  %v3322_v1 = vmax.f32 %v3244_v46, 0.0  ;;  %v3323_v47 = vmax.f32 %v3247_v48, 0.0  ;;  %v1352_v4 = vpop.f32.mrf.mxu1  ;;  %v16397_v60 = vsel %vm2953_vm6, %v16242_v14, %v10198_v7  ;;  %v19387_v3 = vld [vmem:[#allocation94_spill] sm:$0xff]  ;;  %v19388_v50 = vld [vmem:[#allocation41_spill] sm:$0xff] }
 0x32e   : > { %v16401_v55 = vsel %vm2953_vm6, %v16246_v30, %v10199_v41  ;;  %v3324_v32 = vmax.f32 %v3252_v25, 0.0  ;;  %v3259_v31 = vpop.f32.mrf.mxu0  ;;  %v19389_v46 = vpack.i.bf16 %v19387_v3, %v19388_v50  ;;  %1453 = vst.msk [vmem:[#allocation3 + $0x48] sm:$0xff] %vm1230_vm2, %v1352_v4  ;;  %v5172_v48 = vsel %vm2986_vm7, %v5140_v37, %v10263_v18  ;;  %v19390_v30 = vld [vmem:[#allocation34_spill] sm:$0xff]  ;;  %v19391_v41 = vld [vmem:[#allocation93_spill] sm:$0xff]  ;;  %v10312_v37 = vpop.permute.xlu1 %10311 }
 0x32f   : > { %v5173_v14 = vsel %vm2986_vm7, %v5141_v35, %v10264_v36  ;;  %v5170_v7 = vsel %vm2986_vm7, %v5138_v33, %v10258_v49  ;;  %v3346_v22 = vpack.c.bf16 %v3323_v47, %v3322_v1  ;;  %v19392_v9 = vpack.i.bf16 %v19390_v30, %v19391_v41  ;;  %v8865_v25 = vpop.f32.mrf.mxu1 }
 0x330   : > { %10591 = vrot.lane.b32.xlu1 %v19389_v46, %s11098_s29  ;;  %v5171_v24 = vsel %vm2986_vm7, %v5139_v54, %v10259_v17  ;;  %v10268_v3 = vunpack.i.l.bf16 %v16270_v51  ;;  %v3347_v50 = vpack.c.bf16 %v3325_v8, %v3324_v32  ;;  %v3268_v4 = vadd.f32 %v8911_v21, %v15947_v40  ;;  %v8912_v46 = vpop.f32.mrf.mxu0  ;;  %1458 = vst.msk [vmem:[#allocation3 + $0x70] sm:$0xff] %vm1230_vm2, %v8865_v25  ;;  %v10307_v49 = vpop.permute.xlu0 %10306  ;;  %v19394_v32 = vld [vmem:[#allocation12_spill] sm:$0xff] }
 0x331   : > { %10586 = vrot.lane.b32.xlu0 %v19392_v9, %s11098_s29  ;;  %v3260_v35 = vadd.f32 %v15947_v40, %v3259_v31  ;;  %v3271_v33 = vadd.f32 %v8912_v46, %v15947_v40  ;;  %v10314_v36 = vunpack.i.h.bf16 %v10312_v37  ;;  %v10313_v18 = vunpack.i.l.bf16 %v10312_v37  ;;  %8939 = vmatprep.mubr.msk.bf16.mxu1 %vm1230_vm2, %v3346_v22  ;;  %v1365_v1 = vpop.f32.mrf.mxu1  ;;  %v19393_v9 = vld [vmem:[#allocation76_spill] sm:$0xff]  ;;  %v19397_v46 = vld [vmem:[#allocation47_spill] sm:$0xff] }
 0x332   : > { %v10269_v17 = vunpack.i.h.bf16 %v16270_v51  ;;  %v10309_v8 = vunpack.i.h.bf16 %v10307_v49  ;;  %v10308_v21 = vunpack.i.l.bf16 %v10307_v49  ;;  %v3262_v47 = vpop.f32.mrf.mxu0  ;;  %8940 = vmatmul.mubr.msk.bf16.gmra.mxu1 %vm1230_vm2, %v3347_v50  ;;  %v19395_v31 = vpack.i.bf16 %v19393_v9, %v19394_v32  ;;  %1456 = vst.msk [vmem:[#allocation3 + $0x60] sm:$0xff] %vm1230_vm2, %v1365_v1  ;;  %v19396_v51 = vld [vmem:[#allocation49_spill] sm:$0xff] }
 0x333   : > { %v3329_v30 = vmax.f32 %v3271_v33, 0.0  ;;  %v5204_v22 = vsel %vm3019_vm8, %v5172_v48, %v10313_v18  ;;  %v5205_v41 = vsel %vm3019_vm8, %v5173_v14, %v10314_v36  ;;  %v3263_v25 = vadd.f32 %v15947_v40, %v3262_v47  ;;  %v8866_v50 = vpop.f32.mrf.mxu1  ;;  %v10322_v48 = vpop.permute.xlu1 %10321 }
 0x334   : > { %10601 = vrot.lane.b32.xlu1 %v19395_v31, %s11099_s30  ;;  %v19398_v37 = vpack.i.bf16 %v19396_v51, %v19397_v46  ;;  %v10273_v49 = vunpack.i.l.bf16 %v16263_v5  ;;  %v5174_v9 = vsel %vm2986_vm7, %v5142_v63, %v10268_v3  ;;  %v5202_v32 = vsel %vm3019_vm8, %v5170_v7, %v10308_v21  ;;  %v8915_v1 = vpop.f32.mrf.mxu0  ;;  %1459 = vst.msk [vmem:[#allocation3 + $0x78] sm:$0xff] %vm1230_vm2, %v8866_v50  ;;  %v10317_v31 = vpop.permute.xlu0 %10316  ;;  %v19399_v7 = vld [vmem:[#allocation68_spill] sm:$0xff]  ;;  %v19400_v3 = vld [vmem:[#allocation95_spill] sm:$0xff] }
 0x335   : > { %v5203_v33 = vsel %vm3019_vm8, %v5171_v24, %v10309_v8  ;;  %v3328_v14 = vmax.f32 %v3268_v4, 0.0  ;;  %v3326_v36 = vmax.f32 %v3260_v35, 0.0  ;;  %v5235_v18 = vpack.c.bf16 %v5205_v41, %v5204_v22  ;;  %v1368_v51 = vpop.f32.mrf.mxu1  ;;  %v19402_v41 = vld [vmem:[#allocation37_spill] sm:$0xff] }
 0x336   : > { %10596 = vrot.lane.b32.xlu0 %v19398_v37, %s11099_s30  ;;  %v3327_v47 = vmax.f32 %v3263_v25, 0.0  ;;  %v5175_v46 = vsel %vm2986_vm7, %v16379_v10, %v10269_v17  ;;  %v10319_v37 = vunpack.i.h.bf16 %v10317_v31  ;;  %v10318_v54 = vunpack.i.l.bf16 %v10317_v31  ;;  %v3275_v63 = vpop.f32.mrf.mxu0  ;;  %1457 = vst.msk [vmem:[#allocation3 + $0x68] sm:$0xff] %vm1230_vm2, %v1368_v51  ;;  %v19403_v10 = vld [vmem:[#allocation50_spill] sm:$0xff] }
 0x337   : > { %v19401_v24 = vpack.i.bf16 %v19399_v7, %v19400_v3  ;;  %v5234_v8 = vpack.c.bf16 %v5203_v33, %v5202_v32  ;;  %v10279_v4 = vunpack.i.h.bf16 %v16314_v57  ;;  %v10278_v35 = vunpack.i.l.bf16 %v16314_v57  ;;  %v8869_v25 = vpop.f32.mrf.mxu1  ;;  %v16459_v51 = vpop.permute.xlu1 %10331  ;;  %v11062_v57 = vld [vmem:[%s18127_s2 + $0x30] sm:$0xff]  }
 0x338   : > { %v3349_v21 = vpack.c.bf16 %v3329_v30, %v3328_v14  ;;  %v3348_v22 = vpack.c.bf16 %v3327_v47, %v3326_v36  ;;  %v19404_v17 = vpack.i.bf16 %v19402_v41, %v19403_v10  ;;  %v10324_v50 = vunpack.i.h.bf16 %v10322_v48  ;;  %v8916_v33 = vpop.f32.mrf.mxu0  ;;  %1462 = vst.msk [vmem:[#allocation3 + $0x90] sm:$0xff] %vm1230_vm2, %v8869_v25  ;;  %v19405_v30 = vld [vmem:[#allocation22_spill] sm:$0xff]  ;;  %v10327_v36 = vpop.permute.xlu0 %10326  ;;  %v19410_v10 = vld [vmem:[#allocation77_spill] sm:$0xff] }
 0x339   : > { %10611 = vrot.lane.b32.xlu1 %v19401_v24, %s11100_s7  ;;  %v10323_v31 = vunpack.i.l.bf16 %v10322_v48  ;;  %v5206_v7 = vsel %vm3019_vm8, %v5174_v9, %v10318_v54  ;;  %v5207_v32 = vsel %vm3019_vm8, %v5175_v46, %v10319_v37  ;;  %8961 = vmatprep.mubr.msk.bf16.mxu0 %vm3093_vm9, %v5234_v8  ;;  %v10208_v14 = vunpack.i.l.bf16 %v19405_v30  ;;  %v1381_v47 = vpop.f32.mrf.mxu1  ;;  %v19406_v8 = vld [vmem:[#allocation99_spill] sm:$0xff] }
 0x33a   : > { %10606 = vrot.lane.b32.xlu0 %v19404_v17, %s11100_s7  ;;  %v5176_v48 = vsel %vm2986_vm7, %v16340_v26, %v10273_v49  ;;  %v3276_v54 = vadd.f32 %v15947_v40, %v3275_v63  ;;  %v3287_v9 = vadd.f32 %v8916_v33, %v15947_v40  ;;  %8962 = vmatmul.mubr.msk.bf16.vlgmr.msra.gmra.mxu0 %vm3093_vm9, %v5235_v18  ;;  %v10329_v37 = vunpack.i.h.bf16 %v10327_v36  ;;  %v3278_v24 = vpop.f32.mrf.mxu0  ;;  %v19407_v26 = vld [vmem:[#allocation97_spill] sm:$0xff]  ;;  %v19411_v17 = vld [vmem:[#allocation52_spill] sm:$0xff] }
 0x33b   : > { %8943 = vmatprep.mubr.msk.bf16.mxu1 %vm1230_vm2, %v3348_v22  ;;  %v3284_v46 = vadd.f32 %v8915_v1, %v15947_v40  ;;  %v10328_v3 = vunpack.i.l.bf16 %v10327_v36  ;;  %v19408_v49 = vpack.i.bf16 %v19406_v8, %v19407_v26  ;;  %v5236_v63 = vpack.c.bf16 %v5207_v32, %v5206_v7  ;;  %1460 = vst.msk [vmem:[#allocation3 + $0x80] sm:$0xff] %vm1230_vm2, %v1381_v47  ;;  %v8870_v7 = vpop.f32.mrf.mxu1  ;;  %v19413_v26 = vld [vmem:[#allocation28_spill] sm:$0xff] }
 0x33c   : > { %8944 = vmatmul.mubr.msk.bf16.gmra.mxu1 %vm1230_vm2, %v3349_v21  ;;  %v10209_v18 = vunpack.i.h.bf16 %v19405_v30  ;;  %v19409_v22 = vunpack.i.h.bf16 %v16263_v5  ;;  %v5178_v41 = vsel %vm2986_vm7, %v16397_v60, %v10278_v35  ;;  %v3279_v21 = vadd.f32 %v15947_v40, %v3278_v24  ;;  %9028 = vmatpush3.bf16.msra.mxu0 %v16325_v28  ;;  %v8919_v60 = vpop.f32.mrf.mxu0  ;;  %v16497_v35 = vpop.permute.xlu1 %10341  ;;  %v11063_v30 = vld [vmem:[%s18127_s2 + $0x28] sm:$0xff]   ;;  %1463 = vst.msk [vmem:[#allocation3 + $0x98] sm:$0xff] %vm1230_vm2, %v8870_v7 }
 0x33d   : > { %10621 = vrot.lane.b32.xlu1 %v19408_v49, %s11101_s8  ;;  %v19412_v25 = vpack.i.bf16 %v19410_v10, %v19411_v17  ;;  %v5179_v32 = vsel %vm2986_vm7, %v16401_v55, %v10279_v4  ;;  %v5208_v5 = vsel %vm3019_vm8, %v5176_v48, %v10323_v31  ;;  %v3333_v33 = vmax.f32 %v3287_v9, 0.0  ;;  %8965 = vmatprep.mubr.msk.bf16.mxu0 %vm3093_vm9, %v5236_v63  ;;  %v1384_v48 = vpop.f32.mrf.mxu1  ;;  %v19414_v49 = vld [vmem:[#allocation38_spill] sm:$0xff] }
 0x33e   : > { %v5177_v1 = vsel %vm2986_vm7, %v16356_v43, %v19409_v22  ;;  %9029 = vmatprep.subr.bf16.mxu0 %v11062_v57  ;;  %v3330_v28 = vmax.f32 %v3276_v54, 0.0  ;;  %v5210_v55 = vsel %vm3019_vm8, %v5178_v41, %v10328_v3  ;;  %v5211_v4 = vsel %vm3019_vm8, %v5179_v32, %v10329_v37  ;;  %v3291_v8 = vpop.f32.mrf.mxu0  ;;  %1461 = vst.msk [vmem:[#allocation3 + $0x88] sm:$0xff] %vm1230_vm2, %v1384_v48 }
 0x33f   : > { %10616 = vrot.lane.b32.xlu0 %v19412_v25, %s11101_s8  ;;  %v5209_v43 = vsel %vm3019_vm8, %v5177_v1, %v10324_v50  ;;  %v3331_v31 = vmax.f32 %v3279_v21, 0.0  ;;  %v10337_v50 = vpop.permute.xlu0 %10336  ;;  %v5150_v9 = vsel %vm2953_vm6, %v16275_v13, %v10208_v14  ;;  %v10284_v36 = vunpack.i.h.bf16 %v16303_v6  ;;  %v19416_v13 = vld [vmem:[#allocation100_spill] sm:$0xff]  ;;  %v19417_v14 = vld [vmem:[#allocation51_spill] sm:$0xff] }
 0x340   : > { %v10283_v47 = vunpack.i.l.bf16 %v16303_v6  ;;  %v3332_v24 = vmax.f32 %v3284_v46, 0.0  ;;  %v19415_v54 = vpack.i.bf16 %v19413_v26, %v19414_v49  ;;  %v10289_v37 = vunpack.i.h.bf16 %v16351_v27  ;;  %9030 = vmatpush3.bf16.msra.mxu0 %v11062_v57  ;;  %v8873_v46 = vpop.f32.mrf.mxu1  ;;  %v8920_v10 = vpop.f32.mrf.mxu0 }
 0x341   : > { %v10288_v3 = vunpack.i.l.bf16 %v16351_v27  ;;  %v3350_v63 = vpack.c.bf16 %v3331_v31, %v3330_v28  ;;  %v19418_v22 = vpack.i.bf16 %v19416_v13, %v19417_v14  ;;  %v5237_v6 = vpack.c.bf16 %v5209_v43, %v5208_v5  ;;  %v16522_v17 = vpop.permute.xlu1 %10351  ;;  %9031 = vmatprep.subr.bf16.mxu0 %v11063_v30  ;;  %1466 = vst.msk [vmem:[#allocation3 + $0xb0] sm:$0xff] %vm1230_vm2, %v8873_v46 }
 0x342   : > { %10631 = vrot.lane.b32.xlu1 %v19415_v54, %s11102_s11  ;;  %v3351_v1 = vpack.c.bf16 %v3333_v33, %v3332_v24  ;;  %v10334_v41 = vunpack.i.h.bf16 %v16459_v51  ;;  %v10333_v21 = vunpack.i.l.bf16 %v16459_v51  ;;  %v5238_v25 = vpack.c.bf16 %v5211_v4, %v5210_v55  ;;  %v1397_v51 = vpop.f32.mrf.mxu1  ;;  %v3294_v4 = vpop.f32.mrf.mxu0  ;;  %v19423_v24 = vld [vmem:[#allocation53_spill] sm:$0xff] }
 0x343   : > { %10626 = vrot.lane.b32.xlu0 %v19418_v22, %s11102_s11  ;;  %v10339_v27 = vunpack.i.h.bf16 %v10337_v50  ;;  %v10338_v7 = vunpack.i.l.bf16 %v10337_v50  ;;  %v3292_v32 = vadd.f32 %v15947_v40, %v3291_v8  ;;  %v3303_v5 = vadd.f32 %v8920_v10, %v15947_v40  ;;  %8966 = vmatmul.mubr.msk.bf16.gmra.mxu0 %vm3093_vm9, %v5237_v6  ;;  %v16528_v57 = vpop.permute.xlu0 %10346  ;;  %1464 = vst.msk [vmem:[#allocation3 + $0xa0] sm:$0xff] %vm1230_vm2, %v1397_v51 }
 0x344   : > { %8947 = vmatprep.mubr.msk.bf16.mxu1 %vm1230_vm2, %v3350_v63  ;;  %v10213_v43 = vunpack.i.l.bf16 %v19386_v58  ;;  %v5151_v33 = vsel %vm2953_vm6, %v16279_v61, %v10209_v18  ;;  %v5181_v28 = vsel %vm2986_vm7, %v16391_v62, %v10284_v36  ;;  %v3300_v55 = vadd.f32 %v8919_v60, %v15947_v40  ;;  %8969 = vmatprep.mubr.msk.bf16.mxu0 %vm3093_vm9, %v5238_v25  ;;  %v19419_v62 = vld [vmem:[#allocation66_spill] sm:$0xff]  ;;  %v19420_v18 = vld [vmem:[#allocation27_spill] sm:$0xff]  ;;  %v19422_v36 = vld [vmem:[#allocation69_spill] sm:$0xff]  ;;  %v8874_v26 = vpop.f32.mrf.mxu1 }
 0x345   : > { %8948 = vmatmul.mubr.msk.bf16.gmra.mxu1 %vm1230_vm2, %v3351_v1  ;;  %v10219_v31 = vunpack.i.h.bf16 %v16023_v38  ;;  %v5180_v50 = vsel %vm2986_vm7, %v16387_v45, %v10283_v47  ;;  %v5182_v48 = vsel %vm2986_vm7, %v5150_v9, %v10288_v3  ;;  %v3295_v61 = vadd.f32 %v15947_v40, %v3294_v4  ;;  %v16556_v47 = vpop.permute.xlu1 %10361  ;;  %9032 = vmatpush3.bf16.msra.mxu0 %v11063_v30  ;;  %v19426_v25 = vld [vmem:[#allocation102_spill] sm:$0xff] }
 0x346   : > { %v19421_v60 = vpack.i.bf16 %v19419_v62, %v19420_v18  ;;  %v19424_v8 = vpack.i.bf16 %v19422_v36, %v19423_v24  ;;  %v5183_v49 = vsel %vm2986_vm7, %v5151_v33, %v10289_v37  ;;  %v5212_v54 = vsel %vm3019_vm8, %v5180_v50, %v10333_v21  ;;  %1467 = vst.msk [vmem:[#allocation3 + $0xb8] sm:$0xff] %vm1230_vm2, %v8874_v26  ;;  %v1400_v22 = vpop.f32.mrf.mxu1  ;;  %v19434_v62 = vld [vmem:[#allocation64_spill] sm:$0xff] }
 0x347   : > { %v5213_v45 = vsel %vm3019_vm8, %v5181_v28, %v10334_v41  ;;  %v3337_v9 = vmax.f32 %v3303_v5, 0.0  ;;  %v5214_v40 = vsel %vm3019_vm8, %v5182_v48, %v10338_v7  ;;  %v5215_v3 = vsel %vm3019_vm8, %v5183_v49, %v10339_v27  ;;  %v16561_v14 = vpop.permute.xlu0 %10356  ;;  %1465 = vst.msk [vmem:[#allocation3 + $0xa8] sm:$0xff] %vm1230_vm2, %v1400_v22  ;;  %v19427_v27 = vld [vmem:[#allocation78_spill] sm:$0xff] }
 0x348   : > { %10641 = vrot.lane.b32.xlu1 %v19421_v60, %s11103_s12  ;;  %10636 = vrot.lane.b32.xlu0 %v19424_v8, %s11103_s12  ;;  %v3334_v63 = vmax.f32 %v3292_v32, 0.0  ;;  %v3335_v13 = vmax.f32 %v3295_v61, 0.0  ;;  %v19425_v37 = vmov 0.0   ;;  %v10218_v6 = vunpack.i.l.bf16 %v16023_v38  ;;  %v19429_v32 = vld [vmem:[#allocation25_spill] sm:$0xff]  ;;  %v19433_v48 = vld [vmem:[#allocation58_spill] sm:$0xff] }
 0x349   : > { %9099 = vmatprep.subr.mxu0 %v19425_v37  ;;  %v10294_v46 = vunpack.i.h.bf16 %v16344_v11  ;;  %v10293_v1 = vunpack.i.l.bf16 %v16344_v11  ;;  %v3336_v30 = vmax.f32 %v3300_v55, 0.0  ;;  %v10299_v41 = vunpack.i.h.bf16 %v16393_v29  ;;  %v19430_v38 = vld [vmem:[#allocation61_spill] sm:$0xff]  ;;  %v8877_v11 = vpop.f32.mrf.mxu1  ;;  %v16580_v4 = vpop.permute.xlu1 %10371 }
 0x34a   : > { %v10298_v21 = vunpack.i.l.bf16 %v16393_v29  ;;  %v3352_v10 = vpack.c.bf16 %v3335_v13, %v3334_v63  ;;  %v19428_v7 = vpack.i.bf16 %v19426_v25, %v19427_v27  ;;  %v19431_v5 = vpack.i.bf16 %v19429_v32, %v19430_v38  ;;  %1470 = vst.msk [vmem:[#allocation3 + $0xd0] sm:$0xff] %vm1230_vm2, %v8877_v11 }
 0x34b   : > { %v5239_v51 = vpack.c.bf16 %v5213_v45, %v5212_v54  ;;  %v10344_v33 = vunpack.i.h.bf16 %v16497_v35  ;;  %v10343_v28 = vunpack.i.l.bf16 %v16497_v35  ;;  %v3353_v55 = vpack.c.bf16 %v3337_v9, %v3336_v30  ;;  %v16591_v35 = vpop.permute.xlu0 %10366  ;;  %v1413_v24 = vpop.f32.mrf.mxu1  ;;  %v19436_v54 = vld [vmem:[#allocation18_spill] sm:$0xff]  ;;  %v19443_v30 = vld [vmem:[#allocation85_spill] sm:$0xff] }
 0x34c   : > { %10651 = vrot.lane.b32.xlu1 %v19428_v7, %s11097_s28  ;;  %10646 = vrot.lane.b32.xlu0 %v19431_v5, %s11104_s19  ;;  %v5240_v29 = vpack.c.bf16 %v5215_v3, %v5214_v40  ;;  %v19432_v50 = vunpack.i.h.bf16 %v19360_v20  ;;  %v10153_v18 = vunpack.i.l.bf16 %v19434_v62  ;;  %v10349_v60 = vunpack.i.h.bf16 %v16528_v57  ;;  %1468 = vst.msk [vmem:[#allocation3 + $0xc0] sm:$0xff] %vm1230_vm2, %v1413_v24  ;;  %v19441_v3 = vld [vmem:[#allocation15_spill] sm:$0xff] }
 0x34d   : > { %v10348_v36 = vunpack.i.l.bf16 %v16528_v57  ;;  %8970 = vmatmul.mubr.msk.bf16.gmra.mxu0 %vm3093_vm9, %v5239_v51  ;;  %8951 = vmatprep.mubr.msk.bf16.mxu1 %vm1230_vm2, %v3352_v10  ;;  %v10154_v8 = vunpack.i.h.bf16 %v19434_v62  ;;  %v5152_v20 = vsel %vm2953_vm6, %v16256_v16, %v10213_v43  ;;  %v19435_v26 = vunpack.i.h.bf16 %v19386_v58  ;;  %v19437_v43 = vld [vmem:[#allocation60_spill] sm:$0xff]  ;;  %v8878_v13 = vpop.f32.mrf.mxu1 }
 0x34e   : > { %v5123_v61 = vsel %vm2920_vm5, %v19433_v48, %v19432_v50  ;;  %v5154_v57 = vsel %vm2953_vm6, %v16312_v44, %v10218_v6  ;;  %8973 = vmatprep.mubr.msk.bf16.mxu0 %vm3093_vm9, %v5240_v29  ;;  %8952 = vmatmul.mubr.msk.bf16.gmra.mxu1 %vm1230_vm2, %v3353_v55  ;;  %v10149_v45 = vunpack.i.h.bf16 %v19436_v54  ;;  %v5184_v16 = vsel %vm2986_vm7, %v5152_v20, %v10293_v1  ;;  %v19440_v44 = vld [vmem:[#allocation33_spill] sm:$0xff]  ;;  %v19445_v29 = vld [vmem:[#allocation104_spill] sm:$0xff]  ;;  %v19450_v20 = vld [vmem:[#allocation42_spill] sm:$0xff] }
 0x34f   : > { %v5153_v49 = vsel %vm2953_vm6, %v16260_v12, %v19435_v26  ;;  %v5155_v9 = vsel %vm2953_vm6, %v5123_v61, %v10219_v31  ;;  %v19438_v12 = vld [vmem:[#allocation73_spill] sm:$0xff]  ;;  %v19442_v63 = vpack.i.bf16 %v19440_v44, %v19441_v3  ;;  %v5186_v22 = vsel %vm2986_vm7, %v5154_v57, %v10298_v21  ;;  %1471 = vst.msk [vmem:[#allocation3 + $0xd8] sm:$0xff] %vm1230_vm2, %v8878_v13  ;;  %v16632_v7 = vpop.permute.xlu0 %10376  ;;  %v19447_v48 = vld [vmem:[#allocation56_spill] sm:$0xff] }
 0x350   : > { %v5185_v58 = vsel %vm2986_vm7, %v5153_v49, %v10294_v46  ;;  %v19439_v40 = vpack.i.bf16 %v19437_v43, %v19438_v12  ;;  %v5187_v6 = vsel %vm2986_vm7, %v5155_v9, %v10299_v41  ;;  %v5216_v31 = vsel %vm3019_vm8, %v5184_v16, %v10343_v28  ;;  %v16622_v46 = vpop.permute.xlu1 %10381  ;;  %v1416_v41 = vpop.f32.mrf.mxu1  ;;  %v19444_v55 = vld [vmem:[#allocation105_spill] sm:$0xff] }
 0x351   : > { %10656 = vrot.lane.b32.xlu0 %v19442_v63, %s11104_s19  ;;  %v5217_v1 = vsel %vm3019_vm8, %v5185_v58, %v10344_v33  ;;  %v16627_v10 = vsel %vm2920_vm5, %v19443_v30, %v10153_v18  ;;  %v10148_v25 = vunpack.i.l.bf16 %v19436_v54  ;;  %v5218_v27 = vsel %vm3019_vm8, %v5186_v22, %v10348_v36  ;;  %1469 = vst.msk [vmem:[#allocation3 + $0xc8] sm:$0xff] %vm1230_vm2, %v1416_v41 }
 0x352   : > { %10661 = vrot.lane.b32.xlu1 %v19439_v40, %s11097_s28  ;;  %v5219_v21 = vsel %vm3019_vm8, %v5187_v6, %v10349_v60  ;;  %v10224_v32 = vunpack.i.h.bf16 %v16013_v23  ;;  %v10223_v38 = vunpack.i.l.bf16 %v16013_v23  ;;  %v10229_v5 = vunpack.i.h.bf16 %v16081_v52  ;;  %v19448_v23 = vld [vmem:[#allocation72_spill] sm:$0xff] }
 0x353   : > { %v10228_v51 = vunpack.i.l.bf16 %v16081_v52  ;;  %v10304_v11 = vunpack.i.h.bf16 %v16382_v2  ;;  %v10303_v33 = vunpack.i.l.bf16 %v16382_v2  ;;  %v10354_v28 = vunpack.i.h.bf16 %v16522_v17  ;;  %v8881_v52 = vpop.f32.mrf.mxu1 }
 0x354   : > { %v19446_v50 = vpack.i.bf16 %v19444_v55, %v19445_v29  ;;  %v19449_v61 = vpack.i.bf16 %v19447_v48, %v19448_v23  ;;  %v5241_v62 = vpack.c.bf16 %v5217_v1, %v5216_v31  ;;  %v10353_v18 = vunpack.i.l.bf16 %v16522_v17  ;;  %v16653_v36 = vpop.permute.xlu1 %10391  ;;  %1474 = vst.msk [vmem:[#allocation3 + $0xf0] sm:$0xff] %vm1230_vm2, %v8881_v52  ;;  %v16663_v17 = vpop.permute.xlu0 %10386  ;;  %v19457_v1 = vld [vmem:[#allocation98_spill] sm:$0xff]  ;;  %v19459_v29 = vld [vmem:[#allocation79_spill] sm:$0xff] }
 0x355   : > { %v10359_v60 = vunpack.i.h.bf16 %v16561_v14  ;;  %v10358_v2 = vunpack.i.l.bf16 %v16561_v14  ;;  %v5242_v24 = vpack.c.bf16 %v5219_v21, %v5218_v27  ;;  %v5129_v26 = vsel %vm2920_vm5, %v19450_v20, %v10154_v8  ;;  %v1429_v14 = vpop.f32.mrf.mxu1  ;;  %v19462_v52 = vld [vmem:[#allocation86_spill] sm:$0xff] }
 0x356   : > { %10671 = vrot.lane.b32.xlu1 %v19446_v50, %s11098_s29  ;;  %10666 = vrot.lane.b32.xlu0 %v19449_v61, %s11098_s29  ;;  %v5126_v49 = vsel %vm2920_vm5, %v16031_v0, %v10148_v25  ;;  %v10369_v57 = vunpack.i.h.bf16 %v16591_v35  ;;  %v10368_v54 = vunpack.i.l.bf16 %v16591_v35  ;;  %v5127_v9 = vsel %vm2920_vm5, %v16035_v34, %v10149_v45  ;;  %1472 = vst.msk [vmem:[#allocation3 + $0xe0] sm:$0xff] %vm1230_vm2, %v1429_v14  ;;  %v19451_v35 = vld [vmem:[#allocation13_spill] sm:$0xff]  ;;  %v19452_v45 = vld [vmem:[#allocation14_spill] sm:$0xff] }
 0x357   : > { %8974 = vmatmul.mubr.msk.bf16.gmra.mxu0 %vm3093_vm9, %v5241_v62  ;;  %v5156_v16 = vsel %vm2953_vm6, %v16299_v53, %v10223_v38  ;;  %v5157_v8 = vsel %vm2953_vm6, %v16308_v15, %v10224_v32  ;;  %v5158_v0 = vsel %vm2953_vm6, %v5126_v49, %v10228_v51  ;;  %v10163_v58 = vunpack.i.l.bf16 %v19451_v35  ;;  %v19453_v53 = vld [vmem:[#allocation32_spill] sm:$0xff]  ;;  %v8882_v3 = vpop.f32.mrf.mxu1 }
 0x358   : > { %8977 = vmatprep.mubr.msk.bf16.mxu0 %vm3093_vm9, %v5242_v24  ;;  %v5159_v43 = vsel %vm2953_vm6, %v5127_v9, %v10229_v5  ;;  %v5188_v12 = vsel %vm2986_vm7, %v5156_v16, %v10303_v33  ;;  %v5189_v34 = vsel %vm2986_vm7, %v5157_v8, %v10304_v11  ;;  %v19454_v40 = vpack.i.bf16 %v19452_v45, %v19453_v53  ;;  %v19455_v15 = vld [vmem:[#allocation16_spill] sm:$0xff]  ;;  %v16690_v31 = vpop.permute.xlu1 %10401  ;;  %v16697_v21 = vpop.permute.xlu0 %10396  ;;  %v19464_v24 = vld [vmem:[#allocation109_spill] sm:$0xff]  ;;  %v19466_v8 = vld [vmem:[#allocation31_spill] sm:$0xff] }
 0x359   : > { %v19456_v44 = vpack.i.bf16 %v16003_v59, %v19455_v15  ;;  %v5220_v63 = vsel %vm3019_vm8, %v5188_v12, %v10353_v18  ;;  %v5221_v13 = vsel %vm3019_vm8, %v5189_v34, %v10354_v28  ;;  %v5190_v22 = vsel %vm2986_vm7, %v5158_v0, %v10358_v2  ;;  %1475 = vst.msk [vmem:[#allocation3 + $0xf8] sm:$0xff] %vm1230_vm2, %v8882_v3  ;;  %v1432_v41 = vpop.f32.mrf.mxu1  ;;  %v19465_v16 = vld [vmem:[#allocation40_spill] sm:$0xff] }
 0x35a   : > { %10681 = vrot.lane.b32.xlu1 %v19454_v40, %s11099_s30  ;;  %v5191_v6 = vsel %vm2986_vm7, %v5159_v43, %v10359_v60  ;;  %v10159_v30 = vunpack.i.h.bf16 %v19457_v1  ;;  %v10158_v25 = vunpack.i.l.bf16 %v19457_v1  ;;  %v5222_v59 = vsel %vm3019_vm8, %v5190_v22, %v10368_v54  ;;  %1473 = vst.msk [vmem:[#allocation3 + $0xe8] sm:$0xff] %vm1230_vm2, %v1432_v41  ;;  %v19471_v53 = vld [vmem:[#allocation96_spill] sm:$0xff]  ;;  %v19473_v1 = vld [vmem:[#allocation62_spill] sm:$0xff] }
 0x35b   : > { %10676 = vrot.lane.b32.xlu0 %v19456_v44, %s11099_s30  ;;  %v5223_v27 = vsel %vm3019_vm8, %v5191_v6, %v10369_v57  ;;  %v10234_v32 = vunpack.i.h.bf16 %v16061_v19  ;;  %v10233_v38 = vunpack.i.l.bf16 %v16061_v19  ;;  %v10239_v5 = vunpack.i.h.bf16 %v16123_v39  ;;  %v19460_v19 = vld [vmem:[#allocation83_spill] sm:$0xff] }
 0x35c   : > { %v10238_v51 = vunpack.i.l.bf16 %v16123_v39  ;;  %v10364_v11 = vunpack.i.h.bf16 %v16556_v47  ;;  %v10363_v33 = vunpack.i.l.bf16 %v16556_v47  ;;  %v10374_v28 = vunpack.i.h.bf16 %v16580_v4  ;;  %v16718_v47 = vpop.permute.xlu1 %10411 }
 0x35d   : > { %v19458_v55 = vpack.i.bf16 %v16019_v56, %v16017_v42  ;;  %v19461_v50 = vpack.i.bf16 %v19459_v29, %v19460_v19  ;;  %v5243_v48 = vpack.c.bf16 %v5221_v13, %v5220_v63  ;;  %v10373_v39 = vunpack.i.l.bf16 %v16580_v4  ;;  %v19463_v42 = vld [vmem:[#allocation108_spill] sm:$0xff]  ;;  %v16727_v4 = vpop.permute.xlu0 %10406  ;;  %v19472_v13 = vld [vmem:[#allocation87_spill] sm:$0xff] }
 0x35e   : > { %v10379_v23 = vunpack.i.h.bf16 %v16632_v7  ;;  %v10378_v61 = vunpack.i.l.bf16 %v16632_v7  ;;  %v5244_v62 = vpack.c.bf16 %v5223_v27, %v5222_v59  ;;  %v5132_v18 = vsel %vm2920_vm5, %v19462_v52, %v10163_v58 }
 0x35f   : > { %10691 = vrot.lane.b32.xlu1 %v19458_v55, %s11100_s7  ;;  %10686 = vrot.lane.b32.xlu0 %v19461_v50, %s11100_s7  ;;  %v5130_v56 = vsel %vm2920_vm5, %v19463_v42, %v10158_v25  ;;  %v10389_v60 = vunpack.i.h.bf16 %v16663_v17  ;;  %v10388_v2 = vunpack.i.l.bf16 %v16663_v17  ;;  %v5131_v7 = vsel %vm2920_vm5, %v19464_v24, %v10159_v30  ;;  %v19482_v42 = vld [vmem:[#allocation10_spill] sm:$0xff] }
 0x360   : > { %8978 = vmatmul.mubr.msk.bf16.gmra.mxu0 %vm3093_vm9, %v5243_v48  ;;  %v5160_v20 = vsel %vm2953_vm6, %v16627_v10, %v10233_v38  ;;  %v5161_v49 = vsel %vm2953_vm6, %v5129_v26, %v10234_v32  ;;  %v5162_v57 = vsel %vm2953_vm6, %v5130_v56, %v10238_v51  ;;  %v10164_v54 = vunpack.i.h.bf16 %v19451_v35  ;;  %v19468_v10 = vld [vmem:[#allocation107_spill] sm:$0xff]  ;;  %v16752_v45 = vpop.permute.xlu1 %10421  ;;  %v19474_v32 = vld [vmem:[#allocation81_spill] sm:$0xff]  ;;  %v19480_v48 = vld [vmem:[#allocation54_spill] sm:$0xff] }
 0x361   : > { %8981 = vmatprep.mubr.msk.bf16.mxu0 %vm3093_vm9, %v5244_v62  ;;  %v5163_v17 = vsel %vm2953_vm6, %v5131_v7, %v10239_v5  ;;  %v5192_v14 = vsel %vm2986_vm7, %v5160_v20, %v10363_v33  ;;  %v5193_v9 = vsel %vm2986_vm7, %v5161_v49, %v10364_v11  ;;  %v19467_v0 = vpack.i.bf16 %v19465_v16, %v19466_v8  ;;  %v19469_v26 = vld [vmem:[#allocation23_spill] sm:$0xff]  ;;  %v16758_v63 = vpop.permute.xlu0 %10416  ;;  %v19478_v11 = vld [vmem:[#allocation110_spill] sm:$0xff]  ;;  %v5897_v16 = vld [vmem:[#allocation2 + $0x698] sm:$0xff] }
 0x362   : > { %v19470_v58 = vpack.i.bf16 %v19468_v10, %v19469_v26  ;;  %v5224_v43 = vsel %vm3019_vm8, %v5192_v14, %v10373_v39  ;;  %v5225_v35 = vsel %vm3019_vm8, %v5193_v9, %v10374_v28  ;;  %v5194_v12 = vsel %vm2986_vm7, %v5162_v57, %v10378_v61  ;;  %v19475_v38 = vld [vmem:[#allocation75_spill] sm:$0xff]  ;;  %v19483_v24 = vld [vmem:[#allocation74_spill] sm:$0xff]  ;;  %v19484_v57 = vld [vmem:[#allocation112_spill] sm:$0xff] }
 0x363   : > { %10701 = vrot.lane.b32.xlu1 %v19467_v0, %s11101_s8  ;;  %v5195_v34 = vsel %vm2986_vm7, %v5163_v17, %v10379_v23  ;;  %v10169_v40 = vunpack.i.h.bf16 %v19471_v53  ;;  %v10168_v15 = vunpack.i.l.bf16 %v19471_v53  ;;  %v5226_v44 = vsel %vm3019_vm8, %v5194_v12, %v10388_v2  ;;  %v19477_v51 = vld [vmem:[#allocation111_spill] sm:$0xff]  ;;  %v19488_v14 = vld [vmem:[#allocation44_spill] sm:$0xff]  ;;  %v5898_v8 = vld [vmem:[#allocation2 + $0x6a0] sm:$0xff] }
 0x364   : > { %10696 = vrot.lane.b32.xlu0 %v19470_v58, %s11101_s8  ;;  %v5227_v3 = vsel %vm3019_vm8, %v5195_v34, %v10389_v60  ;;  %v10244_v22 = vunpack.i.h.bf16 %v19472_v13  ;;  %v10243_v6 = vunpack.i.l.bf16 %v19472_v13  ;;  %v10249_v30 = vunpack.i.h.bf16 %v19473_v1  ;;  %v19481_v23 = vld [vmem:[#allocation35_spill] sm:$0xff]  ;;  %v19490_v34 = vld [vmem:[#allocation17_spill] sm:$0xff] }
 0x365   : > { %v10248_v25 = vunpack.i.l.bf16 %v19473_v1  ;;  %v10384_v59 = vunpack.i.h.bf16 %v16622_v46  ;;  %v10383_v27 = vunpack.i.l.bf16 %v16622_v46  ;;  %v10394_v41 = vunpack.i.h.bf16 %v16653_v36  ;;  %v16778_v46 = vpop.permute.xlu1 %10431  ;;  %v6119_v12 = vld [vmem:[#allocation2 + $0x1042] sm:$0xff] }
 0x366   : > { %v19476_v5 = vpack.i.bf16 %v19474_v32, %v19475_v38  ;;  %v19479_v33 = vpack.i.bf16 %v19477_v51, %v19478_v11  ;;  %v5245_v28 = vpack.c.bf16 %v5225_v35, %v5224_v43  ;;  %v10393_v55 = vunpack.i.l.bf16 %v16653_v36  ;;  %v16787_v36 = vpop.permute.xlu0 %10426  ;;  %v6118_v35 = vld [vmem:[#allocation2 + $0x103a] sm:$0xff]  ;;  %v19494_v32 = vld [vmem:[#allocation115_spill] sm:$0xff] }
 0x367   : > { %v10399_v29 = vunpack.i.h.bf16 %v16697_v21  ;;  %v10398_v19 = vunpack.i.l.bf16 %v16697_v21  ;;  %v5246_v50 = vpack.c.bf16 %v5227_v3, %v5226_v44  ;;  %v5133_v39 = vsel %vm2920_vm5, %v19480_v48, %v10164_v54  ;;  %v19485_v54 = vld [vmem:[#allocation63_spill] sm:$0xff]  ;;  %v19493_v1 = vld [vmem:[#allocation114_spill] sm:$0xff] }
 0x368   : > { %10711 = vrot.lane.b32.xlu1 %v19476_v5, %s11102_s11  ;;  %10706 = vrot.lane.b32.xlu0 %v19479_v33, %s11102_s11  ;;  %v5134_v61 = vsel %vm2920_vm5, %v19481_v23, %v10168_v15  ;;  %v10409_v62 = vunpack.i.h.bf16 %v16727_v4  ;;  %v10408_v52 = vunpack.i.l.bf16 %v16727_v4  ;;  %v5135_v21 = vsel %vm2920_vm5, %v19482_v42, %v10169_v40  ;;  %v19495_v38 = vld [vmem:[#allocation11_spill] sm:$0xff]  ;;  %v19498_v11 = vld [vmem:[#allocation82_spill] sm:$0xff]  ;;  %v16841_v42 = vld [vmem:[#allocation2 + $0xb96] sm:$0xff] }
 0x369   : > { %8982 = vmatmul.mubr.msk.bf16.gmra.mxu0 %vm3093_vm9, %v5245_v28  ;;  %v5164_v56 = vsel %vm2953_vm6, %v5132_v18, %v10243_v6  ;;  %v5165_v60 = vsel %vm2953_vm6, %v5133_v39, %v10244_v22  ;;  %v5166_v2 = vsel %vm2953_vm6, %v5134_v61, %v10248_v25  ;;  %v10094_v7 = vunpack.i.h.bf16 %v19483_v24  ;;  %v19487_v18 = vld [vmem:[#allocation113_spill] sm:$0xff]  ;;  %v16811_v43 = vpop.permute.xlu1 %10441  ;;  %v19492_v22 = vld [vmem:[#allocation26_spill] sm:$0xff]  ;;  %v19497_v51 = vld [vmem:[#allocation43_spill] sm:$0xff] }
 0x36a   : > { %8985 = vmatprep.mubr.msk.bf16.mxu0 %vm3093_vm9, %v5246_v50  ;;  %v5167_v20 = vsel %vm2953_vm6, %v5135_v21, %v10249_v30  ;;  %v5196_v4 = vsel %vm2986_vm7, %v5164_v56, %v10383_v27  ;;  %v5197_v49 = vsel %vm2986_vm7, %v5165_v60, %v10384_v59  ;;  %v19486_v17 = vpack.i.bf16 %v19484_v57, %v19485_v54  ;;  %v16817_v3 = vpop.permute.xlu0 %10436  ;;  %v19500_v50 = vld [vmem:[#allocation101_spill] sm:$0xff]  ;;  %v16859_v57 = vld [vmem:[#allocation2 + $0xbb0] sm:$0xff]  ;;  %v16861_v54 = vld [vmem:[#allocation2 + $0xb60] sm:$0xff] }
 0x36b   : > { %v19489_v9 = vpack.i.bf16 %v19487_v18, %v19488_v14  ;;  %v5228_v0 = vsel %vm3019_vm8, %v5196_v4, %v10393_v55  ;;  %v5229_v10 = vsel %vm3019_vm8, %v5197_v49, %v10394_v41  ;;  %v5198_v26 = vsel %vm2986_vm7, %v5166_v2, %v10398_v19  ;;  %v5930_v19 = vld [vmem:[#allocation2 + $0x6b2] sm:$0xff]  ;;  %v16848_v2 = vld [vmem:[#allocation2 + $0xb9e] sm:$0xff]  ;;  %v16857_v49 = vld [vmem:[#allocation2 + $0xba8] sm:$0xff] }
 0x36c   : > { %10721 = vrot.lane.b32.xlu1 %v19486_v17, %s11103_s12  ;;  %v5199_v58 = vsel %vm2986_vm7, %v5167_v20, %v10399_v29  ;;  %v10174_v53 = vunpack.i.h.bf16 %v19490_v34  ;;  %v10173_v40 = vunpack.i.l.bf16 %v19490_v34  ;;  %v5230_v15 = vsel %vm3019_vm8, %v5198_v26, %v10408_v52  ;;  %v5929_v29 = vld [vmem:[#allocation2 + $0x6aa] sm:$0xff] }
 0x36d   : > { %10716 = vrot.lane.b32.xlu0 %v19489_v9, %s11103_s12  ;;  %v5231_v44 = vsel %vm3019_vm8, %v5199_v58, %v10409_v62  ;;  %v19491_v13 = vunpack.i.l.bf16 %v19483_v24  ;;  %v10254_v30 = vunpack.i.h.bf16 %v19493_v1  ;;  %v10253_v25 = vunpack.i.l.bf16 %v19493_v1  ;;  %v16839_v23 = vpop.permute.xlu1 %10451  ;;  %v5927_v62 = vld [vmem:[#allocation2 + $0x662] sm:$0xff]  ;;  %v5928_v52 = vld [vmem:[#allocation2 + $0x66a] sm:$0xff]  ;;  %v16877_v58 = vld [vmem:[#allocation2 + $0xb72] sm:$0xff] }
 0x36e   : > { %v10740_v59 = vpack.i.bf16 %v5898_v8, %v5897_v16  ;;  %v10404_v27 = vunpack.i.h.bf16 %v16690_v31  ;;  %v10403_v41 = vunpack.i.l.bf16 %v16690_v31  ;;  %v19496_v5 = vpack.i.bf16 %v19494_v32, %v19495_v38  ;;  %v16846_v60 = vpop.permute.xlu0 %10446  ;;  %v16850_v24 = vld [vmem:[#allocation2 + $0xb4e] sm:$0xff]  ;;  %v16869_v16 = vld [vmem:[#allocation2 + $0xbba] sm:$0xff]  ;;  %v16871_v8 = vld [vmem:[#allocation2 + $0xbc2] sm:$0xff] }
 0x36f   : > { %v5104_v6 = vsel %vm2887_vm4, %v19492_v22, %v19491_v13  ;;  %v19499_v33 = vpack.i.bf16 %v19497_v51, %v19498_v11  ;;  %v5247_v28 = vpack.c.bf16 %v5229_v10, %v5228_v0  ;;  %v10735_v55 = vpack.i.bf16 %v6119_v12, %v6118_v35  ;;  %v16867_v9 = vld [vmem:[#allocation2 + $0xb68] sm:$0xff]  ;;  %v5847_v11 = vld [vmem:[#allocation2 + $0x3fe] sm:$0xff] }
 0x370   : > { %10731 = vrot.lane.b32.xlu1 %v19496_v5, %s11097_s28  ;;  %v5105_v48 = vsel %vm2887_vm4, %v19500_v50, %v10094_v7  ;;  %v10414_v39 = vunpack.i.h.bf16 %v16718_v47  ;;  %v10413_v31 = vunpack.i.l.bf16 %v16718_v47  ;;  %v5248_v61 = vpack.c.bf16 %v5231_v44, %v5230_v15  ;;  %v16852_v47 = vld [vmem:[#allocation2 + $0xb56] sm:$0xff]  ;;  %v16890_v44 = vld [vmem:[#allocation2 + $0x10a6] sm:$0xff]  ;;  %v16892_v13 = vld [vmem:[#allocation2 + $0x10ae] sm:$0xff] }
 0x371   : > { %10726 = vrot.lane.b32.xlu0 %v19499_v33, %s11104_s19  ;;  %v5136_v21 = vsel %vm2920_vm5, %v5104_v6, %v10173_v40  ;;  %v5137_v56 = vsel %vm2920_vm5, %v5105_v48, %v10174_v53  ;;  %8986 = vmatmul.mubr.msk.bf16.gmra.mxu0 %vm3093_vm9, %v5247_v28  ;;  %v10750_v4 = vpack.i.bf16 %v5930_v19, %v5929_v29  ;;  %v16875_v26 = vpop.permute.xlu1 %10461  ;;  %v10424_v35 = vunpack.i.h.bf16 %v16752_v45  ;;  %v16888_v15 = vld [vmem:[#allocation2 + $0xb7a] sm:$0xff]  ;;  %v5850_v22 = vld [vmem:[#allocation2 + $0x44e] sm:$0xff]  ;;  %v5848_v32 = vld [vmem:[#allocation2 + $0x406] sm:$0xff] }
 0x372   : > { %v5168_v7 = vsel %vm2953_vm6, %v5136_v21, %v10253_v25  ;;  %v5169_v20 = vsel %vm2953_vm6, %v5137_v56, %v10254_v30  ;;  %8989 = vmatprep.mubr.msk.bf16.mxu0 %vm3093_vm9, %v5248_v61  ;;  %v10745_v14 = vpack.i.bf16 %v5928_v52, %v5927_v62  ;;  %v16880_v12 = vpop.permute.xlu0 %10456  ;;  %v10760_v34 = vpack.i.bf16 %v16848_v2, %v16841_v42 }
 0x373   : > { %v5200_v17 = vsel %vm2986_vm7, %v5168_v7, %v10403_v41  ;;  %v5201_v18 = vsel %vm2986_vm7, %v5169_v20, %v10404_v27  ;;  %v10755_v53 = vpack.i.bf16 %v16852_v47, %v16850_v24  ;;  %v10770_v40 = vpack.i.bf16 %v16859_v57, %v16857_v49  ;;  %v16902_v27 = vld [vmem:[#allocation2 + $0x1066] sm:$0xff] }
 0x374   : > { %10741 = vrot.lane.b32.xlu1 %v10740_v59, %s11097_s28  ;;  %v5232_v0 = vsel %vm3019_vm8, %v5200_v17, %v10413_v31  ;;  %v5233_v10 = vsel %vm3019_vm8, %v5201_v18, %v10414_v39  ;;  %v10423_v6 = vunpack.i.l.bf16 %v16752_v45  ;;  %v10419_v1 = vunpack.i.h.bf16 %v16758_v63  ;;  %v16900_v59 = vld [vmem:[#allocation2 + $0x105e] sm:$0xff]  ;;  %v5849_v41 = vld [vmem:[#allocation2 + $0x446] sm:$0xff] }
 0x375   : > { %10736 = vrot.lane.b32.xlu0 %v10735_v55, %s11104_s19  ;;  %v10765_v30 = vpack.i.bf16 %v16867_v9, %v16861_v54  ;;  %v10780_v25 = vpack.i.bf16 %v16871_v8, %v16869_v16  ;;  %v10418_v38 = vunpack.i.l.bf16 %v16758_v63  ;;  %v10434_v5 = vunpack.i.h.bf16 %v16778_v46  ;;  %v16911_v55 = vpop.permute.xlu1 %10471 }
 0x376   : > { %v10433_v45 = vunpack.i.l.bf16 %v16778_v46  ;;  %v5249_v51 = vpack.c.bf16 %v5233_v10, %v5232_v0  ;;  %v10429_v33 = vunpack.i.h.bf16 %v16787_v36  ;;  %v10428_v28 = vunpack.i.l.bf16 %v16787_v36  ;;  %v10467_v48 = vpop.permute.xlu0 %10466 }
 0x377   : > { %v10775_v29 = vpack.i.bf16 %v16888_v15, %v16877_v58  ;;  %v10790_v63 = vpack.i.bf16 %v16892_v13, %v16890_v44  ;;  %v7163_v46 = vsel %vm253_vm0, %v5850_v22, %v10424_v35  ;;  %v10444_v19 = vunpack.i.h.bf16 %v16811_v43 }
 0x378   : > { %10751 = vrot.lane.b32.xlu1 %v10750_v4, %s11098_s29  ;;  %v10443_v50 = vunpack.i.l.bf16 %v16811_v43  ;;  %v10785_v36 = vpack.i.bf16 %v16902_v27, %v16900_v59  ;;  %v7162_v39 = vsel %vm253_vm0, %v5849_v41, %v10423_v6  ;;  %v7161_v31 = vsel %vm253_vm0, %v5848_v32, %v10419_v1  ;;  %v6090_v32 = vld [vmem:[#allocation2 + $0x10b8] sm:$0xff]  ;;  %v8601_v59 = vld [vmem:[%s18129_s4 + $0x8] sm:$0xf] }
 0x379   : > { %10746 = vrot.lane.b32.xlu0 %v10745_v14, %s11098_s29  ;;  %8990 = vmatmul.mubr.msk.bf16.gmra.mxu0 %vm3093_vm9, %v5249_v51  ;;  %v10439_v61 = vunpack.i.h.bf16 %v16817_v3  ;;  %v10438_v62 = vunpack.i.l.bf16 %v16817_v3  ;;  %v7160_v52 = vsel %vm253_vm0, %v5847_v11, %v10418_v38  ;;  %v7194_v42 = vsel %vm1230_vm2, %v7162_v39, %v10433_v45  ;;  %v10482_v47 = vpop.permute.xlu1 %10481  ;;  %v6091_v38 = vld [vmem:[#allocation2 + $0x10c0] sm:$0xff] }
 0x37a   : > { %v7195_v43 = vsel %vm1230_vm2, %v7163_v46, %v10434_v5  ;;  %v7192_v21 = vsel %vm1230_vm2, %v7160_v52, %v10428_v28  ;;  %v7193_v56 = vsel %vm1230_vm2, %v7161_v31, %v10429_v33  ;;  %v10449_v2 = vunpack.i.h.bf16 %v16846_v60  ;;  %v10477_v49 = vpop.permute.xlu0 %10476  ;;  %9114 = vmatprep.subr.msk.bf16.mxu1 %vm1279_vm10, %v8601_v59 }
 0x37b   : > { %v10448_v24 = vunpack.i.l.bf16 %v16846_v60  ;;  %v7226_v3 = vsel %vm2854_vm3, %v7194_v42, %v10443_v50  ;;  %v7227_v7 = vsel %vm2854_vm3, %v7195_v43, %v10444_v19  ;;  %v10459_v20 = vunpack.i.h.bf16 %v16880_v12  ;;  %v6088_v19 = vld [vmem:[#allocation2 + $0x1070] sm:$0xff]  ;;  %v6089_v50 = vld [vmem:[#allocation2 + $0x1078] sm:$0xff] }
 0x37c   : > { %10761 = vrot.lane.b32.xlu1 %v10760_v34, %s11099_s30  ;;  %v10458_v4 = vunpack.i.l.bf16 %v16880_v12  ;;  %v7224_v57 = vsel %vm2854_vm3, %v7192_v21, %v10438_v62  ;;  %v7225_v54 = vsel %vm2854_vm3, %v7193_v56, %v10439_v61  ;;  %v10469_v17 = vunpack.i.h.bf16 %v10467_v48  ;;  %v5899_v21 = vld [vmem:[#allocation2 + $0x6e0] sm:$0xff] }
 0x37d   : > { %10756 = vrot.lane.b32.xlu0 %v10755_v53, %s11099_s30  ;;  %v10468_v18 = vunpack.i.l.bf16 %v10467_v48  ;;  %v10454_v14 = vunpack.i.h.bf16 %v16839_v23  ;;  %v10453_v60 = vunpack.i.l.bf16 %v16839_v23  ;;  %v10479_v9 = vunpack.i.h.bf16 %v10477_v49  ;;  %v16950_v34 = vpop.permute.xlu1 %10491 }
 0x37e   : > { %v10478_v0 = vunpack.i.l.bf16 %v10477_v49  ;;  %v7256_v10 = vsel %vm2887_vm4, %v7224_v57, %v10448_v24  ;;  %v7257_v58 = vsel %vm2887_vm4, %v7225_v54, %v10449_v2  ;;  %v10464_v35 = vunpack.i.h.bf16 %v16875_v26  ;;  %v10487_v22 = vpop.permute.xlu0 %10486  ;;  %v5902_v49 = vld [vmem:[#allocation2 + $0x730] sm:$0xff] }
 0x37f   : > { %v10463_v12 = vunpack.i.l.bf16 %v16875_v26  ;;  %v7288_v53 = vsel %vm2920_vm5, %v7256_v10, %v10458_v4  ;;  %v7289_v23 = vsel %vm2920_vm5, %v7257_v58, %v10459_v20  ;;  %v10474_v15 = vunpack.i.h.bf16 %v16911_v55  ;;  %v6122_v57 = vld [vmem:[#allocation2 + $0x10ca] sm:$0xff]  ;;  %v6123_v54 = vld [vmem:[#allocation2 + $0x10d2] sm:$0xff]  ;;  %v5932_v58 = vld [vmem:[#allocation2 + $0x6fa] sm:$0xff] }
 0x380   : > { %10771 = vrot.lane.b32.xlu1 %v10770_v40, %s11100_s7  ;;  %v10473_v40 = vunpack.i.l.bf16 %v16911_v55  ;;  %v7320_v6 = vsel %vm2953_vm6, %v7288_v53, %v10468_v18  ;;  %v7321_v1 = vsel %vm2953_vm6, %v7289_v23, %v10469_v17  ;;  %v10488_v41 = vunpack.i.l.bf16 %v10487_v22  ;;  %v5931_v10 = vld [vmem:[#allocation2 + $0x6f2] sm:$0xff]  ;;  %v5963_v23 = vld [vmem:[#allocation2 + $0xbde] sm:$0xff] }
 0x381   : > { %10766 = vrot.lane.b32.xlu0 %v10765_v30, %s11100_s7  ;;  %v10489_v30 = vunpack.i.h.bf16 %v10487_v22  ;;  %v10484_v26 = vunpack.i.h.bf16 %v10482_v47  ;;  %v10483_v5 = vunpack.i.l.bf16 %v10482_v47  ;;  %v7352_v45 = vsel %vm2986_vm7, %v7320_v6, %v10478_v0  ;;  %v16969_v46 = vpop.permute.xlu1 %10501  ;;  %v5900_v47 = vld [vmem:[#allocation2 + $0x6e8] sm:$0xff] }
 0x382   : > { %v7353_v51 = vsel %vm2986_vm7, %v7321_v1, %v10479_v9  ;;  %v7258_v11 = vsel %vm2887_vm4, %v7226_v3, %v10453_v60  ;;  %v7259_v33 = vsel %vm2887_vm4, %v7227_v7, %v10454_v14  ;;  %v7384_v28 = vsel %vm3019_vm8, %v7352_v45, %v10488_v41  ;;  %v10497_v16 = vpop.permute.xlu0 %10496  ;;  %v6120_v3 = vld [vmem:[#allocation2 + $0x1082] sm:$0xff]  ;;  %v6121_v7 = vld [vmem:[#allocation2 + $0x108a] sm:$0xff]  ;;  %v5933_v60 = vld [vmem:[#allocation2 + $0x73a] sm:$0xff] }
 0x383   : > { %v7385_v55 = vsel %vm3019_vm8, %v7353_v51, %v10489_v30  ;;  %v7290_v48 = vsel %vm2920_vm5, %v7258_v11, %v10463_v12  ;;  %v7291_v39 = vsel %vm2920_vm5, %v7259_v33, %v10464_v35  ;;  %v10499_v61 = vunpack.i.h.bf16 %v10497_v16  ;;  %v5934_v0 = vld [vmem:[#allocation2 + $0x742] sm:$0xff]  ;;  %v5966_v53 = vld [vmem:[#allocation2 + $0xc2e] sm:$0xff]  ;;  %v17018_v41 = vld [vmem:[#allocation2 + $0xbf8] sm:$0xff] }
 0x384   : > { %10781 = vrot.lane.b32.xlu1 %v10780_v25, %s11101_s8  ;;  %v7416_v8 = vpack.c.bf16 %v7385_v55, %v7384_v28  ;;  %v10800_v25 = vpack.i.bf16 %v6091_v38, %v6090_v32  ;;  %v7323_v31 = vsel %vm2953_vm6, %v7291_v39, %v10474_v15  ;;  %v10498_v62 = vunpack.i.l.bf16 %v10497_v16  ;;  %v5965_v12 = vld [vmem:[#allocation2 + $0xc26] sm:$0xff]  ;;  %v17016_v30 = vld [vmem:[#allocation2 + $0xbf0] sm:$0xff] }
 0x385   : > { %10776 = vrot.lane.b32.xlu0 %v10775_v29, %s11101_s8  ;;  %v7322_v29 = vsel %vm2953_vm6, %v7290_v48, %v10473_v40  ;;  %v7355_v42 = vsel %vm2986_vm7, %v7323_v31, %v10484_v26  ;;  %v10795_v43 = vpack.i.bf16 %v6089_v50, %v6088_v19  ;;  %v16988_v24 = vpop.permute.xlu1 %10511  ;;  %v10810_v27 = vpack.i.bf16 %v5900_v47, %v5899_v21  ;;  %v5964_v15 = vld [vmem:[#allocation2 + $0xbe6] sm:$0xff]  ;;  %v17010_v40 = vld [vmem:[#allocation2 + $0xc38] sm:$0xff] }
 0x386   : > { %v7354_v52 = vsel %vm2986_vm7, %v7322_v29, %v10483_v5  ;;  %v7387_v56 = vsel %vm3019_vm8, %v7355_v42, %v10499_v61  ;;  %9033 = vmatprep.mubr.msk.bf16.mxu0 %vm3093_vm9, %v7416_v8  ;;  %v16990_v13 = vpop.permute.xlu0 %10506  ;;  %v5619_v20 = vsel %vm1279_vm10, %v8601_v59, 0  ;;  %v10815_v14 = vpack.i.bf16 %v6123_v54, %v6122_v57  ;;  %v17014_v1 = vld [vmem:[#allocation2 + $0xc40] sm:$0xff]  ;;  %v17022_v38 = vld [vmem:[#allocation2 + $0xc4a] sm:$0xff]  ;;  %v17024_v26 = vld [vmem:[#allocation2 + $0xc52] sm:$0xff] }
 0x387   : > { %v7386_v2 = vsel %vm3019_vm8, %v7354_v52, %v10498_v62  ;;  %8994 = vmatpush3.bf16.msra.mxu1 %v5619_v20  ;;  %v10830_v22 = vpack.i.bf16 %v5934_v0, %v5933_v60  ;;  %v10825_v6 = vpack.i.bf16 %v5932_v58, %v5931_v10  ;;  %v17026_v5 = vld [vmem:[#allocation2 + $0xc02] sm:$0xff]  ;;  %v10494_v45 = vunpack.i.h.bf16 %v16950_v34  ;;  %v17031_v28 = vld [vmem:[#allocation2 + $0xc0a] sm:$0xff]  ;;  %v17033_v55 = vld [vmem:[#allocation2 + $0x1136] sm:$0xff] }
 0x388   : > { %10791 = vrot.lane.b32.xlu1 %v10790_v63, %s11102_s11  ;;  %v7417_v44 = vpack.c.bf16 %v7387_v56, %v7386_v2  ;;  %v10805_v63 = vpack.i.bf16 %v6121_v7, %v6120_v3  ;;  %v10840_v11 = vpack.i.bf16 %v5966_v53, %v5965_v12  ;;  %v10835_v33 = vpack.i.bf16 %v5964_v15, %v5963_v23  ;;  %v17035_v19 = vld [vmem:[#allocation2 + $0x113e] sm:$0xff]  ;;  %v5852_v50 = vld [vmem:[#allocation2 + $0x496] sm:$0xff] }
 0x389   : > { %10786 = vrot.lane.b32.xlu0 %v10785_v36, %s11102_s11  ;;  %v5901_v36 = vld [vmem:[#allocation2 + $0x728] sm:$0xff]  ;;  %v16999_v4 = vpop.permute.xlu1 %10521  ;;  %v10504_v48 = vunpack.i.h.bf16 %v16969_v46  ;;  %v10503_v39 = vunpack.i.l.bf16 %v16969_v46  ;;  %v10850_v16 = vpack.i.bf16 %v17014_v1, %v17010_v40  ;;  %v10845_v8 = vpack.i.bf16 %v17018_v41, %v17016_v30  ;;  %v17045_v29 = vld [vmem:[#allocation2 + $0x10f6] sm:$0xff]  ;;  %v5854_v62 = vld [vmem:[#allocation2 + $0x4de] sm:$0xff] }
 0x38a   : > { %9034 = vmatmul.mubr.msk.bf16.vlgmr.msra.gmra.mxu0 %vm3093_vm9, %v7417_v44  ;;  %v17002_v17 = vpop.permute.xlu0 %10516  ;;  %v10820_v18 = vpack.i.bf16 %v5902_v49, %v5901_v36  ;;  %v10493_v31 = vunpack.i.l.bf16 %v16950_v34  ;;  %v5853_v61 = vld [vmem:[#allocation2 + $0x4d6] sm:$0xff]  ;;  %v10514_v52 = vunpack.i.h.bf16 %v16988_v24  ;;  %v10513_v42 = vunpack.i.l.bf16 %v16988_v24 }
 0x38b   : > { %v10860_v46 = vpack.i.bf16 %v17024_v26, %v17022_v38  ;;  %v10509_v21 = vunpack.i.h.bf16 %v16990_v13  ;;  %v10508_v56 = vunpack.i.l.bf16 %v16990_v13  ;;  %v10855_v34 = vpack.i.bf16 %v17031_v28, %v17026_v5 }
 0x38c   : > { %10801 = vrot.lane.b32.xlu1 %v10800_v25, %s11103_s12  ;;  %v17043_v25 = vld [vmem:[#allocation2 + $0x10ee] sm:$0xff]  ;;  %v10870_v24 = vpack.i.bf16 %v17035_v19, %v17033_v55  ;;  %v7165_v47 = vsel %vm253_vm0, %v5852_v50, %v10494_v45  ;;  %v10524_v3 = vunpack.i.h.bf16 %v16999_v4  ;;  %v10523_v7 = vunpack.i.l.bf16 %v16999_v4 }
 0x38d   : > { %10796 = vrot.lane.b32.xlu0 %v10795_v43, %s11103_s12  ;;  %v17006_v9 = vpop.permute.xlu1 %10531  ;;  %v5851_v43 = vld [vmem:[#allocation2 + $0x48e] sm:$0xff]  ;;  %v10865_v59 = vpack.i.bf16 %v17045_v29, %v17043_v25  ;;  %v7167_v13 = vsel %vm253_vm0, %v5854_v62, %v10504_v48  ;;  %v10518_v36 = vunpack.i.l.bf16 %v17002_v17  ;;  %v7197_v4 = vsel %vm1230_vm2, %v7165_v47, %v10509_v21 }
 0x38e   : > { %v17008_v35 = vpop.permute.xlu0 %10526  ;;  %v7164_v20 = vsel %vm253_vm0, %v5851_v43, %v10493_v31  ;;  %v7199_v57 = vsel %vm1230_vm2, %v7167_v13, %v10514_v52  ;;  %v6093_v47 = vld [vmem:[#allocation2 + $0x1108] sm:$0xff] }
 0x38f   : > { %v7196_v54 = vsel %vm1230_vm2, %v7164_v20, %v10508_v56  ;;  %v7231_v0 = vsel %vm2854_vm3, %v7199_v57, %v10524_v3 }
 0x390   : > { %10811 = vrot.lane.b32.xlu1 %v10810_v27, %s11097_s28  ;;  %v7166_v27 = vsel %vm253_vm0, %v5853_v61, %v10503_v39  ;;  %v7228_v53 = vsel %vm2854_vm3, %v7196_v54, %v10518_v36 }
 0x391   : > { %10806 = vrot.lane.b32.xlu0 %v10805_v63, %s11104_s19  ;;  %v17020_v32 = vpop.permute.xlu1 %10541  ;;  %v10519_v63 = vunpack.i.h.bf16 %v17002_v17  ;;  %v7198_v49 = vsel %vm1230_vm2, %v7166_v27, %v10513_v42 }
 0x392   : > { %v17029_v51 = vpop.permute.xlu0 %10536  ;;  %v7230_v17 = vsel %vm2854_vm3, %v7198_v49, %v10523_v7  ;;  %v10544_v38 = vunpack.i.h.bf16 %v17020_v32  ;;  %v10543_v26 = vunpack.i.l.bf16 %v17020_v32 }
 0x393   : > { %v10539_v10 = vunpack.i.h.bf16 %v17029_v51  ;;  %v10538_v58 = vunpack.i.l.bf16 %v17029_v51  ;;  %v7229_v23 = vsel %vm2854_vm3, %v7197_v4, %v10519_v63  ;;  %v5903_v4 = vld [vmem:[#allocation2 + $0x770] sm:$0xff] }
 0x394   : > { %10821 = vrot.lane.b32.xlu1 %v10820_v18, %s11097_s28  ;;  %v10529_v18 = vunpack.i.h.bf16 %v17008_v35 }
 0x395   : > { %10816 = vrot.lane.b32.xlu0 %v10815_v14, %s11104_s19  ;;  %v17056_v2 = vpop.permute.xlu1 %10551  ;;  %v10528_v14 = vunpack.i.l.bf16 %v17008_v35  ;;  %v10533_v35 = vunpack.i.l.bf16 %v17006_v9 }
 0x396   : > { %v10547_v44 = vpop.permute.xlu0 %10546  ;;  %v7261_v41 = vsel %vm2887_vm4, %v7229_v23, %v10529_v18  ;;  %v10554_v51 = vunpack.i.h.bf16 %v17056_v2 }
 0x397   : > { %v10549_v15 = vunpack.i.h.bf16 %v10547_v44  ;;  %v10548_v40 = vunpack.i.l.bf16 %v10547_v44  ;;  %v7260_v30 = vsel %vm2887_vm4, %v7228_v53, %v10528_v14  ;;  %v7262_v52 = vsel %vm2887_vm4, %v7230_v17, %v10533_v35  ;;  %v6124_v17 = vld [vmem:[#allocation2 + $0x1112] sm:$0xff] }
 0x398   : > { %10831 = vrot.lane.b32.xlu1 %v10830_v22, %s11098_s29  ;;  %v10534_v22 = vunpack.i.h.bf16 %v17006_v9  ;;  %v7292_v45 = vsel %vm2920_vm5, %v7260_v30, %v10538_v58  ;;  %v7293_v9 = vsel %vm2920_vm5, %v7261_v41, %v10539_v10  ;;  %v7294_v3 = vsel %vm2920_vm5, %v7262_v52, %v10543_v26  ;;  %v5906_v10 = vld [vmem:[#allocation2 + $0x7c0] sm:$0xff]  ;;  %v5969_v30 = vld [vmem:[#allocation2 + $0xcb6] sm:$0xff]  ;;  %v5967_v26 = vld [vmem:[#allocation2 + $0xc6e] sm:$0xff] }
 0x399   : > { %10826 = vrot.lane.b32.xlu0 %v10825_v6, %s11098_s29  ;;  %v10562_v60 = vpop.permute.xlu1 %10561  ;;  %v7324_v28 = vsel %vm2953_vm6, %v7292_v45, %v10548_v40  ;;  %v7325_v50 = vsel %vm2953_vm6, %v7293_v9, %v10549_v15  ;;  %v6126_v58 = vld [vmem:[#allocation2 + $0x115a] sm:$0xff]  ;;  %v5937_v40 = vld [vmem:[#allocation2 + $0x7ca] sm:$0xff] }
 0x39a   : > { %v10557_v12 = vpop.permute.xlu0 %10556  ;;  %v10564_v32 = vunpack.i.h.bf16 %v10562_v60  ;;  %v10563_v31 = vunpack.i.l.bf16 %v10562_v60  ;;  %v7263_v42 = vsel %vm2887_vm4, %v7231_v0, %v10534_v22  ;;  %v5904_v60 = vld [vmem:[#allocation2 + $0x778] sm:$0xff]  ;;  %v17146_v9 = vld [vmem:[#allocation2 + $0xcc8] sm:$0xff] }
 0x39b   : > { %v10559_v6 = vunpack.i.h.bf16 %v10557_v12  ;;  %v10558_v1 = vunpack.i.l.bf16 %v10557_v12  ;;  %v7295_v7 = vsel %vm2920_vm5, %v7263_v42, %v10544_v38  ;;  %v6125_v0 = vld [vmem:[#allocation2 + $0x111a] sm:$0xff]  ;;  %v10890_v25 = vpack.i.bf16 %v5904_v60, %v5903_v4  ;;  %v6127_v12 = vld [vmem:[#allocation2 + $0x1162] sm:$0xff]  ;;  %v5938_v22 = vld [vmem:[#allocation2 + $0x7d2] sm:$0xff] }
 0x39c   : > { %10841 = vrot.lane.b32.xlu1 %v10840_v11, %s11099_s30  ;;  %v10553_v11 = vunpack.i.l.bf16 %v17056_v2  ;;  %v6092_v2 = vld [vmem:[#allocation2 + $0x1100] sm:$0xff]  ;;  %v7327_v27 = vsel %vm2953_vm6, %v7295_v7, %v10554_v51  ;;  %v10885_v29 = vpack.i.bf16 %v6125_v0, %v6124_v17  ;;  %v10895_v15 = vpack.i.bf16 %v6127_v12, %v6126_v58  ;;  %v5968_v45 = vld [vmem:[#allocation2 + $0xc76] sm:$0xff] }
 0x39d   : > { %10836 = vrot.lane.b32.xlu0 %v10835_v33, %s11099_s30  ;;  %v17094_v5 = vpop.permute.xlu1 %10571  ;;  %v7356_v61 = vsel %vm2986_vm7, %v7324_v28, %v10558_v1  ;;  %v7357_v62 = vsel %vm2986_vm7, %v7325_v50, %v10559_v6  ;;  %v7359_v49 = vsel %vm2986_vm7, %v7327_v27, %v10564_v32  ;;  %v10875_v57 = vpack.i.bf16 %v6093_v47, %v6092_v2  ;;  %v5935_v6 = vld [vmem:[#allocation2 + $0x782] sm:$0xff]  ;;  %v5936_v1 = vld [vmem:[#allocation2 + $0x78a] sm:$0xff]  ;;  %v17164_v32 = vld [vmem:[#allocation2 + $0xc9a] sm:$0xff] }
 0x39e   : > { %v10567_v33 = vpop.permute.xlu0 %10566  ;;  %v5970_v38 = vld [vmem:[#allocation2 + $0xcbe] sm:$0xff]  ;;  %v17148_v51 = vld [vmem:[#allocation2 + $0xcd0] sm:$0xff]  ;;  %v10905_v28 = vpack.i.bf16 %v5936_v1, %v5935_v6  ;;  %v17154_v50 = vld [vmem:[#allocation2 + $0xc88] sm:$0xff]  ;;  %v10915_v42 = vpack.i.bf16 %v5968_v45, %v5967_v26 }
 0x39f   : > { %v10569_v48 = vunpack.i.h.bf16 %v10567_v33  ;;  %v10568_v39 = vunpack.i.l.bf16 %v10567_v33  ;;  %v10910_v33 = vpack.i.bf16 %v5938_v22, %v5937_v40  ;;  %v10920_v52 = vpack.i.bf16 %v5970_v38, %v5969_v30  ;;  %v17175_v2 = vld [vmem:[#allocation2 + $0x117e] sm:$0xff]  ;;  %v17177_v47 = vld [vmem:[#allocation2 + $0x1186] sm:$0xff] }
 0x3a0   : > { %10851 = vrot.lane.b32.xlu1 %v10850_v16, %s11100_s7  ;;  %v6094_v16 = vld [vmem:[#allocation2 + $0x1148] sm:$0xff]  ;;  %v17187_v27 = vld [vmem:[#allocation2 + $0x11e0] sm:$0xff] }
 0x3a1   : > { %10846 = vrot.lane.b32.xlu0 %v10845_v8, %s11100_s7  ;;  %v6095_v8 = vld [vmem:[#allocation2 + $0x1150] sm:$0xff]  ;;  %v7388_v43 = vsel %vm3019_vm8, %v7356_v61, %v10568_v39  ;;  %v7389_v21 = vsel %vm3019_vm8, %v7357_v62, %v10569_v48  ;;  %v17110_v56 = vpop.permute.xlu1 %10581  ;;  %v17156_v48 = vld [vmem:[#allocation2 + $0xcda] sm:$0xff]  ;;  %v17158_v39 = vld [vmem:[#allocation2 + $0xce2] sm:$0xff]  ;;  %v10574_v61 = vunpack.i.h.bf16 %v17094_v5 }
 0x3a2   : > { %v7418_v44 = vpack.c.bf16 %v7389_v21, %v7388_v43  ;;  %v10880_v13 = vpack.i.bf16 %v6095_v8, %v6094_v16  ;;  %v17162_v8 = vld [vmem:[#allocation2 + $0xc92] sm:$0xff]  ;;  %v10930_v43 = vpack.i.bf16 %v17148_v51, %v17146_v9  ;;  %v10584_v7 = vunpack.i.h.bf16 %v17110_v56  ;;  %v5855_v4 = vld [vmem:[#allocation2 + $0x51e] sm:$0xff] }
 0x3a3   : > { %v17173_v21 = vld [vmem:[#allocation2 + $0x11ce] sm:$0xff] }
 0x3a4   : > { %10861 = vrot.lane.b32.xlu1 %v10860_v46, %s11101_s8  ;;  %v10577_v46 = vpop.permute.xlu0 %10576  ;;  %9037 = vmatprep.mubr.msk.bf16.mxu0 %vm3093_vm9, %v7418_v44  ;;  %v10583_v44 = vunpack.i.l.bf16 %v17110_v56  ;;  %v10935_v56 = vpack.i.bf16 %v17164_v32, %v17162_v8 }
 0x3a5   : > { %10856 = vrot.lane.b32.xlu0 %v10855_v34, %s11101_s8  ;;  %v7326_v34 = vsel %vm2953_vm6, %v7294_v3, %v10553_v11  ;;  %v10579_v63 = vunpack.i.h.bf16 %v10577_v46  ;;  %v10578_v36 = vunpack.i.l.bf16 %v10577_v46  ;;  %v17129_v14 = vpop.permute.xlu1 %10591  ;;  %v17150_v11 = vld [vmem:[#allocation2 + $0xc80] sm:$0xff] }
 0x3a6   : > { %v7358_v20 = vsel %vm2986_vm7, %v7326_v34, %v10563_v31  ;;  %v17166_v31 = vld [vmem:[#allocation2 + $0x11c6] sm:$0xff]  ;;  %v10925_v46 = vpack.i.bf16 %v17154_v50, %v17150_v11  ;;  %v17185_v34 = vld [vmem:[#allocation2 + $0x11d8] sm:$0xff] }
 0x3a7   : > { %v7391_v54 = vsel %vm3019_vm8, %v7359_v49, %v10579_v63  ;;  %v7390_v18 = vsel %vm3019_vm8, %v7358_v20, %v10578_v36  ;;  %v5856_v3 = vld [vmem:[#allocation2 + $0x526] sm:$0xff]  ;;  %v10573_v63 = vunpack.i.l.bf16 %v17094_v5  ;;  %v5858_v20 = vld [vmem:[#allocation2 + $0x56e] sm:$0xff]  ;;  %v10594_v49 = vunpack.i.h.bf16 %v17129_v14 }
 0x3a8   : > { %10871 = vrot.lane.b32.xlu1 %v10870_v24, %s11102_s11  ;;  %v7419_v55 = vpack.c.bf16 %v7391_v54, %v7390_v18  ;;  %v17131_v19 = vpop.permute.xlu0 %10586  ;;  %v5905_v24 = vld [vmem:[#allocation2 + $0x7b8] sm:$0xff]  ;;  %v5857_v36 = vld [vmem:[#allocation2 + $0x566] sm:$0xff]  ;;  %v10950_v5 = vpack.i.bf16 %v17173_v21, %v17166_v31  ;;  %v7169_v17 = vsel %vm253_vm0, %v5856_v3, %v10574_v61 }
 0x3a9   : > { %10866 = vrot.lane.b32.xlu0 %v10865_v59, %s11102_s11  ;;  %v17136_v59 = vpop.permute.xlu1 %10601  ;;  %v10900_v23 = vpack.i.bf16 %v5906_v10, %v5905_v24  ;;  %v10589_v54 = vunpack.i.h.bf16 %v17131_v19  ;;  %v10588_v18 = vunpack.i.l.bf16 %v17131_v19  ;;  %v7171_v19 = vsel %vm253_vm0, %v5858_v20, %v10584_v7 }
 0x3aa   : > { %9038 = vmatmul.mubr.msk.bf16.gmra.mxu0 %vm3093_vm9, %v7419_v55  ;;  %v10604_v0 = vunpack.i.h.bf16 %v17136_v59  ;;  %v10603_v55 = vunpack.i.l.bf16 %v17136_v59  ;;  %v7170_v24 = vsel %vm253_vm0, %v5857_v36, %v10583_v44  ;;  %v7168_v12 = vsel %vm253_vm0, %v5855_v4, %v10573_v63 }
 0x3ab   : > { %v7201_v59 = vsel %vm1230_vm2, %v7169_v17, %v10589_v54  ;;  %v7200_v40 = vsel %vm1230_vm2, %v7168_v12, %v10588_v18 }
 0x3ac   : > { %10881 = vrot.lane.b32.xlu1 %v10880_v13, %s11103_s12  ;;  %v17138_v53 = vpop.permute.xlu0 %10596  ;;  %v10940_v13 = vpack.i.bf16 %v17158_v39, %v17156_v48 }
 0x3ad   : > { %10876 = vrot.lane.b32.xlu0 %v10875_v57, %s11103_s12  ;;  %v17142_v35 = vpop.permute.xlu1 %10611  ;;  %v10593_v57 = vunpack.i.l.bf16 %v17129_v14  ;;  %v10945_v14 = vpack.i.bf16 %v17177_v47, %v17175_v2  ;;  %v10599_v10 = vunpack.i.h.bf16 %v17138_v53  ;;  %v10598_v58 = vunpack.i.l.bf16 %v17138_v53  ;;  %v5909_v47 = vld [vmem:[#allocation2 + $0x848] sm:$0xff] }
 0x3af   : > { %v7232_v9 = vsel %vm2854_vm3, %v7200_v40, %v10598_v58  ;;  %v7233_v51 = vsel %vm2854_vm3, %v7201_v59, %v10599_v10 }
 0x3b0   : > { %10891 = vrot.lane.b32.xlu1 %v10890_v25, %s11097_s28  ;;  %v17144_v41 = vpop.permute.xlu0 %10606 }
 0x3b1   : > { %10886 = vrot.lane.b32.xlu0 %v10885_v29, %s11104_s19  ;;  %v17160_v16 = vpop.permute.xlu1 %10621  ;;  %v10960_v29 = vpack.i.bf16 %v17187_v27, %v17185_v34  ;;  %v10609_v22 = vunpack.i.h.bf16 %v17144_v41  ;;  %v10608_v6 = vunpack.i.l.bf16 %v17144_v41  ;;  %v10613_v41 = vunpack.i.l.bf16 %v17142_v35  ;;  %v17292_v34 = vld [vmem:[#allocation2 + $0xd46] sm:$0xff]  ;;  %v17294_v27 = vld [vmem:[#allocation2 + $0xd4e] sm:$0xff] }
 0x3b3   : > { %v7264_v32 = vsel %vm2887_vm4, %v7232_v9, %v10608_v6  ;;  %v7265_v61 = vsel %vm2887_vm4, %v7233_v51, %v10609_v22  ;;  %v5907_v22 = vld [vmem:[#allocation2 + $0x800] sm:$0xff]  ;;  %v6131_v9 = vld [vmem:[#allocation2 + $0x11f2] sm:$0xff] }
 0x3b4   : > { %10901 = vrot.lane.b32.xlu1 %v10900_v23, %s11097_s28  ;;  %v17169_v62 = vpop.permute.xlu0 %10616  ;;  %v7202_v23 = vsel %vm1230_vm2, %v7170_v24, %v10593_v57 }
 0x3b5   : > { %10896 = vrot.lane.b32.xlu0 %v10895_v15, %s11104_s19  ;;  %v17198_v60 = vpop.permute.xlu1 %10631  ;;  %v7203_v15 = vsel %vm1230_vm2, %v7171_v19, %v10594_v49  ;;  %v7234_v53 = vsel %vm2854_vm3, %v7202_v23, %v10603_v55  ;;  %v10619_v30 = vunpack.i.h.bf16 %v17169_v62  ;;  %v10618_v38 = vunpack.i.l.bf16 %v17169_v62  ;;  %v6097_v55 = vld [vmem:[#allocation2 + $0x1198] sm:$0xff] }
 0x3b6   : > { %v7235_v1 = vsel %vm2854_vm3, %v7203_v15, %v10604_v0  ;;  %v10624_v62 = vunpack.i.h.bf16 %v17160_v16  ;;  %v10633_v7 = vunpack.i.l.bf16 %v17198_v60  ;;  %v7266_v54 = vsel %vm2887_vm4, %v7234_v53, %v10613_v41  ;;  %v6096_v0 = vld [vmem:[#allocation2 + $0x1190] sm:$0xff] }
 0x3b7   : > { %v7297_v3 = vsel %vm2920_vm5, %v7265_v61, %v10619_v30  ;;  %v10955_v40 = vpack.i.bf16 %v6097_v55, %v6096_v0  ;;  %v6128_v30 = vld [vmem:[#allocation2 + $0x11a2] sm:$0xff]  ;;  %v5939_v41 = vld [vmem:[#allocation2 + $0x812] sm:$0xff]  ;;  %v11000_v55 = vpack.i.bf16 %v17294_v27, %v17292_v34 }
 0x3b8   : > { %10911 = vrot.lane.b32.xlu1 %v10910_v33, %s11098_s29  ;;  %v10627_v25 = vpop.permute.xlu0 %10626  ;;  %v17300_v61 = vld [vmem:[#allocation2 + $0xd06] sm:$0xff] }
 0x3b9   : > { %10906 = vrot.lane.b32.xlu0 %v10905_v28, %s11098_s29  ;;  %v10629_v11 = vunpack.i.h.bf16 %v10627_v25  ;;  %v10628_v33 = vunpack.i.l.bf16 %v10627_v25  ;;  %v10614_v28 = vunpack.i.h.bf16 %v17142_v35  ;;  %v10634_v35 = vunpack.i.h.bf16 %v17198_v60  ;;  %v8099_v25 = vld [vmem:[%s18128_s3] sm:$0x3] }
 0x3ba   : > { %v10642_v26 = vpop.permute.xlu1 %10641  ;;  %v8100_v24 = vunpack.c.l.bf16 %v8099_v25  ;;  %v3356_v27 = vld [vmem:[#allocation3 + $0x10] sm:$0xff] }
 0x3bb   : > { %v7329_v63 = vsel %vm2953_vm6, %v7297_v3, %v10629_v11  ;;  %v10644_v49 = vunpack.i.h.bf16 %v10642_v26  ;;  %v10643_v57 = vunpack.i.l.bf16 %v10642_v26  ;;  %v7267_v18 = vsel %vm2887_vm4, %v7235_v1, %v10614_v28  ;;  %v5908_v1 = vld [vmem:[#allocation2 + $0x808] sm:$0xff]  ;;  %v17308_v3 = vld [vmem:[#allocation2 + $0xd18] sm:$0xff] }
 0x3bc   : > { %10921 = vrot.lane.b32.xlu1 %v10920_v52, %s11099_s30  ;;  %v10637_v45 = vpop.permute.xlu0 %10636  ;;  %v10623_v52 = vunpack.i.l.bf16 %v17160_v16  ;;  %v7299_v48 = vsel %vm2920_vm5, %v7267_v18, %v10624_v62  ;;  %9100 = vmatpush3.msk.msra.mxu0 %vm1279_vm10, %v8100_v24  ;;  %v10970_v21 = vpack.i.bf16 %v5908_v1, %v5907_v22  ;;  %v5942_v28 = vld [vmem:[#allocation2 + $0x862] sm:$0xff]  ;;  %v17302_v62 = vld [vmem:[#allocation2 + $0xd58] sm:$0xff] }
 0x3bd   : > { %10916 = vrot.lane.b32.xlu0 %v10915_v42, %s11099_s30  ;;  %v10639_v50 = vunpack.i.h.bf16 %v10637_v45  ;;  %v10638_v8 = vunpack.i.l.bf16 %v10637_v45  ;;  %v7296_v42 = vsel %vm2920_vm5, %v7264_v32, %v10618_v38  ;;  %v7331_v58 = vsel %vm2953_vm6, %v7299_v48, %v10634_v35  ;;  %v6129_v38 = vld [vmem:[#allocation2 + $0x11aa] sm:$0xff]  ;;  %v17298_v32 = vld [vmem:[#allocation2 + $0xcfe] sm:$0xff] }
 0x3be   : > { %v17240_v44 = vpop.permute.xlu1 %10651  ;;  %v7298_v19 = vsel %vm2920_vm5, %v7266_v54, %v10623_v52  ;;  %v7363_v59 = vsel %vm2986_vm7, %v7331_v58, %v10644_v49  ;;  %v10965_v2 = vpack.i.bf16 %v6129_v38, %v6128_v30  ;;  %v17304_v52 = vld [vmem:[#allocation2 + $0xd60] sm:$0xff]  ;;  %v17327_v54 = vld [vmem:[#allocation2 + $0x1256] sm:$0xff]  ;;  %v10995_v25 = vpack.i.bf16 %v17300_v61, %v17298_v32  ;;  %v17344_v48 = vld [vmem:[#allocation2 + $0x120e] sm:$0xff] }
 0x3bf   : > { %v7361_v4 = vsel %vm2986_vm7, %v7329_v63, %v10639_v50  ;;  %v7330_v10 = vsel %vm2953_vm6, %v7298_v19, %v10633_v7  ;;  %v5940_v50 = vld [vmem:[#allocation2 + $0x81a] sm:$0xff]  ;;  %v17318_v63 = vld [vmem:[#allocation2 + $0xd22] sm:$0xff]  ;;  %v11010_v19 = vpack.i.bf16 %v17304_v52, %v17302_v62  ;;  %v10654_v24 = vunpack.i.h.bf16 %v17240_v44 }
 0x3c0   : > { %10931 = vrot.lane.b32.xlu1 %v10930_v43, %s11100_s7  ;;  %v10647_v43 = vpop.permute.xlu0 %10646  ;;  %v7362_v15 = vsel %vm2986_vm7, %v7330_v10, %v10643_v57  ;;  %v17329_v18 = vld [vmem:[#allocation2 + $0x125e] sm:$0xff]  ;;  %v10653_v22 = vunpack.i.l.bf16 %v17240_v44 }
 0x3c1   : > { %10926 = vrot.lane.b32.xlu0 %v10925_v46, %s11100_s7  ;;  %v7328_v46 = vsel %vm2953_vm6, %v7296_v42, %v10628_v33  ;;  %v10649_v36 = vunpack.i.h.bf16 %v10647_v43  ;;  %v10648_v20 = vunpack.i.l.bf16 %v10647_v43  ;;  %v5941_v33 = vld [vmem:[#allocation2 + $0x85a] sm:$0xff]  ;;  %v17306_v42 = vld [vmem:[#allocation2 + $0xd10] sm:$0xff] }
 0x3c2   : > { %v7360_v16 = vsel %vm2986_vm7, %v7328_v46, %v10638_v8  ;;  %v17314_v43 = vld [vmem:[#allocation2 + $0xd6a] sm:$0xff]  ;;  %v17316_v46 = vld [vmem:[#allocation2 + $0xd72] sm:$0xff]  ;;  %v10990_v57 = vpack.i.bf16 %v5942_v28, %v5941_v33  ;;  %v11005_v58 = vpack.i.bf16 %v17308_v3, %v17306_v42 }
 0x3c3   : > { %v7392_v60 = vsel %vm3019_vm8, %v7360_v16, %v10648_v20  ;;  %v7393_v17 = vsel %vm3019_vm8, %v7361_v4, %v10649_v36  ;;  %v19501_v36 = vld [vmem:[#allocation4_spill] sm:$0xff]  ;;  %v10985_v16 = vpack.i.bf16 %v5940_v50, %v5939_v41 }
 0x3c4   : > { %10941 = vrot.lane.b32.xlu1 %v10940_v13, %s11101_s8  ;;  %v7420_v39 = vpack.c.bf16 %v7393_v17, %v7392_v60  ;;  %v17260_v13 = vpop.permute.xlu1 %10661  ;;  %v19502_v20 = vunpack.c.h.bf16 %v19501_v36  ;;  %v17325_v4 = vld [vmem:[#allocation2 + $0xd2a] sm:$0xff]  ;;  %v19503_v60 = vld [vmem:[#allocation6_spill] sm:$0xff] }
 0x3c5   : > { %10936 = vrot.lane.b32.xlu0 %v10935_v56, %s11101_s8  ;;  %v10657_v56 = vpop.permute.xlu0 %10656  ;;  %v19504_v17 = vunpack.c.l.bf16 %v19503_v60  ;;  %v10663_v10 = vunpack.i.l.bf16 %v17260_v13 }
 0x3c6   : > { %v10659_v12 = vunpack.i.h.bf16 %v10657_v56  ;;  %v10658_v23 = vunpack.i.l.bf16 %v10657_v56  ;;  %9041 = vmatprep.mubr.msk.bf16.mxu0 %vm3093_vm9, %v7420_v39  ;;  %v17323_v49 = vsel %vm253_vm0, %v19502_v20, 0.0  ;;  %v17346_v39 = vld [vmem:[#allocation2 + $0x1216] sm:$0xff]  ;;  %v17348_v56 = vld [vmem:[#allocation2 + $0x1268] sm:$0xff] }
 0x3c7   : > { %v17334_v0 = vsel %vm253_vm0, %v19504_v17, 0.0  ;;  %v11025_v33 = vpack.i.bf16 %v17346_v39, %v17344_v48 }
 0x3c8   : > { %10951 = vrot.lane.b32.xlu1 %v10950_v5, %s11102_s11  ;;  %v7395_v6 = vsel %vm3019_vm8, %v7363_v59, %v10659_v12  ;;  %v7394_v53 = vsel %vm3019_vm8, %v7362_v15, %v10658_v23  ;;  %v17277_v45 = vpop.permute.xlu1 %10671  ;;  %v5910_v5 = vld [vmem:[#allocation2 + $0x850] sm:$0xff]  ;;  %v11020_v12 = vpack.i.bf16 %v17316_v46, %v17314_v43  ;;  %v17358_v15 = vld [vmem:[#allocation2 + $0x1220] sm:$0xff]  ;;  %v17360_v59 = vld [vmem:[#allocation2 + $0x1228] sm:$0xff] }
 0x3c9   : > { %10946 = vrot.lane.b32.xlu0 %v10945_v14, %s11102_s11  ;;  %v7421_v26 = vpack.c.bf16 %v7395_v6, %v7394_v53  ;;  %v17279_v31 = vpop.permute.xlu0 %10666  ;;  %v6130_v14 = vld [vmem:[#allocation2 + $0x11ea] sm:$0xff]  ;;  %v5861_v6 = vld [vmem:[#allocation2 + $0x5f6] sm:$0xff]  ;;  %v10664_v53 = vunpack.i.h.bf16 %v17260_v13  ;;  %v10673_v1 = vunpack.i.l.bf16 %v17277_v45  ;;  %v10674_v44 = vunpack.i.h.bf16 %v17277_v45 }
 0x3ca   : > { %v10975_v8 = vpack.i.bf16 %v6131_v9, %v6130_v14  ;;  %v17356_v23 = vld [vmem:[#allocation2 + $0x1270] sm:$0xff]  ;;  %v10669_v13 = vunpack.i.h.bf16 %v17279_v31  ;;  %v11030_v14 = vpack.i.bf16 %v17329_v18, %v17327_v54  ;;  %v7174_v41 = vsel %vm253_vm0, %v5861_v6, %v10663_v10 }
 0x3cb   : > { %9042 = vmatmul.mubr.msk.bf16.gmra.mxu0 %vm3093_vm9, %v7421_v26  ;;  %v11015_v26 = vpack.i.bf16 %v17325_v4, %v17318_v63  ;;  %v11040_v45 = vpack.i.bf16 %v17356_v23, %v17348_v56  ;;  %v7206_v32 = vsel %vm1230_vm2, %v7174_v41, %v10673_v1  ;;  %v3354_v10 = vld [vmem:[#allocation3] sm:$0xff]  ;;  %v3363_v23 = vld [vmem:[#allocation3 + $0x48] sm:$0xff] }
 0x3cc   : > { %10961 = vrot.lane.b32.xlu1 %v10960_v29, %s11103_s12  ;;  %v17288_v51 = vpop.permute.xlu1 %10681  ;;  %v10980_v29 = vpack.i.bf16 %v5910_v5, %v5909_v47  ;;  %v5862_v47 = vld [vmem:[#allocation2 + $0x5fe] sm:$0xff]  ;;  %v10668_v5 = vunpack.i.l.bf16 %v17279_v31  ;;  %v11035_v31 = vpack.i.bf16 %v17360_v59, %v17358_v15 }
 0x3cd   : > { %10956 = vrot.lane.b32.xlu0 %v10955_v40, %s11103_s12  ;;  %v17290_v11 = vpop.permute.xlu0 %10676  ;;  %v5860_v40 = vld [vmem:[#allocation2 + $0x5b6] sm:$0xff]  ;;  %v10683_v9 = vunpack.i.l.bf16 %v17288_v51  ;;  %v10684_v50 = vunpack.i.h.bf16 %v17288_v51  ;;  %v3368_v59 = vld [vmem:[#allocation3 + $0x70] sm:$0xff] }
 0x3ce   : > { %v7173_v28 = vsel %vm253_vm0, %v5860_v40, %v10654_v24  ;;  %v10678_v34 = vunpack.i.l.bf16 %v17290_v11  ;;  %v10679_v61 = vunpack.i.h.bf16 %v17290_v11  ;;  %v19505_v11 = vld [vmem:[#allocation9_spill] sm:$0xff] }
 0x3cf   : > { %v7238_v40 = vsel %vm2854_vm3, %v7206_v32, %v10683_v9 }
 0x3d0   : > { %10971 = vrot.lane.b32.xlu1 %v10970_v21, %s11097_s28  ;;  %v17374_v21 = vld [vmem:[%s18129_s4 + $0xc] sm:$0xf]  ;;  %v8925_v24 = vpop.f32.mrf.mxu1 }
 0x3d1   : > { %10966 = vrot.lane.b32.xlu0 %v10965_v2, %s11104_s19  ;;  %v17310_v35 = vpop.permute.xlu1 %10691  ;;  %v17312_v7 = vpop.permute.xlu0 %10686  ;;  %v5859_v2 = vld [vmem:[#allocation2 + $0x5ae] sm:$0xff]  ;;  %9116 = vmatprep.subr.msk.bf16.mxu1 %vm1279_vm10, %v17374_v21  ;;  %v3602_v6 = vadd.f32 %v8925_v24, %v3356_v27 }
 0x3d2   : > { %v10688_v17 = vunpack.i.l.bf16 %v17312_v7  ;;  %v10694_v41 = vunpack.i.h.bf16 %v17310_v35 }
 0x3d3   : > { %3634 = vst.msk [vmem:[#allocation3 + $0x10] sm:$0xff] %vm1230_vm2, %v3602_v6 }
 0x3d4   : > { %10981 = vrot.lane.b32.xlu1 %v10980_v29, %s11097_s28  ;;  %v7172_v29 = vsel %vm253_vm0, %v5859_v2, %v10653_v22  ;;  %v10689_v22 = vunpack.i.h.bf16 %v17312_v7 }
 0x3d5   : > { %10976 = vrot.lane.b32.xlu0 %v10975_v8, %s11104_s19  ;;  %v17365_v30 = vpop.permute.xlu1 %10701  ;;  %v7175_v8 = vsel %vm253_vm0, %v5862_v47, %v10664_v53  ;;  %v7204_v51 = vsel %vm1230_vm2, %v7172_v29, %v10668_v5  ;;  %v8074_v53 = vadd.f32 %v17323_v49, %v19505_v11  ;;  %v3357_v5 = vld [vmem:[#allocation3 + $0x18] sm:$0xff]  ;;  %v3355_v29 = vld [vmem:[#allocation3 + $0x8] sm:$0xff]  ;;  %v3358_v11 = vld [vmem:[#allocation3 + $0x20] sm:$0xff] }
 0x3d6   : > { %v17367_v38 = vpop.permute.xlu0 %10696  ;;  %v7236_v2 = vsel %vm2854_vm3, %v7204_v51, %v10678_v34 }
 0x3d7   : > { %v10699_v47 = vunpack.i.h.bf16 %v17367_v38  ;;  %v17421_v49 = vadd.f32 %v17334_v0, %v8074_v53  ;;  %v10703_v0 = vunpack.i.l.bf16 %v17365_v30 }
 0x3d8   : > { %10991 = vrot.lane.b32.xlu1 %v10990_v57, %s11098_s29  ;;  %v7207_v57 = vsel %vm1230_vm2, %v7175_v8, %v10674_v44  ;;  %v10698_v44 = vunpack.i.l.bf16 %v17367_v38  ;;  %v7268_v38 = vsel %vm2887_vm4, %v7236_v2, %v10688_v17  ;;  %v3360_v17 = vld [vmem:[#allocation3 + $0x30] sm:$0xff] }
 0x3d9   : > { %10986 = vrot.lane.b32.xlu0 %v10985_v16, %s11098_s29  ;;  %v7205_v16 = vsel %vm1230_vm2, %v7173_v28, %v10669_v13  ;;  %v7239_v1 = vsel %vm2854_vm3, %v7207_v57, %v10684_v50  ;;  %v3473_v13 = vpop.f32.mrf.mxu1  ;;  %v10693_v50 = vunpack.i.l.bf16 %v17310_v35  ;;  %v10704_v35 = vunpack.i.h.bf16 %v17365_v30 }
 0x3da   : > { %v17400_v36 = vpop.permute.xlu1 %10711  ;;  %v10707_v20 = vpop.permute.xlu0 %10706  ;;  %v7237_v7 = vsel %vm2854_vm3, %v7205_v16, %v10679_v61 }
 0x3db   : > { %v10708_v9 = vunpack.i.l.bf16 %v10707_v20  ;;  %v10709_v34 = vunpack.i.h.bf16 %v10707_v20  ;;  %v8926_v27 = vpop.f32.mrf.mxu1  ;;  %v7269_v8 = vsel %vm2887_vm4, %v7237_v7, %v10689_v22  ;;  %v7300_v20 = vsel %vm2920_vm5, %v7268_v38, %v10698_v44 }
 0x3dc   : > { %11001 = vrot.lane.b32.xlu1 %v11000_v55, %s11099_s30  ;;  %v3600_v55 = vadd.f32 %v3473_v13, %v3354_v10  ;;  %v3603_v57 = vadd.f32 %v8926_v27, %v3357_v5  ;;  %v7301_v16 = vsel %vm2920_vm5, %v7269_v8, %v10699_v47  ;;  %v10714_v24 = vunpack.i.h.bf16 %v17400_v36  ;;  %v6134_v8 = vld [vmem:[#allocation2 + $0x127a] sm:$0xff] }
 0x3dd   : > { %10996 = vrot.lane.b32.xlu0 %v10995_v25, %s11099_s30  ;;  %v3476_v51 = vpop.f32.mrf.mxu1  ;;  %v10713_v62 = vunpack.i.l.bf16 %v17400_v36  ;;  %v7332_v52 = vsel %vm2953_vm6, %v7300_v20, %v10708_v9  ;;  %v7270_v44 = vsel %vm2887_vm4, %v7238_v40, %v10693_v50  ;;  %v7271_v13 = vsel %vm2887_vm4, %v7239_v1, %v10694_v41  ;;  %v3359_v50 = vld [vmem:[#allocation3 + $0x28] sm:$0xff] }
 0x3de   : > { %v17418_v25 = vpop.permute.xlu1 %10721  ;;  %3632 = vst.msk [vmem:[#allocation3] sm:$0xff] %vm1230_vm2, %v3600_v55  ;;  %3635 = vst.msk [vmem:[#allocation3 + $0x18] sm:$0xff] %vm1230_vm2, %v3603_v57  ;;  %v3601_v42 = vadd.f32 %v3476_v51, %v3355_v29  ;;  %v3361_v55 = vld [vmem:[#allocation3 + $0x38] sm:$0xff]  ;;  %v7303_v43 = vsel %vm2920_vm5, %v7271_v13, %v10704_v35  ;;  %v3364_v29 = vld [vmem:[#allocation3 + $0x50] sm:$0xff] }
 0x3df   : > { %v10717_v28 = vpop.permute.xlu0 %10716  ;;  %v10724_v30 = vunpack.i.h.bf16 %v17418_v25  ;;  %v8929_v6 = vpop.f32.mrf.mxu1  ;;  %v10723_v53 = vunpack.i.l.bf16 %v17418_v25  ;;  %v7302_v25 = vsel %vm2920_vm5, %v7270_v44, %v10703_v0  ;;  %v7335_v40 = vsel %vm2953_vm6, %v7303_v43, %v10714_v24  ;;  %v6135_v35 = vld [vmem:[#allocation2 + $0x1282] sm:$0xff]  ;;  %v6132_v0 = vld [vmem:[#allocation2 + $0x1232] sm:$0xff]  ;;  %v6133_v20 = vld [vmem:[#allocation2 + $0x123a] sm:$0xff] }
 0x3e0   : > { %v10719_v32 = vunpack.i.h.bf16 %v10717_v28  ;;  %v10718_v61 = vunpack.i.l.bf16 %v10717_v28  ;;  %11011 = vrot.lane.b32.xlu1 %v11010_v19, %s11100_s7  ;;  %3633 = vst.msk [vmem:[#allocation3 + $0x8] sm:$0xff] %vm1230_vm2, %v3601_v42  ;;  %v3606_v47 = vadd.f32 %v8929_v6, %v3360_v17  ;;  %v11050_v51 = vpack.i.bf16 %v6135_v35, %v6134_v8  ;;  %v5864_v44 = vld [vmem:[#allocation2 + $0x646] sm:$0xff]  ;;  %v5866_v43 = vld [vmem:[#allocation2 + $0x68e] sm:$0xff] }
 0x3e1   : > { %11006 = vrot.lane.b32.xlu0 %v11005_v58, %s11100_s7  ;;  %v7333_v58 = vsel %vm2953_vm6, %v7301_v16, %v10709_v34  ;;  %v3489_v9 = vpop.f32.mrf.mxu1  ;;  %v7367_v34 = vsel %vm2986_vm7, %v7335_v40, %v10724_v30  ;;  %v11045_v17 = vpack.i.bf16 %v6133_v20, %v6132_v0 }
 0x3e2   : > { %v17444_v3 = vpop.permute.xlu1 %10731  ;;  %v7364_v36 = vsel %vm2986_vm7, %v7332_v52, %v10718_v61  ;;  %v7365_v2 = vsel %vm2986_vm7, %v7333_v58, %v10719_v32  ;;  %3638 = vst.msk [vmem:[#allocation3 + $0x30] sm:$0xff] %vm1230_vm2, %v3606_v47  ;;  %v5863_v47 = vld [vmem:[#allocation2 + $0x63e] sm:$0xff] }
 0x3e3   : > { %v10727_v19 = vpop.permute.xlu0 %10726  ;;  %v8930_v41 = vpop.f32.mrf.mxu1 }
 0x3e4   : > { %v10729_v10 = vunpack.i.h.bf16 %v10727_v19  ;;  %v10728_v22 = vunpack.i.l.bf16 %v10727_v19  ;;  %11021 = vrot.lane.b32.xlu1 %v11020_v12, %s11101_s8  ;;  %v3604_v12 = vadd.f32 %v3489_v9, %v3358_v11  ;;  %v3607_v27 = vadd.f32 %v8930_v41, %v3361_v55 }
 0x3e5   : > { %11016 = vrot.lane.b32.xlu0 %v11015_v26, %s11101_s8  ;;  %v7334_v26 = vsel %vm2953_vm6, %v7302_v25, %v10713_v62  ;;  %v3492_v57 = vpop.f32.mrf.mxu1  ;;  %v3365_v62 = vld [vmem:[#allocation3 + $0x58] sm:$0xff]  ;;  %v10734_v11 = vunpack.i.h.bf16 %v17444_v3 }
 0x3e6   : > { %v7396_v5 = vsel %vm3019_vm8, %v7364_v36, %v10728_v22  ;;  %v7397_v7 = vsel %vm3019_vm8, %v7365_v2, %v10729_v10  ;;  %v17467_v63 = vpop.permute.xlu1 %10741  ;;  %v7366_v38 = vsel %vm2986_vm7, %v7334_v26, %v10723_v53  ;;  %3636 = vst.msk [vmem:[#allocation3 + $0x20] sm:$0xff] %vm1230_vm2, %v3604_v12  ;;  %3639 = vst.msk [vmem:[#allocation3 + $0x38] sm:$0xff] %vm1230_vm2, %v3607_v27  ;;  %v3366_v22 = vld [vmem:[#allocation3 + $0x60] sm:$0xff]  ;;  %v10733_v53 = vunpack.i.l.bf16 %v17444_v3  ;;  %v3369_v2 = vld [vmem:[#allocation3 + $0x78] sm:$0xff] }
 0x3e7   : > { %v7422_v46 = vpack.c.bf16 %v7397_v7, %v7396_v5  ;;  %v10737_v4 = vpop.permute.xlu0 %10736  ;;  %v3605_v54 = vadd.f32 %v3492_v57, %v3359_v50  ;;  %v8933_v39 = vpop.f32.mrf.mxu1  ;;  %v10744_v13 = vunpack.i.h.bf16 %v17467_v63  ;;  %v10743_v5 = vunpack.i.l.bf16 %v17467_v63  ;;  %v5865_v25 = vld [vmem:[#allocation2 + $0x686] sm:$0xff]  ;;  %v3367_v26 = vld [vmem:[#allocation3 + $0x68] sm:$0xff] }
 0x3e8   : > { %v10739_v1 = vunpack.i.h.bf16 %v10737_v4  ;;  %v10738_v28 = vunpack.i.l.bf16 %v10737_v4  ;;  %11031 = vrot.lane.b32.xlu1 %v11030_v14, %s11102_s11  ;;  %v3362_v14 = vld [vmem:[#allocation3 + $0x40] sm:$0xff]  ;;  %v7177_v41 = vsel %vm253_vm0, %v5864_v44, %v10734_v11  ;;  %v7176_v50 = vsel %vm253_vm0, %v5863_v47, %v10733_v53  ;;  %v3371_v11 = vld [vmem:[#allocation3 + $0x88] sm:$0xff] }
 0x3e9   : > { %11026 = vrot.lane.b32.xlu0 %v11025_v33, %s11102_s11  ;;  %9045 = vmatprep.mubr.msk.bf16.mxu0 %vm3093_vm9, %v7422_v46  ;;  %3637 = vst.msk [vmem:[#allocation3 + $0x28] sm:$0xff] %vm1230_vm2, %v3605_v54  ;;  %v3610_v33 = vadd.f32 %v8933_v39, %v3364_v29  ;;  %v3505_v24 = vpop.f32.mrf.mxu1  ;;  %v3372_v29 = vld [vmem:[#allocation3 + $0x90] sm:$0xff]  ;;  %v7179_v8 = vsel %vm253_vm0, %v5866_v43, %v10744_v13 }
 0x3ea   : > { %v7399_v32 = vsel %vm3019_vm8, %v7367_v34, %v10739_v1  ;;  %v7398_v61 = vsel %vm3019_vm8, %v7366_v38, %v10738_v28  ;;  %v17486_v18 = vpop.permute.xlu1 %10751  ;;  %v3608_v52 = vadd.f32 %v3505_v24, %v3362_v14  ;;  %v19506_v1 = vunpack.c.h.bf16 %v19503_v60 }
 0x3eb   : > { %v7423_v16 = vpack.c.bf16 %v7399_v32, %v7398_v61  ;;  %v17488_v48 = vpop.permute.xlu0 %10746  ;;  %3642 = vst.msk [vmem:[#allocation3 + $0x50] sm:$0xff] %vm1230_vm2, %v3610_v33  ;;  %v8934_v56 = vpop.f32.mrf.mxu1  ;;  %v10754_v46 = vunpack.i.h.bf16 %v17486_v18  ;;  %v10753_v3 = vunpack.i.l.bf16 %v17486_v18  ;;  %v7178_v32 = vsel %vm253_vm0, %v5865_v25, %v10743_v5  ;;  %v3376_v25 = vld [vmem:[#allocation3 + $0xb0] sm:$0xff] }
 0x3ec   : > { %11041 = vrot.lane.b32.xlu1 %v11040_v45, %s11103_s12  ;;  %3640 = vst.msk [vmem:[#allocation3 + $0x40] sm:$0xff] %vm1230_vm2, %v3608_v52  ;;  %v3611_v45 = vadd.f32 %v8934_v56, %v3365_v62  ;;  %v10749_v12 = vunpack.i.h.bf16 %v17488_v48  ;;  %v10748_v40 = vunpack.i.l.bf16 %v17488_v48  ;;  %v17531_v28 = vsel %vm253_vm0, %v19506_v1, 0.0  ;;  %v3370_v48 = vld [vmem:[#allocation3 + $0x80] sm:$0xff] }
 0x3ed   : > { %11036 = vrot.lane.b32.xlu0 %v11035_v31, %s11103_s12  ;;  %9046 = vmatmul.mubr.msk.bf16.gmra.mxu0 %vm3093_vm9, %v7423_v16  ;;  %v3508_v15 = vpop.f32.mrf.mxu1  ;;  %v7210_v0 = vsel %vm1230_vm2, %v7178_v32, %v10753_v3  ;;  %v7211_v20 = vsel %vm1230_vm2, %v7179_v8, %v10754_v46 }
 0x3ee   : > { %v17501_v42 = vpop.permute.xlu1 %10761  ;;  %3643 = vst.msk [vmem:[#allocation3 + $0x58] sm:$0xff] %vm1230_vm2, %v3611_v45  ;;  %v3609_v31 = vadd.f32 %v3508_v15, %v3363_v23  ;;  %v7209_v16 = vsel %vm1230_vm2, %v7177_v41, %v10749_v12  ;;  %v7208_v39 = vsel %vm1230_vm2, %v7176_v50, %v10748_v40 }
 0x3ef   : > { %v17503_v19 = vpop.permute.xlu0 %10756  ;;  %v8937_v10 = vpop.f32.mrf.mxu1  ;;  %v10764_v38 = vunpack.i.h.bf16 %v17501_v42  ;;  %v10763_v34 = vunpack.i.l.bf16 %v17501_v42 }
 0x3f0   : > { %11051 = vrot.lane.b32.xlu1 %v11050_v51, %s11104_s19  ;;  %3641 = vst.msk [vmem:[#allocation3 + $0x48] sm:$0xff] %vm1230_vm2, %v3609_v31  ;;  %v3614_v6 = vadd.f32 %v8937_v10, %v3368_v59  ;;  %v10758_v61 = vunpack.i.l.bf16 %v17503_v19  ;;  %v10759_v54 = vunpack.i.h.bf16 %v17503_v19  ;;  %v3373_v19 = vld [vmem:[#allocation3 + $0x98] sm:$0xff] }
 0x3f1   : > { %11046 = vrot.lane.b32.xlu0 %v11045_v17, %s11104_s19  ;;  %v3521_v36 = vpop.f32.mrf.mxu1  ;;  %v7242_v17 = vsel %vm2854_vm3, %v7210_v0, %v10763_v34  ;;  %v7243_v24 = vsel %vm2854_vm3, %v7211_v20, %v10764_v38  ;;  %v3374_v38 = vld [vmem:[#allocation3 + $0xa0] sm:$0xff]  ;;  %v17588_v0 = vld [vmem:[%s18130_s5 + $0x2] ss:$0 sm:$0xff] }
 0x3f2   : > { %v17509_v58 = vpop.permute.xlu1 %10771  ;;  %3646 = vst.msk [vmem:[#allocation3 + $0x70] sm:$0xff] %vm1230_vm2, %v3614_v6  ;;  %v3612_v7 = vadd.f32 %v3521_v36, %v3366_v22  ;;  %v7240_v56 = vsel %vm2854_vm3, %v7208_v39, %v10758_v61 }
 0x3f3   : > { %v17511_v30 = vpop.permute.xlu0 %10766  ;;  %v8938_v4 = vpop.f32.mrf.mxu1  ;;  %v10774_v14 = vunpack.i.h.bf16 %v17509_v58  ;;  %v10773_v33 = vunpack.i.l.bf16 %v17509_v58  ;;  %v7241_v58 = vsel %vm2854_vm3, %v7209_v16, %v10759_v54  ;;  %v3377_v16 = vld [vmem:[#allocation3 + $0xb8] sm:$0xff] }
 0x3f4   : > { %3644 = vst.msk [vmem:[#allocation3 + $0x60] sm:$0xff] %vm1230_vm2, %v3612_v7  ;;  %v3615_v63 = vadd.f32 %v8938_v4, %v3369_v2  ;;  %v10769_v62 = vunpack.i.h.bf16 %v17511_v30  ;;  %v10768_v52 = vunpack.i.l.bf16 %v17511_v30 }
 0x3f5   : > { %v3524_v27 = vpop.f32.mrf.mxu1  ;;  %v7274_v53 = vsel %vm2887_vm4, %v7242_v17, %v10773_v33  ;;  %v7275_v36 = vsel %vm2887_vm4, %v7243_v24, %v10774_v14 }
 0x3f6   : > { %v17519_v9 = vpop.permute.xlu1 %10781  ;;  %3647 = vst.msk [vmem:[#allocation3 + $0x78] sm:$0xff] %vm1230_vm2, %v3615_v63  ;;  %v3613_v60 = vadd.f32 %v3524_v27, %v3367_v26  ;;  %v7272_v44 = vsel %vm2887_vm4, %v7240_v56, %v10768_v52  ;;  %v7273_v13 = vsel %vm2887_vm4, %v7241_v58, %v10769_v62 }
 0x3f7   : > { %v17521_v55 = vpop.permute.xlu0 %10776  ;;  %v8941_v18 = vpop.f32.mrf.mxu1  ;;  %v10783_v23 = vunpack.i.l.bf16 %v17519_v9  ;;  %v10784_v10 = vunpack.i.h.bf16 %v17519_v9 }
 0x3f8   : > { %3645 = vst.msk [vmem:[#allocation3 + $0x68] sm:$0xff] %vm1230_vm2, %v3613_v60  ;;  %v3618_v51 = vadd.f32 %v8941_v18, %v3372_v29  ;;  %v10778_v45 = vunpack.i.l.bf16 %v17521_v55  ;;  %v10779_v30 = vunpack.i.h.bf16 %v17521_v55 }
 0x3f9   : > { %v3537_v42 = vpop.f32.mrf.mxu1  ;;  %v7306_v55 = vsel %vm2920_vm5, %v7274_v53, %v10783_v23  ;;  %v7307_v26 = vsel %vm2920_vm5, %v7275_v36, %v10784_v10 }
 0x3fa   : > { %v17541_v57 = vpop.permute.xlu1 %10791  ;;  %3650 = vst.msk [vmem:[#allocation3 + $0x90] sm:$0xff] %vm1230_vm2, %v3618_v51  ;;  %v3616_v15 = vadd.f32 %v3537_v42, %v3370_v48  ;;  %v7304_v43 = vsel %vm2920_vm5, %v7272_v44, %v10778_v45  ;;  %v8963_v12 = vpop.f32.mrf.mxu0  ;;  %v7305_v40 = vsel %vm2920_vm5, %v7273_v13, %v10779_v30  ;;  %v3380_v44 = vld [vmem:[#allocation3 + $0xd0] sm:$0xff] }
 0x3fb   : > { %v10787_v35 = vpop.permute.xlu0 %10786  ;;  %v8942_v6 = vpop.f32.mrf.mxu1  ;;  %v10793_v46 = vunpack.i.l.bf16 %v17541_v57  ;;  %v10794_v63 = vunpack.i.h.bf16 %v17541_v57  ;;  %v5370_v56 = vadd.f32 %v8963_v12, %v17588_v0 }
 0x3fc   : > { %v10788_v22 = vunpack.i.l.bf16 %v10787_v35  ;;  %v10789_v2 = vunpack.i.h.bf16 %v10787_v35  ;;  %3648 = vst.msk [vmem:[#allocation3 + $0x80] sm:$0xff] %vm1230_vm2, %v3616_v15  ;;  %v3619_v47 = vadd.f32 %v8942_v6, %v3373_v19  ;;  %v5361_v32 = vpop.f32.mrf.mxu0  ;;  %v3375_v19 = vld [vmem:[#allocation3 + $0xa8] sm:$0xff] }
 0x3fd   : > { %v3540_v9 = vpop.f32.mrf.mxu1  ;;  %v7338_v54 = vsel %vm2953_vm6, %v7306_v55, %v10793_v46  ;;  %v7339_v51 = vsel %vm2953_vm6, %v7307_v26, %v10794_v63  ;;  %v5362_v24 = vadd.f32 %v17588_v0, %v5361_v32  ;;  %v19507_v55 = vld [vmem:[#allocation5_spill] sm:$0xff]  ;;  %v3381_v63 = vld [vmem:[#allocation3 + $0xd8] sm:$0xff] }
 0x3fe   : > { %v17559_v59 = vpop.permute.xlu1 %10801  ;;  %3651 = vst.msk [vmem:[#allocation3 + $0x98] sm:$0xff] %vm1230_vm2, %v3619_v47  ;;  %v3617_v3 = vadd.f32 %v3540_v9, %v3371_v11  ;;  %v7336_v1 = vsel %vm2953_vm6, %v7304_v43, %v10788_v22  ;;  %v7337_v34 = vsel %vm2953_vm6, %v7305_v40, %v10789_v2  ;;  %v8964_v14 = vpop.f32.mrf.mxu0  ;;  %v8078_v22 = vadd.f32 %v17531_v28, %v17421_v49 }
 0x3ff   : > { %v10797_v31 = vpop.permute.xlu0 %10796  ;;  %v8945_v50 = vpop.f32.mrf.mxu1  ;;  %v10804_v61 = vunpack.i.h.bf16 %v17559_v59  ;;  %v10803_v60 = vunpack.i.l.bf16 %v17559_v59  ;;  %v5373_v62 = vadd.f32 %v8964_v14, %v17588_v0  ;;  %v5488_v13 = vmax.f32 %v5362_v24, 0.0  ;;  %v3384_v24 = vld [vmem:[#allocation3 + $0xf0] sm:$0xff] }
 0x400   : > { %v10799_v5 = vunpack.i.h.bf16 %v10797_v31  ;;  %v10798_v7 = vunpack.i.l.bf16 %v10797_v31  ;;  %3649 = vst.msk [vmem:[#allocation3 + $0x88] sm:$0xff] %vm1230_vm2, %v3617_v3  ;;  %v3622_v8 = vadd.f32 %v8945_v50, %v3376_v25  ;;  %v5364_v59 = vpop.f32.mrf.mxu0  ;;  %v19508_v49 = vunpack.c.l.bf16 %v19507_v55  ;;  %v3378_v3 = vld [vmem:[#allocation3 + $0xc0] sm:$0xff] }
 0x401   : > { %v3553_v20 = vpop.f32.mrf.mxu1  ;;  %v7370_v31 = vsel %vm2986_vm7, %v7338_v54, %v10803_v60  ;;  %v7371_v58 = vsel %vm2986_vm7, %v7339_v51, %v10804_v61  ;;  %v5365_v10 = vadd.f32 %v17588_v0, %v5364_v59  ;;  %v5491_v6 = vmax.f32 %v5373_v62, 0.0  ;;  %v5869_v62 = vld [vmem:[#allocation2 + $0x716] sm:$0xff] }
 0x402   : > { %v17573_v4 = vpop.permute.xlu1 %10811  ;;  %v7368_v35 = vsel %vm2986_vm7, %v7336_v1, %v10798_v7  ;;  %v7369_v57 = vsel %vm2986_vm7, %v7337_v34, %v10799_v5  ;;  %3654 = vst.msk [vmem:[#allocation3 + $0xb0] sm:$0xff] %vm1230_vm2, %v3622_v8  ;;  %v3620_v39 = vadd.f32 %v3553_v20, %v3374_v38  ;;  %v8079_v28 = vsel %vm253_vm0, %v19508_v49, 0.0 }
 0x403   : > { %v10807_v41 = vpop.permute.xlu0 %10806  ;;  %v8946_v42 = vpop.f32.mrf.mxu1  ;;  %v5489_v7 = vmax.f32 %v5365_v10, 0.0  ;;  %v5490_v43 = vmax.f32 %v5370_v56, 0.0  ;;  %v7801_v38 = vsel %vm1279_vm10, %v17374_v21, 0  ;;  %v8080_v34 = vadd.f32 %v8079_v28, %v8078_v22 }
 0x404   : > { %v10809_v27 = vunpack.i.h.bf16 %v10807_v41  ;;  %v10808_v29 = vunpack.i.l.bf16 %v10807_v41  ;;  %3652 = vst.msk [vmem:[#allocation3 + $0xa0] sm:$0xff] %vm1230_vm2, %v3620_v39  ;;  %v3623_v15 = vadd.f32 %v8946_v42, %v3377_v16  ;;  %v8967_v2 = vpop.f32.mrf.mxu0  ;;  %v10813_v20 = vunpack.i.l.bf16 %v17573_v4  ;;  %v5867_v39 = vld [vmem:[#allocation2 + $0x6ce] sm:$0xff] }
 0x405   : > { %v3556_v30 = vpop.f32.mrf.mxu1  ;;  %v5520_v12 = vpack.c.bf16 %v5489_v7, %v5488_v13  ;;  %v5521_v1 = vpack.c.bf16 %v5491_v6, %v5490_v43  ;;  %v5386_v21 = vadd.f32 %v8967_v2, %v17588_v0 }
 0x406   : > { %v7400_v18 = vsel %vm3019_vm8, %v7368_v35, %v10808_v29  ;;  %v7401_v48 = vsel %vm3019_vm8, %v7369_v57, %v10809_v27  ;;  %v17594_v33 = vpop.permute.xlu1 %10821  ;;  %3655 = vst.msk [vmem:[#allocation3 + $0xb8] sm:$0xff] %vm1230_vm2, %v3623_v15  ;;  %v3621_v36 = vadd.f32 %v3556_v30, %v3375_v19  ;;  %v5377_v46 = vpop.f32.mrf.mxu0  ;;  %v10814_v27 = vunpack.i.h.bf16 %v17573_v4  ;;  %v3379_v35 = vld [vmem:[#allocation3 + $0xc8] sm:$0xff]  ;;  %v3382_v30 = vld [vmem:[#allocation3 + $0xe0] sm:$0xff] }
 0x407   : > { %v7424_v17 = vpack.c.bf16 %v7401_v48, %v7400_v18  ;;  %v10817_v52 = vpop.permute.xlu0 %10816  ;;  %v8949_v25 = vpop.f32.mrf.mxu1  ;;  %v5378_v29 = vadd.f32 %v17588_v0, %v5377_v46  ;;  %8995 = vmatprep.mubr.msk.bf16.mxu1 %vm1230_vm2, %v5520_v12  ;;  %v5868_v57 = vld [vmem:[#allocation2 + $0x6d6] sm:$0xff]  ;;  %v19509_v18 = vunpack.c.h.bf16 %v19507_v55  ;;  %v10824_v14 = vunpack.i.h.bf16 %v17594_v33 }
 0x408   : > { %v10819_v23 = vunpack.i.h.bf16 %v10817_v52  ;;  %v10818_v45 = vunpack.i.l.bf16 %v10817_v52  ;;  %3653 = vst.msk [vmem:[#allocation3 + $0xa8] sm:$0xff] %vm1230_vm2, %v3621_v36  ;;  %v3626_v26 = vadd.f32 %v8949_v25, %v3380_v44  ;;  %v8968_v41 = vpop.f32.mrf.mxu0  ;;  %8996 = vmatmul.mubr.msk.bf16.vlgmr.msra.gmra.mxu1 %vm1230_vm2, %v5521_v1  ;;  %v10823_v51 = vunpack.i.l.bf16 %v17594_v33  ;;  %v5870_v52 = vld [vmem:[#allocation2 + $0x71e] sm:$0xff]  ;;  %v3385_v25 = vld [vmem:[#allocation3 + $0xf8] sm:$0xff] }
 0x409   : > { %9049 = vmatprep.mubr.msk.bf16.mxu0 %vm3093_vm9, %v7424_v17  ;;  %v3569_v40 = vpop.f32.mrf.mxu1  ;;  %v5389_v32 = vadd.f32 %v8968_v41, %v17588_v0  ;;  %v8081_v48 = vsel %vm253_vm0, %v19509_v18, 0.0  ;;  %9066 = vmatpush3.bf16.msra.mxu1 %v7801_v38  ;;  %v7181_v33 = vsel %vm253_vm0, %v5868_v57, %v10814_v27  ;;  %v5492_v59 = vmax.f32 %v5378_v29, 0.0  ;;  %v3383_v41 = vld [vmem:[#allocation3 + $0xe8] sm:$0xff] }
 0x40a   : > { %v7403_v11 = vsel %vm3019_vm8, %v7371_v58, %v10819_v23  ;;  %v7402_v53 = vsel %vm3019_vm8, %v7370_v31, %v10818_v45  ;;  %v17610_v47 = vpop.permute.xlu1 %10831  ;;  %3658 = vst.msk [vmem:[#allocation3 + $0xd0] sm:$0xff] %vm1230_vm2, %v3626_v26  ;;  %v3624_v8 = vadd.f32 %v3569_v40, %v3378_v3  ;;  %v5380_v54 = vpop.f32.mrf.mxu0  ;;  %9104 = vmatprep.subr.mxu1 %v19425_v37 }
 0x40b   : > { %v7425_v5 = vpack.c.bf16 %v7403_v11, %v7402_v53  ;;  %v17612_v9 = vpop.permute.xlu0 %10826  ;;  %v8950_v60 = vpop.f32.mrf.mxu1  ;;  %v5381_v17 = vadd.f32 %v17588_v0, %v5380_v54  ;;  %v10834_v42 = vunpack.i.h.bf16 %v17610_v47  ;;  %v10833_v19 = vunpack.i.l.bf16 %v17610_v47 }
 0x40c   : > { %v3627_v16 = vadd.f32 %v8950_v60, %v3381_v63  ;;  %3656 = vst.msk [vmem:[#allocation3 + $0xc0] sm:$0xff] %vm1230_vm2, %v3624_v8  ;;  %v5495_v56 = vmax.f32 %v5389_v32, 0.0  ;;  %v17649_v22 = vadd.f32 %v8081_v48, %v8080_v34  ;;  %v7180_v6 = vsel %vm253_vm0, %v5867_v39, %v10813_v20 }
 0x40d   : > { %9050 = vmatmul.mubr.msk.bf16.gmra.mxu0 %vm3093_vm9, %v7425_v5  ;;  %v3572_v4 = vpop.f32.mrf.mxu1  ;;  %v8971_v45 = vpop.f32.mrf.mxu0  ;;  %v5493_v31 = vmax.f32 %v5381_v17, 0.0  ;;  %v5494_v11 = vmax.f32 %v5386_v21, 0.0  ;;  %v10829_v53 = vunpack.i.h.bf16 %v17612_v9  ;;  %v7183_v47 = vsel %vm253_vm0, %v5870_v52, %v10824_v14 }
 0x40e   : > { %v17619_v50 = vpop.permute.xlu1 %10841  ;;  %3659 = vst.msk [vmem:[#allocation3 + $0xd8] sm:$0xff] %vm1230_vm2, %v3627_v16  ;;  %v3625_v23 = vadd.f32 %v3572_v4, %v3379_v35  ;;  %v7182_v44 = vsel %vm253_vm0, %v5869_v62, %v10823_v51  ;;  %v10828_v13 = vunpack.i.l.bf16 %v17612_v9  ;;  %v7215_v49 = vsel %vm1230_vm2, %v7183_v47, %v10834_v42 }
 0x40f   : > { %v17627_v61 = vpop.permute.xlu0 %10836  ;;  %v8953_v10 = vpop.f32.mrf.mxu1  ;;  %v5522_v5 = vpack.c.bf16 %v5493_v31, %v5492_v59  ;;  %v7214_v55 = vsel %vm1230_vm2, %v7182_v44, %v10833_v19  ;;  %v5523_v28 = vpack.c.bf16 %v5495_v56, %v5494_v11  ;;  %v10844_v12 = vunpack.i.h.bf16 %v17619_v50 }
 0x410   : > { %3657 = vst.msk [vmem:[#allocation3 + $0xc8] sm:$0xff] %vm1230_vm2, %v3625_v23  ;;  %v3630_v36 = vadd.f32 %v8953_v10, %v3384_v24  ;;  %v5393_v2 = vpop.f32.mrf.mxu0  ;;  %v10843_v26 = vunpack.i.l.bf16 %v17619_v50  ;;  %v7213_v38 = vsel %vm1230_vm2, %v7181_v33, %v10829_v53  ;;  %v10838_v34 = vunpack.i.l.bf16 %v17627_v61 }
 0x411   : > { %v3585_v7 = vpop.f32.mrf.mxu1  ;;  %v5394_v9 = vadd.f32 %v17588_v0, %v5393_v2  ;;  %8999 = vmatprep.mubr.msk.bf16.mxu1 %vm1230_vm2, %v5522_v5  ;;  %v5402_v27 = vadd.f32 %v8971_v45, %v17588_v0  ;;  %v7212_v50 = vsel %vm1230_vm2, %v7180_v6, %v10828_v13  ;;  %v10839_v32 = vunpack.i.h.bf16 %v17627_v61 }
 0x412   : > { %v17643_v15 = vpop.permute.xlu1 %10851  ;;  %3662 = vst.msk [vmem:[#allocation3 + $0xf0] sm:$0xff] %vm1230_vm2, %v3630_v36  ;;  %v3628_v43 = vadd.f32 %v3585_v7, %v3382_v30  ;;  %v8972_v46 = vpop.f32.mrf.mxu0  ;;  %9000 = vmatmul.mubr.msk.bf16.gmra.mxu1 %vm1230_vm2, %v5523_v28  ;;  %v7246_v39 = vsel %vm2854_vm3, %v7214_v55, %v10843_v26  ;;  %v7247_v61 = vsel %vm2854_vm3, %v7215_v49, %v10844_v12 }
 0x413   : > { %v17647_v58 = vpop.permute.xlu0 %10846  ;;  %v5405_v40 = vadd.f32 %v8972_v46, %v17588_v0  ;;  %v8954_v1 = vpop.f32.mrf.mxu1  ;;  %v10854_v60 = vunpack.i.h.bf16 %v17643_v15  ;;  %v10853_v20 = vunpack.i.l.bf16 %v17643_v15  ;;  %v5496_v14 = vmax.f32 %v5394_v9, 0.0 }
 0x414   : > { %3660 = vst.msk [vmem:[#allocation3 + $0xe0] sm:$0xff] %vm1230_vm2, %v3628_v43  ;;  %v3631_v29 = vadd.f32 %v8954_v1, %v3385_v25  ;;  %v5396_v8 = vpop.f32.mrf.mxu0  ;;  %v10848_v21 = vunpack.i.l.bf16 %v17647_v58  ;;  %v7244_v4 = vsel %vm2854_vm3, %v7212_v50, %v10838_v34  ;;  %v5498_v24 = vmax.f32 %v5402_v27, 0.0 }
 0x415   : > { %v5397_v35 = vadd.f32 %v17588_v0, %v5396_v8  ;;  %v3588_v57 = vpop.f32.mrf.mxu1  ;;  %v5499_v16 = vmax.f32 %v5405_v40, 0.0  ;;  %v10849_v62 = vunpack.i.h.bf16 %v17647_v58  ;;  %v7245_v19 = vsel %vm2854_vm3, %v7213_v38, %v10839_v32 }
 0x416   : > { %v17660_v3 = vpop.permute.xlu1 %10861  ;;  %3663 = vst.msk [vmem:[#allocation3 + $0xf8] sm:$0xff] %vm1230_vm2, %v3631_v29  ;;  %v3629_v54 = vadd.f32 %v3588_v57, %v3383_v41  ;;  %v7279_v56 = vsel %vm2887_vm4, %v7247_v61, %v10854_v60  ;;  %v7278_v15 = vsel %vm2887_vm4, %v7246_v39, %v10853_v20  ;;  %v7276_v33 = vsel %vm2887_vm4, %v7244_v4, %v10848_v21 }
 0x417   : > { %v10857_v63 = vpop.permute.xlu0 %10856  ;;  %v8975_v18 = vpop.f32.mrf.mxu0  ;;  %v5497_v51 = vmax.f32 %v5397_v35, 0.0  ;;  %v10863_v52 = vunpack.i.l.bf16 %v17660_v3  ;;  %v5525_v59 = vpack.c.bf16 %v5499_v16, %v5498_v24  ;;  %v7277_v2 = vsel %vm2887_vm4, %v7245_v19, %v10849_v62 }
 0x418   : > { %3661 = vst.msk [vmem:[#allocation3 + $0xe8] sm:$0xff] %vm1230_vm2, %v3629_v54  ;;  %v10858_v23 = vunpack.i.l.bf16 %v10857_v63  ;;  %v10859_v31 = vunpack.i.h.bf16 %v10857_v63  ;;  %v5418_v58 = vadd.f32 %v8975_v18, %v17588_v0  ;;  %v10864_v47 = vunpack.i.h.bf16 %v17660_v3 }
 0x419   : > { %v5409_v42 = vpop.f32.mrf.mxu0  ;;  %v5524_v45 = vpack.c.bf16 %v5497_v51, %v5496_v14  ;;  %v7310_v44 = vsel %vm2920_vm5, %v7278_v15, %v10863_v52 }
 0x41a   : > { %v17679_v48 = vpop.permute.xlu1 %10871  ;;  %v5410_v11 = vadd.f32 %v17588_v0, %v5409_v42  ;;  %v7308_v7 = vsel %vm2920_vm5, %v7276_v33, %v10858_v23  ;;  %v7309_v28 = vsel %vm2920_vm5, %v7277_v2, %v10859_v31  ;;  %v5502_v9 = vmax.f32 %v5418_v58, 0.0  ;;  %v19510_v23 = vld [vmem:[#allocation8_spill] sm:$0xff] }
 0x41b   : > { %v10867_v17 = vpop.permute.xlu0 %10866  ;;  %v8976_v10 = vpop.f32.mrf.mxu0  ;;  %9003 = vmatprep.mubr.msk.bf16.mxu1 %vm1230_vm2, %v5524_v45  ;;  %v10874_v43 = vunpack.i.h.bf16 %v17679_v48  ;;  %v10873_v46 = vunpack.i.l.bf16 %v17679_v48  ;;  %v7311_v57 = vsel %vm2920_vm5, %v7279_v56, %v10864_v47  ;;  %v19511_v45 = vunpack.c.l.bf16 %v19510_v23 }
 0x41c   : > { %v10868_v6 = vunpack.i.l.bf16 %v10867_v17  ;;  %v5421_v53 = vadd.f32 %v8976_v10, %v17588_v0  ;;  %v10869_v13 = vunpack.i.h.bf16 %v10867_v17  ;;  %9004 = vmatmul.mubr.msk.bf16.gmra.mxu1 %vm1230_vm2, %v5525_v59  ;;  %v5500_v63 = vmax.f32 %v5410_v11, 0.0 }
 0x41d   : > { %v5412_v5 = vpop.f32.mrf.mxu0  ;;  %v7343_v48 = vsel %vm2953_vm6, %v7311_v57, %v10874_v43  ;;  %v7342_v17 = vsel %vm2953_vm6, %v7310_v44, %v10873_v46  ;;  %v8083_v15 = vsel %vm253_vm0, %v19511_v45, 0.0 }
 0x41e   : > { %v10882_v30 = vpop.permute.xlu1 %10881  ;;  %v5413_v49 = vadd.f32 %v17588_v0, %v5412_v5  ;;  %v5503_v12 = vmax.f32 %v5421_v53, 0.0  ;;  %v7340_v40 = vsel %vm2953_vm6, %v7308_v7, %v10868_v6  ;;  %v7341_v38 = vsel %vm2953_vm6, %v7309_v28, %v10869_v13 }
 0x41f   : > { %v10877_v36 = vpop.permute.xlu0 %10876  ;;  %v10884_v34 = vunpack.i.h.bf16 %v10882_v30  ;;  %v10883_v50 = vunpack.i.l.bf16 %v10882_v30  ;;  %v8084_v47 = vadd.f32 %v8083_v15, %v17649_v22  ;;  %v19512_v13 = vunpack.c.h.bf16 %v19510_v23 }
 0x420   : > { %v10879_v25 = vunpack.i.h.bf16 %v10877_v36  ;;  %v10878_v55 = vunpack.i.l.bf16 %v10877_v36  ;;  %v8979_v3 = vpop.f32.mrf.mxu0  ;;  %v5501_v1 = vmax.f32 %v5413_v49, 0.0  ;;  %v5527_v20 = vpack.c.bf16 %v5503_v12, %v5502_v9 }
 0x421   : > { %v5434_v4 = vadd.f32 %v8979_v3, %v17588_v0  ;;  %v7374_v42 = vsel %vm2986_vm7, %v7342_v17, %v10883_v50  ;;  %v7375_v19 = vsel %vm2986_vm7, %v7343_v48, %v10884_v34  ;;  %v8085_v5 = vsel %vm253_vm0, %v19512_v13, 0.0  ;;  %v5871_v50 = vld [vmem:[#allocation2 + $0x75e] sm:$0xff] }
 0x422   : > { %v17704_v26 = vpop.permute.xlu1 %10891  ;;  %v5425_v8 = vpop.f32.mrf.mxu0  ;;  %v7372_v32 = vsel %vm2986_vm7, %v7340_v40, %v10878_v55  ;;  %v7373_v60 = vsel %vm2986_vm7, %v7341_v38, %v10879_v25  ;;  %v5526_v35 = vpack.c.bf16 %v5501_v1, %v5500_v63  ;;  %v8086_v12 = vadd.f32 %v8085_v5, %v8084_v47  ;;  %v19513_v40 = vld [vmem:[#allocation7_spill] sm:$0xff] }
 0x423   : > { %v10887_v41 = vpop.permute.xlu0 %10886  ;;  %v5426_v61 = vadd.f32 %v17588_v0, %v5425_v8  ;;  %v5506_v36 = vmax.f32 %v5434_v4, 0.0  ;;  %v10894_v3 = vunpack.i.h.bf16 %v17704_v26  ;;  %v19514_v63 = vunpack.c.l.bf16 %v19513_v40 }
 0x424   : > { %v10889_v27 = vunpack.i.h.bf16 %v10887_v41  ;;  %v10888_v29 = vunpack.i.l.bf16 %v10887_v41  ;;  %v8980_v54 = vpop.f32.mrf.mxu0  ;;  %9007 = vmatprep.mubr.msk.bf16.mxu1 %vm1230_vm2, %v5526_v35  ;;  %v5872_v41 = vld [vmem:[#allocation2 + $0x766] sm:$0xff]  ;;  %v10893_v38 = vunpack.i.l.bf16 %v17704_v26  ;;  %v19515_v26 = vunpack.c.h.bf16 %v19513_v40 }
 0x425   : > { %v5437_v14 = vadd.f32 %v8980_v54, %v17588_v0  ;;  %9008 = vmatmul.mubr.msk.bf16.gmra.mxu1 %vm1230_vm2, %v5527_v20  ;;  %v5504_v58 = vmax.f32 %v5426_v61, 0.0  ;;  %v8087_v1 = vsel %vm253_vm0, %v19514_v63, 0.0  ;;  %v5873_v61 = vld [vmem:[#allocation2 + $0x7a6] sm:$0xff] }
 0x426   : > { %v7404_v21 = vsel %vm3019_vm8, %v7372_v32, %v10888_v29  ;;  %v7405_v16 = vsel %vm3019_vm8, %v7373_v60, %v10889_v27  ;;  %v17713_v18 = vpop.permute.xlu1 %10901  ;;  %v5428_v52 = vpop.f32.mrf.mxu0  ;;  %v5874_v32 = vld [vmem:[#allocation2 + $0x7ae] sm:$0xff]  ;;  %v17761_v54 = vadd.f32 %v8087_v1, %v8086_v12  ;;  %v17766_v48 = vsel %vm253_vm0, %v19515_v26, 0.0 }
 0x427   : > { %v7426_v39 = vpack.c.bf16 %v7405_v16, %v7404_v21  ;;  %v10897_v51 = vpop.permute.xlu0 %10896  ;;  %v5429_v56 = vadd.f32 %v17588_v0, %v5428_v52  ;;  %v5507_v33 = vmax.f32 %v5437_v14, 0.0  ;;  %v10904_v34 = vunpack.i.h.bf16 %v17713_v18 }
 0x428   : > { %v10899_v24 = vunpack.i.h.bf16 %v10897_v51  ;;  %v10898_v62 = vunpack.i.l.bf16 %v10897_v51  ;;  %v10903_v20 = vunpack.i.l.bf16 %v17713_v18  ;;  %v7184_v4 = vsel %vm253_vm0, %v5871_v50, %v10893_v38 }
 0x429   : > { %9053 = vmatprep.mubr.msk.bf16.mxu0 %vm3093_vm9, %v7426_v39  ;;  %v8983_v10 = vpop.f32.mrf.mxu0  ;;  %v5505_v11 = vmax.f32 %v5429_v56, 0.0  ;;  %v5529_v7 = vpack.c.bf16 %v5507_v33, %v5506_v36  ;;  %v7185_v39 = vsel %vm253_vm0, %v5872_v41, %v10894_v3  ;;  %v7187_v18 = vsel %vm253_vm0, %v5874_v32, %v10904_v34 }
 0x42a   : > { %v7407_v59 = vsel %vm3019_vm8, %v7375_v19, %v10899_v24  ;;  %v7406_v31 = vsel %vm3019_vm8, %v7374_v42, %v10898_v62  ;;  %v17731_v30 = vpop.permute.xlu1 %10911  ;;  %v5450_v22 = vadd.f32 %v8983_v10, %v17588_v0  ;;  %v7186_v33 = vsel %vm253_vm0, %v5873_v61, %v10903_v20 }
 0x42b   : > { %v7427_v6 = vpack.c.bf16 %v7407_v59, %v7406_v31  ;;  %v17733_v53 = vpop.permute.xlu0 %10906  ;;  %v5441_v2 = vpop.f32.mrf.mxu0  ;;  %v5528_v44 = vpack.c.bf16 %v5505_v11, %v5504_v58  ;;  %v10914_v14 = vunpack.i.h.bf16 %v17731_v30  ;;  %v10913_v51 = vunpack.i.l.bf16 %v17731_v30 }
 0x42c   : > { %v5442_v49 = vadd.f32 %v17588_v0, %v5441_v2  ;;  %v5510_v21 = vmax.f32 %v5450_v22, 0.0  ;;  %v10909_v24 = vunpack.i.h.bf16 %v17733_v53  ;;  %v10908_v19 = vunpack.i.l.bf16 %v17733_v53 }
 0x42d   : > { %9054 = vmatmul.mubr.msk.bf16.gmra.mxu0 %vm3093_vm9, %v7427_v6  ;;  %v8984_v25 = vpop.f32.mrf.mxu0  ;;  %9011 = vmatprep.mubr.msk.bf16.mxu1 %vm1230_vm2, %v5528_v44  ;;  %v7218_v58 = vsel %vm1230_vm2, %v7186_v33, %v10913_v51  ;;  %v7219_v6 = vsel %vm1230_vm2, %v7187_v18, %v10914_v14 }
 0x42e   : > { %v17740_v55 = vpop.permute.xlu1 %10921  ;;  %v5453_v28 = vadd.f32 %v8984_v25, %v17588_v0  ;;  %9012 = vmatmul.mubr.msk.bf16.gmra.mxu1 %vm1230_vm2, %v5529_v7  ;;  %v5508_v60 = vmax.f32 %v5442_v49, 0.0  ;;  %v7217_v36 = vsel %vm1230_vm2, %v7185_v39, %v10909_v24  ;;  %v7216_v7 = vsel %vm1230_vm2, %v7184_v4, %v10908_v19 }
 0x42f   : > { %v17744_v43 = vpop.permute.xlu0 %10916  ;;  %v5444_v46 = vpop.f32.mrf.mxu0  ;;  %v10923_v56 = vunpack.i.l.bf16 %v17740_v55  ;;  %v10924_v59 = vunpack.i.h.bf16 %v17740_v55 }
 0x430   : > { %v5445_v9 = vadd.f32 %v17588_v0, %v5444_v46  ;;  %v5511_v27 = vmax.f32 %v5453_v28, 0.0  ;;  %v10918_v31 = vunpack.i.l.bf16 %v17744_v43  ;;  %v10919_v11 = vunpack.i.h.bf16 %v17744_v43 }
 0x431   : > { %v8987_v29 = vpop.f32.mrf.mxu0  ;;  %v7250_v25 = vsel %vm2854_vm3, %v7218_v58, %v10923_v56  ;;  %v7251_v43 = vsel %vm2854_vm3, %v7219_v6, %v10924_v59 }
 0x432   : > { %v17756_v8 = vpop.permute.xlu1 %10931  ;;  %v5509_v35 = vmax.f32 %v5445_v9, 0.0  ;;  %v5531_v62 = vpack.c.bf16 %v5511_v27, %v5510_v21  ;;  %v5466_v10 = vadd.f32 %v8987_v29, %v17588_v0  ;;  %v7248_v22 = vsel %vm2854_vm3, %v7216_v7, %v10918_v31 }
 0x433   : > { %v17758_v57 = vpop.permute.xlu0 %10926  ;;  %v5457_v16 = vpop.f32.mrf.mxu0  ;;  %v10934_v2 = vunpack.i.h.bf16 %v17756_v8  ;;  %v7249_v9 = vsel %vm2854_vm3, %v7217_v36, %v10919_v11  ;;  %v10933_v40 = vunpack.i.l.bf16 %v17756_v8  ;;  %v8090_v7 = vadd.f32 %v17766_v48, %v17761_v54 }
 0x434   : > { %v5530_v17 = vpack.c.bf16 %v5509_v35, %v5508_v60  ;;  %v5458_v23 = vadd.f32 %v17588_v0, %v5457_v16  ;;  %v10928_v47 = vunpack.i.l.bf16 %v17758_v57  ;;  %v5514_v46 = vmax.f32 %v5466_v10, 0.0 }
 0x435   : > { %v8988_v52 = vpop.f32.mrf.mxu0  ;;  %v10929_v12 = vunpack.i.h.bf16 %v17758_v57  ;;  %v7283_v41 = vsel %vm2887_vm4, %v7251_v43, %v10934_v2  ;;  %v7282_v6 = vsel %vm2887_vm4, %v7250_v25, %v10933_v40 }
 0x436   : > { %v17774_v42 = vpop.permute.xlu1 %10941  ;;  %v5469_v45 = vadd.f32 %v8988_v52, %v17588_v0  ;;  %9015 = vmatprep.mubr.msk.bf16.mxu1 %vm1230_vm2, %v5530_v17  ;;  %v5512_v55 = vmax.f32 %v5458_v23, 0.0  ;;  %v7280_v38 = vsel %vm2887_vm4, %v7248_v22, %v10928_v47 }
 0x437   : > { %v10937_v15 = vpop.permute.xlu0 %10936  ;;  %v5460_v30 = vpop.f32.mrf.mxu0  ;;  %9016 = vmatmul.mubr.msk.bf16.gmra.mxu1 %vm1230_vm2, %v5531_v62  ;;  %v7281_v8 = vsel %vm2887_vm4, %v7249_v9, %v10929_v12  ;;  %v10944_v21 = vunpack.i.h.bf16 %v17774_v42  ;;  %v10943_v16 = vunpack.i.l.bf16 %v17774_v42  ;;  %v8091_v9 = vrot.slane %v8090_v7, 4 }
 0x438   : > { %v5461_v53 = vadd.f32 %v17588_v0, %v5460_v30  ;;  %v5515_v44 = vmax.f32 %v5469_v45, 0.0  ;;  %v10938_v63 = vunpack.i.l.bf16 %v10937_v15  ;;  %v10939_v27 = vunpack.i.h.bf16 %v10937_v15 }
 0x439   : > { %v8991_v13 = vpop.f32.mrf.mxu0  ;;  %v7314_v47 = vsel %vm2920_vm5, %v7282_v6, %v10943_v16 }
 0x43a   : > { %v17793_v5 = vpop.permute.xlu1 %10951  ;;  %v5513_v49 = vmax.f32 %v5461_v53, 0.0  ;;  %v5533_v34 = vpack.c.bf16 %v5515_v44, %v5514_v46  ;;  %v5482_v32 = vadd.f32 %v8991_v13, %v17588_v0  ;;  %v7312_v61 = vsel %vm2920_vm5, %v7280_v38, %v10938_v63 }
 0x43b   : > { %v10947_v28 = vpop.permute.xlu0 %10946  ;;  %v5473_v3 = vpop.f32.mrf.mxu0  ;;  %v7313_v4 = vsel %vm2920_vm5, %v7281_v8, %v10939_v27  ;;  %v10954_v18 = vunpack.i.h.bf16 %v17793_v5  ;;  %v10953_v24 = vunpack.i.l.bf16 %v17793_v5  ;;  %v7315_v44 = vsel %vm2920_vm5, %v7283_v41, %v10944_v21 }
 0x43c   : > { %v5532_v1 = vpack.c.bf16 %v5513_v49, %v5512_v55  ;;  %v10948_v60 = vunpack.i.l.bf16 %v10947_v28  ;;  %v5474_v35 = vadd.f32 %v17588_v0, %v5473_v3  ;;  %v10949_v26 = vunpack.i.h.bf16 %v10947_v28 }
 0x43d   : > { %v8992_v29 = vpop.f32.mrf.mxu0  ;;  %v5518_v42 = vmax.f32 %v5482_v32, 0.0  ;;  %v7346_v55 = vsel %vm2953_vm6, %v7314_v47, %v10953_v24  ;;  %v7347_v25 = vsel %vm2953_vm6, %v7315_v44, %v10954_v18  ;;  %v8092_v38 = vadd.f32 %v8091_v9, %v8090_v7 }
 0x43e   : > { %v10962_v50 = vpop.permute.xlu1 %10961  ;;  %v5485_v57 = vadd.f32 %v8992_v29, %v17588_v0  ;;  %9019 = vmatprep.mubr.msk.bf16.mxu1 %vm1230_vm2, %v5532_v1  ;;  %v7344_v19 = vsel %vm2953_vm6, %v7312_v61, %v10948_v60  ;;  %v5516_v56 = vmax.f32 %v5474_v35, 0.0  ;;  %v7345_v15 = vsel %vm2953_vm6, %v7313_v4, %v10949_v26 }
 0x43f   : > { %v10957_v20 = vpop.permute.xlu0 %10956  ;;  %v5476_v39 = vpop.f32.mrf.mxu0  ;;  %9020 = vmatmul.mubr.msk.bf16.gmra.mxu1 %vm1230_vm2, %v5533_v34  ;;  %v10964_v33 = vunpack.i.h.bf16 %v10962_v50  ;;  %v10963_v31 = vunpack.i.l.bf16 %v10962_v50  ;;  %v17843_v34 = vld [vmem:[%s18130_s5 + $0x3] ss:$0 sm:$0xff] }
 0x440   : > { %v10959_v14 = vunpack.i.h.bf16 %v10957_v20  ;;  %v10958_v51 = vunpack.i.l.bf16 %v10957_v20  ;;  %v5477_v17 = vadd.f32 %v17588_v0, %v5476_v39  ;;  %v5519_v62 = vmax.f32 %v5485_v57, 0.0  ;;  %v5878_v39 = vld [vmem:[#allocation2 + $0x83e] sm:$0xff] }
 0x441   : > { %v7378_v43 = vsel %vm2986_vm7, %v7346_v55, %v10963_v31  ;;  %v7379_v22 = vsel %vm2986_vm7, %v7347_v25, %v10964_v33  ;;  %v8093_v20 = vrot.slane %v8092_v38, 2 }
 0x442   : > { %v17817_v52 = vpop.permute.xlu1 %10971  ;;  %v5517_v23 = vmax.f32 %v5477_v17, 0.0  ;;  %v7376_v10 = vsel %vm2986_vm7, %v7344_v19, %v10958_v51  ;;  %v7377_v30 = vsel %vm2986_vm7, %v7345_v15, %v10959_v14  ;;  %v5535_v11 = vpack.c.bf16 %v5519_v62, %v5518_v42  ;;  %v5877_v51 = vld [vmem:[#allocation2 + $0x836] sm:$0xff]  ;;  %v5875_v42 = vld [vmem:[#allocation2 + $0x7ee] sm:$0xff] }
 0x443   : > { %v10967_v45 = vpop.permute.xlu0 %10966  ;;  %v10974_v16 = vunpack.i.h.bf16 %v17817_v52  ;;  %v10973_v26 = vunpack.i.l.bf16 %v17817_v52  ;;  %v5876_v19 = vld [vmem:[#allocation2 + $0x7f6] sm:$0xff]  ;;  %v17853_v33 = vadd.f32 %v8093_v20, %v8092_v38 }
 0x444   : > { %v10969_v59 = vunpack.i.h.bf16 %v10967_v45  ;;  %v10968_v0 = vunpack.i.l.bf16 %v10967_v45  ;;  %v5534_v58 = vpack.c.bf16 %v5517_v23, %v5516_v56 }
 0x446   : > { %v7408_v53 = vsel %vm3019_vm8, %v7376_v10, %v10968_v0  ;;  %v7409_v36 = vsel %vm3019_vm8, %v7377_v30, %v10969_v59  ;;  %v10982_v2 = vpop.permute.xlu1 %10981  ;;  %9023 = vmatprep.mubr.msk.bf16.mxu1 %vm1230_vm2, %v5534_v58 }
 0x447   : > { %v7428_v13 = vpack.c.bf16 %v7409_v36, %v7408_v53  ;;  %v10977_v5 = vpop.permute.xlu0 %10976  ;;  %9024 = vmatmul.mubr.msk.bf16.gmra.mxu1 %vm1230_vm2, %v5535_v11  ;;  %v10984_v8 = vunpack.i.h.bf16 %v10982_v2  ;;  %v10983_v61 = vunpack.i.l.bf16 %v10982_v2  ;;  %v7189_v11 = vsel %vm253_vm0, %v5876_v19, %v10974_v16 }
 0x448   : > { %v10979_v49 = vunpack.i.h.bf16 %v10977_v5  ;;  %v10978_v28 = vunpack.i.l.bf16 %v10977_v5  ;;  %v7188_v53 = vsel %vm253_vm0, %v5875_v42, %v10973_v26 }
 0x449   : > { %9057 = vmatprep.mubr.msk.bf16.mxu0 %vm3093_vm9, %v7428_v13  ;;  %v7191_v59 = vsel %vm253_vm0, %v5878_v39, %v10984_v8  ;;  %v7190_v10 = vsel %vm253_vm0, %v5877_v51, %v10983_v61 }
 0x44a   : > { %v7411_v46 = vsel %vm3019_vm8, %v7379_v22, %v10979_v49  ;;  %v7410_v12 = vsel %vm3019_vm8, %v7378_v43, %v10978_v28  ;;  %v10992_v3 = vpop.permute.xlu1 %10991  ;;  %v9035_v40 = vpop.f32.mrf.mxu0 }
 0x44b   : > { %v7429_v54 = vpack.c.bf16 %v7411_v46, %v7410_v12  ;;  %v10987_v48 = vpop.permute.xlu0 %10986  ;;  %v7552_v60 = vadd.f32 %v9035_v40, %v17843_v34  ;;  %v10994_v17 = vunpack.i.h.bf16 %v10992_v3  ;;  %v10993_v4 = vunpack.i.l.bf16 %v10992_v3 }
 0x44c   : > { %v7543_v41 = vpop.f32.mrf.mxu0  ;;  %v10989_v56 = vunpack.i.h.bf16 %v10987_v48  ;;  %v10988_v23 = vunpack.i.l.bf16 %v10987_v48 }
 0x44d   : > { %9058 = vmatmul.mubr.msk.bf16.gmra.mxu0 %vm3093_vm9, %v7429_v54  ;;  %v7544_v29 = vadd.f32 %v17843_v34, %v7543_v41  ;;  %v7672_v45 = vmax.f32 %v7552_v60, 0.0  ;;  %v7222_v36 = vsel %vm1230_vm2, %v7190_v10, %v10993_v4  ;;  %v7223_v2 = vsel %vm1230_vm2, %v7191_v59, %v10994_v17 }
 0x44e   : > { %v11002_v63 = vpop.permute.xlu1 %11001  ;;  %v9036_v27 = vpop.f32.mrf.mxu0  ;;  %v7221_v44 = vsel %vm1230_vm2, %v7189_v11, %v10989_v56  ;;  %v7220_v13 = vsel %vm1230_vm2, %v7188_v53, %v10988_v23  ;;  %v8095_v10 = vrot.slane %v17853_v33, 1 }
 0x44f   : > { %v10997_v1 = vpop.permute.xlu0 %10996  ;;  %v7555_v50 = vadd.f32 %v9036_v27, %v17843_v34  ;;  %v7670_v18 = vmax.f32 %v7544_v29, 0.0  ;;  %v11004_v52 = vunpack.i.h.bf16 %v11002_v63  ;;  %v11003_v0 = vunpack.i.l.bf16 %v11002_v63 }
 0x450   : > { %v7546_v57 = vpop.f32.mrf.mxu0  ;;  %v10999_v30 = vunpack.i.h.bf16 %v10997_v1  ;;  %v10998_v58 = vunpack.i.l.bf16 %v10997_v1 }
 0x451   : > { %v7547_v21 = vadd.f32 %v17843_v34, %v7546_v57  ;;  %v7673_v14 = vmax.f32 %v7555_v50, 0.0  ;;  %v7254_v25 = vsel %vm2854_vm3, %v7222_v36, %v11003_v0  ;;  %v7255_v49 = vsel %vm2854_vm3, %v7223_v2, %v11004_v52 }
 0x452   : > { %v11012_v32 = vpop.permute.xlu1 %11011  ;;  %v7252_v22 = vsel %vm2854_vm3, %v7220_v13, %v10998_v58  ;;  %v7253_v46 = vsel %vm2854_vm3, %v7221_v44, %v10999_v30  ;;  %v8096_v58 = vadd.f32 %v8095_v10, %v17853_v33  ;;  %v5539_v10 = vld [vmem:[#allocation3 + $0x18] sm:$0xff] }
 0x453   : > { %v17848_v35 = vpop.permute.xlu0 %11006  ;;  %v7671_v24 = vmax.f32 %v7547_v21, 0.0  ;;  %v7703_v6 = vpack.c.bf16 %v7673_v14, %v7672_v45  ;;  %v11014_v5 = vunpack.i.h.bf16 %v11012_v32  ;;  %v11013_v7 = vunpack.i.l.bf16 %v11012_v32 }
 0x454   : > { %v11009_v28 = vunpack.i.h.bf16 %v17848_v35  ;;  %v11008_v43 = vunpack.i.l.bf16 %v17848_v35  ;;  %v8098_v11 = vmul.f32 0.00390625, %v8096_v58 }
 0x455   : > { %v7702_v31 = vpack.c.bf16 %v7671_v24, %v7670_v18  ;;  %v7286_v1 = vsel %vm2887_vm4, %v7254_v25, %v11013_v7  ;;  %v7287_v41 = vsel %vm2887_vm4, %v7255_v49, %v11014_v5 }
 0x456   : > { %v11022_v62 = vpop.permute.xlu1 %11021  ;;  %v7284_v50 = vsel %vm2887_vm4, %v7252_v22, %v11008_v43  ;;  %v7285_v32 = vsel %vm2887_vm4, %v7253_v46, %v11009_v28  ;;  %v8662_v43 = vld [vmem:[%s18129_s4 + $0x10] sm:$0xf] }
 0x457   : > { %v11017_v15 = vpop.permute.xlu0 %11016  ;;  %9067 = vmatprep.mubr.msk.bf16.mxu1 %vm1230_vm2, %v7702_v31  ;;  %v11024_v12 = vunpack.i.h.bf16 %v11022_v62  ;;  %v11023_v3 = vunpack.i.l.bf16 %v11022_v62  ;;  %v8183_v22 = vunpack.c.l.bf16 %v8662_v43  ;;  %v5543_v43 = vld [vmem:[#allocation3 + $0x38] sm:$0xff] }
 0x458   : > { %9068 = vmatmul.mubr.msk.bf16.vlgmr.msra.gmra.mxu1 %vm1230_vm2, %v7703_v6  ;;  %v11019_v54 = vunpack.i.h.bf16 %v11017_v15  ;;  %v11018_v48 = vunpack.i.l.bf16 %v11017_v15 }
 0x459   : > { %v7318_v57 = vsel %vm2920_vm5, %v7286_v1, %v11023_v3  ;;  %v7319_v20 = vsel %vm2920_vm5, %v7287_v41, %v11024_v12  ;;  %9105 = vmatpush3.msra.mxu1 %v8183_v22 }
 0x45a   : > { %v11032_v47 = vpop.permute.xlu1 %11031  ;;  %v7316_v16 = vsel %vm2920_vm5, %v7284_v50, %v11018_v48  ;;  %v7317_v26 = vsel %vm2920_vm5, %v7285_v32, %v11019_v54 }
 0x45b   : > { %v11027_v55 = vpop.permute.xlu0 %11026  ;;  %v11034_v9 = vunpack.i.h.bf16 %v11032_v47  ;;  %v11033_v40 = vunpack.i.l.bf16 %v11032_v47 }
 0x45c   : > { %v11029_v38 = vunpack.i.h.bf16 %v11027_v55  ;;  %v11028_v27 = vunpack.i.l.bf16 %v11027_v55 }
 0x45d   : > { %v7350_v39 = vsel %vm2953_vm6, %v7318_v57, %v11033_v40  ;;  %v7351_v61 = vsel %vm2953_vm6, %v7319_v20, %v11034_v9 }
 0x45e   : > { %v11042_v63 = vpop.permute.xlu1 %11041  ;;  %v7348_v51 = vsel %vm2953_vm6, %v7316_v16, %v11028_v27  ;;  %v7349_v17 = vsel %vm2953_vm6, %v7317_v26, %v11029_v38 }
 0x45f   : > { %v11037_v29 = vpop.permute.xlu0 %11036  ;;  %v11044_v60 = vunpack.i.h.bf16 %v11042_v63  ;;  %v11043_v35 = vunpack.i.l.bf16 %v11042_v63 }
 0x460   : > { %v11039_v8 = vunpack.i.h.bf16 %v11037_v29  ;;  %v11038_v21 = vunpack.i.l.bf16 %v11037_v29 }
 0x461   : > { %v7382_v62 = vsel %vm2986_vm7, %v7350_v39, %v11043_v35  ;;  %v7383_v42 = vsel %vm2986_vm7, %v7351_v61, %v11044_v60 }
 0x462   : > { %v11052_v14 = vpop.permute.xlu1 %11051  ;;  %v7380_v23 = vsel %vm2986_vm7, %v7348_v51, %v11038_v21  ;;  %v7381_v45 = vsel %vm2986_vm7, %v7349_v17, %v11039_v8 }
 0x463   : > { %v11054_v4 = vunpack.i.h.bf16 %v11052_v14  ;;  %v11053_v18 = vunpack.i.l.bf16 %v11052_v14  ;;  %v11047_v24 = vpop.permute.xlu0 %11046 }
 0x464   : > { %v11049_v19 = vunpack.i.h.bf16 %v11047_v24  ;;  %v11048_v56 = vunpack.i.l.bf16 %v11047_v24  ;;  %v5538_v24 = vld [vmem:[#allocation3 + $0x10] sm:$0xff] }
 0x465   : > { %v7414_v15 = vsel %vm3019_vm8, %v7382_v62, %v11053_v18  ;;  %v7415_v59 = vsel %vm3019_vm8, %v7383_v42, %v11054_v4 }
 0x466   : > { %v7431_v52 = vpack.c.bf16 %v7415_v59, %v7414_v15  ;;  %v7412_v0 = vsel %vm3019_vm8, %v7380_v23, %v11048_v56  ;;  %v7413_v31 = vsel %vm3019_vm8, %v7381_v45, %v11049_v19  ;;  %v5536_v45 = vld [vmem:[#allocation3] sm:$0xff] }
 0x467   : > { %v7430_v30 = vpack.c.bf16 %v7413_v31, %v7412_v0 }
 0x469   : > { %9061 = vmatprep.mubr.msk.bf16.mxu0 %vm3093_vm9, %v7430_v30 }
 0x46a   : > { %9062 = vmatmul.mubr.msk.bf16.gmra.mxu0 %vm3093_vm9, %v7431_v52  ;;  %v9039_v6 = vpop.f32.mrf.mxu0 }
 0x46b   : > { %9101 = vmatprep.mubr.msk.f32.mxu0 %vm11105_vm12, %v19425_v37  ;;  %v7568_v44 = vadd.f32 %v9039_v6, %v17843_v34 }
 0x46c   : > { %v7559_v53 = vpop.f32.mrf.mxu0 }
 0x46d   : > { %v7560_v2 = vadd.f32 %v17843_v34, %v7559_v53  ;;  %v7676_v25 = vmax.f32 %v7568_v44, 0.0 }
 0x46e   : > { %v9040_v36 = vpop.f32.mrf.mxu0 }
 0x46f   : > { %v7571_v47 = vadd.f32 %v9040_v36, %v17843_v34  ;;  %v7674_v7 = vmax.f32 %v7560_v2, 0.0  ;;  %v5537_v36 = vld [vmem:[#allocation3 + $0x8] sm:$0xff] }
 0x470   : > { %v7562_v13 = vpop.f32.mrf.mxu0 }
 0x471   : > { %v7563_v5 = vadd.f32 %v17843_v34, %v7562_v13  ;;  %v7677_v33 = vmax.f32 %v7571_v47, 0.0 }
 0x472   : > { %9102 = vmatmul.mubr.msk.f32.vlgmr.msra.gmra.mxu0 %vm253_vm0, %v8098_v11 }
 0x473   : > { %v7675_v55 = vmax.f32 %v7563_v5, 0.0  ;;  %v7705_v28 = vpack.c.bf16 %v7677_v33, %v7676_v25  ;;  %v5542_v5 = vld [vmem:[#allocation3 + $0x30] sm:$0xff]  ;;  %v5540_v25 = vld [vmem:[#allocation3 + $0x20] sm:$0xff] }
 0x475   : > { %v7704_v49 = vpack.c.bf16 %v7675_v55, %v7674_v7 }
 0x477   : > { %9071 = vmatprep.mubr.msk.bf16.mxu1 %vm1230_vm2, %v7704_v49 }
 0x478   : > { %9072 = vmatmul.mubr.msk.bf16.gmra.mxu1 %vm1230_vm2, %v7705_v28 }
 0x48b   : > { %v9043_v46 = vpop.f32.mrf.mxu0 }
 0x48c   : > { %v7584_v9 = vadd.f32 %v9043_v46, %v17843_v34 }
 0x48d   : > { %v7575_v12 = vpop.f32.mrf.mxu0 }
 0x48e   : > { %v7576_v54 = vadd.f32 %v17843_v34, %v7575_v12  ;;  %v7680_v27 = vmax.f32 %v7584_v9, 0.0  ;;  %v5541_v12 = vld [vmem:[#allocation3 + $0x28] sm:$0xff] }
 0x48f   : > { %v9044_v3 = vpop.f32.mrf.mxu0 }
 0x490   : > { %v7587_v48 = vadd.f32 %v9044_v3, %v17843_v34  ;;  %v7678_v41 = vmax.f32 %v7576_v54, 0.0 }
 0x491   : > { %v7578_v40 = vpop.f32.mrf.mxu0 }
 0x492   : > { %v7579_v63 = vadd.f32 %v17843_v34, %v7578_v40  ;;  %v7681_v1 = vmax.f32 %v7587_v48, 0.0  ;;  %v5546_v48 = vld [vmem:[#allocation3 + $0x50] sm:$0xff] }
 0x494   : > { %v7679_v38 = vmax.f32 %v7579_v63, 0.0  ;;  %v7707_v50 = vpack.c.bf16 %v7681_v1, %v7680_v27  ;;  %v5544_v63 = vld [vmem:[#allocation3 + $0x40] sm:$0xff] }
 0x496   : > { %v7706_v29 = vpack.c.bf16 %v7679_v38, %v7678_v41  ;;  %v5547_v38 = vld [vmem:[#allocation3 + $0x58] sm:$0xff] }
 0x498   : > { %9075 = vmatprep.mubr.msk.bf16.mxu1 %vm1230_vm2, %v7706_v29 }
 0x499   : > { %9076 = vmatmul.mubr.msk.bf16.gmra.mxu1 %vm1230_vm2, %v7707_v50  ;;  %v5545_v50 = vld [vmem:[#allocation3 + $0x48] sm:$0xff] }
 0x4ad   : > { %v9047_v32 = vpop.f32.mrf.mxu0 }
 0x4ae   : > { %v7600_v8 = vadd.f32 %v9047_v32, %v17843_v34 }
 0x4af   : > { %v7591_v60 = vpop.f32.mrf.mxu0 }
 0x4b0   : > { %v7592_v57 = vadd.f32 %v17843_v34, %v7591_v60  ;;  %v7684_v14 = vmax.f32 %v7600_v8, 0.0  ;;  %v5548_v8 = vld [vmem:[#allocation3 + $0x60] sm:$0xff] }
 0x4b1   : > { %v9048_v35 = vpop.f32.mrf.mxu0 }
 0x4b2   : > { %v7603_v20 = vadd.f32 %v9048_v35, %v17843_v34  ;;  %v7682_v39 = vmax.f32 %v7592_v57, 0.0  ;;  %v5550_v35 = vld [vmem:[#allocation3 + $0x70] sm:$0xff] }
 0x4b3   : > { %v7594_v21 = vpop.f32.mrf.mxu0 }
 0x4b4   : > { %v7595_v16 = vadd.f32 %v17843_v34, %v7594_v21  ;;  %v7685_v26 = vmax.f32 %v7603_v20, 0.0 }
 0x4b6   : > { %v7683_v61 = vmax.f32 %v7595_v16, 0.0  ;;  %v7709_v17 = vpack.c.bf16 %v7685_v26, %v7684_v14  ;;  %v5551_v26 = vld [vmem:[#allocation3 + $0x78] sm:$0xff] }
 0x4b8   : > { %v7708_v51 = vpack.c.bf16 %v7683_v61, %v7682_v39 }
 0x4ba   : > { %9079 = vmatprep.mubr.msk.bf16.mxu1 %vm1230_vm2, %v7708_v51  ;;  %v5549_v51 = vld [vmem:[#allocation3 + $0x68] sm:$0xff] }
 0x4bb   : > { %9080 = vmatmul.mubr.msk.bf16.gmra.mxu1 %vm1230_vm2, %v7709_v17 }
 0x4c8   : > { %v8997_v62 = vpop.f32.mrf.mxu1 }
 0x4c9   : > { %v5784_v42 = vadd.f32 %v8997_v62, %v5538_v24  ;;  %v5554_v24 = vld [vmem:[#allocation3 + $0x90] sm:$0xff] }
 0x4ca   : > { %v5655_v15 = vpop.f32.mrf.mxu1 }
 0x4cb   : > { %5816 = vst.msk [vmem:[#allocation3 + $0x10] sm:$0xff] %vm1230_vm2, %v5784_v42  ;;  %v5782_v52 = vadd.f32 %v5655_v15, %v5536_v45  ;;  %v5552_v45 = vld [vmem:[#allocation3 + $0x80] sm:$0xff] }
 0x4cc   : > { %v8998_v30 = vpop.f32.mrf.mxu1 }
 0x4cd   : > { %v9051_v4 = vpop.f32.mrf.mxu0  ;;  %5814 = vst.msk [vmem:[#allocation3] sm:$0xff] %vm1230_vm2, %v5782_v52  ;;  %v5785_v6 = vadd.f32 %v8998_v30, %v5539_v10  ;;  %v5555_v10 = vld [vmem:[#allocation3 + $0x98] sm:$0xff] }
 0x4ce   : > { %v7616_v59 = vadd.f32 %v9051_v4, %v17843_v34  ;;  %v5658_v2 = vpop.f32.mrf.mxu1 }
 0x4cf   : > { %v7607_v18 = vpop.f32.mrf.mxu0  ;;  %5817 = vst.msk [vmem:[#allocation3 + $0x18] sm:$0xff] %vm1230_vm2, %v5785_v6  ;;  %v5783_v44 = vadd.f32 %v5658_v2, %v5537_v36  ;;  %v5553_v36 = vld [vmem:[#allocation3 + $0x88] sm:$0xff] }
 0x4d0   : > { %v7608_v56 = vadd.f32 %v17843_v34, %v7607_v18  ;;  %v7688_v47 = vmax.f32 %v7616_v59, 0.0 }
 0x4d1   : > { %v9052_v19 = vpop.f32.mrf.mxu0  ;;  %5815 = vst.msk [vmem:[#allocation3 + $0x8] sm:$0xff] %vm1230_vm2, %v5783_v44 }
 0x4d2   : > { %v7619_v23 = vadd.f32 %v9052_v19, %v17843_v34  ;;  %v7686_v11 = vmax.f32 %v7608_v56, 0.0  ;;  %v9001_v33 = vpop.f32.mrf.mxu1 }
 0x4d3   : > { %v7610_v0 = vpop.f32.mrf.mxu0  ;;  %v5788_v55 = vadd.f32 %v9001_v33, %v5542_v5  ;;  %v5558_v5 = vld [vmem:[#allocation3 + $0xb0] sm:$0xff] }
 0x4d4   : > { %v7611_v31 = vadd.f32 %v17843_v34, %v7610_v0  ;;  %v7689_v58 = vmax.f32 %v7619_v23, 0.0  ;;  %v5671_v49 = vpop.f32.mrf.mxu1 }
 0x4d5   : > { %5820 = vst.msk [vmem:[#allocation3 + $0x30] sm:$0xff] %vm1230_vm2, %v5788_v55  ;;  %v5786_v28 = vadd.f32 %v5671_v49, %v5540_v25  ;;  %v5556_v25 = vld [vmem:[#allocation3 + $0xa0] sm:$0xff] }
 0x4d6   : > { %v7687_v53 = vmax.f32 %v7611_v31, 0.0  ;;  %v7711_v7 = vpack.c.bf16 %v7689_v58, %v7688_v47  ;;  %v9002_v22 = vpop.f32.mrf.mxu1 }
 0x4d7   : > { %5818 = vst.msk [vmem:[#allocation3 + $0x20] sm:$0xff] %vm1230_vm2, %v5786_v28  ;;  %v5789_v46 = vadd.f32 %v9002_v22, %v5543_v43  ;;  %v5559_v43 = vld [vmem:[#allocation3 + $0xb8] sm:$0xff] }
 0x4d8   : > { %v7710_v13 = vpack.c.bf16 %v7687_v53, %v7686_v11  ;;  %v5674_v3 = vpop.f32.mrf.mxu1 }
 0x4d9   : > { %5821 = vst.msk [vmem:[#allocation3 + $0x38] sm:$0xff] %vm1230_vm2, %v5789_v46  ;;  %v5787_v54 = vadd.f32 %v5674_v3, %v5541_v12  ;;  %v5557_v12 = vld [vmem:[#allocation3 + $0xa8] sm:$0xff] }
 0x4da   : > { %9083 = vmatprep.mubr.msk.bf16.mxu1 %vm1230_vm2, %v7710_v13 }
 0x4db   : > { %9084 = vmatmul.mubr.msk.bf16.gmra.mxu1 %vm1230_vm2, %v7711_v7  ;;  %5819 = vst.msk [vmem:[#allocation3 + $0x28] sm:$0xff] %vm1230_vm2, %v5787_v54 }
 0x4dc   : > { %v9005_v9 = vpop.f32.mrf.mxu1 }
 0x4dd   : > { %v5792_v40 = vadd.f32 %v9005_v9, %v5546_v48  ;;  %v5562_v48 = vld [vmem:[#allocation3 + $0xd0] sm:$0xff] }
 0x4de   : > { %v5687_v1 = vpop.f32.mrf.mxu1 }
 0x4df   : > { %5824 = vst.msk [vmem:[#allocation3 + $0x50] sm:$0xff] %vm1230_vm2, %v5792_v40  ;;  %v5790_v41 = vadd.f32 %v5687_v1, %v5544_v63  ;;  %v5560_v63 = vld [vmem:[#allocation3 + $0xc0] sm:$0xff] }
 0x4e0   : > { %v9006_v27 = vpop.f32.mrf.mxu1 }
 0x4e1   : > { %5822 = vst.msk [vmem:[#allocation3 + $0x40] sm:$0xff] %vm1230_vm2, %v5790_v41  ;;  %v5793_v29 = vadd.f32 %v9006_v27, %v5547_v38  ;;  %v5563_v38 = vld [vmem:[#allocation3 + $0xd8] sm:$0xff] }
 0x4e2   : > { %v5690_v32 = vpop.f32.mrf.mxu1 }
 0x4e3   : > { %5825 = vst.msk [vmem:[#allocation3 + $0x58] sm:$0xff] %vm1230_vm2, %v5793_v29  ;;  %v5791_v60 = vadd.f32 %v5690_v32, %v5545_v50  ;;  %v5561_v50 = vld [vmem:[#allocation3 + $0xc8] sm:$0xff] }
 0x4e5   : > { %v9009_v57 = vpop.f32.mrf.mxu1  ;;  %5823 = vst.msk [vmem:[#allocation3 + $0x48] sm:$0xff] %vm1230_vm2, %v5791_v60 }
 0x4e6   : > { %v5796_v20 = vadd.f32 %v9009_v57, %v5550_v35  ;;  %v5566_v35 = vld [vmem:[#allocation3 + $0xf0] sm:$0xff] }
 0x4e7   : > { %v5703_v21 = vpop.f32.mrf.mxu1 }
 0x4e8   : > { %5828 = vst.msk [vmem:[#allocation3 + $0x70] sm:$0xff] %vm1230_vm2, %v5796_v20  ;;  %v5794_v16 = vadd.f32 %v5703_v21, %v5548_v8  ;;  %v5564_v8 = vld [vmem:[#allocation3 + $0xe0] sm:$0xff] }
 0x4e9   : > { %v9010_v39 = vpop.f32.mrf.mxu1 }
 0x4ea   : > { %5826 = vst.msk [vmem:[#allocation3 + $0x60] sm:$0xff] %vm1230_vm2, %v5794_v16  ;;  %v5797_v61 = vadd.f32 %v9010_v39, %v5551_v26  ;;  %v5567_v26 = vld [vmem:[#allocation3 + $0xf8] sm:$0xff] }
 0x4eb   : > { %v5706_v17 = vpop.f32.mrf.mxu1 }
 0x4ec   : > { %5829 = vst.msk [vmem:[#allocation3 + $0x78] sm:$0xff] %vm1230_vm2, %v5797_v61  ;;  %v5795_v4 = vadd.f32 %v5706_v17, %v5549_v51  ;;  %v5565_v51 = vld [vmem:[#allocation3 + $0xe8] sm:$0xff] }
 0x4ed   : > { %v9055_v14 = vpop.f32.mrf.mxu0 }
 0x4ee   : > { %v9013_v62 = vpop.f32.mrf.mxu1  ;;  %5827 = vst.msk [vmem:[#allocation3 + $0x68] sm:$0xff] %vm1230_vm2, %v5795_v4  ;;  %v7632_v59 = vadd.f32 %v9055_v14, %v17843_v34 }
 0x4ef   : > { %v7623_v18 = vpop.f32.mrf.mxu0  ;;  %v5800_v42 = vadd.f32 %v9013_v62, %v5554_v24 }
 0x4f0   : > { %v7624_v56 = vadd.f32 %v17843_v34, %v7623_v18  ;;  %v5719_v15 = vpop.f32.mrf.mxu1  ;;  %v7692_v47 = vmax.f32 %v7632_v59, 0.0 }
 0x4f1   : > { %v9056_v19 = vpop.f32.mrf.mxu0  ;;  %5832 = vst.msk [vmem:[#allocation3 + $0x90] sm:$0xff] %vm1230_vm2, %v5800_v42  ;;  %v5798_v52 = vadd.f32 %v5719_v15, %v5552_v45 }
 0x4f2   : > { %v7635_v23 = vadd.f32 %v9056_v19, %v17843_v34  ;;  %v9014_v30 = vpop.f32.mrf.mxu1  ;;  %v7690_v11 = vmax.f32 %v7624_v56, 0.0 }
 0x4f3   : > { %v7626_v0 = vpop.f32.mrf.mxu0  ;;  %5830 = vst.msk [vmem:[#allocation3 + $0x80] sm:$0xff] %vm1230_vm2, %v5798_v52  ;;  %v5801_v6 = vadd.f32 %v9014_v30, %v5555_v10  ;;  %v7720_v10 = vld [vmem:[#allocation3 + $0x10] sm:$0xff] }
 0x4f4   : > { %v7627_v31 = vadd.f32 %v17843_v34, %v7626_v0  ;;  %v7693_v58 = vmax.f32 %v7635_v23, 0.0  ;;  %v5722_v2 = vpop.f32.mrf.mxu1 }
 0x4f5   : > { %5833 = vst.msk [vmem:[#allocation3 + $0x98] sm:$0xff] %vm1230_vm2, %v5801_v6  ;;  %v5799_v44 = vadd.f32 %v5722_v2, %v5553_v36  ;;  %v7718_v6 = vld [vmem:[#allocation3] sm:$0xff]  ;;  %v7721_v36 = vld [vmem:[#allocation3 + $0x18] sm:$0xff] }
 0x4f6   : > { %v7691_v53 = vmax.f32 %v7627_v31, 0.0  ;;  %v7713_v7 = vpack.c.bf16 %v7693_v58, %v7692_v47 }
 0x4f7   : > { %v9017_v33 = vpop.f32.mrf.mxu1  ;;  %5831 = vst.msk [vmem:[#allocation3 + $0x88] sm:$0xff] %vm1230_vm2, %v5799_v44  ;;  %v7719_v44 = vld [vmem:[#allocation3 + $0x8] sm:$0xff] }
 0x4f8   : > { %v7712_v13 = vpack.c.bf16 %v7691_v53, %v7690_v11  ;;  %v5804_v55 = vadd.f32 %v9017_v33, %v5558_v5 }
 0x4f9   : > { %v5735_v49 = vpop.f32.mrf.mxu1 }
 0x4fa   : > { %9087 = vmatprep.mubr.msk.bf16.mxu1 %vm1230_vm2, %v7712_v13  ;;  %5836 = vst.msk [vmem:[#allocation3 + $0xb0] sm:$0xff] %vm1230_vm2, %v5804_v55  ;;  %v5802_v28 = vadd.f32 %v5735_v49, %v5556_v25 }
 0x4fb   : > { %9088 = vmatmul.mubr.msk.bf16.gmra.mxu1 %vm1230_vm2, %v7713_v7  ;;  %v9018_v22 = vpop.f32.mrf.mxu1 }
 0x4fc   : > { %5834 = vst.msk [vmem:[#allocation3 + $0xa0] sm:$0xff] %vm1230_vm2, %v5802_v28  ;;  %v5805_v46 = vadd.f32 %v9018_v22, %v5559_v43 }
 0x4fd   : > { %v5738_v3 = vpop.f32.mrf.mxu1 }
 0x4fe   : > { %5837 = vst.msk [vmem:[#allocation3 + $0xb8] sm:$0xff] %vm1230_vm2, %v5805_v46  ;;  %v5803_v54 = vadd.f32 %v5738_v3, %v5557_v12 }
 0x4ff   : > { %v9021_v9 = vpop.f32.mrf.mxu1 }
 0x500   : > { %5835 = vst.msk [vmem:[#allocation3 + $0xa8] sm:$0xff] %vm1230_vm2, %v5803_v54  ;;  %v5808_v40 = vadd.f32 %v9021_v9, %v5562_v48 }
 0x501   : > { %v5751_v1 = vpop.f32.mrf.mxu1 }
 0x502   : > { %5840 = vst.msk [vmem:[#allocation3 + $0xd0] sm:$0xff] %vm1230_vm2, %v5808_v40  ;;  %v5806_v41 = vadd.f32 %v5751_v1, %v5560_v63  ;;  %v8101_v63 = vld [vmem:[%s18130_s5 + $0x4] sm:$0x1] }
 0x503   : > { %v9022_v27 = vpop.f32.mrf.mxu1 }
 0x504   : > { %5838 = vst.msk [vmem:[#allocation3 + $0xc0] sm:$0xff] %vm1230_vm2, %v5806_v41  ;;  %v5809_v29 = vadd.f32 %v9022_v27, %v5563_v38 }
 0x505   : > { %v5754_v32 = vpop.f32.mrf.mxu1 }
 0x506   : > { %5841 = vst.msk [vmem:[#allocation3 + $0xd8] sm:$0xff] %vm1230_vm2, %v5809_v29  ;;  %v5807_v60 = vadd.f32 %v5754_v32, %v5561_v50  ;;  %v7722_v50 = vld [vmem:[#allocation3 + $0x20] sm:$0xff] }
 0x507   : > { %v9025_v57 = vpop.f32.mrf.mxu1 }
 0x508   : > { %5839 = vst.msk [vmem:[#allocation3 + $0xc8] sm:$0xff] %vm1230_vm2, %v5807_v60  ;;  %v5812_v20 = vadd.f32 %v9025_v57, %v5566_v35  ;;  %v7725_v35 = vld [vmem:[#allocation3 + $0x38] sm:$0xff] }
 0x509   : > { %v5767_v21 = vpop.f32.mrf.mxu1 }
 0x50a   : > { %5844 = vst.msk [vmem:[#allocation3 + $0xf0] sm:$0xff] %vm1230_vm2, %v5812_v20  ;;  %v5810_v16 = vadd.f32 %v5767_v21, %v5564_v8  ;;  %v7723_v8 = vld [vmem:[#allocation3 + $0x28] sm:$0xff] }
 0x50b   : > { %v9026_v39 = vpop.f32.mrf.mxu1 }
 0x50c   : > { %5842 = vst.msk [vmem:[#allocation3 + $0xe0] sm:$0xff] %vm1230_vm2, %v5810_v16  ;;  %v5813_v61 = vadd.f32 %v9026_v39, %v5567_v26  ;;  %v7728_v16 = vld [vmem:[#allocation3 + $0x50] sm:$0xff] }
 0x50d   : > { %v9059_v14 = vpop.f32.mrf.mxu0  ;;  %v5770_v17 = vpop.f32.mrf.mxu1 }
 0x50e   : > { %5845 = vst.msk [vmem:[#allocation3 + $0xf8] sm:$0xff] %vm1230_vm2, %v5813_v61  ;;  %v5811_v4 = vadd.f32 %v5770_v17, %v5565_v51  ;;  %v7648_v19 = vadd.f32 %v9059_v14, %v17843_v34  ;;  %v7726_v61 = vld [vmem:[#allocation3 + $0x40] sm:$0xff]  ;;  %v7729_v17 = vld [vmem:[#allocation3 + $0x58] sm:$0xff] }
 0x50f   : > { %v7639_v18 = vpop.f32.mrf.mxu0 }
 0x510   : > { %5843 = vst.msk [vmem:[#allocation3 + $0xe8] sm:$0xff] %vm1230_vm2, %v5811_v4  ;;  %v7640_v62 = vadd.f32 %v17843_v34, %v7639_v18  ;;  %v7696_v52 = vmax.f32 %v7648_v19, 0.0  ;;  %v7732_v19 = vld [vmem:[#allocation3 + $0x70] sm:$0xff] }
 0x511   : > { %v9060_v24 = vpop.f32.mrf.mxu0 }
 0x512   : > { %v7651_v42 = vadd.f32 %v9060_v24, %v17843_v34  ;;  %v7694_v15 = vmax.f32 %v7640_v62, 0.0  ;;  %v7727_v24 = vld [vmem:[#allocation3 + $0x48] sm:$0xff] }
 0x513   : > { %v7642_v56 = vpop.f32.mrf.mxu0 }
 0x514   : > { %v7643_v23 = vadd.f32 %v17843_v34, %v7642_v56  ;;  %v7697_v45 = vmax.f32 %v7651_v42, 0.0 }
 0x516   : > { %v7695_v59 = vmax.f32 %v7643_v23, 0.0  ;;  %v7715_v31 = vpack.c.bf16 %v7697_v45, %v7696_v52  ;;  %v7730_v45 = vld [vmem:[#allocation3 + $0x60] sm:$0xff]  ;;  %v7733_v52 = vld [vmem:[#allocation3 + $0x78] sm:$0xff] }
 0x518   : > { %v7714_v0 = vpack.c.bf16 %v7695_v59, %v7694_v15  ;;  %v9069_v30 = vpop.f32.mrf.mxu1 }
 0x519   : > { %v7966_v58 = vadd.f32 %v9069_v30, %v7720_v10  ;;  %v7731_v10 = vld [vmem:[#allocation3 + $0x68] sm:$0xff] }
 0x51a   : > { %9091 = vmatprep.mubr.msk.bf16.mxu1 %vm1230_vm2, %v7714_v0  ;;  %v7837_v11 = vpop.f32.mrf.mxu1 }
 0x51b   : > { %9092 = vmatmul.mubr.msk.bf16.gmra.mxu1 %vm1230_vm2, %v7715_v31  ;;  %7998 = vst.msk [vmem:[#allocation3 + $0x10] sm:$0xff] %vm1230_vm2, %v7966_v58  ;;  %v7964_v53 = vadd.f32 %v7837_v11, %v7718_v6  ;;  %v7736_v6 = vld [vmem:[#allocation3 + $0x90] sm:$0xff] }
 0x51c   : > { %v9070_v2 = vpop.f32.mrf.mxu1 }
 0x51d   : > { %7996 = vst.msk [vmem:[#allocation3] sm:$0xff] %vm1230_vm2, %v7964_v53  ;;  %v7967_v47 = vadd.f32 %v9070_v2, %v7721_v36  ;;  %v7734_v36 = vld [vmem:[#allocation3 + $0x80] sm:$0xff] }
 0x51e   : > { %v7840_v13 = vpop.f32.mrf.mxu1 }
 0x51f   : > { %7999 = vst.msk [vmem:[#allocation3 + $0x18] sm:$0xff] %vm1230_vm2, %v7967_v47  ;;  %v7965_v5 = vadd.f32 %v7840_v13, %v7719_v44  ;;  %v7737_v44 = vld [vmem:[#allocation3 + $0x98] sm:$0xff] }
 0x521   : > { %7997 = vst.msk [vmem:[#allocation3 + $0x8] sm:$0xff] %vm1230_vm2, %v7965_v5 }
 0x52a   : > { %v9063_v33 = vpop.f32.mrf.mxu0 }
 0x52b   : > { %v7664_v28 = vadd.f32 %v9063_v33, %v17843_v34  ;;  %v7735_v33 = vld [vmem:[#allocation3 + $0x88] sm:$0xff] }
 0x52c   : > { %v7655_v7 = vpop.f32.mrf.mxu0 }
 0x52d   : > { %v7656_v25 = vadd.f32 %v17843_v34, %v7655_v7  ;;  %v7700_v48 = vmax.f32 %v7664_v28, 0.0 }
 0x52e   : > { %v9064_v55 = vpop.f32.mrf.mxu0 }
 0x52f   : > { %v7667_v49 = vadd.f32 %v9064_v55, %v17843_v34  ;;  %v7698_v3 = vmax.f32 %v7656_v25, 0.0  ;;  %v7740_v25 = vld [vmem:[#allocation3 + $0xb0] sm:$0xff] }
 0x530   : > { %v7658_v43 = vpop.f32.mrf.mxu0 }
 0x531   : > { %v7659_v22 = vadd.f32 %v17843_v34, %v7658_v43  ;;  %v7701_v46 = vmax.f32 %v7667_v49, 0.0  ;;  %v7724_v34 = vld [vmem:[#allocation3 + $0x30] sm:$0xff]  ;;  %v7738_v43 = vld [vmem:[#allocation3 + $0xa0] sm:$0xff] }
 0x532   : > { %v8174_v12 = vpop.f32.mrf.mxu0 }
 0x533   : > { %v7699_v54 = vmax.f32 %v7659_v22, 0.0  ;;  %v7717_v1 = vpack.c.bf16 %v7701_v46, %v7700_v48  ;;  %v8175_v41 = vadd.f32 %v8174_v12, %v8101_v63  ;;  %v7741_v12 = vld [vmem:[#allocation3 + $0xb8] sm:$0xff]  ;;  %v7739_v48 = vld [vmem:[#allocation3 + $0xa8] sm:$0xff]  ;;  %v7744_v63 = vld [vmem:[#allocation3 + $0xd0] sm:$0xff] }
 0x534   : > { %v9103_v9 = vpop.f32.mrf.mxu0 }
 0x535   : > { %v7716_v40 = vpack.c.bf16 %v7699_v54, %v7698_v3  ;;  %v8178_v29 = vmax.f32 %v8175_v41, 0.0 }
 0x537   : > { %9095 = vmatprep.mubr.msk.bf16.mxu1 %vm1230_vm2, %v7716_v40 }
 0x538   : > { %9096 = vmatmul.mubr.msk.bf16.gmra.mxu1 %vm1230_vm2, %v7717_v1  ;;  %v9073_v38 = vpop.f32.mrf.mxu1 }
 0x539   : > { %9106 = vmatprep.mubr.msk.f32.mxu1 %vm11105_vm12, %v19425_v37  ;;  %v7970_v27 = vadd.f32 %v9073_v38, %v7724_v34  ;;  %v7742_v34 = vld [vmem:[#allocation3 + $0xc0] sm:$0xff] }
 0x53a   : > { %v7853_v32 = vpop.f32.mrf.mxu1 }
 0x53b   : > { %8002 = vst.msk [vmem:[#allocation3 + $0x30] sm:$0xff] %vm1230_vm2, %v7970_v27  ;;  %v7968_v60 = vadd.f32 %v7853_v32, %v7722_v50 }
 0x53c   : > { %v9074_v57 = vpop.f32.mrf.mxu1 }
 0x53d   : > { %8000 = vst.msk [vmem:[#allocation3 + $0x20] sm:$0xff] %vm1230_vm2, %v7968_v60  ;;  %v7971_v20 = vadd.f32 %v9074_v57, %v7725_v35  ;;  %v7743_v60 = vld [vmem:[#allocation3 + $0xc8] sm:$0xff] }
 0x53e   : > { %v7856_v21 = vpop.f32.mrf.mxu1 }
 0x53f   : > { %8003 = vst.msk [vmem:[#allocation3 + $0x38] sm:$0xff] %vm1230_vm2, %v7971_v20  ;;  %v7969_v37 = vadd.f32 %v7856_v21, %v7723_v8  ;;  %v8289_v20 = vlaneseq  ;;  %v7748_v8 = vld [vmem:[#allocation3 + $0xf0] sm:$0xff] }
 0x540   : > { %9107 = vmatmul.mubr.msk.f32.vlgmr.msra.gmra.mxu1 %vm1230_vm2, %v8178_v29  ;;  %v7745_v29 = vld [vmem:[#allocation3 + $0xd8] sm:$0xff] }
 0x541   : > { %8001 = vst.msk [vmem:[#allocation3 + $0x28] sm:$0xff] %vm1230_vm2, %v7969_v37 }
 0x559   : > { %v9077_v26 = vpop.f32.mrf.mxu1 }
 0x55a   : > { %v7974_v39 = vadd.f32 %v9077_v26, %v7728_v16  ;;  %v8290_v16 = vshrl.u32 %v8289_v20, 7  ;;  %v7746_v26 = vld [vmem:[#allocation3 + $0xe0] sm:$0xff] }
 0x55b   : > { %v7869_v14 = vpop.f32.mrf.mxu1 }
 0x55c   : > { %8006 = vst.msk [vmem:[#allocation3 + $0x50] sm:$0xff] %vm1230_vm2, %v7974_v39  ;;  %v7972_v51 = vadd.f32 %v7869_v14, %v7726_v61  ;;  %v7749_v14 = vld [vmem:[#allocation3 + $0xf8] sm:$0xff] }
 0x55d   : > { %v9078_v4 = vpop.f32.mrf.mxu1 }
 0x55e   : > { %8004 = vst.msk [vmem:[#allocation3 + $0x40] sm:$0xff] %vm1230_vm2, %v7972_v51  ;;  %v7975_v18 = vadd.f32 %v9078_v4, %v7729_v17  ;;  %v8291_v4 = vsub.s32 0, %v8290_v16 }
 0x55f   : > { %v7872_v62 = vpop.f32.mrf.mxu1 }
 0x560   : > { %8007 = vst.msk [vmem:[#allocation3 + $0x58] sm:$0xff] %vm1230_vm2, %v7975_v18  ;;  %v7973_v42 = vadd.f32 %v7872_v62, %v7727_v24  ;;  %v7747_v18 = vld [vmem:[#allocation3 + $0xe8] sm:$0xff] }
 0x562   : > { %8005 = vst.msk [vmem:[#allocation3 + $0x48] sm:$0xff] %vm1230_vm2, %v7973_v42  ;;  %v8259_v42 = vld [vmem:[#allocation3 + $0x10] sm:$0xff] }
 0x57b   : > { %v9081_v56 = vpop.f32.mrf.mxu1 }
 0x57c   : > { %v7978_v23 = vadd.f32 %v9081_v56, %v7732_v19  ;;  %v8257_v19 = vld [vmem:[#allocation3] sm:$0xff]  ;;  %v8260_v56 = vld [vmem:[#allocation3 + $0x18] sm:$0xff] }
 0x57d   : > { %v7885_v15 = vpop.f32.mrf.mxu1 }
 0x57e   : > { %8010 = vst.msk [vmem:[#allocation3 + $0x70] sm:$0xff] %vm1230_vm2, %v7978_v23  ;;  %v7976_v59 = vadd.f32 %v7885_v15, %v7730_v45  ;;  %v8258_v23 = vld [vmem:[#allocation3 + $0x8] sm:$0xff]  ;;  %v8263_v15 = vld [vmem:[#allocation3 + $0x30] sm:$0xff] }
 0x57f   : > { %v9082_v0 = vpop.f32.mrf.mxu1 }
 0x580   : > { %8008 = vst.msk [vmem:[#allocation3 + $0x60] sm:$0xff] %vm1230_vm2, %v7976_v59  ;;  %v7979_v31 = vadd.f32 %v9082_v0, %v7733_v52  ;;  %v8261_v59 = vld [vmem:[#allocation3 + $0x20] sm:$0xff]  ;;  %v8264_v52 = vld [vmem:[#allocation3 + $0x38] sm:$0xff]  ;;  %v8262_v0 = vld [vmem:[#allocation3 + $0x28] sm:$0xff] }
 0x581   : > { %v7888_v30 = vpop.f32.mrf.mxu1 }
 0x582   : > { %8011 = vst.msk [vmem:[#allocation3 + $0x78] sm:$0xff] %vm1230_vm2, %v7979_v31  ;;  %v7977_v58 = vadd.f32 %v7888_v30, %v7731_v10  ;;  %v8267_v10 = vld [vmem:[#allocation3 + $0x50] sm:$0xff]  ;;  %v8265_v30 = vld [vmem:[#allocation3 + $0x40] sm:$0xff] }
 0x584   : > { %8009 = vst.msk [vmem:[#allocation3 + $0x68] sm:$0xff] %vm1230_vm2, %v7977_v58  ;;  %v8268_v58 = vld [vmem:[#allocation3 + $0x58] sm:$0xff] }
 0x59b   : > { %v9085_v11 = vpop.f32.mrf.mxu1 }
 0x59c   : > { %v7982_v53 = vadd.f32 %v9085_v11, %v7736_v6  ;;  %v8266_v6 = vld [vmem:[#allocation3 + $0x48] sm:$0xff] }
 0x59d   : > { %v7901_v2 = vpop.f32.mrf.mxu1 }
 0x59e   : > { %8014 = vst.msk [vmem:[#allocation3 + $0x90] sm:$0xff] %vm1230_vm2, %v7982_v53  ;;  %v7980_v47 = vadd.f32 %v7901_v2, %v7734_v36  ;;  %v8271_v53 = vld [vmem:[#allocation3 + $0x70] sm:$0xff]  ;;  %v8269_v36 = vld [vmem:[#allocation3 + $0x60] sm:$0xff]  ;;  %v8272_v2 = vld [vmem:[#allocation3 + $0x78] sm:$0xff] }
 0x59f   : > { %v9086_v13 = vpop.f32.mrf.mxu1 }
 0x5a0   : > { %8012 = vst.msk [vmem:[#allocation3 + $0x80] sm:$0xff] %vm1230_vm2, %v7980_v47  ;;  %v7983_v5 = vadd.f32 %v9086_v13, %v7737_v44  ;;  %v8270_v47 = vld [vmem:[#allocation3 + $0x68] sm:$0xff] }
 0x5a1   : > { %v7904_v7 = vpop.f32.mrf.mxu1 }
 0x5a2   : > { %8015 = vst.msk [vmem:[#allocation3 + $0x98] sm:$0xff] %vm1230_vm2, %v7983_v5  ;;  %v7981_v55 = vadd.f32 %v7904_v7, %v7735_v33 }
 0x5a4   : > { %8013 = vst.msk [vmem:[#allocation3 + $0x88] sm:$0xff] %vm1230_vm2, %v7981_v55 }
 0x5a5   : > { %v8275_v7 = vld [vmem:[#allocation3 + $0x90] sm:$0xff] }
 0x5a7   : > { %v8273_v55 = vld [vmem:[#allocation3 + $0x80] sm:$0xff] }
 0x5bb   : > { %v9089_v49 = vpop.f32.mrf.mxu1 }
 0x5bc   : > { %v7986_v28 = vadd.f32 %v9089_v49, %v7740_v25  ;;  %v8276_v25 = vld [vmem:[#allocation3 + $0x98] sm:$0xff]  ;;  %v8274_v49 = vld [vmem:[#allocation3 + $0x88] sm:$0xff] }
 0x5bd   : > { %v7917_v22 = vpop.f32.mrf.mxu1 }
 0x5be   : > { %8018 = vst.msk [vmem:[#allocation3 + $0xb0] sm:$0xff] %vm1230_vm2, %v7986_v28  ;;  %v7984_v46 = vadd.f32 %v7917_v22, %v7738_v43 }
 0x5bf   : > { %v9090_v3 = vpop.f32.mrf.mxu1 }
 0x5c0   : > { %8016 = vst.msk [vmem:[#allocation3 + $0xa0] sm:$0xff] %vm1230_vm2, %v7984_v46  ;;  %v7987_v54 = vadd.f32 %v9090_v3, %v7741_v12 }
 0x5c1   : > { %v7920_v9 = vpop.f32.mrf.mxu1 }
 0x5c2   : > { %8019 = vst.msk [vmem:[#allocation3 + $0xb8] sm:$0xff] %vm1230_vm2, %v7987_v54  ;;  %v7985_v40 = vadd.f32 %v7920_v9, %v7739_v48 }
 0x5c4   : > { %8017 = vst.msk [vmem:[#allocation3 + $0xa8] sm:$0xff] %vm1230_vm2, %v7985_v40 }
 0x5c5   : > { %v8279_v12 = vld [vmem:[#allocation3 + $0xb0] sm:$0xff] }
 0x5c7   : > { %v8277_v3 = vld [vmem:[#allocation3 + $0xa0] sm:$0xff] }
 0x5c9   : > { %v8280_v54 = vld [vmem:[#allocation3 + $0xb8] sm:$0xff] }
 0x5db   : > { %v9093_v1 = vpop.f32.mrf.mxu1 }
 0x5dc   : > { %v7990_v41 = vadd.f32 %v9093_v1, %v7744_v63  ;;  %v8278_v1 = vld [vmem:[#allocation3 + $0xa8] sm:$0xff] }
 0x5dd   : > { %v7933_v38 = vpop.f32.mrf.mxu1 }
 0x5de   : > { %8022 = vst.msk [vmem:[#allocation3 + $0xd0] sm:$0xff] %vm1230_vm2, %v7990_v41  ;;  %v7988_v27 = vadd.f32 %v7933_v38, %v7742_v34 }
 0x5df   : > { %v9094_v50 = vpop.f32.mrf.mxu1 }
 0x5e0   : > { %8020 = vst.msk [vmem:[#allocation3 + $0xc0] sm:$0xff] %vm1230_vm2, %v7988_v27  ;;  %v7991_v32 = vadd.f32 %v9094_v50, %v7745_v29 }
 0x5e1   : > { %v7936_v35 = vpop.f32.mrf.mxu1 }
 0x5e2   : > { %8023 = vst.msk [vmem:[#allocation3 + $0xd8] sm:$0xff] %vm1230_vm2, %v7991_v32  ;;  %v7989_v57 = vadd.f32 %v7936_v35, %v7743_v60  ;;  %v8664_v32 = vld [vmem:[%s18130_s5 + $0x5] ss:$0 sm:$0xff] }
 0x5e4   : > { %8021 = vst.msk [vmem:[#allocation3 + $0xc8] sm:$0xff] %vm1230_vm2, %v7989_v57 }
 0x5e5   : > { %v8283_v41 = vld [vmem:[#allocation3 + $0xd0] sm:$0xff] }
 0x5e7   : > { %v8281_v34 = vld [vmem:[#allocation3 + $0xc0] sm:$0xff] }
 0x5e9   : > { %v8284_v16 = vld [vmem:[#allocation3 + $0xd8] sm:$0xff] }
 0x5f8   : > { %v9097_v21 = vpop.f32.mrf.mxu1 }
 0x5f9   : > { %v7994_v37 = vadd.f32 %v9097_v21, %v7748_v8 }
 0x5fa   : > { %v7949_v39 = vpop.f32.mrf.mxu1 }
 0x5fb   : > { %8026 = vst.msk [vmem:[#allocation3 + $0xf0] sm:$0xff] %vm1230_vm2, %v7994_v37  ;;  %v7992_v61 = vadd.f32 %v7949_v39, %v7746_v26  ;;  %v8282_v26 = vld [vmem:[#allocation3 + $0xc8] sm:$0xff] }
 0x5fc   : > { %v9098_v51 = vpop.f32.mrf.mxu1 }
 0x5fd   : > { %8024 = vst.msk [vmem:[#allocation3 + $0xe0] sm:$0xff] %vm1230_vm2, %v7992_v61  ;;  %v7995_v17 = vadd.f32 %v9098_v51, %v7749_v14 }
 0x5fe   : > { %v7952_v24 = vpop.f32.mrf.mxu1 }
 0x5ff   : > { %8027 = vst.msk [vmem:[#allocation3 + $0xf8] sm:$0xff] %vm1230_vm2, %v7995_v17  ;;  %v7993_v62 = vadd.f32 %v7952_v24, %v7747_v18 }
 0x600   : > { %v8253_v45 = vpop.f32.mrf.mxu1 }
 0x601   : > { %8025 = vst.msk [vmem:[#allocation3 + $0xe8] sm:$0xff] %vm1230_vm2, %v7993_v62  ;;  %v8292_v31 = vrot.slane %v8253_v45, %v8291_v4 }
 0x602   : > { %v9108_v11 = vpop.f32.mrf.mxu1  ;;  %v8287_v60 = vld [vmem:[#allocation3 + $0xf0] sm:$0xff] }
 0x603   : > { %v8293_v44 = vadd.f32 %v8292_v31, %v8257_v19  ;;  %v8294_v13 = vadd.f32 %v8292_v31, %v8258_v23  ;;  %v8295_v5 = vadd.f32 %v8292_v31, %v8259_v42  ;;  %v8296_v33 = vadd.f32 %v8292_v31, %v8260_v56 }
 0x604   : > { %v8297_v28 = vadd.f32 %v8292_v31, %v8261_v59  ;;  %v8298_v43 = vadd.f32 %v8292_v31, %v8262_v0  ;;  %v8299_v22 = vadd.f32 %v8292_v31, %v8263_v15  ;;  %v8300_v46 = vadd.f32 %v8292_v31, %v8264_v52  ;;  %v8285_v35 = vld [vmem:[#allocation3 + $0xe0] sm:$0xff] }
 0x605   : > { %v8301_v48 = vadd.f32 %v8292_v31, %v8265_v30  ;;  %v8302_v9 = vadd.f32 %v8292_v31, %v8266_v6  ;;  %v8303_v40 = vadd.f32 %v8292_v31, %v8267_v10  ;;  %v8304_v63 = vadd.f32 %v8292_v31, %v8268_v58 }
 0x606   : > { %v8305_v38 = vadd.f32 %v8292_v31, %v8269_v36  ;;  %v8306_v27 = vadd.f32 %v8292_v31, %v8270_v47  ;;  %v8307_v29 = vadd.f32 %v8292_v31, %v8271_v53  ;;  %v8308_v50 = vadd.f32 %v8292_v31, %v8272_v2  ;;  %v8288_v57 = vld [vmem:[#allocation3 + $0xf8] sm:$0xff] }
 0x607   : > { %v8309_v20 = vadd.f32 %v8292_v31, %v8273_v55  ;;  %v8310_v8 = vadd.f32 %v8292_v31, %v8274_v49  ;;  %v8311_v21 = vadd.f32 %v8292_v31, %v8275_v7  ;;  %v8312_v37 = vadd.f32 %v8292_v31, %v8276_v25 }
 0x608   : > { %v8286_v39 = vld [vmem:[#allocation3 + $0xe8] sm:$0xff]  ;;  %v8313_v61 = vadd.f32 %v8292_v31, %v8277_v3  ;;  %v8314_v14 = vadd.f32 %v8292_v31, %v8278_v1  ;;  %v8315_v51 = vadd.f32 %v8292_v31, %v8279_v12  ;;  %v8316_v17 = vadd.f32 %v8292_v31, %v8280_v54 }
 0x609   : > { %v8317_v4 = vadd.f32 %v8292_v31, %v8281_v34  ;;  %v8318_v18 = vadd.f32 %v8292_v31, %v8282_v26  ;;  %v8319_v24 = vadd.f32 %v8292_v31, %v8283_v41  ;;  %v8320_v62 = vadd.f32 %v8292_v31, %v8284_v16 }
 0x60a   : > { %v8321_v42 = vadd.f32 %v8292_v31, %v8285_v35  ;;  %v8322_v19 = vadd.f32 %v8292_v31, %v8286_v39  ;;  %v8323_v56 = vadd.f32 %v8292_v31, %v8287_v60  ;;  %v8324_v23 = vadd.f32 %v8292_v31, %v8288_v57 }
 0x60b   : > { %v8330_v45 = vadd.f32 %v8664_v32, %v8293_v44  ;;  %v8331_v15 = vadd.f32 %v8664_v32, %v8294_v13  ;;  %v8332_v59 = vadd.f32 %v8664_v32, %v8295_v5  ;;  %v8333_v52 = vadd.f32 %v8664_v32, %v8296_v33 }
 0x60c   : > { %v8334_v0 = vadd.f32 %v8664_v32, %v8297_v28  ;;  %v8335_v10 = vadd.f32 %v8664_v32, %v8298_v43  ;;  %v8336_v30 = vadd.f32 %v8664_v32, %v8299_v22  ;;  %v8337_v58 = vadd.f32 %v8664_v32, %v8300_v46 }
 0x60d   : > { %v8338_v6 = vadd.f32 %v8664_v32, %v8301_v48  ;;  %v8339_v11 = vadd.f32 %v8664_v32, %v8302_v9  ;;  %v8340_v53 = vadd.f32 %v8664_v32, %v8303_v40  ;;  %v8341_v36 = vadd.f32 %v8664_v32, %v8304_v63 }
 0x60e   : > { %v8342_v2 = vadd.f32 %v8664_v32, %v8305_v38  ;;  %v8343_v47 = vadd.f32 %v8664_v32, %v8306_v27  ;;  %v8344_v7 = vadd.f32 %v8664_v32, %v8307_v29  ;;  %v8345_v55 = vadd.f32 %v8664_v32, %v8308_v50 }
 0x60f   : > { %v8346_v25 = vadd.f32 %v8664_v32, %v8309_v20  ;;  %v8347_v31 = vadd.f32 %v8664_v32, %v8310_v8  ;;  %v8348_v44 = vadd.f32 %v8664_v32, %v8311_v21  ;;  %v8349_v49 = vadd.f32 %v8664_v32, %v8312_v37 }
 0x610   : > { %v18017_v13 = vadd.f32 %v8664_v32, %v8313_v61  ;;  %v18019_v5 = vadd.f32 %v8664_v32, %v8314_v14  ;;  %v18021_v33 = vadd.f32 %v8664_v32, %v8315_v51  ;;  %v18023_v28 = vadd.f32 %v8664_v32, %v8316_v17 }
 0x611   : > { %v18025_v43 = vadd.f32 %v8664_v32, %v8317_v4  ;;  %v18027_v22 = vadd.f32 %v8664_v32, %v8318_v18  ;;  %v18029_v46 = vadd.f32 %v8664_v32, %v8319_v24  ;;  %v18031_v12 = vadd.f32 %v8664_v32, %v8320_v62 }
 0x612   : > { %v18038_v3 = vadd.f32 %v8664_v32, %v8321_v42  ;;  %v18040_v54 = vadd.f32 %v8664_v32, %v8322_v19  ;;  %v18042_v48 = vadd.f32 %v8664_v32, %v8323_v56  ;;  %v18044_v9 = vadd.f32 %v8664_v32, %v8324_v23 }
 0x613   : > { %v8362_v40 = vmax.f32 %v8330_v45, 0.0  ;;  %v8363_v63 = vmax.f32 %v8331_v15, 0.0  ;;  %v8364_v1 = vmax.f32 %v8332_v59, 0.0  ;;  %v8365_v41 = vmax.f32 %v8333_v52, 0.0 }
 0x614   : > { %v8366_v34 = vmax.f32 %v8334_v0, 0.0  ;;  %v8367_v38 = vmax.f32 %v8335_v10, 0.0  ;;  %v8368_v27 = vmax.f32 %v8336_v30, 0.0  ;;  %v8369_v29 = vmax.f32 %v8337_v58, 0.0 }
 0x615   : > { %v8370_v50 = vmax.f32 %v8338_v6, 0.0  ;;  %v8371_v60 = vmax.f32 %v8339_v11, 0.0  ;;  %v8372_v35 = vmax.f32 %v8340_v53, 0.0  ;;  %v8373_v57 = vmax.f32 %v8341_v36, 0.0  ;;  %8394 = vst.msk [vmem:[%s18036_s24] sm:$0xff] %vm1230_vm2, %v8362_v40  ;;  %8395 = vst.msk [vmem:[%s18036_s24 + $0x8] sm:$0xff] %vm1230_vm2, %v8363_v63 }
 0x616   : > { %8396 = vst.msk [vmem:[%s18036_s24 + $0x10] sm:$0xff] %vm1230_vm2, %v8364_v1  ;;  %8397 = vst.msk [vmem:[%s18036_s24 + $0x18] sm:$0xff] %vm1230_vm2, %v8365_v41  ;;  %v8374_v32 = vmax.f32 %v8342_v2, 0.0  ;;  %v8375_v20 = vmax.f32 %v8343_v47, 0.0  ;;  %v8376_v8 = vmax.f32 %v8344_v7, 0.0  ;;  %v8377_v21 = vmax.f32 %v8345_v55, 0.0 }
 0x617   : > { %8398 = vst.msk [vmem:[%s18036_s24 + $0x20] sm:$0xff] %vm1230_vm2, %v8366_v34  ;;  %8399 = vst.msk [vmem:[%s18036_s24 + $0x28] sm:$0xff] %vm1230_vm2, %v8367_v38  ;;  %v8378_v37 = vmax.f32 %v8346_v25, 0.0  ;;  %v8379_v16 = vmax.f32 %v8347_v31, 0.0  ;;  %v8380_v26 = vmax.f32 %v8348_v44, 0.0  ;;  %v8381_v39 = vmax.f32 %v8349_v49, 0.0 }
 0x618   : > { %8400 = vst.msk [vmem:[%s18036_s24 + $0x30] sm:$0xff] %vm1230_vm2, %v8368_v27  ;;  %8401 = vst.msk [vmem:[%s18036_s24 + $0x38] sm:$0xff] %vm1230_vm2, %v8369_v29  ;;  %v8382_v61 = vmax.f32 %v18017_v13, 0.0  ;;  %v8383_v14 = vmax.f32 %v18019_v5, 0.0  ;;  %v8384_v51 = vmax.f32 %v18021_v33, 0.0  ;;  %v8385_v17 = vmax.f32 %v18023_v28, 0.0 }
 0x619   : > { %8402 = vst.msk [vmem:[%s18036_s24 + $0x40] sm:$0xff] %vm1230_vm2, %v8370_v50  ;;  %8403 = vst.msk [vmem:[%s18036_s24 + $0x48] sm:$0xff] %vm1230_vm2, %v8371_v60  ;;  %v8386_v4 = vmax.f32 %v18025_v43, 0.0  ;;  %v8387_v18 = vmax.f32 %v18027_v22, 0.0  ;;  %v8388_v24 = vmax.f32 %v18029_v46, 0.0  ;;  %v8389_v62 = vmax.f32 %v18031_v12, 0.0 }
 0x61a   : > { %8404 = vst.msk [vmem:[%s18036_s24 + $0x50] sm:$0xff] %vm1230_vm2, %v8372_v35  ;;  %8405 = vst.msk [vmem:[%s18036_s24 + $0x58] sm:$0xff] %vm1230_vm2, %v8373_v57  ;;  %v8390_v42 = vmax.f32 %v18038_v3, 0.0  ;;  %v8391_v19 = vmax.f32 %v18040_v54, 0.0  ;;  %v8392_v56 = vmax.f32 %v18042_v48, 0.0  ;;  %v8393_v23 = vmax.f32 %v18044_v9, 0.0 }
 0x61b   : > { %8406 = vst.msk [vmem:[%s18036_s24 + $0x60] sm:$0xff] %vm1230_vm2, %v8374_v32  ;;  %8407 = vst.msk [vmem:[%s18036_s24 + $0x68] sm:$0xff] %vm1230_vm2, %v8375_v20 }
 0x61c   : > { %8408 = vst.msk [vmem:[%s18036_s24 + $0x70] sm:$0xff] %vm1230_vm2, %v8376_v8  ;;  %8409 = vst.msk [vmem:[%s18036_s24 + $0x78] sm:$0xff] %vm1230_vm2, %v8377_v21 }
 0x61d   : > { %8410 = vst.msk [vmem:[%s18036_s24 + $0x80] sm:$0xff] %vm1230_vm2, %v8378_v37  ;;  %8411 = vst.msk [vmem:[%s18036_s24 + $0x88] sm:$0xff] %vm1230_vm2, %v8379_v16 }
 0x61e   : > { %8412 = vst.msk [vmem:[%s18036_s24 + $0x90] sm:$0xff] %vm1230_vm2, %v8380_v26  ;;  %8413 = vst.msk [vmem:[%s18036_s24 + $0x98] sm:$0xff] %vm1230_vm2, %v8381_v39 }
 0x61f   : > { %8414 = vst.msk [vmem:[%s18036_s24 + $0xa0] sm:$0xff] %vm1230_vm2, %v8382_v61  ;;  %8415 = vst.msk [vmem:[%s18036_s24 + $0xa8] sm:$0xff] %vm1230_vm2, %v8383_v14 }
 0x620   : > { %8416 = vst.msk [vmem:[%s18036_s24 + $0xb0] sm:$0xff] %vm1230_vm2, %v8384_v51  ;;  %8417 = vst.msk [vmem:[%s18036_s24 + $0xb8] sm:$0xff] %vm1230_vm2, %v8385_v17 }
 0x621   : > { %8418 = vst.msk [vmem:[%s18036_s24 + $0xc0] sm:$0xff] %vm1230_vm2, %v8386_v4  ;;  %8419 = vst.msk [vmem:[%s18036_s24 + $0xc8] sm:$0xff] %vm1230_vm2, %v8387_v18 }
 0x622   : > { %8420 = vst.msk [vmem:[%s18036_s24 + $0xd0] sm:$0xff] %vm1230_vm2, %v8388_v24  ;;  %8421 = vst.msk [vmem:[%s18036_s24 + $0xd8] sm:$0xff] %vm1230_vm2, %v8389_v62 }
 0x623   : > { %8422 = vst.msk [vmem:[%s18036_s24 + $0xe0] sm:$0xff] %vm1230_vm2, %v8390_v42  ;;  %8423 = vst.msk [vmem:[%s18036_s24 + $0xe8] sm:$0xff] %vm1230_vm2, %v8391_v19 }
 0x624   : > { %8424 = vst.msk [vmem:[%s18036_s24 + $0xf0] sm:$0xff] %vm1230_vm2, %v8392_v56  ;;  %8425 = vst.msk [vmem:[%s18036_s24 + $0xf8] sm:$0xff] %vm1230_vm2, %v8393_v23 }
 0x625 PF: > { %s16_s21 = sadd.s32 1, %s11094_s21  }
 0x626   : > { %p13_p4 = scmp.ge.s32.totalorder %s16_s21, 4  }
 0x628   :  { %15 = sbr.rel (!%p13_p4) target bundleno = 1 (0x1), region = 87 }

</bundles_post_ra>
